<compile_context>
chip_gen: v6e
topology: v6e:2x2x1
jax: 0.10.0
libtpu: 0.0.40
codegen_flags: <defaults>
</compile_context>

<pallas_src>
import jax
import jax.numpy as jnp
from jax import lax
from jax.experimental import pallas as pl
from jax.experimental.pallas import tpu as pltpu

EPS = 1e-5          # PyTorch BatchNorm1d default eps
HIDDEN = 512
IMG_PIXELS = 28 * 28
N_HIDDEN_BLOCKS = 5  # blocks 1..5 are 512 -> 512 (block 0 is noise_dim -> 512)


def generator_kernel(x_ref, w1t_ref, wh_ref, wft_ref, bn_ref, bf_ref, o_ref):
    # x_ref:   (B, noise_dim)            input noise
    # w1t_ref: (noise_dim, 512)          block-0 weight, pre-transposed
    # wh_ref:  (5, 512, 512)             blocks 1..5 weights, pre-transposed, stacked
    # wft_ref: (512, 784)                final Linear weight, pre-transposed
    # bn_ref:  (6, 2, 512)               [layer, {gamma, beta}, feature]
    # bf_ref:  (1, 784)                  final Linear bias
    # o_ref:   (B, 784)                  sigmoid outputs (reshaped to images outside)

    def bn_relu(y, layer):
        # One-pass batch statistics + folded affine:
        #   var   = E[y^2] - E[y]^2
        #   scale = gamma * rsqrt(var + eps)
        #   out   = relu(scale * y + (beta - scale * mean))
        gb = bn_ref[layer]            # (2, 512) -- static slice of the packed BN params
        gamma = gb[0:1, :]            # (1, 512)
        beta = gb[1:2, :]             # (1, 512)
        s1 = jnp.mean(y, axis=0, keepdims=True)
        s2 = jnp.mean(y * y, axis=0, keepdims=True)
        var = s2 - s1 * s1
        scale = gamma * lax.rsqrt(var + EPS)   # rsqrt -> EUP (free slot vs VALU)
        shift = beta - scale * s1
        return jnp.maximum(scale * y + shift, 0.0)

    # Block 0: Linear(noise_dim -> 512) [bias cancelled by BN] + BN + ReLU.
    h = bn_relu(
        jnp.dot(x_ref[...], w1t_ref[...], preferred_element_type=jnp.float32), 0)

    # Blocks 1..5: Linear(512 -> 512) [bias cancelled by BN] + BN + ReLU.
    # Static Python loop -> fully unrolled, each wh_ref[l] is a static slice (no copy).
    for l in range(N_HIDDEN_BLOCKS):
        h = bn_relu(
            jnp.dot(h, wh_ref[l], preferred_element_type=jnp.float32), l + 1)

    # Final Linear(512 -> 784) + bias + Sigmoid (exp on EUP; divide kept exact).
    logits = jnp.dot(h, wft_ref[...], preferred_element_type=jnp.float32) + bf_ref[...]
    o_ref[...] = (1.0 / (1.0 + jnp.exp(-logits))).astype(o_ref.dtype)


def prepare_generator_params(block_weights, block_gammas, block_betas, w_final, b_final):
    """One-time parameter packing, done OUTSIDE the hot path:
       - transpose every weight to (in, out) so the kernel never transposes,
       - stack the five 512x512 hidden-layer weights into one array,
       - pack all BN gamma/beta into one (6, 2, 512) array (single DMA),
       - drop the blocks' Linear biases (cancelled exactly by train-mode BN)."""
    w1t = jnp.asarray(block_weights[0]).T                              # (noise_dim, 512)
    wh = jnp.stack([jnp.asarray(w).T for w in block_weights[1:]])      # (5, 512, 512)
    bn = jnp.stack([jnp.stack([jnp.asarray(g), jnp.asarray(b)])
                    for g, b in zip(block_gammas, block_betas)])       # (6, 2, 512)
    wft = jnp.asarray(w_final).T                                       # (512, 784)
    bf = jnp.asarray(b_final).reshape(1, -1)                           # (1, 784)
    return w1t, wh, wft, bn, bf


@jax.jit
def generator_forward(noise, w1t, wh, wft, bn, bf):
    B = noise.shape[0]
    vmem_spec = pl.BlockSpec(memory_space=pltpu.MemorySpace.VMEM)
    out = pl.pallas_call(
        generator_kernel,
        out_shape=jax.ShapeDtypeStruct((B, IMG_PIXELS), jnp.float32),
        in_specs=[vmem_spec] * 6,
        out_specs=vmem_spec,
        compiler_params=pltpu.CompilerParams(
            vmem_limit_bytes=32 * 1024 * 1024,   # ~7 MiB of params; safe on v5e/v6e/v7x
        ),
    )(noise, w1t, wh, wft, bn, bf)
    return out.reshape(B, 1, 28, 28)


def generator_ref(noise, block_w, block_b, block_g, block_be, w_final, b_final):
    """Pure-JAX reference with full PyTorch semantics (including the block
    biases, to demonstrate that dropping them in the kernel is exact)."""
    h = noise
    for w, b, g, be in zip(block_w, block_b, block_g, block_be):
        y = h @ w.T + b
        mean = jnp.mean(y, axis=0, keepdims=True)
        var = jnp.mean((y - mean) ** 2, axis=0, keepdims=True)
        h = jnp.maximum(g * (y - mean) / jnp.sqrt(var + EPS) + be, 0.0)
    logits = h @ w_final.T + b_final
    return jax.nn.sigmoid(logits).reshape(-1, 1, 28, 28)


if __name__ == "__main__":
    B, NOISE_DIM = 8, 64   # batch and noise_dim kept small; 512/784 are fixed by the module

    key = jax.random.PRNGKey(0)
    keys = iter(jax.random.split(key, 32))

    noise = jax.random.normal(next(keys), (B, NOISE_DIM), dtype=jnp.float32)

    # Deterministic PyTorch-like parameter init (non-trivial gamma/beta to
    # exercise the packed BN-parameter path).
    in_dims = [NOISE_DIM] + [HIDDEN] * N_HIDDEN_BLOCKS
    block_w, block_b, block_g, block_be = [], [], [], []
    for d in in_dims:
        bound = 1.0 / (d ** 0.5)
        block_w.append(jax.random.uniform(next(keys), (HIDDEN, d),
                                          minval=-bound, maxval=bound, dtype=jnp.float32))
        block_b.append(jax.random.uniform(next(keys), (HIDDEN,),
                                          minval=-bound, maxval=bound, dtype=jnp.float32))
        block_g.append(jax.random.uniform(next(keys), (HIDDEN,),
                                          minval=0.5, maxval=1.5, dtype=jnp.float32))
        block_be.append(0.1 * jax.random.normal(next(keys), (HIDDEN,), dtype=jnp.float32))

    bound_f = 1.0 / (HIDDEN ** 0.5)
    w_final = jax.random.uniform(next(keys), (IMG_PIXELS, HIDDEN),
                                 minval=-bound_f, maxval=bound_f, dtype=jnp.float32)
    b_final = jax.random.uniform(next(keys), (IMG_PIXELS,),
                                 minval=-bound_f, maxval=bound_f, dtype=jnp.float32)

    # Pack parameters once (outside the hot path), then run the fused kernel.
    w1t, wh, wft, bn, bf = prepare_generator_params(block_w, block_g, block_be,
                                                    w_final, b_final)
    out = generator_forward(noise, w1t, wh, wft, bn, bf)
    out = jax.block_until_ready(out)

    ref = generator_ref(noise, block_w, block_b, block_g, block_be, w_final, b_final)

    assert out.shape == (B, 1, 28, 28)
    assert bool(jnp.all(jnp.isfinite(out)))
    assert jnp.allclose(out, ref, atol=1e-3, rtol=1e-3), \
        float(jnp.max(jnp.abs(out - ref)))

    print("KERNEL_OK")
</pallas_src>

<mosaic_0001>
module attributes {stable_mosaic.version = 11 : i64} {
  func.func @generator_kernel(%arg0: memref<8x64xf32, #tpu.memory_space<vmem>>, %arg1: memref<64x512xf32, #tpu.memory_space<vmem>>, %arg2: memref<5x512x512xf32, #tpu.memory_space<vmem>>, %arg3: memref<512x784xf32, #tpu.memory_space<vmem>>, %arg4: memref<6x2x512xf32, #tpu.memory_space<vmem>>, %arg5: memref<1x784xf32, #tpu.memory_space<vmem>>, %arg6: memref<8x784xf32, #tpu.memory_space<vmem>>) attributes {dimension_semantics = [], scalar_prefetch = 0 : i64, scratch_operands = 0 : i64, tpu.core_type = #tpu.core_type<tc>} {
    %c0 = arith.constant 0 : index
    %c0_0 = arith.constant 0 : index
    %0 = vector.load %arg0[%c0, %c0_0] : memref<8x64xf32, #tpu.memory_space<vmem>>, vector<8x64xf32>
    %c0_1 = arith.constant 0 : index
    %c0_2 = arith.constant 0 : index
    %1 = vector.load %arg1[%c0_1, %c0_2] : memref<64x512xf32, #tpu.memory_space<vmem>>, vector<64x512xf32>
    %cst = arith.constant dense<0.000000e+00> : vector<8x512xf32>
    %2 = tpu.matmul %0, %1, %cst {dimension_numbers = #tpu.dot_dimension_numbers<[1], [0], [0], [1], [0, 0, 1, 1], [], []>} : vector<8x64xf32>, vector<64x512xf32>, vector<8x512xf32> -> vector<8x512xf32>
    %c0_3 = arith.constant 0 : index
    %c0_4 = arith.constant 0 : index
    %c0_5 = arith.constant 0 : index
    %3 = vector.load %arg4[%c0_3, %c0_4, %c0_5] : memref<6x2x512xf32, #tpu.memory_space<vmem>>, vector<1x2x512xf32>
    %4 = vector.shape_cast %3 : vector<1x2x512xf32> to vector<2x512xf32>
    %5 = vector.extract_strided_slice %4 {offsets = [0, 0], sizes = [1, 512], strides = [1, 1]} : vector<2x512xf32> to vector<1x512xf32>
    %6 = vector.extract_strided_slice %4 {offsets = [1, 0], sizes = [1, 512], strides = [1, 1]} : vector<2x512xf32> to vector<1x512xf32>
    %cst_6 = arith.constant dense<0.000000e+00> : vector<512xf32>
    %7 = vector.multi_reduction <add>, %2, %cst_6 [0] : vector<8x512xf32> to vector<512xf32>
    %8 = vector.shape_cast %7 : vector<512xf32> to vector<1x512xf32>
    %cst_7 = arith.constant 8.000000e+00 : f32
    %9 = vector.broadcast %cst_7 : f32 to vector<1x512xf32>
    %10 = arith.divf %8, %9 : vector<1x512xf32>
    %11 = arith.mulf %2, %2 : vector<8x512xf32>
    %cst_8 = arith.constant dense<0.000000e+00> : vector<512xf32>
    %12 = vector.multi_reduction <add>, %11, %cst_8 [0] : vector<8x512xf32> to vector<512xf32>
    %13 = vector.shape_cast %12 : vector<512xf32> to vector<1x512xf32>
    %cst_9 = arith.constant 8.000000e+00 : f32
    %14 = vector.broadcast %cst_9 : f32 to vector<1x512xf32>
    %15 = arith.divf %13, %14 : vector<1x512xf32>
    %16 = arith.mulf %10, %10 : vector<1x512xf32>
    %17 = arith.subf %15, %16 : vector<1x512xf32>
    %cst_10 = arith.constant 9.99999974E-6 : f32
    %18 = vector.broadcast %cst_10 : f32 to vector<1x512xf32>
    %19 = arith.addf %17, %18 : vector<1x512xf32>
    %20 = math.rsqrt %19 : vector<1x512xf32>
    %21 = arith.mulf %5, %20 : vector<1x512xf32>
    %22 = arith.mulf %21, %10 : vector<1x512xf32>
    %23 = arith.subf %6, %22 : vector<1x512xf32>
    %24 = vector.broadcast %21 : vector<1x512xf32> to vector<8x512xf32>
    %25 = arith.mulf %24, %2 : vector<8x512xf32>
    %26 = vector.broadcast %23 : vector<1x512xf32> to vector<8x512xf32>
    %27 = arith.addf %25, %26 : vector<8x512xf32>
    %cst_11 = arith.constant 0.000000e+00 : f32
    %28 = vector.broadcast %cst_11 : f32 to vector<8x512xf32>
    %29 = arith.maximumf %27, %28 : vector<8x512xf32>
    %c0_12 = arith.constant 0 : index
    %c0_13 = arith.constant 0 : index
    %c0_14 = arith.constant 0 : index
    %30 = vector.load %arg2[%c0_12, %c0_13, %c0_14] : memref<5x512x512xf32, #tpu.memory_space<vmem>>, vector<1x512x512xf32>
    %31 = vector.shape_cast %30 : vector<1x512x512xf32> to vector<512x512xf32>
    %cst_15 = arith.constant dense<0.000000e+00> : vector<8x512xf32>
    %32 = tpu.matmul %29, %31, %cst_15 {dimension_numbers = #tpu.dot_dimension_numbers<[1], [0], [0], [1], [0, 0, 1, 1], [], []>} : vector<8x512xf32>, vector<512x512xf32>, vector<8x512xf32> -> vector<8x512xf32>
    %c1 = arith.constant 1 : index
    %c0_16 = arith.constant 0 : index
    %c0_17 = arith.constant 0 : index
    %33 = vector.load %arg4[%c1, %c0_16, %c0_17] : memref<6x2x512xf32, #tpu.memory_space<vmem>>, vector<1x2x512xf32>
    %34 = vector.shape_cast %33 : vector<1x2x512xf32> to vector<2x512xf32>
    %35 = vector.extract_strided_slice %34 {offsets = [0, 0], sizes = [1, 512], strides = [1, 1]} : vector<2x512xf32> to vector<1x512xf32>
    %36 = vector.extract_strided_slice %34 {offsets = [1, 0], sizes = [1, 512], strides = [1, 1]} : vector<2x512xf32> to vector<1x512xf32>
    %cst_18 = arith.constant dense<0.000000e+00> : vector<512xf32>
    %37 = vector.multi_reduction <add>, %32, %cst_18 [0] : vector<8x512xf32> to vector<512xf32>
    %38 = vector.shape_cast %37 : vector<512xf32> to vector<1x512xf32>
    %cst_19 = arith.constant 8.000000e+00 : f32
    %39 = vector.broadcast %cst_19 : f32 to vector<1x512xf32>
    %40 = arith.divf %38, %39 : vector<1x512xf32>
    %41 = arith.mulf %32, %32 : vector<8x512xf32>
    %cst_20 = arith.constant dense<0.000000e+00> : vector<512xf32>
    %42 = vector.multi_reduction <add>, %41, %cst_20 [0] : vector<8x512xf32> to vector<512xf32>
    %43 = vector.shape_cast %42 : vector<512xf32> to vector<1x512xf32>
    %cst_21 = arith.constant 8.000000e+00 : f32
    %44 = vector.broadcast %cst_21 : f32 to vector<1x512xf32>
    %45 = arith.divf %43, %44 : vector<1x512xf32>
    %46 = arith.mulf %40, %40 : vector<1x512xf32>
    %47 = arith.subf %45, %46 : vector<1x512xf32>
    %cst_22 = arith.constant 9.99999974E-6 : f32
    %48 = vector.broadcast %cst_22 : f32 to vector<1x512xf32>
    %49 = arith.addf %47, %48 : vector<1x512xf32>
    %50 = math.rsqrt %49 : vector<1x512xf32>
    %51 = arith.mulf %35, %50 : vector<1x512xf32>
    %52 = arith.mulf %51, %40 : vector<1x512xf32>
    %53 = arith.subf %36, %52 : vector<1x512xf32>
    %54 = vector.broadcast %51 : vector<1x512xf32> to vector<8x512xf32>
    %55 = arith.mulf %54, %32 : vector<8x512xf32>
    %56 = vector.broadcast %53 : vector<1x512xf32> to vector<8x512xf32>
    %57 = arith.addf %55, %56 : vector<8x512xf32>
    %cst_23 = arith.constant 0.000000e+00 : f32
    %58 = vector.broadcast %cst_23 : f32 to vector<8x512xf32>
    %59 = arith.maximumf %57, %58 : vector<8x512xf32>
    %c1_24 = arith.constant 1 : index
    %c0_25 = arith.constant 0 : index
    %c0_26 = arith.constant 0 : index
    %60 = vector.load %arg2[%c1_24, %c0_25, %c0_26] : memref<5x512x512xf32, #tpu.memory_space<vmem>>, vector<1x512x512xf32>
    %61 = vector.shape_cast %60 : vector<1x512x512xf32> to vector<512x512xf32>
    %cst_27 = arith.constant dense<0.000000e+00> : vector<8x512xf32>
    %62 = tpu.matmul %59, %61, %cst_27 {dimension_numbers = #tpu.dot_dimension_numbers<[1], [0], [0], [1], [0, 0, 1, 1], [], []>} : vector<8x512xf32>, vector<512x512xf32>, vector<8x512xf32> -> vector<8x512xf32>
    %c2 = arith.constant 2 : index
    %c0_28 = arith.constant 0 : index
    %c0_29 = arith.constant 0 : index
    %63 = vector.load %arg4[%c2, %c0_28, %c0_29] : memref<6x2x512xf32, #tpu.memory_space<vmem>>, vector<1x2x512xf32>
    %64 = vector.shape_cast %63 : vector<1x2x512xf32> to vector<2x512xf32>
    %65 = vector.extract_strided_slice %64 {offsets = [0, 0], sizes = [1, 512], strides = [1, 1]} : vector<2x512xf32> to vector<1x512xf32>
    %66 = vector.extract_strided_slice %64 {offsets = [1, 0], sizes = [1, 512], strides = [1, 1]} : vector<2x512xf32> to vector<1x512xf32>
    %cst_30 = arith.constant dense<0.000000e+00> : vector<512xf32>
    %67 = vector.multi_reduction <add>, %62, %cst_30 [0] : vector<8x512xf32> to vector<512xf32>
    %68 = vector.shape_cast %67 : vector<512xf32> to vector<1x512xf32>
    %cst_31 = arith.constant 8.000000e+00 : f32
    %69 = vector.broadcast %cst_31 : f32 to vector<1x512xf32>
    %70 = arith.divf %68, %69 : vector<1x512xf32>
    %71 = arith.mulf %62, %62 : vector<8x512xf32>
    %cst_32 = arith.constant dense<0.000000e+00> : vector<512xf32>
    %72 = vector.multi_reduction <add>, %71, %cst_32 [0] : vector<8x512xf32> to vector<512xf32>
    %73 = vector.shape_cast %72 : vector<512xf32> to vector<1x512xf32>
    %cst_33 = arith.constant 8.000000e+00 : f32
    %74 = vector.broadcast %cst_33 : f32 to vector<1x512xf32>
    %75 = arith.divf %73, %74 : vector<1x512xf32>
    %76 = arith.mulf %70, %70 : vector<1x512xf32>
    %77 = arith.subf %75, %76 : vector<1x512xf32>
    %cst_34 = arith.constant 9.99999974E-6 : f32
    %78 = vector.broadcast %cst_34 : f32 to vector<1x512xf32>
    %79 = arith.addf %77, %78 : vector<1x512xf32>
    %80 = math.rsqrt %79 : vector<1x512xf32>
    %81 = arith.mulf %65, %80 : vector<1x512xf32>
    %82 = arith.mulf %81, %70 : vector<1x512xf32>
    %83 = arith.subf %66, %82 : vector<1x512xf32>
    %84 = vector.broadcast %81 : vector<1x512xf32> to vector<8x512xf32>
    %85 = arith.mulf %84, %62 : vector<8x512xf32>
    %86 = vector.broadcast %83 : vector<1x512xf32> to vector<8x512xf32>
    %87 = arith.addf %85, %86 : vector<8x512xf32>
    %cst_35 = arith.constant 0.000000e+00 : f32
    %88 = vector.broadcast %cst_35 : f32 to vector<8x512xf32>
    %89 = arith.maximumf %87, %88 : vector<8x512xf32>
    %c2_36 = arith.constant 2 : index
    %c0_37 = arith.constant 0 : index
    %c0_38 = arith.constant 0 : index
    %90 = vector.load %arg2[%c2_36, %c0_37, %c0_38] : memref<5x512x512xf32, #tpu.memory_space<vmem>>, vector<1x512x512xf32>
    %91 = vector.shape_cast %90 : vector<1x512x512xf32> to vector<512x512xf32>
    %cst_39 = arith.constant dense<0.000000e+00> : vector<8x512xf32>
    %92 = tpu.matmul %89, %91, %cst_39 {dimension_numbers = #tpu.dot_dimension_numbers<[1], [0], [0], [1], [0, 0, 1, 1], [], []>} : vector<8x512xf32>, vector<512x512xf32>, vector<8x512xf32> -> vector<8x512xf32>
    %c3 = arith.constant 3 : index
    %c0_40 = arith.constant 0 : index
    %c0_41 = arith.constant 0 : index
    %93 = vector.load %arg4[%c3, %c0_40, %c0_41] : memref<6x2x512xf32, #tpu.memory_space<vmem>>, vector<1x2x512xf32>
    %94 = vector.shape_cast %93 : vector<1x2x512xf32> to vector<2x512xf32>
    %95 = vector.extract_strided_slice %94 {offsets = [0, 0], sizes = [1, 512], strides = [1, 1]} : vector<2x512xf32> to vector<1x512xf32>
    %96 = vector.extract_strided_slice %94 {offsets = [1, 0], sizes = [1, 512], strides = [1, 1]} : vector<2x512xf32> to vector<1x512xf32>
    %cst_42 = arith.constant dense<0.000000e+00> : vector<512xf32>
    %97 = vector.multi_reduction <add>, %92, %cst_42 [0] : vector<8x512xf32> to vector<512xf32>
    %98 = vector.shape_cast %97 : vector<512xf32> to vector<1x512xf32>
    %cst_43 = arith.constant 8.000000e+00 : f32
    %99 = vector.broadcast %cst_43 : f32 to vector<1x512xf32>
    %100 = arith.divf %98, %99 : vector<1x512xf32>
    %101 = arith.mulf %92, %92 : vector<8x512xf32>
    %cst_44 = arith.constant dense<0.000000e+00> : vector<512xf32>
    %102 = vector.multi_reduction <add>, %101, %cst_44 [0] : vector<8x512xf32> to vector<512xf32>
    %103 = vector.shape_cast %102 : vector<512xf32> to vector<1x512xf32>
    %cst_45 = arith.constant 8.000000e+00 : f32
    %104 = vector.broadcast %cst_45 : f32 to vector<1x512xf32>
    %105 = arith.divf %103, %104 : vector<1x512xf32>
    %106 = arith.mulf %100, %100 : vector<1x512xf32>
    %107 = arith.subf %105, %106 : vector<1x512xf32>
    %cst_46 = arith.constant 9.99999974E-6 : f32
    %108 = vector.broadcast %cst_46 : f32 to vector<1x512xf32>
    %109 = arith.addf %107, %108 : vector<1x512xf32>
    %110 = math.rsqrt %109 : vector<1x512xf32>
    %111 = arith.mulf %95, %110 : vector<1x512xf32>
    %112 = arith.mulf %111, %100 : vector<1x512xf32>
    %113 = arith.subf %96, %112 : vector<1x512xf32>
    %114 = vector.broadcast %111 : vector<1x512xf32> to vector<8x512xf32>
    %115 = arith.mulf %114, %92 : vector<8x512xf32>
    %116 = vector.broadcast %113 : vector<1x512xf32> to vector<8x512xf32>
    %117 = arith.addf %115, %116 : vector<8x512xf32>
    %cst_47 = arith.constant 0.000000e+00 : f32
    %118 = vector.broadcast %cst_47 : f32 to vector<8x512xf32>
    %119 = arith.maximumf %117, %118 : vector<8x512xf32>
    %c3_48 = arith.constant 3 : index
    %c0_49 = arith.constant 0 : index
    %c0_50 = arith.constant 0 : index
    %120 = vector.load %arg2[%c3_48, %c0_49, %c0_50] : memref<5x512x512xf32, #tpu.memory_space<vmem>>, vector<1x512x512xf32>
    %121 = vector.shape_cast %120 : vector<1x512x512xf32> to vector<512x512xf32>
    %cst_51 = arith.constant dense<0.000000e+00> : vector<8x512xf32>
    %122 = tpu.matmul %119, %121, %cst_51 {dimension_numbers = #tpu.dot_dimension_numbers<[1], [0], [0], [1], [0, 0, 1, 1], [], []>} : vector<8x512xf32>, vector<512x512xf32>, vector<8x512xf32> -> vector<8x512xf32>
    %c4 = arith.constant 4 : index
    %c0_52 = arith.constant 0 : index
    %c0_53 = arith.constant 0 : index
    %123 = vector.load %arg4[%c4, %c0_52, %c0_53] : memref<6x2x512xf32, #tpu.memory_space<vmem>>, vector<1x2x512xf32>
    %124 = vector.shape_cast %123 : vector<1x2x512xf32> to vector<2x512xf32>
    %125 = vector.extract_strided_slice %124 {offsets = [0, 0], sizes = [1, 512], strides = [1, 1]} : vector<2x512xf32> to vector<1x512xf32>
    %126 = vector.extract_strided_slice %124 {offsets = [1, 0], sizes = [1, 512], strides = [1, 1]} : vector<2x512xf32> to vector<1x512xf32>
    %cst_54 = arith.constant dense<0.000000e+00> : vector<512xf32>
    %127 = vector.multi_reduction <add>, %122, %cst_54 [0] : vector<8x512xf32> to vector<512xf32>
    %128 = vector.shape_cast %127 : vector<512xf32> to vector<1x512xf32>
    %cst_55 = arith.constant 8.000000e+00 : f32
    %129 = vector.broadcast %cst_55 : f32 to vector<1x512xf32>
    %130 = arith.divf %128, %129 : vector<1x512xf32>
    %131 = arith.mulf %122, %122 : vector<8x512xf32>
    %cst_56 = arith.constant dense<0.000000e+00> : vector<512xf32>
    %132 = vector.multi_reduction <add>, %131, %cst_56 [0] : vector<8x512xf32> to vector<512xf32>
    %133 = vector.shape_cast %132 : vector<512xf32> to vector<1x512xf32>
    %cst_57 = arith.constant 8.000000e+00 : f32
    %134 = vector.broadcast %cst_57 : f32 to vector<1x512xf32>
    %135 = arith.divf %133, %134 : vector<1x512xf32>
    %136 = arith.mulf %130, %130 : vector<1x512xf32>
    %137 = arith.subf %135, %136 : vector<1x512xf32>
    %cst_58 = arith.constant 9.99999974E-6 : f32
    %138 = vector.broadcast %cst_58 : f32 to vector<1x512xf32>
    %139 = arith.addf %137, %138 : vector<1x512xf32>
    %140 = math.rsqrt %139 : vector<1x512xf32>
    %141 = arith.mulf %125, %140 : vector<1x512xf32>
    %142 = arith.mulf %141, %130 : vector<1x512xf32>
    %143 = arith.subf %126, %142 : vector<1x512xf32>
    %144 = vector.broadcast %141 : vector<1x512xf32> to vector<8x512xf32>
    %145 = arith.mulf %144, %122 : vector<8x512xf32>
    %146 = vector.broadcast %143 : vector<1x512xf32> to vector<8x512xf32>
    %147 = arith.addf %145, %146 : vector<8x512xf32>
    %cst_59 = arith.constant 0.000000e+00 : f32
    %148 = vector.broadcast %cst_59 : f32 to vector<8x512xf32>
    %149 = arith.maximumf %147, %148 : vector<8x512xf32>
    %c4_60 = arith.constant 4 : index
    %c0_61 = arith.constant 0 : index
    %c0_62 = arith.constant 0 : index
    %150 = vector.load %arg2[%c4_60, %c0_61, %c0_62] : memref<5x512x512xf32, #tpu.memory_space<vmem>>, vector<1x512x512xf32>
    %151 = vector.shape_cast %150 : vector<1x512x512xf32> to vector<512x512xf32>
    %cst_63 = arith.constant dense<0.000000e+00> : vector<8x512xf32>
    %152 = tpu.matmul %149, %151, %cst_63 {dimension_numbers = #tpu.dot_dimension_numbers<[1], [0], [0], [1], [0, 0, 1, 1], [], []>} : vector<8x512xf32>, vector<512x512xf32>, vector<8x512xf32> -> vector<8x512xf32>
    %c5 = arith.constant 5 : index
    %c0_64 = arith.constant 0 : index
    %c0_65 = arith.constant 0 : index
    %153 = vector.load %arg4[%c5, %c0_64, %c0_65] : memref<6x2x512xf32, #tpu.memory_space<vmem>>, vector<1x2x512xf32>
    %154 = vector.shape_cast %153 : vector<1x2x512xf32> to vector<2x512xf32>
    %155 = vector.extract_strided_slice %154 {offsets = [0, 0], sizes = [1, 512], strides = [1, 1]} : vector<2x512xf32> to vector<1x512xf32>
    %156 = vector.extract_strided_slice %154 {offsets = [1, 0], sizes = [1, 512], strides = [1, 1]} : vector<2x512xf32> to vector<1x512xf32>
    %cst_66 = arith.constant dense<0.000000e+00> : vector<512xf32>
    %157 = vector.multi_reduction <add>, %152, %cst_66 [0] : vector<8x512xf32> to vector<512xf32>
    %158 = vector.shape_cast %157 : vector<512xf32> to vector<1x512xf32>
    %cst_67 = arith.constant 8.000000e+00 : f32
    %159 = vector.broadcast %cst_67 : f32 to vector<1x512xf32>
    %160 = arith.divf %158, %159 : vector<1x512xf32>
    %161 = arith.mulf %152, %152 : vector<8x512xf32>
    %cst_68 = arith.constant dense<0.000000e+00> : vector<512xf32>
    %162 = vector.multi_reduction <add>, %161, %cst_68 [0] : vector<8x512xf32> to vector<512xf32>
    %163 = vector.shape_cast %162 : vector<512xf32> to vector<1x512xf32>
    %cst_69 = arith.constant 8.000000e+00 : f32
    %164 = vector.broadcast %cst_69 : f32 to vector<1x512xf32>
    %165 = arith.divf %163, %164 : vector<1x512xf32>
    %166 = arith.mulf %160, %160 : vector<1x512xf32>
    %167 = arith.subf %165, %166 : vector<1x512xf32>
    %cst_70 = arith.constant 9.99999974E-6 : f32
    %168 = vector.broadcast %cst_70 : f32 to vector<1x512xf32>
    %169 = arith.addf %167, %168 : vector<1x512xf32>
    %170 = math.rsqrt %169 : vector<1x512xf32>
    %171 = arith.mulf %155, %170 : vector<1x512xf32>
    %172 = arith.mulf %171, %160 : vector<1x512xf32>
    %173 = arith.subf %156, %172 : vector<1x512xf32>
    %174 = vector.broadcast %171 : vector<1x512xf32> to vector<8x512xf32>
    %175 = arith.mulf %174, %152 : vector<8x512xf32>
    %176 = vector.broadcast %173 : vector<1x512xf32> to vector<8x512xf32>
    %177 = arith.addf %175, %176 : vector<8x512xf32>
    %cst_71 = arith.constant 0.000000e+00 : f32
    %178 = vector.broadcast %cst_71 : f32 to vector<8x512xf32>
    %179 = arith.maximumf %177, %178 : vector<8x512xf32>
    %c0_72 = arith.constant 0 : index
    %c0_73 = arith.constant 0 : index
    %180 = vector.load %arg3[%c0_72, %c0_73] : memref<512x784xf32, #tpu.memory_space<vmem>>, vector<512x784xf32>
    %cst_74 = arith.constant dense<0.000000e+00> : vector<8x784xf32>
    %181 = tpu.matmul %179, %180, %cst_74 {dimension_numbers = #tpu.dot_dimension_numbers<[1], [0], [0], [1], [0, 0, 1, 1], [], []>} : vector<8x512xf32>, vector<512x784xf32>, vector<8x784xf32> -> vector<8x784xf32>
    %c0_75 = arith.constant 0 : index
    %c0_76 = arith.constant 0 : index
    %182 = vector.load %arg5[%c0_75, %c0_76] : memref<1x784xf32, #tpu.memory_space<vmem>>, vector<1x784xf32>
    %183 = vector.broadcast %182 : vector<1x784xf32> to vector<8x784xf32>
    %184 = arith.addf %181, %183 : vector<8x784xf32>
    %cst_77 = arith.constant 0.000000e+00 : f32
    %185 = vector.broadcast %cst_77 : f32 to vector<8x784xf32>
    %186 = arith.subf %185, %184 : vector<8x784xf32>
    %187 = math.exp %186 : vector<8x784xf32>
    %cst_78 = arith.constant 1.000000e+00 : f32
    %188 = vector.broadcast %cst_78 : f32 to vector<8x784xf32>
    %189 = arith.addf %188, %187 : vector<8x784xf32>
    %cst_79 = arith.constant 1.000000e+00 : f32
    %190 = vector.broadcast %cst_79 : f32 to vector<8x784xf32>
    %191 = arith.divf %190, %189 : vector<8x784xf32>
    %c0_80 = arith.constant 0 : index
    %c0_81 = arith.constant 0 : index
    %192 = vector.load %arg6[%c0_80, %c0_81] : memref<8x784xf32, #tpu.memory_space<vmem>>, vector<8x784xf32>
    tpu.vector_store %arg6[%c0_80, %c0_81], %191 {strides = array<i32>} : memref<8x784xf32, #tpu.memory_space<vmem>>, vector<8x784xf32>,
    return
  }
}

</mosaic_0001>

<bundles_post_ra>
// kernel: generator_forward.1
= control target key start
LH: loop header
LB: loop body
LE: loop exit
PB: predicated region body
PF: predicated region fallthrough
CT: control target
= control target key end

     0   :  { %11 = vsyncpa [#allocation3], 0  ;;  %s5490_s21 = smov [#allocation2]   ;;  %s7459_s0 = inlined_call_operand.vmem [shape: f32[8,64], index: 0, kind: input, shape index: {}]   ;;  %s7460_s1 = inlined_call_operand.vmem [shape: f32[64,512], index: 1, kind: input, shape index: {}]   ;;  %s7461_s2 = inlined_call_operand.hbm [shape: f32[5,512,512], index: 2, kind: input, shape index: {}]   ;;  %s7462_s3 = inlined_call_operand.vmem [shape: f32[512,784], index: 3, kind: input, shape index: {}]   ;;  %s7463_s4 = inlined_call_operand.vmem [shape: f32[6,2,512], index: 4, kind: input, shape index: {}]   ;;  %s7464_s5 = inlined_call_operand.vmem [shape: f32[1,784], index: 5, kind: input, shape index: {}]   ;;  %s7465_s6 = inlined_call_operand.vmem [shape: f32[8,784], index: 6, kind: output, shape index: {}]  }
   0x1   :  { %s21_s22 = sshll.u32 %s5490_s21, 4  ;;  %s22_s22 = int_to_ptr.vmem [resolvable:$true] %s21_s22 }
   0x2   :  { %s5476_s23 = scalar_lea.vmem %s22_s22, 163840  ;;  %p5481_p1 = scmp.lt.s32.totalorder %s22_s22, %s22_s22 }
   0x3   :  { %p5477_p0 = scmp.ne.s32.totalorder %s22_s22, %s5476_s23  ;;  %p5482_p2 = scmp.lt.s32.totalorder %s5476_s23, %s5476_s23 }
   0x5   :  { %p5483_p3 = por %p5482_p2, %p5481_p1 }
   0x7   :  { %p5484_p4 = pnand %p5483_p3, %p5477_p0 }
   0x9   :  { %5487 = shalt.err (!%p5484_p4)
}
   0xa   :  { %s5491_s24 = smov 512   ;;  %s5492_s25 = smov 32  }
   0xb   :  { %27 = dma.hbm_to_vmem [thread:$0]  %s7461_s2, 163840, %s22_s22, [#allocation3], %s5491_s24, %s5491_s24, %s5492_s25  }
   0xc   :  { %5488 = dma.done.wait [#allocation3], 163840  }
   0xd   :  { %5489 = vsyncadd [#allocation3], 4294803456  ;;  %v5493_v0 = vmov 0.0   ;;  %v67_v1 = vld [vmem:[%s7460_s1 + $0xe8] sm:$0xff]  ;;  %v69_v2 = vld [vmem:[%s7460_s1 + $0xf8] sm:$0xff]  ;;  %vm70_vm0 = vcmask 523264  }
   0xe   :  { %138 = vmatprep.mubr.f32.mxu0 %v5493_v0  ;;  %209 = vmatprep.mubr.f32.mxu1 %v5493_v0  ;;  %v66_v3 = vld [vmem:[%s7460_s1 + $0xe0] sm:$0xff]  ;;  %v68_v4 = vld [vmem:[%s7460_s1 + $0xf0] sm:$0xff]  ;;  %v63_v5 = vld [vmem:[%s7460_s1 + $0xc8] sm:$0xff]  ;;  %vm5303_vm1 = vcmask 130048  }
   0xf   :  { %90 = vmatprep.subr.mxu0 %v67_v1  ;;  %161 = vmatprep.subr.mxu1 %v69_v2  ;;  %v65_v6 = vld [vmem:[%s7460_s1 + $0xd8] sm:$0xff]  ;;  %v62_v7 = vld [vmem:[%s7460_s1 + $0xc0] sm:$0xff]  ;;  %v64_v8 = vld [vmem:[%s7460_s1 + $0xd0] sm:$0xff] }
  0x10   :  { %91 = vmatpush1.msra.mxu0 %v66_v3  ;;  %162 = vmatpush1.msra.mxu1 %v68_v4  ;;  %v59_v9 = vld [vmem:[%s7460_s1 + $0xa8] sm:$0xff]  ;;  %v61_v10 = vld [vmem:[%s7460_s1 + $0xb8] sm:$0xff]  ;;  %v58_v11 = vld [vmem:[%s7460_s1 + $0xa0] sm:$0xff] }
  0x11   :  { %92 = vmatprep.subr.mxu0 %v63_v5  ;;  %163 = vmatprep.subr.mxu1 %v65_v6  ;;  %v60_v12 = vld [vmem:[%s7460_s1 + $0xb0] sm:$0xff]  ;;  %v55_v13 = vld [vmem:[%s7460_s1 + $0x88] sm:$0xff]  ;;  %v57_v14 = vld [vmem:[%s7460_s1 + $0x98] sm:$0xff] }
  0x12   :  { %93 = vmatpush1.msra.mxu0 %v62_v7  ;;  %164 = vmatpush1.msra.mxu1 %v64_v8  ;;  %v54_v15 = vld [vmem:[%s7460_s1 + $0x80] sm:$0xff]  ;;  %v56_v16 = vld [vmem:[%s7460_s1 + $0x90] sm:$0xff]  ;;  %v51_v17 = vld [vmem:[%s7460_s1 + $0x68] sm:$0xff] }
  0x13   :  { %94 = vmatprep.subr.mxu0 %v59_v9  ;;  %165 = vmatprep.subr.mxu1 %v61_v10  ;;  %v53_v18 = vld [vmem:[%s7460_s1 + $0x78] sm:$0xff]  ;;  %v50_v19 = vld [vmem:[%s7460_s1 + $0x60] sm:$0xff]  ;;  %v52_v20 = vld [vmem:[%s7460_s1 + $0x70] sm:$0xff] }
  0x14   :  { %95 = vmatpush1.msra.mxu0 %v58_v11  ;;  %166 = vmatpush1.msra.mxu1 %v60_v12  ;;  %v47_v21 = vld [vmem:[%s7460_s1 + $0x48] sm:$0xff]  ;;  %v49_v22 = vld [vmem:[%s7460_s1 + $0x58] sm:$0xff]  ;;  %v46_v23 = vld [vmem:[%s7460_s1 + $0x40] sm:$0xff] }
  0x15   :  { %96 = vmatprep.subr.mxu0 %v55_v13  ;;  %167 = vmatprep.subr.mxu1 %v57_v14  ;;  %v48_v24 = vld [vmem:[%s7460_s1 + $0x50] sm:$0xff]  ;;  %v43_v25 = vld [vmem:[%s7460_s1 + $0x28] sm:$0xff]  ;;  %v45_v26 = vld [vmem:[%s7460_s1 + $0x38] sm:$0xff] }
  0x16   :  { %97 = vmatpush1.msra.mxu0 %v54_v15  ;;  %168 = vmatpush1.msra.mxu1 %v56_v16  ;;  %v42_v27 = vld [vmem:[%s7460_s1 + $0x20] sm:$0xff]  ;;  %v44_v28 = vld [vmem:[%s7460_s1 + $0x30] sm:$0xff]  ;;  %v39_v29 = vld [vmem:[%s7460_s1 + $0x8] sm:$0xff] }
  0x17   :  { %98 = vmatprep.subr.mxu0 %v51_v17  ;;  %169 = vmatprep.subr.mxu1 %v53_v18  ;;  %v41_v30 = vld [vmem:[%s7460_s1 + $0x18] sm:$0xff]  ;;  %v38_v31 = vld [vmem:[%s7460_s1] sm:$0xff]  ;;  %v40_v32 = vld [vmem:[%s7460_s1 + $0x10] sm:$0xff] }
  0x18   :  { %99 = vmatpush1.msra.mxu0 %v50_v19  ;;  %170 = vmatpush1.msra.mxu1 %v52_v20  ;;  %v37_v33 = vld [vmem:[%s7459_s0] sm:$0xff]  ;;  %v491_v34 = vld [vmem:[#allocation2 + $0x1e8] sm:$0xff] }
  0x19   :  { %100 = vmatprep.subr.mxu0 %v47_v21  ;;  %171 = vmatprep.subr.mxu1 %v49_v22  ;;  %v619_v35 = vld [vmem:[#allocation2 + $0x5e8] sm:$0xff]  ;;  %v490_v36 = vld [vmem:[#allocation2 + $0x1e0] sm:$0xff] }
  0x1a   :  { %101 = vmatpush1.msra.mxu0 %v46_v23  ;;  %172 = vmatpush1.msra.mxu1 %v48_v24  ;;  %v618_v37 = vld [vmem:[#allocation2 + $0x5e0] sm:$0xff]  ;;  %v487_v38 = vld [vmem:[#allocation2 + $0x1c8] sm:$0xff] }
  0x1b   :  { %102 = vmatprep.subr.mxu0 %v43_v25  ;;  %173 = vmatprep.subr.mxu1 %v45_v26  ;;  %v615_v39 = vld [vmem:[#allocation2 + $0x5c8] sm:$0xff]  ;;  %v486_v40 = vld [vmem:[#allocation2 + $0x1c0] sm:$0xff] }
  0x1c   :  { %103 = vmatpush1.msra.mxu0 %v42_v27  ;;  %174 = vmatpush1.msra.mxu1 %v44_v28  ;;  %v614_v41 = vld [vmem:[#allocation2 + $0x5c0] sm:$0xff]  ;;  %v483_v42 = vld [vmem:[#allocation2 + $0x1a8] sm:$0xff] }
  0x1d   :  { %104 = vmatprep.subr.mxu0 %v39_v29  ;;  %175 = vmatprep.subr.mxu1 %v41_v30  ;;  %v611_v43 = vld [vmem:[#allocation2 + $0x5a8] sm:$0xff]  ;;  %v482_v44 = vld [vmem:[#allocation2 + $0x1a0] sm:$0xff] }
  0x1e   :  { %105 = vmatpush1.msra.mxu0 %v38_v31  ;;  %176 = vmatpush1.msra.mxu1 %v40_v32  ;;  %v610_v45 = vld [vmem:[#allocation2 + $0x5a0] sm:$0xff]  ;;  %v479_v46 = vld [vmem:[#allocation2 + $0x188] sm:$0xff] }
  0x1f   :  { %5310 = vmatmul.mubr.msk.f32.vlgmr.msra.gmra.mxu0 %vm70_vm0, %v37_v33  ;;  %5311 = vmatmul.mubr.msk.f32.vlgmr.msra.gmra.mxu1 %vm70_vm0, %v37_v33  ;;  %v607_v47 = vld [vmem:[#allocation2 + $0x588] sm:$0xff]  ;;  %v478_v48 = vld [vmem:[#allocation2 + $0x180] sm:$0xff] }
  0x20   :  { %686 = vmatprep.subr.mxu0 %v491_v34  ;;  %757 = vmatprep.subr.mxu1 %v619_v35  ;;  %v606_v49 = vld [vmem:[#allocation2 + $0x580] sm:$0xff]  ;;  %v475_v50 = vld [vmem:[#allocation2 + $0x168] sm:$0xff] }
  0x21   :  { %687 = vmatpush1.msra.mxu0 %v490_v36  ;;  %758 = vmatpush1.msra.mxu1 %v618_v37  ;;  %v603_v51 = vld [vmem:[#allocation2 + $0x568] sm:$0xff]  ;;  %v474_v52 = vld [vmem:[#allocation2 + $0x160] sm:$0xff] }
  0x22   :  { %688 = vmatprep.subr.mxu0 %v487_v38  ;;  %759 = vmatprep.subr.mxu1 %v615_v39  ;;  %v602_v53 = vld [vmem:[#allocation2 + $0x560] sm:$0xff]  ;;  %v471_v54 = vld [vmem:[#allocation2 + $0x148] sm:$0xff] }
  0x23   :  { %689 = vmatpush1.msra.mxu0 %v486_v40  ;;  %760 = vmatpush1.msra.mxu1 %v614_v41  ;;  %v599_v55 = vld [vmem:[#allocation2 + $0x548] sm:$0xff]  ;;  %v470_v56 = vld [vmem:[#allocation2 + $0x140] sm:$0xff] }
  0x24   :  { %690 = vmatprep.subr.mxu0 %v483_v42  ;;  %761 = vmatprep.subr.mxu1 %v611_v43  ;;  %v598_v57 = vld [vmem:[#allocation2 + $0x540] sm:$0xff]  ;;  %v467_v58 = vld [vmem:[#allocation2 + $0x128] sm:$0xff] }
  0x25   :  { %691 = vmatpush1.msra.mxu0 %v482_v44  ;;  %762 = vmatpush1.msra.mxu1 %v610_v45  ;;  %v595_v59 = vld [vmem:[#allocation2 + $0x528] sm:$0xff]  ;;  %v466_v60 = vld [vmem:[#allocation2 + $0x120] sm:$0xff] }
  0x26   :  { %692 = vmatprep.subr.mxu0 %v479_v46  ;;  %763 = vmatprep.subr.mxu1 %v607_v47  ;;  %v594_v61 = vld [vmem:[#allocation2 + $0x520] sm:$0xff]  ;;  %v463_v62 = vld [vmem:[#allocation2 + $0x108] sm:$0xff] }
  0x27   :  { %693 = vmatpush1.msra.mxu0 %v478_v48  ;;  %764 = vmatpush1.msra.mxu1 %v606_v49  ;;  %v591_v63 = vld [vmem:[#allocation2 + $0x508] sm:$0xff]  ;;  %v462_v0 = vld [vmem:[#allocation2 + $0x100] sm:$0xff] }
  0x28   :  { %694 = vmatprep.subr.mxu0 %v475_v50  ;;  %765 = vmatprep.subr.mxu1 %v603_v51  ;;  %v590_v1 = vld [vmem:[#allocation2 + $0x500] sm:$0xff]  ;;  %v459_v2 = vld [vmem:[#allocation2 + $0xe8] sm:$0xff] }
  0x29   :  { %695 = vmatpush1.msra.mxu0 %v474_v52  ;;  %766 = vmatpush1.msra.mxu1 %v602_v53  ;;  %v587_v3 = vld [vmem:[#allocation2 + $0x4e8] sm:$0xff]  ;;  %v458_v4 = vld [vmem:[#allocation2 + $0xe0] sm:$0xff] }
  0x2a   :  { %696 = vmatprep.subr.mxu0 %v471_v54  ;;  %767 = vmatprep.subr.mxu1 %v599_v55  ;;  %v586_v5 = vld [vmem:[#allocation2 + $0x4e0] sm:$0xff]  ;;  %v455_v6 = vld [vmem:[#allocation2 + $0xc8] sm:$0xff] }
  0x2b   :  { %697 = vmatpush1.msra.mxu0 %v470_v56  ;;  %768 = vmatpush1.msra.mxu1 %v598_v57  ;;  %v583_v7 = vld [vmem:[#allocation2 + $0x4c8] sm:$0xff]  ;;  %v454_v8 = vld [vmem:[#allocation2 + $0xc0] sm:$0xff] }
  0x2c   :  { %698 = vmatprep.subr.mxu0 %v467_v58  ;;  %769 = vmatprep.subr.mxu1 %v595_v59  ;;  %v582_v9 = vld [vmem:[#allocation2 + $0x4c0] sm:$0xff]  ;;  %v451_v10 = vld [vmem:[#allocation2 + $0xa8] sm:$0xff] }
  0x2d   :  { %699 = vmatpush1.msra.mxu0 %v466_v60  ;;  %770 = vmatpush1.msra.mxu1 %v594_v61  ;;  %v579_v11 = vld [vmem:[#allocation2 + $0x4a8] sm:$0xff]  ;;  %v450_v12 = vld [vmem:[#allocation2 + $0xa0] sm:$0xff] }
  0x2e   :  { %700 = vmatprep.subr.mxu0 %v463_v62  ;;  %771 = vmatprep.subr.mxu1 %v591_v63  ;;  %v578_v13 = vld [vmem:[#allocation2 + $0x4a0] sm:$0xff]  ;;  %v447_v14 = vld [vmem:[#allocation2 + $0x88] sm:$0xff] }
  0x2f   :  { %701 = vmatpush1.msra.mxu0 %v462_v0  ;;  %772 = vmatpush1.msra.mxu1 %v590_v1  ;;  %v575_v15 = vld [vmem:[#allocation2 + $0x488] sm:$0xff]  ;;  %v446_v16 = vld [vmem:[#allocation2 + $0x80] sm:$0xff] }
  0x30   :  { %702 = vmatprep.subr.mxu0 %v459_v2  ;;  %773 = vmatprep.subr.mxu1 %v587_v3  ;;  %v574_v17 = vld [vmem:[#allocation2 + $0x480] sm:$0xff]  ;;  %v443_v18 = vld [vmem:[#allocation2 + $0x68] sm:$0xff] }
  0x31   :  { %703 = vmatpush1.msra.mxu0 %v458_v4  ;;  %774 = vmatpush1.msra.mxu1 %v586_v5  ;;  %v571_v19 = vld [vmem:[#allocation2 + $0x468] sm:$0xff]  ;;  %v442_v20 = vld [vmem:[#allocation2 + $0x60] sm:$0xff] }
  0x32   :  { %704 = vmatprep.subr.mxu0 %v455_v6  ;;  %775 = vmatprep.subr.mxu1 %v583_v7  ;;  %v570_v21 = vld [vmem:[#allocation2 + $0x460] sm:$0xff]  ;;  %v439_v22 = vld [vmem:[#allocation2 + $0x48] sm:$0xff] }
  0x33   :  { %705 = vmatpush1.msra.mxu0 %v454_v8  ;;  %776 = vmatpush1.msra.mxu1 %v582_v9  ;;  %v567_v23 = vld [vmem:[#allocation2 + $0x448] sm:$0xff]  ;;  %v438_v24 = vld [vmem:[#allocation2 + $0x40] sm:$0xff] }
  0x34   :  { %706 = vmatprep.subr.mxu0 %v451_v10  ;;  %777 = vmatprep.subr.mxu1 %v579_v11  ;;  %v566_v25 = vld [vmem:[#allocation2 + $0x440] sm:$0xff]  ;;  %v435_v26 = vld [vmem:[#allocation2 + $0x28] sm:$0xff] }
  0x35   :  { %707 = vmatpush1.msra.mxu0 %v450_v12  ;;  %778 = vmatpush1.msra.mxu1 %v578_v13  ;;  %v563_v27 = vld [vmem:[#allocation2 + $0x428] sm:$0xff]  ;;  %v434_v28 = vld [vmem:[#allocation2 + $0x20] sm:$0xff] }
  0x36   :  { %708 = vmatprep.subr.mxu0 %v447_v14  ;;  %779 = vmatprep.subr.mxu1 %v575_v15  ;;  %v562_v29 = vld [vmem:[#allocation2 + $0x420] sm:$0xff]  ;;  %v431_v30 = vld [vmem:[#allocation2 + $0x8] sm:$0xff] }
  0x37   :  { %709 = vmatpush1.msra.mxu0 %v446_v16  ;;  %780 = vmatpush1.msra.mxu1 %v574_v17  ;;  %v559_v31 = vld [vmem:[#allocation2 + $0x408] sm:$0xff]  ;;  %v430_v32 = vld [vmem:[#allocation2] sm:$0xff] }
  0x38   :  { %710 = vmatprep.subr.mxu0 %v443_v18  ;;  %781 = vmatprep.subr.mxu1 %v571_v19  ;;  %v558_v33 = vld [vmem:[#allocation2 + $0x400] sm:$0xff]  ;;  %v555_v34 = vld [vmem:[#allocation2 + $0x3e8] sm:$0xff] }
  0x39   :  { %711 = vmatpush1.msra.mxu0 %v442_v20  ;;  %782 = vmatpush1.msra.mxu1 %v570_v21  ;;  %v683_v35 = vld [vmem:[#allocation2 + $0x7e8] sm:$0xff]  ;;  %v554_v36 = vld [vmem:[#allocation2 + $0x3e0] sm:$0xff] }
  0x3a   :  { %712 = vmatprep.subr.mxu0 %v439_v22  ;;  %783 = vmatprep.subr.mxu1 %v567_v23  ;;  %v682_v37 = vld [vmem:[#allocation2 + $0x7e0] sm:$0xff]  ;;  %v551_v38 = vld [vmem:[#allocation2 + $0x3c8] sm:$0xff] }
  0x3b   :  { %713 = vmatpush1.msra.mxu0 %v438_v24  ;;  %784 = vmatpush1.msra.mxu1 %v566_v25  ;;  %v679_v39 = vld [vmem:[#allocation2 + $0x7c8] sm:$0xff]  ;;  %v550_v40 = vld [vmem:[#allocation2 + $0x3c0] sm:$0xff] }
  0x3c   :  { %714 = vmatprep.subr.mxu0 %v435_v26  ;;  %785 = vmatprep.subr.mxu1 %v563_v27  ;;  %v678_v41 = vld [vmem:[#allocation2 + $0x7c0] sm:$0xff]  ;;  %v547_v42 = vld [vmem:[#allocation2 + $0x3a8] sm:$0xff] }
  0x3d   :  { %715 = vmatpush1.msra.mxu0 %v434_v28  ;;  %786 = vmatpush1.msra.mxu1 %v562_v29  ;;  %v675_v43 = vld [vmem:[#allocation2 + $0x7a8] sm:$0xff]  ;;  %v546_v44 = vld [vmem:[#allocation2 + $0x3a0] sm:$0xff] }
  0x3e   :  { %716 = vmatprep.subr.mxu0 %v431_v30  ;;  %787 = vmatprep.subr.mxu1 %v559_v31  ;;  %v674_v45 = vld [vmem:[#allocation2 + $0x7a0] sm:$0xff]  ;;  %v543_v46 = vld [vmem:[#allocation2 + $0x388] sm:$0xff] }
  0x3f   :  { %717 = vmatpush1.msra.mxu0 %v430_v32  ;;  %788 = vmatpush1.msra.mxu1 %v558_v33  ;;  %v671_v47 = vld [vmem:[#allocation2 + $0x788] sm:$0xff]  ;;  %v542_v48 = vld [vmem:[#allocation2 + $0x380] sm:$0xff] }
  0x40   :  { %718 = vmatprep.subr.mxu0 %v555_v34  ;;  %789 = vmatprep.subr.mxu1 %v683_v35  ;;  %v670_v49 = vld [vmem:[#allocation2 + $0x780] sm:$0xff]  ;;  %v539_v50 = vld [vmem:[#allocation2 + $0x368] sm:$0xff]  ;;  %v493_v34 = vld [vmem:[#allocation2 + $0x1f8] sm:$0xff] }
  0x41   :  { %719 = vmatpush2.msra.mxu0 %v554_v36  ;;  %790 = vmatpush2.msra.mxu1 %v682_v37  ;;  %v667_v51 = vld [vmem:[#allocation2 + $0x768] sm:$0xff]  ;;  %v538_v52 = vld [vmem:[#allocation2 + $0x360] sm:$0xff]  ;;  %v621_v35 = vld [vmem:[#allocation2 + $0x5f8] sm:$0xff] }
  0x42   :  { %720 = vmatprep.subr.mxu0 %v551_v38  ;;  %791 = vmatprep.subr.mxu1 %v679_v39  ;;  %v666_v53 = vld [vmem:[#allocation2 + $0x760] sm:$0xff]  ;;  %v535_v54 = vld [vmem:[#allocation2 + $0x348] sm:$0xff] }
  0x43   :  { %721 = vmatpush2.msra.mxu0 %v550_v40  ;;  %792 = vmatpush2.msra.mxu1 %v678_v41  ;;  %v663_v55 = vld [vmem:[#allocation2 + $0x748] sm:$0xff]  ;;  %v534_v56 = vld [vmem:[#allocation2 + $0x340] sm:$0xff] }
  0x44   :  { %722 = vmatprep.subr.mxu0 %v547_v42  ;;  %793 = vmatprep.subr.mxu1 %v675_v43  ;;  %v662_v57 = vld [vmem:[#allocation2 + $0x740] sm:$0xff]  ;;  %v531_v58 = vld [vmem:[#allocation2 + $0x328] sm:$0xff] }
  0x45   :  { %723 = vmatpush2.msra.mxu0 %v546_v44  ;;  %794 = vmatpush2.msra.mxu1 %v674_v45  ;;  %v659_v59 = vld [vmem:[#allocation2 + $0x728] sm:$0xff]  ;;  %v530_v60 = vld [vmem:[#allocation2 + $0x320] sm:$0xff] }
  0x46   :  { %724 = vmatprep.subr.mxu0 %v543_v46  ;;  %795 = vmatprep.subr.mxu1 %v671_v47  ;;  %v658_v61 = vld [vmem:[#allocation2 + $0x720] sm:$0xff]  ;;  %v527_v62 = vld [vmem:[#allocation2 + $0x308] sm:$0xff] }
  0x47   :  { %725 = vmatpush2.msra.mxu0 %v542_v48  ;;  %796 = vmatpush2.msra.mxu1 %v670_v49  ;;  %v655_v63 = vld [vmem:[#allocation2 + $0x708] sm:$0xff]  ;;  %v526_v0 = vld [vmem:[#allocation2 + $0x300] sm:$0xff] }
  0x48   :  { %726 = vmatprep.subr.mxu0 %v539_v50  ;;  %797 = vmatprep.subr.mxu1 %v667_v51  ;;  %v654_v1 = vld [vmem:[#allocation2 + $0x700] sm:$0xff]  ;;  %v523_v2 = vld [vmem:[#allocation2 + $0x2e8] sm:$0xff] }
  0x49   :  { %727 = vmatpush2.msra.mxu0 %v538_v52  ;;  %798 = vmatpush2.msra.mxu1 %v666_v53  ;;  %v651_v3 = vld [vmem:[#allocation2 + $0x6e8] sm:$0xff]  ;;  %v522_v4 = vld [vmem:[#allocation2 + $0x2e0] sm:$0xff] }
  0x4a   :  { %728 = vmatprep.subr.mxu0 %v535_v54  ;;  %799 = vmatprep.subr.mxu1 %v663_v55  ;;  %v650_v5 = vld [vmem:[#allocation2 + $0x6e0] sm:$0xff]  ;;  %v519_v6 = vld [vmem:[#allocation2 + $0x2c8] sm:$0xff] }
  0x4b   :  { %729 = vmatpush2.msra.mxu0 %v534_v56  ;;  %800 = vmatpush2.msra.mxu1 %v662_v57  ;;  %v647_v7 = vld [vmem:[#allocation2 + $0x6c8] sm:$0xff]  ;;  %v518_v8 = vld [vmem:[#allocation2 + $0x2c0] sm:$0xff] }
  0x4c   :  { %730 = vmatprep.subr.mxu0 %v531_v58  ;;  %801 = vmatprep.subr.mxu1 %v659_v59  ;;  %v646_v9 = vld [vmem:[#allocation2 + $0x6c0] sm:$0xff]  ;;  %v515_v10 = vld [vmem:[#allocation2 + $0x2a8] sm:$0xff] }
  0x4d   :  { %731 = vmatpush2.msra.mxu0 %v530_v60  ;;  %802 = vmatpush2.msra.mxu1 %v658_v61  ;;  %v643_v11 = vld [vmem:[#allocation2 + $0x6a8] sm:$0xff]  ;;  %v514_v12 = vld [vmem:[#allocation2 + $0x2a0] sm:$0xff] }
  0x4e   :  { %732 = vmatprep.subr.mxu0 %v527_v62  ;;  %803 = vmatprep.subr.mxu1 %v655_v63  ;;  %v642_v13 = vld [vmem:[#allocation2 + $0x6a0] sm:$0xff]  ;;  %v511_v14 = vld [vmem:[#allocation2 + $0x288] sm:$0xff] }
  0x4f   :  { %733 = vmatpush2.msra.mxu0 %v526_v0  ;;  %804 = vmatpush2.msra.mxu1 %v654_v1  ;;  %v639_v15 = vld [vmem:[#allocation2 + $0x688] sm:$0xff]  ;;  %v510_v16 = vld [vmem:[#allocation2 + $0x280] sm:$0xff] }
  0x50   :  { %734 = vmatprep.subr.mxu0 %v523_v2  ;;  %805 = vmatprep.subr.mxu1 %v651_v3  ;;  %v638_v17 = vld [vmem:[#allocation2 + $0x680] sm:$0xff]  ;;  %v507_v18 = vld [vmem:[#allocation2 + $0x268] sm:$0xff] }
  0x51   :  { %735 = vmatpush2.msra.mxu0 %v522_v4  ;;  %806 = vmatpush2.msra.mxu1 %v650_v5  ;;  %v635_v19 = vld [vmem:[#allocation2 + $0x668] sm:$0xff]  ;;  %v506_v20 = vld [vmem:[#allocation2 + $0x260] sm:$0xff] }
  0x52   :  { %736 = vmatprep.subr.mxu0 %v519_v6  ;;  %807 = vmatprep.subr.mxu1 %v647_v7  ;;  %v634_v21 = vld [vmem:[#allocation2 + $0x660] sm:$0xff]  ;;  %v503_v22 = vld [vmem:[#allocation2 + $0x248] sm:$0xff] }
  0x53   :  { %737 = vmatpush2.msra.mxu0 %v518_v8  ;;  %808 = vmatpush2.msra.mxu1 %v646_v9  ;;  %v631_v23 = vld [vmem:[#allocation2 + $0x648] sm:$0xff]  ;;  %v502_v24 = vld [vmem:[#allocation2 + $0x240] sm:$0xff] }
  0x54   :  { %738 = vmatprep.subr.mxu0 %v515_v10  ;;  %809 = vmatprep.subr.mxu1 %v643_v11  ;;  %v630_v25 = vld [vmem:[#allocation2 + $0x640] sm:$0xff]  ;;  %v499_v26 = vld [vmem:[#allocation2 + $0x228] sm:$0xff] }
  0x55   :  { %739 = vmatpush2.msra.mxu0 %v514_v12  ;;  %810 = vmatpush2.msra.mxu1 %v642_v13  ;;  %v627_v27 = vld [vmem:[#allocation2 + $0x628] sm:$0xff]  ;;  %v498_v28 = vld [vmem:[#allocation2 + $0x220] sm:$0xff] }
  0x56   :  { %740 = vmatprep.subr.mxu0 %v511_v14  ;;  %811 = vmatprep.subr.mxu1 %v639_v15  ;;  %v626_v29 = vld [vmem:[#allocation2 + $0x620] sm:$0xff]  ;;  %v495_v30 = vld [vmem:[#allocation2 + $0x208] sm:$0xff] }
  0x57   :  { %741 = vmatpush2.msra.mxu0 %v510_v16  ;;  %812 = vmatpush2.msra.mxu1 %v638_v17  ;;  %v623_v31 = vld [vmem:[#allocation2 + $0x608] sm:$0xff]  ;;  %v494_v32 = vld [vmem:[#allocation2 + $0x200] sm:$0xff] }
  0x58   :  { %742 = vmatprep.subr.mxu0 %v507_v18  ;;  %813 = vmatprep.subr.mxu1 %v635_v19  ;;  %v622_v33 = vld [vmem:[#allocation2 + $0x600] sm:$0xff] }
  0x59   :  { %743 = vmatpush2.msra.mxu0 %v506_v20  ;;  %814 = vmatpush2.msra.mxu1 %v634_v21 }
  0x5a   :  { %744 = vmatprep.subr.mxu0 %v503_v22  ;;  %815 = vmatprep.subr.mxu1 %v631_v23 }
  0x5b   :  { %745 = vmatpush2.msra.mxu0 %v502_v24  ;;  %816 = vmatpush2.msra.mxu1 %v630_v25 }
  0x5c   :  { %746 = vmatprep.subr.mxu0 %v499_v26  ;;  %817 = vmatprep.subr.mxu1 %v627_v27 }
  0x5d   :  { %747 = vmatpush2.msra.mxu0 %v498_v28  ;;  %818 = vmatpush2.msra.mxu1 %v626_v29 }
  0x5e   :  { %748 = vmatprep.subr.mxu0 %v495_v30  ;;  %819 = vmatprep.subr.mxu1 %v623_v31 }
  0x5f   :  { %749 = vmatpush2.msra.mxu0 %v494_v32  ;;  %820 = vmatpush2.msra.mxu1 %v622_v33 }
  0x60   :  { %828 = vmatprep.subr.mxu0 %v493_v34  ;;  %899 = vmatprep.subr.mxu1 %v621_v35 }
  0xdf   :  { %v5632_v36 = vpop.f32.mrf.mxu0  ;;  %v5634_v37 = vpop.f32.mrf.mxu1 }
  0xe0   :  { %v217_v38 = vrot.slane %v5632_v36, 4  ;;  %v246_v39 = vmul.f32 %v5632_v36, %v5632_v36  ;;  %v229_v40 = vrot.slane %v5634_v37, 4  ;;  %v248_v41 = vmul.f32 %v5634_v37, %v5634_v37 }
  0xe1   :  { %v5642_v42 = vpop.f32.mrf.mxu0  ;;  %v5644_v43 = vpop.f32.mrf.mxu1 }
  0xe2   :  { %v218_v44 = vadd.f32 %v217_v38, %v5632_v36  ;;  %v250_v45 = vrot.slane %v246_v39, 4  ;;  %v230_v46 = vadd.f32 %v229_v40, %v5634_v37  ;;  %v262_v47 = vrot.slane %v248_v41, 4 }
  0xe3   :  { %v223_v48 = vrot.slane %v5642_v42, 4  ;;  %v247_v49 = vmul.f32 %v5642_v42, %v5642_v42  ;;  %v235_v50 = vrot.slane %v5644_v43, 4  ;;  %v249_v51 = vmul.f32 %v5644_v43, %v5644_v43 }
  0xe4   :  { %v219_v52 = vrot.slane %v218_v44, 2  ;;  %v251_v53 = vadd.f32 %v250_v45, %v246_v39  ;;  %v231_v54 = vrot.slane %v230_v46, 2  ;;  %v263_v55 = vadd.f32 %v262_v47, %v248_v41 }
  0xe5   :  { %v224_v56 = vadd.f32 %v223_v48, %v5642_v42  ;;  %v256_v57 = vrot.slane %v247_v49, 4  ;;  %v236_v58 = vadd.f32 %v235_v50, %v5644_v43  ;;  %v268_v59 = vrot.slane %v249_v51, 4 }
  0xe6   :  { %v220_v60 = vadd.f32 %v219_v52, %v218_v44  ;;  %v252_v61 = vrot.slane %v251_v53, 2  ;;  %v232_v62 = vadd.f32 %v231_v54, %v230_v46  ;;  %v264_v63 = vrot.slane %v263_v55, 2 }
  0xe7   :  { %v225_v0 = vrot.slane %v224_v56, 2  ;;  %v257_v1 = vadd.f32 %v256_v57, %v247_v49  ;;  %v237_v2 = vrot.slane %v236_v58, 2  ;;  %v269_v3 = vadd.f32 %v268_v59, %v249_v51 }
  0xe8   :  { %v221_v4 = vrot.slane %v220_v60, 1  ;;  %v253_v5 = vadd.f32 %v252_v61, %v251_v53  ;;  %v233_v6 = vrot.slane %v232_v62, 1  ;;  %v265_v7 = vadd.f32 %v264_v63, %v263_v55 }
  0xe9   :  { %v226_v8 = vadd.f32 %v225_v0, %v224_v56  ;;  %v258_v9 = vrot.slane %v257_v1, 2  ;;  %v238_v10 = vadd.f32 %v237_v2, %v236_v58  ;;  %v270_v11 = vrot.slane %v269_v3, 2 }
  0xea   :  { %v222_v12 = vadd.f32 %v221_v4, %v220_v60  ;;  %v254_v13 = vrot.slane %v253_v5, 1  ;;  %v234_v14 = vadd.f32 %v233_v6, %v232_v62  ;;  %v266_v15 = vrot.slane %v265_v7, 1  ;;  %v216_v6 = vld [vmem:[%s7463_s4] sm:$0xff] }
  0xeb   :  { %v227_v16 = vrot.slane %v226_v8, 1  ;;  %v259_v17 = vadd.f32 %v258_v9, %v257_v1  ;;  %v239_v18 = vrot.slane %v238_v10, 1  ;;  %v271_v19 = vadd.f32 %v270_v11, %v269_v3 }
  0xec   :  { %v242_v20 = vmul.f32 0.125, %v222_v12  ;;  %v255_v21 = vadd.f32 %v254_v13, %v253_v5  ;;  %v244_v22 = vmul.f32 0.125, %v234_v14  ;;  %v267_v23 = vadd.f32 %v266_v15, %v265_v7 }
  0xed   :  { %v228_v24 = vadd.f32 %v227_v16, %v226_v8  ;;  %v260_v25 = vrot.slane %v259_v17, 1  ;;  %v240_v26 = vadd.f32 %v239_v18, %v238_v10  ;;  %v272_v27 = vrot.slane %v271_v19, 1 }
  0xee   :  { %v274_v28 = vmul.f32 0.125, %v255_v21  ;;  %v278_v29 = vmul.f32 %v242_v20, %v242_v20  ;;  %v276_v30 = vmul.f32 0.125, %v267_v23  ;;  %v280_v31 = vmul.f32 %v244_v22, %v244_v22 }
  0xef   :  { %v243_v32 = vmul.f32 0.125, %v228_v24  ;;  %v261_v33 = vadd.f32 %v260_v25, %v259_v17  ;;  %v245_v34 = vmul.f32 0.125, %v240_v26  ;;  %v273_v35 = vadd.f32 %v272_v27, %v271_v19 }
  0xf0   :  { %v282_v38 = vsub.f32 %v274_v28, %v278_v29  ;;  %v284_v39 = vsub.f32 %v276_v30, %v280_v31  ;;  %v5494_v52 = vmov 1983009808   ;;  %v303_v54 = vlaneseq }
  0xf1   :  { %v275_v40 = vmul.f32 0.125, %v261_v33  ;;  %v279_v41 = vmul.f32 %v243_v32, %v243_v32  ;;  %v277_v44 = vmul.f32 0.125, %v273_v35  ;;  %v281_v47 = vmul.f32 %v245_v34, %v245_v34 }
  0xf2   :  { %v286_v45 = vadd.f32 1e-05, %v282_v38  ;;  %v288_v46 = vadd.f32 1e-05, %v284_v39  ;;  %v301_v53 = vunpack.c.l.s4 %v5494_v52  ;;  %v304_v56 = vshrl.u32 %v303_v54, 7  ;;  %v617_v52 = vld [vmem:[#allocation2 + $0x5d8] sm:$0xff] }
  0xf3   :  { %v283_v48 = vsub.f32 %v275_v40, %v279_v41  ;;  %v285_v49 = vsub.f32 %v277_v44, %v281_v47  ;;  %v321_v61 = vcombine.low %v242_v20, %v243_v32  ;;  %v322_v62 = vcombine.low %v244_v22, %v245_v34  ;;  %v616_v54 = vld [vmem:[#allocation2 + $0x5d0] sm:$0xff] }
  0xf4   :  { %5392 = vrsqrt.f32 %v286_v45  ;;  %v302_v55 = vunpack.c.0.s8 %v301_v53  ;;  %v5665_v7 = vsub.s32 0, %v304_v56  ;;  %v5667_v9 = vsub.s32 6, %v304_v56  ;;  %v488_v53 = vld [vmem:[#allocation2 + $0x1d0] sm:$0xff] }
  0xf5   :  { %v287_v50 = vadd.f32 1e-05, %v283_v48  ;;  %5394 = vrsqrt.f32 %v288_v46  ;;  %v289_v51 = vadd.f32 1e-05, %v285_v49  ;;  %v5669_v10 = vsub.s32 2, %v304_v56  ;;  %v492_v49 = vld [vmem:[#allocation2 + $0x1f0] sm:$0xff] }
  0xf6   :  { %v5656_v60 = vsub.s32 %v302_v55, %v304_v56  ;;  %v5671_v11 = vsub.s32 4, %v304_v56  ;;  %v5676_v18 = vsub.s32 1, %v304_v56  ;;  %v5679_v21 = vsub.s32 3, %v304_v56  ;;  %v485_v55 = vld [vmem:[#allocation2 + $0x1b8] sm:$0xff] }
  0xf7   :  { %5396 = vrsqrt.f32 %v287_v50  ;;  %v5681_v22 = vsub.s32 7, %v304_v56  ;;  %v5683_v23 = vsub.s32 5, %v304_v56  ;;  %v620_v50 = vld [vmem:[#allocation2 + $0x5f0] sm:$0xff]  ;;  %v613_v56 = vld [vmem:[#allocation2 + $0x5b8] sm:$0xff] }
  0xf8   :  { %5398 = vrsqrt.f32 %v289_v51  ;;  %v329_v3 = vrot.slane %v321_v61, %v5656_v60  ;;  %v336_v5 = vrot.slane %v322_v62, %v5656_v60  ;;  %v489_v51 = vld [vmem:[#allocation2 + $0x1d8] sm:$0xff]  ;;  %v480_v62 = vld [vmem:[#allocation2 + $0x190] sm:$0xff] }
  0xf9   :  { %v609_v61 = vld [vmem:[#allocation2 + $0x598] sm:$0xff] }
  0xfa   :  { %v337_v13 = vcombine.low %v329_v3, %v336_v5  ;;  %v604_v3 = vld [vmem:[#allocation2 + $0x570] sm:$0xff]  ;;  %v601_v5 = vld [vmem:[#allocation2 + $0x558] sm:$0xff] }
 0x101   :  { %v5393_v57 = vpop.eup %5392 }
 0x102   :  { %v5395_v58 = vpop.eup %5394 }
 0x104   :  { %v5397_v59 = vpop.eup %5396 }
 0x105   :  { %v5399_v63 = vpop.eup %5398  ;;  %v298_v0 = vcombine.low %v5393_v57, %v5397_v59  ;;  %v484_v57 = vld [vmem:[#allocation2 + $0x1b0] sm:$0xff]  ;;  %v481_v59 = vld [vmem:[#allocation2 + $0x198] sm:$0xff] }
 0x106   :  { %v299_v1 = vcombine.low %v5395_v58, %v5399_v63  ;;  %v612_v58 = vld [vmem:[#allocation2 + $0x5b0] sm:$0xff] }
 0x107   :  { %v306_v2 = vrot.slane %v298_v0, %v5656_v60  ;;  %v608_v63 = vld [vmem:[#allocation2 + $0x590] sm:$0xff]  ;;  %v477_v0 = vld [vmem:[#allocation2 + $0x178] sm:$0xff] }
 0x108   :  { %v313_v4 = vrot.slane %v299_v1, %v5656_v60  ;;  %v605_v1 = vld [vmem:[#allocation2 + $0x578] sm:$0xff] }
 0x10a   :  { %v314_v8 = vcombine.low %v306_v2, %v313_v4  ;;  %v476_v2 = vld [vmem:[#allocation2 + $0x170] sm:$0xff]  ;;  %v473_v4 = vld [vmem:[#allocation2 + $0x158] sm:$0xff] }
 0x10c   :  { %v316_v12 = vmul.f32 %v314_v8, %v216_v6  ;;  %v600_v8 = vld [vmem:[#allocation2 + $0x550] sm:$0xff] }
 0x10e   :  { %v339_v14 = vmul.f32 %v337_v13, %v316_v12  ;;  %v360_v15 = vrot.slane %v316_v12, %v5667_v9  ;;  %v352_v16 = vrot.slane %v316_v12, %v5669_v10  ;;  %v348_v17 = vrot.slane %v316_v12, %v5665_v7  ;;  %v597_v13 = vld [vmem:[#allocation2 + $0x538] sm:$0xff] }
 0x10f   :  { %v356_v19 = vrot.slane %v316_v12, %v5671_v11  ;;  %v469_v12 = vld [vmem:[#allocation2 + $0x138] sm:$0xff] }
 0x110   :  { %v341_v20 = vrot.slane %v339_v14, 7  ;;  %v380_v24 = vrot.slane %v360_v15, %v5665_v7  ;;  %v372_v25 = vrot.slane %v352_v16, %v5665_v7  ;;  %v368_v26 = vrot.slane %v348_v17, %v5665_v7  ;;  %v468_v14 = vld [vmem:[#allocation2 + $0x130] sm:$0xff]  ;;  %v465_v16 = vld [vmem:[#allocation2 + $0x118] sm:$0xff] }
 0x111   :  { %v376_v27 = vrot.slane %v356_v19, %v5665_v7  ;;  %v596_v15 = vld [vmem:[#allocation2 + $0x530] sm:$0xff]  ;;  %v593_v17 = vld [vmem:[#allocation2 + $0x518] sm:$0xff] }
 0x112   :  { %v343_v28 = vsub.f32 %v216_v6, %v341_v20  ;;  %v384_v33 = vmul.f32 %v380_v24, %v5644_v43  ;;  %v382_v34 = vmul.f32 %v372_v25, %v5642_v42  ;;  %v381_v35 = vmul.f32 %v368_v26, %v5632_v36  ;;  %v472_v6 = vld [vmem:[#allocation2 + $0x150] sm:$0xff]  ;;  %v461_v24 = vld [vmem:[#allocation2 + $0xf8] sm:$0xff] }
 0x113   :  { %v383_v38 = vmul.f32 %v376_v27, %v5634_v37  ;;  %v464_v19 = vld [vmem:[#allocation2 + $0x110] sm:$0xff]  ;;  %v589_v25 = vld [vmem:[#allocation2 + $0x4f8] sm:$0xff] }
 0x114   :  { %v393_v29 = vrot.slane %v343_v28, %v5679_v21  ;;  %v401_v30 = vrot.slane %v343_v28, %v5681_v22  ;;  %v389_v31 = vrot.slane %v343_v28, %v5676_v18  ;;  %v397_v32 = vrot.slane %v343_v28, %v5683_v23  ;;  %v592_v20 = vld [vmem:[#allocation2 + $0x510] sm:$0xff]  ;;  %v457_v28 = vld [vmem:[#allocation2 + $0xd8] sm:$0xff] }
 0x115   :  { %v460_v26 = vld [vmem:[#allocation2 + $0xf0] sm:$0xff] }
 0x116   :  { %v413_v39 = vrot.slane %v393_v29, %v5676_v18  ;;  %v421_v40 = vrot.slane %v401_v30, %v5676_v18  ;;  %v409_v41 = vrot.slane %v389_v31, %v5676_v18  ;;  %v417_v44 = vrot.slane %v397_v32, %v5676_v18  ;;  %v588_v27 = vld [vmem:[#allocation2 + $0x4f0] sm:$0xff]  ;;  %v585_v29 = vld [vmem:[#allocation2 + $0x4d8] sm:$0xff] }
 0x117   :  { %v456_v30 = vld [vmem:[#allocation2 + $0xd0] sm:$0xff]  ;;  %v453_v32 = vld [vmem:[#allocation2 + $0xb8] sm:$0xff] }
 0x118   :  { %v423_v45 = vadd.f32 %v413_v39, %v382_v34  ;;  %v425_v46 = vadd.f32 %v421_v40, %v384_v33  ;;  %v5701_v47 = vadd.f32 %v409_v41, %v381_v35  ;;  %v5703_v48 = vadd.f32 %v417_v44, %v383_v38  ;;  %v584_v31 = vld [vmem:[#allocation2 + $0x4d0] sm:$0xff]  ;;  %v581_v33 = vld [vmem:[#allocation2 + $0x4b8] sm:$0xff] }
 0x119   :  { %v452_v34 = vld [vmem:[#allocation2 + $0xb0] sm:$0xff]  ;;  %v449_v38 = vld [vmem:[#allocation2 + $0x98] sm:$0xff] }
 0x11a   :  { %v427_v43 = vmax.f32 %v423_v45, 0.0  ;;  %v429_v42 = vmax.f32 %v425_v46, 0.0  ;;  %v426_v36 = vmax.f32 %v5701_v47, 0.0  ;;  %v428_v37 = vmax.f32 %v5703_v48, 0.0  ;;  %v580_v35 = vld [vmem:[#allocation2 + $0x4b0] sm:$0xff]  ;;  %v577_v39 = vld [vmem:[#allocation2 + $0x498] sm:$0xff] }
 0x11b   :  { %v448_v40 = vld [vmem:[#allocation2 + $0x90] sm:$0xff]  ;;  %v445_v44 = vld [vmem:[#allocation2 + $0x78] sm:$0xff]  ;;  %v1238_v47 = vld [vmem:[#allocation2 + $0x9a8] sm:$0xff] }
 0x11c   :  { %750 = vmatprep.mubr.f32.mxu0 %v427_v43  ;;  %821 = vmatprep.mubr.f32.mxu1 %v429_v42  ;;  %v576_v41 = vld [vmem:[#allocation2 + $0x490] sm:$0xff]  ;;  %v573_v45 = vld [vmem:[#allocation2 + $0x478] sm:$0xff]  ;;  %v1237_v48 = vld [vmem:[#allocation2 + $0x9a0] sm:$0xff] }
 0x11d   :  { %751 = vmatmul.mubr.f32.vlgmr.msra.gmra.mxu0 %v426_v36  ;;  %822 = vmatmul.mubr.f32.vlgmr.msra.gmra.mxu1 %v428_v37  ;;  %v444_v46 = vld [vmem:[#allocation2 + $0x70] sm:$0xff] }
 0x11e   :  { %829 = vmatpush1.msra.mxu0 %v492_v49  ;;  %900 = vmatpush1.msra.mxu1 %v620_v50  ;;  %v569_v49 = vld [vmem:[#allocation2 + $0x458] sm:$0xff]  ;;  %v440_v50 = vld [vmem:[#allocation2 + $0x50] sm:$0xff] }
 0x11f   :  { %830 = vmatprep.subr.mxu0 %v489_v51  ;;  %892 = vmatprep.mubr.f32.mxu0 %v427_v43  ;;  %v572_v43 = vld [vmem:[#allocation2 + $0x470] sm:$0xff] }
 0x120   :  { %901 = vmatprep.subr.mxu1 %v617_v52  ;;  %963 = vmatprep.mubr.f32.mxu1 %v429_v42  ;;  %v441_v42 = vld [vmem:[#allocation2 + $0x58] sm:$0xff]  ;;  %v568_v51 = vld [vmem:[#allocation2 + $0x450] sm:$0xff] }
 0x121   :  { %831 = vmatpush1.msra.mxu0 %v488_v53  ;;  %902 = vmatpush1.msra.mxu1 %v616_v54  ;;  %v437_v52 = vld [vmem:[#allocation2 + $0x38] sm:$0xff]  ;;  %v436_v54 = vld [vmem:[#allocation2 + $0x30] sm:$0xff] }
 0x122   :  { %832 = vmatprep.subr.mxu0 %v485_v55  ;;  %903 = vmatprep.subr.mxu1 %v613_v56  ;;  %v565_v53 = vld [vmem:[#allocation2 + $0x438] sm:$0xff]  ;;  %v564_v55 = vld [vmem:[#allocation2 + $0x430] sm:$0xff] }
 0x123   :  { %833 = vmatpush1.msra.mxu0 %v484_v57  ;;  %904 = vmatpush1.msra.mxu1 %v612_v58  ;;  %v433_v56 = vld [vmem:[#allocation2 + $0x18] sm:$0xff]  ;;  %v432_v58 = vld [vmem:[#allocation2 + $0x10] sm:$0xff] }
 0x124   :  { %834 = vmatprep.subr.mxu0 %v481_v59  ;;  %905 = vmatprep.subr.mxu1 %v609_v61  ;;  %v561_v57 = vld [vmem:[#allocation2 + $0x418] sm:$0xff]  ;;  %v560_v59 = vld [vmem:[#allocation2 + $0x410] sm:$0xff] }
 0x125   :  { %835 = vmatpush1.msra.mxu0 %v480_v62  ;;  %906 = vmatpush1.msra.mxu1 %v608_v63  ;;  %v557_v61 = vld [vmem:[#allocation2 + $0x3f8] sm:$0xff]  ;;  %v556_v63 = vld [vmem:[#allocation2 + $0x3f0] sm:$0xff] }
 0x126   :  { %836 = vmatprep.subr.mxu0 %v477_v0  ;;  %907 = vmatprep.subr.mxu1 %v605_v1  ;;  %v685_v62 = vld [vmem:[#allocation2 + $0x7f8] sm:$0xff]  ;;  %v684_v0 = vld [vmem:[#allocation2 + $0x7f0] sm:$0xff] }
 0x127   :  { %837 = vmatpush1.msra.mxu0 %v476_v2  ;;  %908 = vmatpush1.msra.mxu1 %v604_v3  ;;  %v553_v1 = vld [vmem:[#allocation2 + $0x3d8] sm:$0xff]  ;;  %v552_v3 = vld [vmem:[#allocation2 + $0x3d0] sm:$0xff] }
 0x128   :  { %838 = vmatprep.subr.mxu0 %v473_v4  ;;  %909 = vmatprep.subr.mxu1 %v601_v5  ;;  %v681_v2 = vld [vmem:[#allocation2 + $0x7d8] sm:$0xff]  ;;  %v680_v4 = vld [vmem:[#allocation2 + $0x7d0] sm:$0xff] }
 0x129   :  { %839 = vmatpush1.msra.mxu0 %v472_v6  ;;  %910 = vmatpush1.msra.mxu1 %v600_v8  ;;  %v549_v5 = vld [vmem:[#allocation2 + $0x3b8] sm:$0xff]  ;;  %v548_v8 = vld [vmem:[#allocation2 + $0x3b0] sm:$0xff] }
 0x12a   :  { %840 = vmatprep.subr.mxu0 %v469_v12  ;;  %911 = vmatprep.subr.mxu1 %v597_v13  ;;  %v677_v6 = vld [vmem:[#allocation2 + $0x7b8] sm:$0xff]  ;;  %v676_v12 = vld [vmem:[#allocation2 + $0x7b0] sm:$0xff] }
 0x12b   :  { %841 = vmatpush1.msra.mxu0 %v468_v14  ;;  %912 = vmatpush1.msra.mxu1 %v596_v15  ;;  %v545_v13 = vld [vmem:[#allocation2 + $0x398] sm:$0xff]  ;;  %v544_v15 = vld [vmem:[#allocation2 + $0x390] sm:$0xff] }
 0x12c   :  { %842 = vmatprep.subr.mxu0 %v465_v16  ;;  %913 = vmatprep.subr.mxu1 %v593_v17  ;;  %v673_v14 = vld [vmem:[#allocation2 + $0x798] sm:$0xff]  ;;  %v672_v16 = vld [vmem:[#allocation2 + $0x790] sm:$0xff] }
 0x12d   :  { %843 = vmatpush1.msra.mxu0 %v464_v19  ;;  %914 = vmatpush1.msra.mxu1 %v592_v20  ;;  %v541_v17 = vld [vmem:[#allocation2 + $0x378] sm:$0xff]  ;;  %v540_v20 = vld [vmem:[#allocation2 + $0x370] sm:$0xff] }
 0x12e   :  { %844 = vmatprep.subr.mxu0 %v461_v24  ;;  %915 = vmatprep.subr.mxu1 %v589_v25  ;;  %v669_v19 = vld [vmem:[#allocation2 + $0x778] sm:$0xff]  ;;  %v668_v24 = vld [vmem:[#allocation2 + $0x770] sm:$0xff] }
 0x12f   :  { %845 = vmatpush1.msra.mxu0 %v460_v26  ;;  %916 = vmatpush1.msra.mxu1 %v588_v27  ;;  %v537_v25 = vld [vmem:[#allocation2 + $0x358] sm:$0xff]  ;;  %v536_v27 = vld [vmem:[#allocation2 + $0x350] sm:$0xff] }
 0x130   :  { %846 = vmatprep.subr.mxu0 %v457_v28  ;;  %917 = vmatprep.subr.mxu1 %v585_v29  ;;  %v665_v26 = vld [vmem:[#allocation2 + $0x758] sm:$0xff]  ;;  %v664_v28 = vld [vmem:[#allocation2 + $0x750] sm:$0xff] }
 0x131   :  { %847 = vmatpush1.msra.mxu0 %v456_v30  ;;  %918 = vmatpush1.msra.mxu1 %v584_v31  ;;  %v533_v29 = vld [vmem:[#allocation2 + $0x338] sm:$0xff]  ;;  %v532_v31 = vld [vmem:[#allocation2 + $0x330] sm:$0xff] }
 0x132   :  { %848 = vmatprep.subr.mxu0 %v453_v32  ;;  %919 = vmatprep.subr.mxu1 %v581_v33  ;;  %v661_v30 = vld [vmem:[#allocation2 + $0x738] sm:$0xff]  ;;  %v660_v32 = vld [vmem:[#allocation2 + $0x730] sm:$0xff] }
 0x133   :  { %849 = vmatpush1.msra.mxu0 %v452_v34  ;;  %920 = vmatpush1.msra.mxu1 %v580_v35  ;;  %v529_v33 = vld [vmem:[#allocation2 + $0x318] sm:$0xff]  ;;  %v528_v35 = vld [vmem:[#allocation2 + $0x310] sm:$0xff] }
 0x134   :  { %850 = vmatprep.subr.mxu0 %v449_v38  ;;  %921 = vmatprep.subr.mxu1 %v577_v39  ;;  %v657_v34 = vld [vmem:[#allocation2 + $0x718] sm:$0xff]  ;;  %v656_v38 = vld [vmem:[#allocation2 + $0x710] sm:$0xff] }
 0x135   :  { %851 = vmatpush1.msra.mxu0 %v448_v40  ;;  %922 = vmatpush1.msra.mxu1 %v576_v41  ;;  %v525_v39 = vld [vmem:[#allocation2 + $0x2f8] sm:$0xff]  ;;  %v524_v41 = vld [vmem:[#allocation2 + $0x2f0] sm:$0xff] }
 0x136   :  { %852 = vmatprep.subr.mxu0 %v445_v44  ;;  %923 = vmatprep.subr.mxu1 %v573_v45  ;;  %v653_v40 = vld [vmem:[#allocation2 + $0x6f8] sm:$0xff]  ;;  %v652_v44 = vld [vmem:[#allocation2 + $0x6f0] sm:$0xff] }
 0x137   :  { %853 = vmatpush1.msra.mxu0 %v444_v46  ;;  %924 = vmatpush1.msra.mxu1 %v572_v43  ;;  %v521_v45 = vld [vmem:[#allocation2 + $0x2d8] sm:$0xff]  ;;  %v520_v43 = vld [vmem:[#allocation2 + $0x2d0] sm:$0xff] }
 0x138   :  { %854 = vmatprep.subr.mxu0 %v441_v42  ;;  %925 = vmatprep.subr.mxu1 %v569_v49  ;;  %v649_v46 = vld [vmem:[#allocation2 + $0x6d8] sm:$0xff]  ;;  %v648_v42 = vld [vmem:[#allocation2 + $0x6d0] sm:$0xff] }
 0x139   :  { %855 = vmatpush1.msra.mxu0 %v440_v50  ;;  %926 = vmatpush1.msra.mxu1 %v568_v51  ;;  %v517_v49 = vld [vmem:[#allocation2 + $0x2b8] sm:$0xff]  ;;  %v516_v51 = vld [vmem:[#allocation2 + $0x2b0] sm:$0xff] }
 0x13a   :  { %856 = vmatprep.subr.mxu0 %v437_v52  ;;  %927 = vmatprep.subr.mxu1 %v565_v53  ;;  %v645_v50 = vld [vmem:[#allocation2 + $0x6b8] sm:$0xff]  ;;  %v644_v52 = vld [vmem:[#allocation2 + $0x6b0] sm:$0xff] }
 0x13b   :  { %857 = vmatpush1.msra.mxu0 %v436_v54  ;;  %928 = vmatpush1.msra.mxu1 %v564_v55  ;;  %v513_v53 = vld [vmem:[#allocation2 + $0x298] sm:$0xff]  ;;  %v512_v55 = vld [vmem:[#allocation2 + $0x290] sm:$0xff] }
 0x13c   :  { %858 = vmatprep.subr.mxu0 %v433_v56  ;;  %929 = vmatprep.subr.mxu1 %v561_v57  ;;  %v641_v54 = vld [vmem:[#allocation2 + $0x698] sm:$0xff]  ;;  %v640_v56 = vld [vmem:[#allocation2 + $0x690] sm:$0xff] }
 0x13d   :  { %859 = vmatpush1.msra.mxu0 %v432_v58  ;;  %930 = vmatpush1.msra.mxu1 %v560_v59  ;;  %v509_v57 = vld [vmem:[#allocation2 + $0x278] sm:$0xff]  ;;  %v508_v59 = vld [vmem:[#allocation2 + $0x270] sm:$0xff] }
 0x13e   :  { %860 = vmatprep.subr.mxu0 %v557_v61  ;;  %931 = vmatprep.subr.mxu1 %v685_v62  ;;  %v637_v58 = vld [vmem:[#allocation2 + $0x678] sm:$0xff]  ;;  %v636_v61 = vld [vmem:[#allocation2 + $0x670] sm:$0xff] }
 0x13f   :  { %861 = vmatpush2.msra.mxu0 %v556_v63  ;;  %932 = vmatpush2.msra.mxu1 %v684_v0  ;;  %v505_v62 = vld [vmem:[#allocation2 + $0x258] sm:$0xff]  ;;  %v504_v0 = vld [vmem:[#allocation2 + $0x250] sm:$0xff] }
 0x140   :  { %862 = vmatprep.subr.mxu0 %v553_v1  ;;  %933 = vmatprep.subr.mxu1 %v681_v2  ;;  %v633_v63 = vld [vmem:[#allocation2 + $0x658] sm:$0xff]  ;;  %v632_v1 = vld [vmem:[#allocation2 + $0x650] sm:$0xff] }
 0x141   :  { %863 = vmatpush2.msra.mxu0 %v552_v3  ;;  %934 = vmatpush2.msra.mxu1 %v680_v4  ;;  %v501_v2 = vld [vmem:[#allocation2 + $0x238] sm:$0xff]  ;;  %v500_v4 = vld [vmem:[#allocation2 + $0x230] sm:$0xff] }
 0x142   :  { %864 = vmatprep.subr.mxu0 %v549_v5  ;;  %935 = vmatprep.subr.mxu1 %v677_v6  ;;  %v629_v3 = vld [vmem:[#allocation2 + $0x638] sm:$0xff]  ;;  %v628_v5 = vld [vmem:[#allocation2 + $0x630] sm:$0xff] }
 0x143   :  { %865 = vmatpush2.msra.mxu0 %v548_v8  ;;  %936 = vmatpush2.msra.mxu1 %v676_v12  ;;  %v497_v6 = vld [vmem:[#allocation2 + $0x218] sm:$0xff]  ;;  %v496_v12 = vld [vmem:[#allocation2 + $0x210] sm:$0xff] }
 0x144   :  { %866 = vmatprep.subr.mxu0 %v545_v13  ;;  %937 = vmatprep.subr.mxu1 %v673_v14  ;;  %v625_v8 = vld [vmem:[#allocation2 + $0x618] sm:$0xff]  ;;  %v624_v13 = vld [vmem:[#allocation2 + $0x610] sm:$0xff]  ;;  %v1246_v14 = vld [vmem:[#allocation2 + $0x9e8] sm:$0xff] }
 0x145   :  { %867 = vmatpush2.msra.mxu0 %v544_v15  ;;  %938 = vmatpush2.msra.mxu1 %v672_v16  ;;  %v1374_v15 = vld [vmem:[#allocation2 + $0xde8] sm:$0xff]  ;;  %v1245_v16 = vld [vmem:[#allocation2 + $0x9e0] sm:$0xff] }
 0x146   :  { %868 = vmatprep.subr.mxu0 %v541_v17  ;;  %939 = vmatprep.subr.mxu1 %v669_v19  ;;  %v1373_v17 = vld [vmem:[#allocation2 + $0xde0] sm:$0xff]  ;;  %v1242_v19 = vld [vmem:[#allocation2 + $0x9c8] sm:$0xff] }
 0x147   :  { %869 = vmatpush2.msra.mxu0 %v540_v20  ;;  %940 = vmatpush2.msra.mxu1 %v668_v24  ;;  %v1370_v20 = vld [vmem:[#allocation2 + $0xdc8] sm:$0xff]  ;;  %v1241_v24 = vld [vmem:[#allocation2 + $0x9c0] sm:$0xff] }
 0x148   :  { %870 = vmatprep.subr.mxu0 %v537_v25  ;;  %941 = vmatprep.subr.mxu1 %v665_v26  ;;  %v1369_v25 = vld [vmem:[#allocation2 + $0xdc0] sm:$0xff]  ;;  %v1234_v26 = vld [vmem:[#allocation2 + $0x988] sm:$0xff] }
 0x149   :  { %871 = vmatpush2.msra.mxu0 %v536_v27  ;;  %942 = vmatpush2.msra.mxu1 %v664_v28  ;;  %v1362_v27 = vld [vmem:[#allocation2 + $0xd88] sm:$0xff]  ;;  %v1233_v28 = vld [vmem:[#allocation2 + $0x980] sm:$0xff] }
 0x14a   :  { %872 = vmatprep.subr.mxu0 %v533_v29  ;;  %943 = vmatprep.subr.mxu1 %v661_v30  ;;  %v1361_v29 = vld [vmem:[#allocation2 + $0xd80] sm:$0xff]  ;;  %v1230_v30 = vld [vmem:[#allocation2 + $0x968] sm:$0xff] }
 0x14b   :  { %873 = vmatpush2.msra.mxu0 %v532_v31  ;;  %944 = vmatpush2.msra.mxu1 %v660_v32  ;;  %v1358_v31 = vld [vmem:[#allocation2 + $0xd68] sm:$0xff]  ;;  %v1229_v32 = vld [vmem:[#allocation2 + $0x960] sm:$0xff] }
 0x14c   :  { %874 = vmatprep.subr.mxu0 %v529_v33  ;;  %945 = vmatprep.subr.mxu1 %v657_v34  ;;  %v1357_v33 = vld [vmem:[#allocation2 + $0xd60] sm:$0xff]  ;;  %v1226_v34 = vld [vmem:[#allocation2 + $0x948] sm:$0xff] }
 0x14d   :  { %875 = vmatpush2.msra.mxu0 %v528_v35  ;;  %946 = vmatpush2.msra.mxu1 %v656_v38  ;;  %v1354_v35 = vld [vmem:[#allocation2 + $0xd48] sm:$0xff]  ;;  %v1225_v38 = vld [vmem:[#allocation2 + $0x940] sm:$0xff] }
 0x14e   :  { %876 = vmatprep.subr.mxu0 %v525_v39  ;;  %947 = vmatprep.subr.mxu1 %v653_v40  ;;  %v1353_v39 = vld [vmem:[#allocation2 + $0xd40] sm:$0xff]  ;;  %v1222_v40 = vld [vmem:[#allocation2 + $0x928] sm:$0xff] }
 0x14f   :  { %877 = vmatpush2.msra.mxu0 %v524_v41  ;;  %948 = vmatpush2.msra.mxu1 %v652_v44  ;;  %v1350_v41 = vld [vmem:[#allocation2 + $0xd28] sm:$0xff]  ;;  %v1221_v44 = vld [vmem:[#allocation2 + $0x920] sm:$0xff] }
 0x150   :  { %878 = vmatprep.subr.mxu0 %v521_v45  ;;  %949 = vmatprep.subr.mxu1 %v649_v46  ;;  %v1349_v45 = vld [vmem:[#allocation2 + $0xd20] sm:$0xff]  ;;  %v1218_v46 = vld [vmem:[#allocation2 + $0x908] sm:$0xff] }
 0x151   :  { %879 = vmatpush2.msra.mxu0 %v520_v43  ;;  %950 = vmatpush2.msra.mxu1 %v648_v42  ;;  %v1346_v43 = vld [vmem:[#allocation2 + $0xd08] sm:$0xff]  ;;  %v1217_v42 = vld [vmem:[#allocation2 + $0x900] sm:$0xff] }
 0x152   :  { %880 = vmatprep.subr.mxu0 %v517_v49  ;;  %951 = vmatprep.subr.mxu1 %v645_v50  ;;  %v1345_v49 = vld [vmem:[#allocation2 + $0xd00] sm:$0xff]  ;;  %v1214_v50 = vld [vmem:[#allocation2 + $0x8e8] sm:$0xff] }
 0x153   :  { %881 = vmatpush2.msra.mxu0 %v516_v51  ;;  %952 = vmatpush2.msra.mxu1 %v644_v52  ;;  %v1342_v51 = vld [vmem:[#allocation2 + $0xce8] sm:$0xff]  ;;  %v1213_v52 = vld [vmem:[#allocation2 + $0x8e0] sm:$0xff] }
 0x154   :  { %882 = vmatprep.subr.mxu0 %v513_v53  ;;  %953 = vmatprep.subr.mxu1 %v641_v54  ;;  %v1341_v53 = vld [vmem:[#allocation2 + $0xce0] sm:$0xff]  ;;  %v1210_v54 = vld [vmem:[#allocation2 + $0x8c8] sm:$0xff] }
 0x155   :  { %883 = vmatpush2.msra.mxu0 %v512_v55  ;;  %954 = vmatpush2.msra.mxu1 %v640_v56  ;;  %v1338_v55 = vld [vmem:[#allocation2 + $0xcc8] sm:$0xff]  ;;  %v1209_v56 = vld [vmem:[#allocation2 + $0x8c0] sm:$0xff] }
 0x156   :  { %884 = vmatprep.subr.mxu0 %v509_v57  ;;  %955 = vmatprep.subr.mxu1 %v637_v58  ;;  %v1337_v57 = vld [vmem:[#allocation2 + $0xcc0] sm:$0xff]  ;;  %v1206_v58 = vld [vmem:[#allocation2 + $0x8a8] sm:$0xff] }
 0x157   :  { %885 = vmatpush2.msra.mxu0 %v508_v59  ;;  %956 = vmatpush2.msra.mxu1 %v636_v61  ;;  %v1334_v59 = vld [vmem:[#allocation2 + $0xca8] sm:$0xff]  ;;  %v1205_v61 = vld [vmem:[#allocation2 + $0x8a0] sm:$0xff] }
 0x158   :  { %886 = vmatprep.subr.mxu0 %v505_v62  ;;  %957 = vmatprep.subr.mxu1 %v633_v63  ;;  %v1333_v62 = vld [vmem:[#allocation2 + $0xca0] sm:$0xff]  ;;  %v1202_v63 = vld [vmem:[#allocation2 + $0x888] sm:$0xff] }
 0x159   :  { %887 = vmatpush2.msra.mxu0 %v504_v0  ;;  %958 = vmatpush2.msra.mxu1 %v632_v1  ;;  %v1330_v0 = vld [vmem:[#allocation2 + $0xc88] sm:$0xff]  ;;  %v1201_v1 = vld [vmem:[#allocation2 + $0x880] sm:$0xff] }
 0x15a   :  { %888 = vmatprep.subr.mxu0 %v501_v2  ;;  %959 = vmatprep.subr.mxu1 %v629_v3  ;;  %v1329_v2 = vld [vmem:[#allocation2 + $0xc80] sm:$0xff]  ;;  %v1198_v3 = vld [vmem:[#allocation2 + $0x868] sm:$0xff] }
 0x15b   :  { %889 = vmatpush2.msra.mxu0 %v500_v4  ;;  %960 = vmatpush2.msra.mxu1 %v628_v5  ;;  %v1326_v4 = vld [vmem:[#allocation2 + $0xc68] sm:$0xff]  ;;  %v1197_v5 = vld [vmem:[#allocation2 + $0x860] sm:$0xff] }
 0x15c   :  { %890 = vmatprep.subr.mxu0 %v497_v6  ;;  %961 = vmatprep.subr.mxu1 %v625_v8  ;;  %v1325_v6 = vld [vmem:[#allocation2 + $0xc60] sm:$0xff]  ;;  %v1194_v8 = vld [vmem:[#allocation2 + $0x848] sm:$0xff] }
 0x15d   :  { %891 = vmatpush2.msra.mxu0 %v496_v12  ;;  %962 = vmatpush2.msra.mxu1 %v624_v13  ;;  %v1322_v12 = vld [vmem:[#allocation2 + $0xc48] sm:$0xff]  ;;  %v1193_v13 = vld [vmem:[#allocation2 + $0x840] sm:$0xff] }
 0x15e   :  { %893 = vmatmul.mubr.f32.vlgmr.msra.gmra.mxu0 %v426_v36  ;;  %964 = vmatmul.mubr.f32.vlgmr.msra.gmra.mxu1 %v428_v37  ;;  %v1366_v36 = vld [vmem:[#allocation2 + $0xda8] sm:$0xff]  ;;  %v1365_v37 = vld [vmem:[#allocation2 + $0xda0] sm:$0xff] }
 0x15f   :  { %1441 = vmatprep.subr.mxu0 %v1246_v14  ;;  %1512 = vmatprep.subr.mxu1 %v1374_v15  ;;  %v1321_v14 = vld [vmem:[#allocation2 + $0xc40] sm:$0xff]  ;;  %v1190_v15 = vld [vmem:[#allocation2 + $0x828] sm:$0xff] }
 0x160   :  { %1442 = vmatpush1.msra.mxu0 %v1245_v16  ;;  %1513 = vmatpush1.msra.mxu1 %v1373_v17  ;;  %v1318_v16 = vld [vmem:[#allocation2 + $0xc28] sm:$0xff]  ;;  %v1189_v17 = vld [vmem:[#allocation2 + $0x820] sm:$0xff] }
 0x161   :  { %1443 = vmatprep.subr.mxu0 %v1242_v19  ;;  %1514 = vmatprep.subr.mxu1 %v1370_v20  ;;  %v1317_v19 = vld [vmem:[#allocation2 + $0xc20] sm:$0xff]  ;;  %v1186_v20 = vld [vmem:[#allocation2 + $0x808] sm:$0xff] }
 0x162   :  { %1444 = vmatpush1.msra.mxu0 %v1241_v24  ;;  %1515 = vmatpush1.msra.mxu1 %v1369_v25  ;;  %v1314_v24 = vld [vmem:[#allocation2 + $0xc08] sm:$0xff]  ;;  %v1185_v25 = vld [vmem:[#allocation2 + $0x800] sm:$0xff] }
 0x163   :  { %1445 = vmatprep.subr.mxu0 %v1238_v47  ;;  %1516 = vmatprep.subr.mxu1 %v1366_v36  ;;  %v1313_v47 = vld [vmem:[#allocation2 + $0xc00] sm:$0xff]  ;;  %v1310_v36 = vld [vmem:[#allocation2 + $0xbe8] sm:$0xff] }
 0x164   :  { %1446 = vmatpush1.msra.mxu0 %v1237_v48  ;;  %1517 = vmatpush1.msra.mxu1 %v1365_v37  ;;  %v1438_v48 = vld [vmem:[#allocation2 + $0xfe8] sm:$0xff]  ;;  %v1309_v37 = vld [vmem:[#allocation2 + $0xbe0] sm:$0xff] }
 0x165   :  { %1447 = vmatprep.subr.mxu0 %v1234_v26  ;;  %1518 = vmatprep.subr.mxu1 %v1362_v27  ;;  %v1437_v26 = vld [vmem:[#allocation2 + $0xfe0] sm:$0xff]  ;;  %v1306_v27 = vld [vmem:[#allocation2 + $0xbc8] sm:$0xff] }
 0x166   :  { %1448 = vmatpush1.msra.mxu0 %v1233_v28  ;;  %1519 = vmatpush1.msra.mxu1 %v1361_v29  ;;  %v1434_v28 = vld [vmem:[#allocation2 + $0xfc8] sm:$0xff]  ;;  %v1305_v29 = vld [vmem:[#allocation2 + $0xbc0] sm:$0xff] }
 0x167   :  { %1449 = vmatprep.subr.mxu0 %v1230_v30  ;;  %1520 = vmatprep.subr.mxu1 %v1358_v31  ;;  %v1433_v30 = vld [vmem:[#allocation2 + $0xfc0] sm:$0xff]  ;;  %v1302_v31 = vld [vmem:[#allocation2 + $0xba8] sm:$0xff] }
 0x168   :  { %1450 = vmatpush1.msra.mxu0 %v1229_v32  ;;  %1521 = vmatpush1.msra.mxu1 %v1357_v33  ;;  %v1430_v32 = vld [vmem:[#allocation2 + $0xfa8] sm:$0xff]  ;;  %v1301_v33 = vld [vmem:[#allocation2 + $0xba0] sm:$0xff] }
 0x169   :  { %1451 = vmatprep.subr.mxu0 %v1226_v34  ;;  %1522 = vmatprep.subr.mxu1 %v1354_v35  ;;  %v1429_v34 = vld [vmem:[#allocation2 + $0xfa0] sm:$0xff]  ;;  %v1298_v35 = vld [vmem:[#allocation2 + $0xb88] sm:$0xff] }
 0x16a   :  { %1452 = vmatpush1.msra.mxu0 %v1225_v38  ;;  %1523 = vmatpush1.msra.mxu1 %v1353_v39  ;;  %v1426_v38 = vld [vmem:[#allocation2 + $0xf88] sm:$0xff]  ;;  %v1297_v39 = vld [vmem:[#allocation2 + $0xb80] sm:$0xff] }
 0x16b   :  { %1453 = vmatprep.subr.mxu0 %v1222_v40  ;;  %1524 = vmatprep.subr.mxu1 %v1350_v41  ;;  %v1425_v40 = vld [vmem:[#allocation2 + $0xf80] sm:$0xff]  ;;  %v1294_v41 = vld [vmem:[#allocation2 + $0xb68] sm:$0xff] }
 0x16c   :  { %1454 = vmatpush1.msra.mxu0 %v1221_v44  ;;  %1525 = vmatpush1.msra.mxu1 %v1349_v45  ;;  %v1422_v44 = vld [vmem:[#allocation2 + $0xf68] sm:$0xff]  ;;  %v1293_v45 = vld [vmem:[#allocation2 + $0xb60] sm:$0xff] }
 0x16d   :  { %1455 = vmatprep.subr.mxu0 %v1218_v46  ;;  %1526 = vmatprep.subr.mxu1 %v1346_v43  ;;  %v1421_v46 = vld [vmem:[#allocation2 + $0xf60] sm:$0xff]  ;;  %v1290_v43 = vld [vmem:[#allocation2 + $0xb48] sm:$0xff] }
 0x16e   :  { %1456 = vmatpush1.msra.mxu0 %v1217_v42  ;;  %1527 = vmatpush1.msra.mxu1 %v1345_v49  ;;  %v1418_v42 = vld [vmem:[#allocation2 + $0xf48] sm:$0xff]  ;;  %v1289_v49 = vld [vmem:[#allocation2 + $0xb40] sm:$0xff] }
 0x16f   :  { %1457 = vmatprep.subr.mxu0 %v1214_v50  ;;  %1528 = vmatprep.subr.mxu1 %v1342_v51  ;;  %v1417_v50 = vld [vmem:[#allocation2 + $0xf40] sm:$0xff]  ;;  %v1286_v51 = vld [vmem:[#allocation2 + $0xb28] sm:$0xff] }
 0x170   :  { %1458 = vmatpush1.msra.mxu0 %v1213_v52  ;;  %1529 = vmatpush1.msra.mxu1 %v1341_v53  ;;  %v1414_v52 = vld [vmem:[#allocation2 + $0xf28] sm:$0xff]  ;;  %v1285_v53 = vld [vmem:[#allocation2 + $0xb20] sm:$0xff] }
 0x171   :  { %1459 = vmatprep.subr.mxu0 %v1210_v54  ;;  %1530 = vmatprep.subr.mxu1 %v1338_v55  ;;  %v1413_v54 = vld [vmem:[#allocation2 + $0xf20] sm:$0xff]  ;;  %v1282_v55 = vld [vmem:[#allocation2 + $0xb08] sm:$0xff] }
 0x172   :  { %1460 = vmatpush1.msra.mxu0 %v1209_v56  ;;  %1531 = vmatpush1.msra.mxu1 %v1337_v57  ;;  %v1410_v56 = vld [vmem:[#allocation2 + $0xf08] sm:$0xff]  ;;  %v1281_v57 = vld [vmem:[#allocation2 + $0xb00] sm:$0xff] }
 0x173   :  { %1461 = vmatprep.subr.mxu0 %v1206_v58  ;;  %1532 = vmatprep.subr.mxu1 %v1334_v59  ;;  %v1409_v58 = vld [vmem:[#allocation2 + $0xf00] sm:$0xff]  ;;  %v1278_v59 = vld [vmem:[#allocation2 + $0xae8] sm:$0xff] }
 0x174   :  { %1462 = vmatpush1.msra.mxu0 %v1205_v61  ;;  %1533 = vmatpush1.msra.mxu1 %v1333_v62  ;;  %v1406_v61 = vld [vmem:[#allocation2 + $0xee8] sm:$0xff]  ;;  %v1277_v62 = vld [vmem:[#allocation2 + $0xae0] sm:$0xff] }
 0x175   :  { %1463 = vmatprep.subr.mxu0 %v1202_v63  ;;  %1534 = vmatprep.subr.mxu1 %v1330_v0  ;;  %v1405_v63 = vld [vmem:[#allocation2 + $0xee0] sm:$0xff]  ;;  %v1274_v0 = vld [vmem:[#allocation2 + $0xac8] sm:$0xff] }
 0x176   :  { %1464 = vmatpush1.msra.mxu0 %v1201_v1  ;;  %1535 = vmatpush1.msra.mxu1 %v1329_v2  ;;  %v1402_v1 = vld [vmem:[#allocation2 + $0xec8] sm:$0xff]  ;;  %v1273_v2 = vld [vmem:[#allocation2 + $0xac0] sm:$0xff] }
 0x177   :  { %1465 = vmatprep.subr.mxu0 %v1198_v3  ;;  %1536 = vmatprep.subr.mxu1 %v1326_v4  ;;  %v1401_v3 = vld [vmem:[#allocation2 + $0xec0] sm:$0xff]  ;;  %v1270_v4 = vld [vmem:[#allocation2 + $0xaa8] sm:$0xff] }
 0x178   :  { %1466 = vmatpush1.msra.mxu0 %v1197_v5  ;;  %1537 = vmatpush1.msra.mxu1 %v1325_v6  ;;  %v1398_v5 = vld [vmem:[#allocation2 + $0xea8] sm:$0xff]  ;;  %v1269_v6 = vld [vmem:[#allocation2 + $0xaa0] sm:$0xff] }
 0x179   :  { %1467 = vmatprep.subr.mxu0 %v1194_v8  ;;  %1538 = vmatprep.subr.mxu1 %v1322_v12  ;;  %v1397_v8 = vld [vmem:[#allocation2 + $0xea0] sm:$0xff]  ;;  %v1266_v12 = vld [vmem:[#allocation2 + $0xa88] sm:$0xff] }
 0x17a   :  { %1468 = vmatpush1.msra.mxu0 %v1193_v13  ;;  %1539 = vmatpush1.msra.mxu1 %v1321_v14  ;;  %v1394_v13 = vld [vmem:[#allocation2 + $0xe88] sm:$0xff]  ;;  %v1265_v14 = vld [vmem:[#allocation2 + $0xa80] sm:$0xff] }
 0x17b   :  { %1469 = vmatprep.subr.mxu0 %v1190_v15  ;;  %1540 = vmatprep.subr.mxu1 %v1318_v16  ;;  %v1393_v15 = vld [vmem:[#allocation2 + $0xe80] sm:$0xff]  ;;  %v1262_v16 = vld [vmem:[#allocation2 + $0xa68] sm:$0xff] }
 0x17c   :  { %1470 = vmatpush1.msra.mxu0 %v1189_v17  ;;  %1541 = vmatpush1.msra.mxu1 %v1317_v19  ;;  %v1390_v17 = vld [vmem:[#allocation2 + $0xe68] sm:$0xff]  ;;  %v1261_v19 = vld [vmem:[#allocation2 + $0xa60] sm:$0xff] }
 0x17d   :  { %1471 = vmatprep.subr.mxu0 %v1186_v20  ;;  %1542 = vmatprep.subr.mxu1 %v1314_v24  ;;  %v1389_v20 = vld [vmem:[#allocation2 + $0xe60] sm:$0xff]  ;;  %v1258_v24 = vld [vmem:[#allocation2 + $0xa48] sm:$0xff] }
 0x17e   :  { %1472 = vmatpush1.msra.mxu0 %v1185_v25  ;;  %1543 = vmatpush1.msra.mxu1 %v1313_v47  ;;  %v1386_v25 = vld [vmem:[#allocation2 + $0xe48] sm:$0xff]  ;;  %v1257_v47 = vld [vmem:[#allocation2 + $0xa40] sm:$0xff] }
 0x17f   :  { %1473 = vmatprep.subr.mxu0 %v1310_v36  ;;  %1544 = vmatprep.subr.mxu1 %v1438_v48  ;;  %v1385_v36 = vld [vmem:[#allocation2 + $0xe40] sm:$0xff]  ;;  %v1254_v48 = vld [vmem:[#allocation2 + $0xa28] sm:$0xff] }
 0x180   :  { %1474 = vmatpush2.msra.mxu0 %v1309_v37  ;;  %1545 = vmatpush2.msra.mxu1 %v1437_v26  ;;  %v1382_v37 = vld [vmem:[#allocation2 + $0xe28] sm:$0xff]  ;;  %v1253_v26 = vld [vmem:[#allocation2 + $0xa20] sm:$0xff] }
 0x181   :  { %1475 = vmatprep.subr.mxu0 %v1306_v27  ;;  %1546 = vmatprep.subr.mxu1 %v1434_v28  ;;  %v1381_v27 = vld [vmem:[#allocation2 + $0xe20] sm:$0xff]  ;;  %v1250_v28 = vld [vmem:[#allocation2 + $0xa08] sm:$0xff] }
 0x182   :  { %1476 = vmatpush2.msra.mxu0 %v1305_v29  ;;  %1547 = vmatpush2.msra.mxu1 %v1433_v30  ;;  %v1378_v29 = vld [vmem:[#allocation2 + $0xe08] sm:$0xff]  ;;  %v1249_v30 = vld [vmem:[#allocation2 + $0xa00] sm:$0xff] }
 0x183   :  { %1477 = vmatprep.subr.mxu0 %v1302_v31  ;;  %1548 = vmatprep.subr.mxu1 %v1430_v32  ;;  %v1377_v31 = vld [vmem:[#allocation2 + $0xe00] sm:$0xff]  ;;  %v1248_v32 = vld [vmem:[#allocation2 + $0x9f8] sm:$0xff] }
 0x184   :  { %1478 = vmatpush2.msra.mxu0 %v1301_v33  ;;  %1549 = vmatpush2.msra.mxu1 %v1429_v34  ;;  %v1376_v33 = vld [vmem:[#allocation2 + $0xdf8] sm:$0xff] }
 0x185   :  { %1479 = vmatprep.subr.mxu0 %v1298_v35  ;;  %1550 = vmatprep.subr.mxu1 %v1426_v38 }
 0x186   :  { %1480 = vmatpush2.msra.mxu0 %v1297_v39  ;;  %1551 = vmatpush2.msra.mxu1 %v1425_v40 }
 0x187   :  { %1481 = vmatprep.subr.mxu0 %v1294_v41  ;;  %1552 = vmatprep.subr.mxu1 %v1422_v44 }
 0x188   :  { %1482 = vmatpush2.msra.mxu0 %v1293_v45  ;;  %1553 = vmatpush2.msra.mxu1 %v1421_v46 }
 0x189   :  { %1483 = vmatprep.subr.mxu0 %v1290_v43  ;;  %1554 = vmatprep.subr.mxu1 %v1418_v42 }
 0x18a   :  { %1484 = vmatpush2.msra.mxu0 %v1289_v49  ;;  %1555 = vmatpush2.msra.mxu1 %v1417_v50 }
 0x18b   :  { %1485 = vmatprep.subr.mxu0 %v1286_v51  ;;  %1556 = vmatprep.subr.mxu1 %v1414_v52 }
 0x18c   :  { %1486 = vmatpush2.msra.mxu0 %v1285_v53  ;;  %1557 = vmatpush2.msra.mxu1 %v1413_v54 }
 0x18d   :  { %1487 = vmatprep.subr.mxu0 %v1282_v55  ;;  %1558 = vmatprep.subr.mxu1 %v1410_v56 }
 0x18e   :  { %1488 = vmatpush2.msra.mxu0 %v1281_v57  ;;  %1559 = vmatpush2.msra.mxu1 %v1409_v58 }
 0x18f   :  { %1489 = vmatprep.subr.mxu0 %v1278_v59  ;;  %1560 = vmatprep.subr.mxu1 %v1406_v61 }
 0x190   :  { %1490 = vmatpush2.msra.mxu0 %v1277_v62  ;;  %1561 = vmatpush2.msra.mxu1 %v1405_v63 }
 0x191   :  { %1491 = vmatprep.subr.mxu0 %v1274_v0  ;;  %1562 = vmatprep.subr.mxu1 %v1402_v1 }
 0x192   :  { %1492 = vmatpush2.msra.mxu0 %v1273_v2  ;;  %1563 = vmatpush2.msra.mxu1 %v1401_v3 }
 0x193   :  { %1493 = vmatprep.subr.mxu0 %v1270_v4  ;;  %1564 = vmatprep.subr.mxu1 %v1398_v5 }
 0x194   :  { %1494 = vmatpush2.msra.mxu0 %v1269_v6  ;;  %1565 = vmatpush2.msra.mxu1 %v1397_v8 }
 0x195   :  { %1495 = vmatprep.subr.mxu0 %v1266_v12  ;;  %1566 = vmatprep.subr.mxu1 %v1394_v13 }
 0x196   :  { %1496 = vmatpush2.msra.mxu0 %v1265_v14  ;;  %1567 = vmatpush2.msra.mxu1 %v1393_v15 }
 0x197   :  { %1497 = vmatprep.subr.mxu0 %v1262_v16  ;;  %1568 = vmatprep.subr.mxu1 %v1390_v17 }
 0x198   :  { %1498 = vmatpush2.msra.mxu0 %v1261_v19  ;;  %1569 = vmatpush2.msra.mxu1 %v1389_v20 }
 0x199   :  { %1499 = vmatprep.subr.mxu0 %v1258_v24  ;;  %1570 = vmatprep.subr.mxu1 %v1386_v25 }
 0x19a   :  { %1500 = vmatpush2.msra.mxu0 %v1257_v47  ;;  %1571 = vmatpush2.msra.mxu1 %v1385_v36 }
 0x19b   :  { %1501 = vmatprep.subr.mxu0 %v1254_v48  ;;  %1572 = vmatprep.subr.mxu1 %v1382_v37 }
 0x19c   :  { %1502 = vmatpush2.msra.mxu0 %v1253_v26  ;;  %1573 = vmatpush2.msra.mxu1 %v1381_v27 }
 0x19d   :  { %1503 = vmatprep.subr.mxu0 %v1250_v28  ;;  %1574 = vmatprep.subr.mxu1 %v1378_v29 }
 0x19e   :  { %1504 = vmatpush2.msra.mxu0 %v1249_v30  ;;  %1575 = vmatpush2.msra.mxu1 %v1377_v31 }
 0x19f   :  { %1583 = vmatprep.subr.mxu0 %v1248_v32  ;;  %1654 = vmatprep.subr.mxu1 %v1376_v33 }
 0x1dd   :  { %v752_v34 = vpop.f32.mrf.mxu0  ;;  %v823_v35 = vpop.f32.mrf.mxu1 }
 0x1de   :  { %v5717_v41 = vadd.f32 %v823_v35, %v752_v34 }
 0x1df   :  { %v754_v38 = vpop.f32.mrf.mxu0  ;;  %v825_v39 = vpop.f32.mrf.mxu1 }
 0x1e0   :  { %v5715_v40 = vadd.f32 %v825_v39, %v754_v38  ;;  %v972_v46 = vrot.slane %v5717_v41, 4  ;;  %v1000_v43 = vmul.f32 %v5717_v41, %v5717_v41 }
 0x1e2   :  { %v978_v44 = vrot.slane %v5715_v40, 4  ;;  %v1001_v45 = vmul.f32 %v5715_v40, %v5715_v40  ;;  %v973_v50 = vadd.f32 %v972_v46, %v5717_v41  ;;  %v1004_v51 = vrot.slane %v1000_v43, 4 }
 0x1e4   :  { %v979_v42 = vadd.f32 %v978_v44, %v5715_v40  ;;  %v1010_v49 = vrot.slane %v1001_v45, 4  ;;  %v974_v54 = vrot.slane %v973_v50, 2  ;;  %v1005_v55 = vadd.f32 %v1004_v51, %v1000_v43 }
 0x1e6   :  { %v980_v52 = vrot.slane %v979_v42, 2  ;;  %v1011_v53 = vadd.f32 %v1010_v49, %v1001_v45  ;;  %v975_v58 = vadd.f32 %v974_v54, %v973_v50  ;;  %v1006_v59 = vrot.slane %v1005_v55, 2 }
 0x1e8   :  { %v981_v56 = vadd.f32 %v980_v52, %v979_v42  ;;  %v1012_v57 = vrot.slane %v1011_v53, 2  ;;  %v976_v63 = vrot.slane %v975_v58, 1  ;;  %v1007_v0 = vadd.f32 %v1006_v59, %v1005_v55 }
 0x1ea   :  { %v982_v61 = vrot.slane %v981_v56, 1  ;;  %v1013_v62 = vadd.f32 %v1012_v57, %v1011_v53  ;;  %v977_v6 = vadd.f32 %v976_v63, %v975_v58  ;;  %v1008_v8 = vrot.slane %v1007_v0, 1 }
 0x1ec   :  { %v983_v1 = vadd.f32 %v982_v61, %v981_v56  ;;  %v1014_v2 = vrot.slane %v1013_v62, 1  ;;  %v996_v36 = vmul.f32 0.125, %v977_v6  ;;  %v1009_v48 = vadd.f32 %v1008_v8, %v1007_v0 }
 0x1ee   :  { %v5734_v17 = vmul.f32 0.125, %v983_v1  ;;  %v1015_v19 = vadd.f32 %v1014_v2, %v1013_v62  ;;  %v1028_v35 = vmul.f32 0.125, %v1009_v48  ;;  %v1032_v38 = vmul.f32 %v996_v36, %v996_v36 }
 0x1f0   :  { %v1029_v29 = vmul.f32 0.125, %v1015_v19  ;;  %v1033_v30 = vmul.f32 %v5734_v17, %v5734_v17  ;;  %v1036_v52 = vsub.f32 %v1028_v35, %v1032_v38 }
 0x1f2   :  { %v1037_v43 = vsub.f32 %v1029_v29, %v1033_v30  ;;  %v1040_v63 = vadd.f32 1e-05, %v1036_v52 }
 0x1f4   :  { %v1041_v57 = vadd.f32 1e-05, %v1037_v43 }
 0x1f6   :  { %5400 = vrsqrt.f32 %v1041_v57 }
 0x1f7   :  { %5402 = vrsqrt.f32 %v1040_v63  ;;  %v1375_v63 = vld [vmem:[#allocation2 + $0xdf0] sm:$0xff] }
 0x203   :  { %v5401_v8 = vpop.eup %5400 }
 0x21e   :  { %v894_v3 = vpop.f32.mrf.mxu0  ;;  %v965_v4 = vpop.f32.mrf.mxu1 }
 0x21f   :  { %v5727_v5 = vadd.f32 %v965_v4, %v894_v3 }
 0x220   :  { %v896_v12 = vpop.f32.mrf.mxu0  ;;  %v967_v13 = vpop.f32.mrf.mxu1 }
 0x221   :  { %v984_v14 = vrot.slane %v5727_v5, 4  ;;  %v1002_v15 = vmul.f32 %v5727_v5, %v5727_v5  ;;  %v5732_v16 = vadd.f32 %v967_v13, %v896_v12  ;;  %v5403_v12 = vpop.eup %5402 }
 0x223   :  { %v985_v20 = vadd.f32 %v984_v14, %v5727_v5  ;;  %v1016_v24 = vrot.slane %v1002_v15, 4  ;;  %v990_v25 = vrot.slane %v5732_v16, 4  ;;  %v1003_v47 = vmul.f32 %v5732_v16, %v5732_v16 }
 0x225   :  { %v986_v37 = vrot.slane %v985_v20, 2  ;;  %v1017_v26 = vadd.f32 %v1016_v24, %v1002_v15  ;;  %v991_v27 = vadd.f32 %v990_v25, %v5732_v16  ;;  %v1022_v28 = vrot.slane %v1003_v47, 4 }
 0x226   :  { %v1052_v15 = vcombine.low %v5403_v12, %v5401_v8  ;;  %v1239_v8 = vld [vmem:[#allocation2 + $0x9b0] sm:$0xff] }
 0x227   :  { %v987_v31 = vadd.f32 %v986_v37, %v985_v20  ;;  %v1018_v32 = vrot.slane %v1017_v26, 2  ;;  %v992_v33 = vrot.slane %v991_v27, 2  ;;  %v1023_v34 = vadd.f32 %v1022_v28, %v1003_v47  ;;  %v5312_v37 = vld [vmem:[%s7463_s4 + $0x8] sm:$0xff]  ;;  %v1367_v12 = vld [vmem:[#allocation2 + $0xdb0] sm:$0xff] }
 0x228   :  { %v1075_v20 = vcombine.low %v996_v36, %v5734_v17  ;;  %v1060_v47 = vrot.slane %v1052_v15, %v5656_v60  ;;  %v1235_v15 = vld [vmem:[#allocation2 + $0x990] sm:$0xff] }
 0x229   :  { %v988_v39 = vrot.slane %v987_v31, 1  ;;  %v1019_v44 = vadd.f32 %v1018_v32, %v1017_v26  ;;  %v993_v45 = vadd.f32 %v992_v33, %v991_v27  ;;  %v1024_v46 = vrot.slane %v1023_v34, 2 }
 0x22a   :  { %v1083_v26 = vrot.slane %v1075_v20, %v5656_v60  ;;  %v1232_v20 = vld [vmem:[#allocation2 + $0x978] sm:$0xff] }
 0x22b   :  { %v989_v42 = vadd.f32 %v988_v39, %v987_v31  ;;  %v1020_v49 = vrot.slane %v1019_v44, 1  ;;  %v994_v50 = vrot.slane %v993_v45, 1  ;;  %v1025_v51 = vadd.f32 %v1024_v46, %v1023_v34 }
 0x22d   :  { %v998_v53 = vmul.f32 0.125, %v989_v42  ;;  %v1021_v54 = vadd.f32 %v1020_v49, %v1019_v44  ;;  %v995_v55 = vadd.f32 %v994_v50, %v993_v45  ;;  %v1026_v56 = vrot.slane %v1025_v51, 1 }
 0x22f   :  { %v1030_v58 = vmul.f32 0.125, %v1021_v54  ;;  %v1034_v59 = vmul.f32 %v998_v53, %v998_v53  ;;  %v999_v61 = vmul.f32 0.125, %v995_v55  ;;  %v1027_v62 = vadd.f32 %v1026_v56, %v1025_v51 }
 0x231   :  { %v1038_v0 = vsub.f32 %v1030_v58, %v1034_v59  ;;  %v1031_v1 = vmul.f32 0.125, %v1027_v62  ;;  %v1035_v2 = vmul.f32 %v999_v61, %v999_v61  ;;  %v1076_v14 = vcombine.low %v998_v53, %v999_v61  ;;  %v1247_v62 = vld [vmem:[#allocation2 + $0x9f0] sm:$0xff] }
 0x233   :  { %v1042_v3 = vadd.f32 1e-05, %v1038_v0  ;;  %v1039_v4 = vsub.f32 %v1031_v1, %v1035_v2  ;;  %v1090_v25 = vrot.slane %v1076_v14, %v5656_v60  ;;  %v1244_v0 = vld [vmem:[#allocation2 + $0x9d8] sm:$0xff]  ;;  %v1243_v2 = vld [vmem:[#allocation2 + $0x9d0] sm:$0xff] }
 0x234   :  { %v1372_v1 = vld [vmem:[#allocation2 + $0xdd8] sm:$0xff] }
 0x235   :  { %v1043_v6 = vadd.f32 1e-05, %v1039_v4  ;;  %5404 = vrsqrt.f32 %v1042_v3  ;;  %v1091_v28 = vcombine.low %v1083_v26, %v1090_v25  ;;  %v1371_v3 = vld [vmem:[#allocation2 + $0xdd0] sm:$0xff]  ;;  %v1240_v4 = vld [vmem:[#allocation2 + $0x9b8] sm:$0xff] }
 0x236   :  { %v1364_v14 = vld [vmem:[#allocation2 + $0xd98] sm:$0xff]  ;;  %v1231_v25 = vld [vmem:[#allocation2 + $0x970] sm:$0xff] }
 0x237   :  { %5406 = vrsqrt.f32 %v1043_v6  ;;  %v1368_v6 = vld [vmem:[#allocation2 + $0xdb8] sm:$0xff]  ;;  %v1227_v26 = vld [vmem:[#allocation2 + $0x950] sm:$0xff] }
 0x242   :  { %v5405_v13 = vpop.eup %5404 }
 0x244   :  { %v5407_v19 = vpop.eup %5406 }
 0x245   :  { %v1053_v24 = vcombine.low %v5405_v13, %v5407_v19  ;;  %v1236_v13 = vld [vmem:[#allocation2 + $0x998] sm:$0xff]  ;;  %v1363_v19 = vld [vmem:[#allocation2 + $0xd90] sm:$0xff] }
 0x247   :  { %v1067_v48 = vrot.slane %v1053_v24, %v5656_v60  ;;  %v1360_v24 = vld [vmem:[#allocation2 + $0xd78] sm:$0xff] }
 0x249   :  { %v1068_v27 = vcombine.low %v1060_v47, %v1067_v48  ;;  %v1359_v47 = vld [vmem:[#allocation2 + $0xd70] sm:$0xff]  ;;  %v1228_v48 = vld [vmem:[#allocation2 + $0x958] sm:$0xff] }
 0x24b   :  { %v1070_v29 = vmul.f32 %v5312_v37, %v1068_v27  ;;  %v1355_v27 = vld [vmem:[#allocation2 + $0xd50] sm:$0xff] }
 0x24d   :  { %v1093_v30 = vmul.f32 %v1091_v28, %v1070_v29  ;;  %v1106_v31 = vrot.slane %v1070_v29, %v5669_v10  ;;  %v1114_v17 = vrot.slane %v1070_v29, %v5667_v9  ;;  %v1102_v36 = vrot.slane %v1070_v29, %v5665_v7  ;;  %v1224_v28 = vld [vmem:[#allocation2 + $0x938] sm:$0xff] }
 0x24e   :  { %v1110_v32 = vrot.slane %v1070_v29, %v5671_v11  ;;  %v1352_v29 = vld [vmem:[#allocation2 + $0xd38] sm:$0xff] }
 0x24f   :  { %v1095_v33 = vrot.slane %v1093_v30, 7  ;;  %v1126_v34 = vrot.slane %v1106_v31, %v5665_v7  ;;  %v1134_v35 = vrot.slane %v1114_v17, %v5665_v7  ;;  %v1122_v38 = vrot.slane %v1102_v36, %v5665_v7  ;;  %v1223_v30 = vld [vmem:[#allocation2 + $0x930] sm:$0xff]  ;;  %v1220_v17 = vld [vmem:[#allocation2 + $0x918] sm:$0xff] }
 0x250   :  { %v1130_v39 = vrot.slane %v1110_v32, %v5665_v7  ;;  %v1351_v31 = vld [vmem:[#allocation2 + $0xd30] sm:$0xff]  ;;  %v1348_v36 = vld [vmem:[#allocation2 + $0xd18] sm:$0xff] }
 0x251   :  { %v1097_v44 = vsub.f32 %v5312_v37, %v1095_v33  ;;  %v1136_v49 = vmul.f32 %v1126_v34, %v5715_v40  ;;  %v1138_v50 = vmul.f32 %v1134_v35, %v5732_v16  ;;  %v1135_v51 = vmul.f32 %v1122_v38, %v5717_v41  ;;  %v1356_v37 = vld [vmem:[#allocation2 + $0xd58] sm:$0xff]  ;;  %v1219_v32 = vld [vmem:[#allocation2 + $0x910] sm:$0xff] }
 0x252   :  { %v1137_v52 = vmul.f32 %v1130_v39, %v5727_v5  ;;  %v1347_v33 = vld [vmem:[#allocation2 + $0xd10] sm:$0xff]  ;;  %v1216_v34 = vld [vmem:[#allocation2 + $0x8f8] sm:$0xff] }
 0x253   :  { %v1147_v45 = vrot.slane %v1097_v44, %v5679_v21  ;;  %v1155_v46 = vrot.slane %v1097_v44, %v5681_v22  ;;  %v1143_v43 = vrot.slane %v1097_v44, %v5676_v18  ;;  %v1151_v42 = vrot.slane %v1097_v44, %v5683_v23  ;;  %v1344_v35 = vld [vmem:[#allocation2 + $0xcf8] sm:$0xff]  ;;  %v1215_v38 = vld [vmem:[#allocation2 + $0x8f0] sm:$0xff] }
 0x254   :  { %v1343_v39 = vld [vmem:[#allocation2 + $0xcf0] sm:$0xff]  ;;  %v1212_v44 = vld [vmem:[#allocation2 + $0x8d8] sm:$0xff] }
 0x255   :  { %v1167_v53 = vrot.slane %v1147_v45, %v5676_v18  ;;  %v1175_v54 = vrot.slane %v1155_v46, %v5676_v18  ;;  %v1163_v55 = vrot.slane %v1143_v43, %v5676_v18  ;;  %v1171_v56 = vrot.slane %v1151_v42, %v5676_v18  ;;  %v1340_v45 = vld [vmem:[#allocation2 + $0xcd8] sm:$0xff]  ;;  %v1211_v46 = vld [vmem:[#allocation2 + $0x8d0] sm:$0xff] }
 0x256   :  { %v1339_v43 = vld [vmem:[#allocation2 + $0xcd0] sm:$0xff]  ;;  %v1208_v42 = vld [vmem:[#allocation2 + $0x8b8] sm:$0xff] }
 0x257   :  { %v1177_v57 = vadd.f32 %v1167_v53, %v1136_v49  ;;  %v1179_v58 = vadd.f32 %v1175_v54, %v1138_v50  ;;  %v5771_v59 = vadd.f32 %v1163_v55, %v1135_v51  ;;  %v5773_v61 = vadd.f32 %v1171_v56, %v1137_v52  ;;  %v1336_v49 = vld [vmem:[#allocation2 + $0xcb8] sm:$0xff]  ;;  %v1207_v50 = vld [vmem:[#allocation2 + $0x8b0] sm:$0xff] }
 0x258   :  { %v1335_v51 = vld [vmem:[#allocation2 + $0xcb0] sm:$0xff]  ;;  %v1204_v52 = vld [vmem:[#allocation2 + $0x898] sm:$0xff] }
 0x259   :  { %v1181_v40 = vmax.f32 %v1177_v57, 0.0  ;;  %v1183_v16 = vmax.f32 %v1179_v58, 0.0  ;;  %v1180_v41 = vmax.f32 %v5771_v59, 0.0  ;;  %v1182_v5 = vmax.f32 %v5773_v61, 0.0  ;;  %v1332_v53 = vld [vmem:[#allocation2 + $0xc98] sm:$0xff]  ;;  %v1203_v54 = vld [vmem:[#allocation2 + $0x890] sm:$0xff] }
 0x25a   :  { %v1331_v55 = vld [vmem:[#allocation2 + $0xc90] sm:$0xff]  ;;  %v1200_v56 = vld [vmem:[#allocation2 + $0x878] sm:$0xff]  ;;  %v1993_v59 = vld [vmem:[#allocation2 + $0x11a8] sm:$0xff] }
 0x25b   :  { %1505 = vmatprep.mubr.f32.mxu0 %v1181_v40  ;;  %1576 = vmatprep.mubr.f32.mxu1 %v1183_v16  ;;  %v1328_v57 = vld [vmem:[#allocation2 + $0xc78] sm:$0xff]  ;;  %v1199_v58 = vld [vmem:[#allocation2 + $0x870] sm:$0xff]  ;;  %v1992_v61 = vld [vmem:[#allocation2 + $0x11a0] sm:$0xff] }
 0x25c   :  { %1506 = vmatmul.mubr.f32.vlgmr.msra.gmra.mxu0 %v1180_v41  ;;  %1577 = vmatmul.mubr.f32.vlgmr.msra.gmra.mxu1 %v1182_v5 }
 0x25d   :  { %1584 = vmatpush1.msra.mxu0 %v1247_v62  ;;  %1655 = vmatpush1.msra.mxu1 %v1375_v63  ;;  %v1324_v62 = vld [vmem:[#allocation2 + $0xc58] sm:$0xff]  ;;  %v1195_v63 = vld [vmem:[#allocation2 + $0x850] sm:$0xff] }
 0x25e   :  { %1585 = vmatprep.subr.mxu0 %v1244_v0  ;;  %1647 = vmatprep.mubr.f32.mxu0 %v1181_v40  ;;  %v1327_v40 = vld [vmem:[#allocation2 + $0xc70] sm:$0xff] }
 0x25f   :  { %1656 = vmatprep.subr.mxu1 %v1372_v1  ;;  %1718 = vmatprep.mubr.f32.mxu1 %v1183_v16  ;;  %v1196_v16 = vld [vmem:[#allocation2 + $0x858] sm:$0xff]  ;;  %v1323_v0 = vld [vmem:[#allocation2 + $0xc50] sm:$0xff] }
 0x260   :  { %1586 = vmatpush1.msra.mxu0 %v1243_v2  ;;  %1657 = vmatpush1.msra.mxu1 %v1371_v3  ;;  %v1192_v1 = vld [vmem:[#allocation2 + $0x838] sm:$0xff]  ;;  %v1191_v3 = vld [vmem:[#allocation2 + $0x830] sm:$0xff] }
 0x261   :  { %1587 = vmatprep.subr.mxu0 %v1240_v4  ;;  %1658 = vmatprep.subr.mxu1 %v1368_v6  ;;  %v1320_v2 = vld [vmem:[#allocation2 + $0xc38] sm:$0xff]  ;;  %v1319_v4 = vld [vmem:[#allocation2 + $0xc30] sm:$0xff] }
 0x262   :  { %1588 = vmatpush1.msra.mxu0 %v1239_v8  ;;  %1659 = vmatpush1.msra.mxu1 %v1367_v12  ;;  %v1188_v6 = vld [vmem:[#allocation2 + $0x818] sm:$0xff]  ;;  %v1187_v12 = vld [vmem:[#allocation2 + $0x810] sm:$0xff] }
 0x263   :  { %1589 = vmatprep.subr.mxu0 %v1236_v13  ;;  %1660 = vmatprep.subr.mxu1 %v1364_v14  ;;  %v1316_v8 = vld [vmem:[#allocation2 + $0xc18] sm:$0xff]  ;;  %v1315_v13 = vld [vmem:[#allocation2 + $0xc10] sm:$0xff] }
 0x264   :  { %1590 = vmatpush1.msra.mxu0 %v1235_v15  ;;  %1661 = vmatpush1.msra.mxu1 %v1363_v19  ;;  %v1312_v14 = vld [vmem:[#allocation2 + $0xbf8] sm:$0xff]  ;;  %v1311_v19 = vld [vmem:[#allocation2 + $0xbf0] sm:$0xff] }
 0x265   :  { %1591 = vmatprep.subr.mxu0 %v1232_v20  ;;  %1662 = vmatprep.subr.mxu1 %v1360_v24  ;;  %v1440_v15 = vld [vmem:[#allocation2 + $0xff8] sm:$0xff]  ;;  %v1439_v20 = vld [vmem:[#allocation2 + $0xff0] sm:$0xff] }
 0x266   :  { %1592 = vmatpush1.msra.mxu0 %v1231_v25  ;;  %1663 = vmatpush1.msra.mxu1 %v1359_v47  ;;  %v1308_v24 = vld [vmem:[#allocation2 + $0xbd8] sm:$0xff]  ;;  %v1307_v47 = vld [vmem:[#allocation2 + $0xbd0] sm:$0xff] }
 0x267   :  { %1593 = vmatprep.subr.mxu0 %v1228_v48  ;;  %1664 = vmatprep.subr.mxu1 %v1356_v37  ;;  %v1436_v25 = vld [vmem:[#allocation2 + $0xfd8] sm:$0xff]  ;;  %v1435_v48 = vld [vmem:[#allocation2 + $0xfd0] sm:$0xff] }
 0x268   :  { %1594 = vmatpush1.msra.mxu0 %v1227_v26  ;;  %1665 = vmatpush1.msra.mxu1 %v1355_v27  ;;  %v1304_v37 = vld [vmem:[#allocation2 + $0xbb8] sm:$0xff]  ;;  %v1303_v27 = vld [vmem:[#allocation2 + $0xbb0] sm:$0xff] }
 0x269   :  { %1595 = vmatprep.subr.mxu0 %v1224_v28  ;;  %1666 = vmatprep.subr.mxu1 %v1352_v29  ;;  %v1432_v26 = vld [vmem:[#allocation2 + $0xfb8] sm:$0xff]  ;;  %v1431_v28 = vld [vmem:[#allocation2 + $0xfb0] sm:$0xff] }
 0x26a   :  { %1596 = vmatpush1.msra.mxu0 %v1223_v30  ;;  %1667 = vmatpush1.msra.mxu1 %v1351_v31  ;;  %v1300_v29 = vld [vmem:[#allocation2 + $0xb98] sm:$0xff]  ;;  %v1299_v31 = vld [vmem:[#allocation2 + $0xb90] sm:$0xff] }
 0x26b   :  { %1597 = vmatprep.subr.mxu0 %v1220_v17  ;;  %1668 = vmatprep.subr.mxu1 %v1348_v36  ;;  %v1428_v30 = vld [vmem:[#allocation2 + $0xf98] sm:$0xff]  ;;  %v1427_v17 = vld [vmem:[#allocation2 + $0xf90] sm:$0xff] }
 0x26c   :  { %1598 = vmatpush1.msra.mxu0 %v1219_v32  ;;  %1669 = vmatpush1.msra.mxu1 %v1347_v33  ;;  %v1296_v36 = vld [vmem:[#allocation2 + $0xb78] sm:$0xff]  ;;  %v1295_v33 = vld [vmem:[#allocation2 + $0xb70] sm:$0xff] }
 0x26d   :  { %1599 = vmatprep.subr.mxu0 %v1216_v34  ;;  %1670 = vmatprep.subr.mxu1 %v1344_v35  ;;  %v1424_v32 = vld [vmem:[#allocation2 + $0xf78] sm:$0xff]  ;;  %v1423_v34 = vld [vmem:[#allocation2 + $0xf70] sm:$0xff] }
 0x26e   :  { %1600 = vmatpush1.msra.mxu0 %v1215_v38  ;;  %1671 = vmatpush1.msra.mxu1 %v1343_v39  ;;  %v1292_v35 = vld [vmem:[#allocation2 + $0xb58] sm:$0xff]  ;;  %v1291_v39 = vld [vmem:[#allocation2 + $0xb50] sm:$0xff] }
 0x26f   :  { %1601 = vmatprep.subr.mxu0 %v1212_v44  ;;  %1672 = vmatprep.subr.mxu1 %v1340_v45  ;;  %v1420_v38 = vld [vmem:[#allocation2 + $0xf58] sm:$0xff]  ;;  %v1419_v44 = vld [vmem:[#allocation2 + $0xf50] sm:$0xff] }
 0x270   :  { %1602 = vmatpush1.msra.mxu0 %v1211_v46  ;;  %1673 = vmatpush1.msra.mxu1 %v1339_v43  ;;  %v1288_v45 = vld [vmem:[#allocation2 + $0xb38] sm:$0xff]  ;;  %v1287_v43 = vld [vmem:[#allocation2 + $0xb30] sm:$0xff] }
 0x271   :  { %1603 = vmatprep.subr.mxu0 %v1208_v42  ;;  %1674 = vmatprep.subr.mxu1 %v1336_v49  ;;  %v1416_v46 = vld [vmem:[#allocation2 + $0xf38] sm:$0xff]  ;;  %v1415_v42 = vld [vmem:[#allocation2 + $0xf30] sm:$0xff] }
 0x272   :  { %1604 = vmatpush1.msra.mxu0 %v1207_v50  ;;  %1675 = vmatpush1.msra.mxu1 %v1335_v51  ;;  %v1284_v49 = vld [vmem:[#allocation2 + $0xb18] sm:$0xff]  ;;  %v1283_v51 = vld [vmem:[#allocation2 + $0xb10] sm:$0xff] }
 0x273   :  { %1605 = vmatprep.subr.mxu0 %v1204_v52  ;;  %1676 = vmatprep.subr.mxu1 %v1332_v53  ;;  %v1412_v50 = vld [vmem:[#allocation2 + $0xf18] sm:$0xff]  ;;  %v1411_v52 = vld [vmem:[#allocation2 + $0xf10] sm:$0xff] }
 0x274   :  { %1606 = vmatpush1.msra.mxu0 %v1203_v54  ;;  %1677 = vmatpush1.msra.mxu1 %v1331_v55  ;;  %v1280_v53 = vld [vmem:[#allocation2 + $0xaf8] sm:$0xff]  ;;  %v1279_v55 = vld [vmem:[#allocation2 + $0xaf0] sm:$0xff] }
 0x275   :  { %1607 = vmatprep.subr.mxu0 %v1200_v56  ;;  %1678 = vmatprep.subr.mxu1 %v1328_v57  ;;  %v1408_v54 = vld [vmem:[#allocation2 + $0xef8] sm:$0xff]  ;;  %v1407_v56 = vld [vmem:[#allocation2 + $0xef0] sm:$0xff] }
 0x276   :  { %1608 = vmatpush1.msra.mxu0 %v1199_v58  ;;  %1679 = vmatpush1.msra.mxu1 %v1327_v40  ;;  %v1276_v57 = vld [vmem:[#allocation2 + $0xad8] sm:$0xff]  ;;  %v1275_v40 = vld [vmem:[#allocation2 + $0xad0] sm:$0xff] }
 0x277   :  { %1609 = vmatprep.subr.mxu0 %v1196_v16  ;;  %1680 = vmatprep.subr.mxu1 %v1324_v62  ;;  %v1404_v58 = vld [vmem:[#allocation2 + $0xed8] sm:$0xff]  ;;  %v1403_v16 = vld [vmem:[#allocation2 + $0xed0] sm:$0xff] }
 0x278   :  { %1610 = vmatpush1.msra.mxu0 %v1195_v63  ;;  %1681 = vmatpush1.msra.mxu1 %v1323_v0  ;;  %v1272_v62 = vld [vmem:[#allocation2 + $0xab8] sm:$0xff]  ;;  %v1271_v0 = vld [vmem:[#allocation2 + $0xab0] sm:$0xff] }
 0x279   :  { %1611 = vmatprep.subr.mxu0 %v1192_v1  ;;  %1682 = vmatprep.subr.mxu1 %v1320_v2  ;;  %v1400_v63 = vld [vmem:[#allocation2 + $0xeb8] sm:$0xff]  ;;  %v1399_v1 = vld [vmem:[#allocation2 + $0xeb0] sm:$0xff] }
 0x27a   :  { %1612 = vmatpush1.msra.mxu0 %v1191_v3  ;;  %1683 = vmatpush1.msra.mxu1 %v1319_v4  ;;  %v1268_v2 = vld [vmem:[#allocation2 + $0xa98] sm:$0xff]  ;;  %v1267_v4 = vld [vmem:[#allocation2 + $0xa90] sm:$0xff] }
 0x27b   :  { %1613 = vmatprep.subr.mxu0 %v1188_v6  ;;  %1684 = vmatprep.subr.mxu1 %v1316_v8  ;;  %v1396_v3 = vld [vmem:[#allocation2 + $0xe98] sm:$0xff]  ;;  %v1395_v6 = vld [vmem:[#allocation2 + $0xe90] sm:$0xff] }
 0x27c   :  { %1614 = vmatpush1.msra.mxu0 %v1187_v12  ;;  %1685 = vmatpush1.msra.mxu1 %v1315_v13  ;;  %v1264_v8 = vld [vmem:[#allocation2 + $0xa78] sm:$0xff]  ;;  %v1263_v13 = vld [vmem:[#allocation2 + $0xa70] sm:$0xff] }
 0x27d   :  { %1615 = vmatprep.subr.mxu0 %v1312_v14  ;;  %1686 = vmatprep.subr.mxu1 %v1440_v15  ;;  %v1392_v12 = vld [vmem:[#allocation2 + $0xe78] sm:$0xff]  ;;  %v1391_v14 = vld [vmem:[#allocation2 + $0xe70] sm:$0xff] }
 0x27e   :  { %1616 = vmatpush2.msra.mxu0 %v1311_v19  ;;  %1687 = vmatpush2.msra.mxu1 %v1439_v20  ;;  %v1260_v15 = vld [vmem:[#allocation2 + $0xa58] sm:$0xff]  ;;  %v1259_v20 = vld [vmem:[#allocation2 + $0xa50] sm:$0xff] }
 0x27f   :  { %1617 = vmatprep.subr.mxu0 %v1308_v24  ;;  %1688 = vmatprep.subr.mxu1 %v1436_v25  ;;  %v1388_v19 = vld [vmem:[#allocation2 + $0xe58] sm:$0xff]  ;;  %v1387_v24 = vld [vmem:[#allocation2 + $0xe50] sm:$0xff] }
 0x280   :  { %1618 = vmatpush2.msra.mxu0 %v1307_v47  ;;  %1689 = vmatpush2.msra.mxu1 %v1435_v48  ;;  %v1256_v25 = vld [vmem:[#allocation2 + $0xa38] sm:$0xff]  ;;  %v1255_v48 = vld [vmem:[#allocation2 + $0xa30] sm:$0xff] }
 0x281   :  { %1619 = vmatprep.subr.mxu0 %v1304_v37  ;;  %1690 = vmatprep.subr.mxu1 %v1432_v26  ;;  %v1384_v47 = vld [vmem:[#allocation2 + $0xe38] sm:$0xff]  ;;  %v1383_v37 = vld [vmem:[#allocation2 + $0xe30] sm:$0xff] }
 0x282   :  { %1620 = vmatpush2.msra.mxu0 %v1303_v27  ;;  %1691 = vmatpush2.msra.mxu1 %v1431_v28  ;;  %v1252_v26 = vld [vmem:[#allocation2 + $0xa18] sm:$0xff]  ;;  %v1251_v28 = vld [vmem:[#allocation2 + $0xa10] sm:$0xff] }
 0x283   :  { %1621 = vmatprep.subr.mxu0 %v1300_v29  ;;  %1692 = vmatprep.subr.mxu1 %v1428_v30  ;;  %v1380_v27 = vld [vmem:[#allocation2 + $0xe18] sm:$0xff]  ;;  %v1379_v29 = vld [vmem:[#allocation2 + $0xe10] sm:$0xff]  ;;  %v2001_v30 = vld [vmem:[#allocation2 + $0x11e8] sm:$0xff] }
 0x284   :  { %1622 = vmatpush2.msra.mxu0 %v1299_v31  ;;  %1693 = vmatpush2.msra.mxu1 %v1427_v17  ;;  %v2129_v31 = vld [vmem:[#allocation2 + $0x15e8] sm:$0xff]  ;;  %v2000_v17 = vld [vmem:[#allocation2 + $0x11e0] sm:$0xff] }
 0x285   :  { %1623 = vmatprep.subr.mxu0 %v1296_v36  ;;  %1694 = vmatprep.subr.mxu1 %v1424_v32  ;;  %v2128_v36 = vld [vmem:[#allocation2 + $0x15e0] sm:$0xff]  ;;  %v1997_v32 = vld [vmem:[#allocation2 + $0x11c8] sm:$0xff] }
 0x286   :  { %1624 = vmatpush2.msra.mxu0 %v1295_v33  ;;  %1695 = vmatpush2.msra.mxu1 %v1423_v34  ;;  %v2125_v33 = vld [vmem:[#allocation2 + $0x15c8] sm:$0xff]  ;;  %v1996_v34 = vld [vmem:[#allocation2 + $0x11c0] sm:$0xff] }
 0x287   :  { %1625 = vmatprep.subr.mxu0 %v1292_v35  ;;  %1696 = vmatprep.subr.mxu1 %v1420_v38  ;;  %v2124_v35 = vld [vmem:[#allocation2 + $0x15c0] sm:$0xff]  ;;  %v1989_v38 = vld [vmem:[#allocation2 + $0x1188] sm:$0xff] }
 0x288   :  { %1626 = vmatpush2.msra.mxu0 %v1291_v39  ;;  %1697 = vmatpush2.msra.mxu1 %v1419_v44  ;;  %v2117_v39 = vld [vmem:[#allocation2 + $0x1588] sm:$0xff]  ;;  %v1988_v44 = vld [vmem:[#allocation2 + $0x1180] sm:$0xff] }
 0x289   :  { %1627 = vmatprep.subr.mxu0 %v1288_v45  ;;  %1698 = vmatprep.subr.mxu1 %v1416_v46  ;;  %v2116_v45 = vld [vmem:[#allocation2 + $0x1580] sm:$0xff]  ;;  %v1985_v46 = vld [vmem:[#allocation2 + $0x1168] sm:$0xff] }
 0x28a   :  { %1628 = vmatpush2.msra.mxu0 %v1287_v43  ;;  %1699 = vmatpush2.msra.mxu1 %v1415_v42  ;;  %v2113_v43 = vld [vmem:[#allocation2 + $0x1568] sm:$0xff]  ;;  %v1984_v42 = vld [vmem:[#allocation2 + $0x1160] sm:$0xff] }
 0x28b   :  { %1629 = vmatprep.subr.mxu0 %v1284_v49  ;;  %1700 = vmatprep.subr.mxu1 %v1412_v50  ;;  %v2112_v49 = vld [vmem:[#allocation2 + $0x1560] sm:$0xff]  ;;  %v1981_v50 = vld [vmem:[#allocation2 + $0x1148] sm:$0xff] }
 0x28c   :  { %1630 = vmatpush2.msra.mxu0 %v1283_v51  ;;  %1701 = vmatpush2.msra.mxu1 %v1411_v52  ;;  %v2109_v51 = vld [vmem:[#allocation2 + $0x1548] sm:$0xff]  ;;  %v1980_v52 = vld [vmem:[#allocation2 + $0x1140] sm:$0xff] }
 0x28d   :  { %1631 = vmatprep.subr.mxu0 %v1280_v53  ;;  %1702 = vmatprep.subr.mxu1 %v1408_v54  ;;  %v2108_v53 = vld [vmem:[#allocation2 + $0x1540] sm:$0xff]  ;;  %v1977_v54 = vld [vmem:[#allocation2 + $0x1128] sm:$0xff] }
 0x28e   :  { %1632 = vmatpush2.msra.mxu0 %v1279_v55  ;;  %1703 = vmatpush2.msra.mxu1 %v1407_v56  ;;  %v2105_v55 = vld [vmem:[#allocation2 + $0x1528] sm:$0xff]  ;;  %v1976_v56 = vld [vmem:[#allocation2 + $0x1120] sm:$0xff] }
 0x28f   :  { %1633 = vmatprep.subr.mxu0 %v1276_v57  ;;  %1704 = vmatprep.subr.mxu1 %v1404_v58  ;;  %v2104_v57 = vld [vmem:[#allocation2 + $0x1520] sm:$0xff]  ;;  %v1973_v58 = vld [vmem:[#allocation2 + $0x1108] sm:$0xff] }
 0x290   :  { %1634 = vmatpush2.msra.mxu0 %v1275_v40  ;;  %1705 = vmatpush2.msra.mxu1 %v1403_v16  ;;  %v2101_v40 = vld [vmem:[#allocation2 + $0x1508] sm:$0xff]  ;;  %v1972_v16 = vld [vmem:[#allocation2 + $0x1100] sm:$0xff] }
 0x291   :  { %1635 = vmatprep.subr.mxu0 %v1272_v62  ;;  %1706 = vmatprep.subr.mxu1 %v1400_v63  ;;  %v2100_v62 = vld [vmem:[#allocation2 + $0x1500] sm:$0xff]  ;;  %v1969_v63 = vld [vmem:[#allocation2 + $0x10e8] sm:$0xff] }
 0x292   :  { %1636 = vmatpush2.msra.mxu0 %v1271_v0  ;;  %1707 = vmatpush2.msra.mxu1 %v1399_v1  ;;  %v2097_v0 = vld [vmem:[#allocation2 + $0x14e8] sm:$0xff]  ;;  %v1968_v1 = vld [vmem:[#allocation2 + $0x10e0] sm:$0xff] }
 0x293   :  { %1637 = vmatprep.subr.mxu0 %v1268_v2  ;;  %1708 = vmatprep.subr.mxu1 %v1396_v3  ;;  %v2096_v2 = vld [vmem:[#allocation2 + $0x14e0] sm:$0xff]  ;;  %v1965_v3 = vld [vmem:[#allocation2 + $0x10c8] sm:$0xff] }
 0x294   :  { %1638 = vmatpush2.msra.mxu0 %v1267_v4  ;;  %1709 = vmatpush2.msra.mxu1 %v1395_v6  ;;  %v2093_v4 = vld [vmem:[#allocation2 + $0x14c8] sm:$0xff]  ;;  %v1964_v6 = vld [vmem:[#allocation2 + $0x10c0] sm:$0xff] }
 0x295   :  { %1639 = vmatprep.subr.mxu0 %v1264_v8  ;;  %1710 = vmatprep.subr.mxu1 %v1392_v12  ;;  %v2092_v8 = vld [vmem:[#allocation2 + $0x14c0] sm:$0xff]  ;;  %v1961_v12 = vld [vmem:[#allocation2 + $0x10a8] sm:$0xff] }
 0x296   :  { %1640 = vmatpush2.msra.mxu0 %v1263_v13  ;;  %1711 = vmatpush2.msra.mxu1 %v1391_v14  ;;  %v2089_v13 = vld [vmem:[#allocation2 + $0x14a8] sm:$0xff]  ;;  %v1960_v14 = vld [vmem:[#allocation2 + $0x10a0] sm:$0xff] }
 0x297   :  { %1641 = vmatprep.subr.mxu0 %v1260_v15  ;;  %1712 = vmatprep.subr.mxu1 %v1388_v19  ;;  %v2088_v15 = vld [vmem:[#allocation2 + $0x14a0] sm:$0xff]  ;;  %v1957_v19 = vld [vmem:[#allocation2 + $0x1088] sm:$0xff] }
 0x298   :  { %1642 = vmatpush2.msra.mxu0 %v1259_v20  ;;  %1713 = vmatpush2.msra.mxu1 %v1387_v24  ;;  %v2085_v20 = vld [vmem:[#allocation2 + $0x1488] sm:$0xff]  ;;  %v1956_v24 = vld [vmem:[#allocation2 + $0x1080] sm:$0xff] }
 0x299   :  { %1643 = vmatprep.subr.mxu0 %v1256_v25  ;;  %1714 = vmatprep.subr.mxu1 %v1384_v47  ;;  %v2084_v25 = vld [vmem:[#allocation2 + $0x1480] sm:$0xff]  ;;  %v1953_v47 = vld [vmem:[#allocation2 + $0x1068] sm:$0xff] }
 0x29a   :  { %1644 = vmatpush2.msra.mxu0 %v1255_v48  ;;  %1715 = vmatpush2.msra.mxu1 %v1383_v37  ;;  %v2081_v48 = vld [vmem:[#allocation2 + $0x1468] sm:$0xff]  ;;  %v1952_v37 = vld [vmem:[#allocation2 + $0x1060] sm:$0xff] }
 0x29b   :  { %1645 = vmatprep.subr.mxu0 %v1252_v26  ;;  %1716 = vmatprep.subr.mxu1 %v1380_v27  ;;  %v2080_v26 = vld [vmem:[#allocation2 + $0x1460] sm:$0xff]  ;;  %v1949_v27 = vld [vmem:[#allocation2 + $0x1048] sm:$0xff] }
 0x29c   :  { %1646 = vmatpush2.msra.mxu0 %v1251_v28  ;;  %1717 = vmatpush2.msra.mxu1 %v1379_v29  ;;  %v2077_v28 = vld [vmem:[#allocation2 + $0x1448] sm:$0xff]  ;;  %v1948_v29 = vld [vmem:[#allocation2 + $0x1040] sm:$0xff] }
 0x29d   :  { %1648 = vmatmul.mubr.f32.vlgmr.msra.gmra.mxu0 %v1180_v41  ;;  %1719 = vmatmul.mubr.f32.vlgmr.msra.gmra.mxu1 %v1182_v5  ;;  %v2121_v41 = vld [vmem:[#allocation2 + $0x15a8] sm:$0xff]  ;;  %v2120_v5 = vld [vmem:[#allocation2 + $0x15a0] sm:$0xff] }
 0x29e   :  { %2196 = vmatprep.subr.mxu0 %v2001_v30  ;;  %2267 = vmatprep.subr.mxu1 %v2129_v31  ;;  %v2076_v30 = vld [vmem:[#allocation2 + $0x1440] sm:$0xff]  ;;  %v1945_v31 = vld [vmem:[#allocation2 + $0x1028] sm:$0xff] }
 0x29f   :  { %2197 = vmatpush1.msra.mxu0 %v2000_v17  ;;  %2268 = vmatpush1.msra.mxu1 %v2128_v36  ;;  %v2073_v17 = vld [vmem:[#allocation2 + $0x1428] sm:$0xff]  ;;  %v1944_v36 = vld [vmem:[#allocation2 + $0x1020] sm:$0xff] }
 0x2a0   :  { %2198 = vmatprep.subr.mxu0 %v1997_v32  ;;  %2269 = vmatprep.subr.mxu1 %v2125_v33  ;;  %v2072_v32 = vld [vmem:[#allocation2 + $0x1420] sm:$0xff]  ;;  %v1941_v33 = vld [vmem:[#allocation2 + $0x1008] sm:$0xff] }
 0x2a1   :  { %2199 = vmatpush1.msra.mxu0 %v1996_v34  ;;  %2270 = vmatpush1.msra.mxu1 %v2124_v35  ;;  %v2069_v34 = vld [vmem:[#allocation2 + $0x1408] sm:$0xff]  ;;  %v1940_v35 = vld [vmem:[#allocation2 + $0x1000] sm:$0xff] }
 0x2a2   :  { %2200 = vmatprep.subr.mxu0 %v1993_v59  ;;  %2271 = vmatprep.subr.mxu1 %v2121_v41  ;;  %v2068_v59 = vld [vmem:[#allocation2 + $0x1400] sm:$0xff]  ;;  %v2065_v41 = vld [vmem:[#allocation2 + $0x13e8] sm:$0xff] }
 0x2a3   :  { %2201 = vmatpush1.msra.mxu0 %v1992_v61  ;;  %2272 = vmatpush1.msra.mxu1 %v2120_v5  ;;  %v2193_v61 = vld [vmem:[#allocation2 + $0x17e8] sm:$0xff]  ;;  %v2064_v5 = vld [vmem:[#allocation2 + $0x13e0] sm:$0xff] }
 0x2a4   :  { %2202 = vmatprep.subr.mxu0 %v1989_v38  ;;  %2273 = vmatprep.subr.mxu1 %v2117_v39  ;;  %v2192_v38 = vld [vmem:[#allocation2 + $0x17e0] sm:$0xff]  ;;  %v2061_v39 = vld [vmem:[#allocation2 + $0x13c8] sm:$0xff] }
 0x2a5   :  { %2203 = vmatpush1.msra.mxu0 %v1988_v44  ;;  %2274 = vmatpush1.msra.mxu1 %v2116_v45  ;;  %v2189_v44 = vld [vmem:[#allocation2 + $0x17c8] sm:$0xff]  ;;  %v2060_v45 = vld [vmem:[#allocation2 + $0x13c0] sm:$0xff] }
 0x2a6   :  { %2204 = vmatprep.subr.mxu0 %v1985_v46  ;;  %2275 = vmatprep.subr.mxu1 %v2113_v43  ;;  %v2188_v46 = vld [vmem:[#allocation2 + $0x17c0] sm:$0xff]  ;;  %v2057_v43 = vld [vmem:[#allocation2 + $0x13a8] sm:$0xff] }
 0x2a7   :  { %2205 = vmatpush1.msra.mxu0 %v1984_v42  ;;  %2276 = vmatpush1.msra.mxu1 %v2112_v49  ;;  %v2185_v42 = vld [vmem:[#allocation2 + $0x17a8] sm:$0xff]  ;;  %v2056_v49 = vld [vmem:[#allocation2 + $0x13a0] sm:$0xff] }
 0x2a8   :  { %2206 = vmatprep.subr.mxu0 %v1981_v50  ;;  %2277 = vmatprep.subr.mxu1 %v2109_v51  ;;  %v2184_v50 = vld [vmem:[#allocation2 + $0x17a0] sm:$0xff]  ;;  %v2053_v51 = vld [vmem:[#allocation2 + $0x1388] sm:$0xff] }
 0x2a9   :  { %2207 = vmatpush1.msra.mxu0 %v1980_v52  ;;  %2278 = vmatpush1.msra.mxu1 %v2108_v53  ;;  %v2181_v52 = vld [vmem:[#allocation2 + $0x1788] sm:$0xff]  ;;  %v2052_v53 = vld [vmem:[#allocation2 + $0x1380] sm:$0xff] }
 0x2aa   :  { %2208 = vmatprep.subr.mxu0 %v1977_v54  ;;  %2279 = vmatprep.subr.mxu1 %v2105_v55  ;;  %v2180_v54 = vld [vmem:[#allocation2 + $0x1780] sm:$0xff]  ;;  %v2049_v55 = vld [vmem:[#allocation2 + $0x1368] sm:$0xff] }
 0x2ab   :  { %2209 = vmatpush1.msra.mxu0 %v1976_v56  ;;  %2280 = vmatpush1.msra.mxu1 %v2104_v57  ;;  %v2177_v56 = vld [vmem:[#allocation2 + $0x1768] sm:$0xff]  ;;  %v2048_v57 = vld [vmem:[#allocation2 + $0x1360] sm:$0xff] }
 0x2ac   :  { %2210 = vmatprep.subr.mxu0 %v1973_v58  ;;  %2281 = vmatprep.subr.mxu1 %v2101_v40  ;;  %v2176_v58 = vld [vmem:[#allocation2 + $0x1760] sm:$0xff]  ;;  %v2045_v40 = vld [vmem:[#allocation2 + $0x1348] sm:$0xff] }
 0x2ad   :  { %2211 = vmatpush1.msra.mxu0 %v1972_v16  ;;  %2282 = vmatpush1.msra.mxu1 %v2100_v62  ;;  %v2173_v16 = vld [vmem:[#allocation2 + $0x1748] sm:$0xff]  ;;  %v2044_v62 = vld [vmem:[#allocation2 + $0x1340] sm:$0xff] }
 0x2ae   :  { %2212 = vmatprep.subr.mxu0 %v1969_v63  ;;  %2283 = vmatprep.subr.mxu1 %v2097_v0  ;;  %v2172_v63 = vld [vmem:[#allocation2 + $0x1740] sm:$0xff]  ;;  %v2041_v0 = vld [vmem:[#allocation2 + $0x1328] sm:$0xff] }
 0x2af   :  { %2213 = vmatpush1.msra.mxu0 %v1968_v1  ;;  %2284 = vmatpush1.msra.mxu1 %v2096_v2  ;;  %v2169_v1 = vld [vmem:[#allocation2 + $0x1728] sm:$0xff]  ;;  %v2040_v2 = vld [vmem:[#allocation2 + $0x1320] sm:$0xff] }
 0x2b0   :  { %2214 = vmatprep.subr.mxu0 %v1965_v3  ;;  %2285 = vmatprep.subr.mxu1 %v2093_v4  ;;  %v2168_v3 = vld [vmem:[#allocation2 + $0x1720] sm:$0xff]  ;;  %v2037_v4 = vld [vmem:[#allocation2 + $0x1308] sm:$0xff] }
 0x2b1   :  { %2215 = vmatpush1.msra.mxu0 %v1964_v6  ;;  %2286 = vmatpush1.msra.mxu1 %v2092_v8  ;;  %v2165_v6 = vld [vmem:[#allocation2 + $0x1708] sm:$0xff]  ;;  %v2036_v8 = vld [vmem:[#allocation2 + $0x1300] sm:$0xff] }
 0x2b2   :  { %2216 = vmatprep.subr.mxu0 %v1961_v12  ;;  %2287 = vmatprep.subr.mxu1 %v2089_v13  ;;  %v2164_v12 = vld [vmem:[#allocation2 + $0x1700] sm:$0xff]  ;;  %v2033_v13 = vld [vmem:[#allocation2 + $0x12e8] sm:$0xff] }
 0x2b3   :  { %2217 = vmatpush1.msra.mxu0 %v1960_v14  ;;  %2288 = vmatpush1.msra.mxu1 %v2088_v15  ;;  %v2161_v14 = vld [vmem:[#allocation2 + $0x16e8] sm:$0xff]  ;;  %v2032_v15 = vld [vmem:[#allocation2 + $0x12e0] sm:$0xff] }
 0x2b4   :  { %2218 = vmatprep.subr.mxu0 %v1957_v19  ;;  %2289 = vmatprep.subr.mxu1 %v2085_v20  ;;  %v2160_v19 = vld [vmem:[#allocation2 + $0x16e0] sm:$0xff]  ;;  %v2029_v20 = vld [vmem:[#allocation2 + $0x12c8] sm:$0xff] }
 0x2b5   :  { %2219 = vmatpush1.msra.mxu0 %v1956_v24  ;;  %2290 = vmatpush1.msra.mxu1 %v2084_v25  ;;  %v2157_v24 = vld [vmem:[#allocation2 + $0x16c8] sm:$0xff]  ;;  %v2028_v25 = vld [vmem:[#allocation2 + $0x12c0] sm:$0xff] }
 0x2b6   :  { %2220 = vmatprep.subr.mxu0 %v1953_v47  ;;  %2291 = vmatprep.subr.mxu1 %v2081_v48  ;;  %v2156_v47 = vld [vmem:[#allocation2 + $0x16c0] sm:$0xff]  ;;  %v2025_v48 = vld [vmem:[#allocation2 + $0x12a8] sm:$0xff] }
 0x2b7   :  { %2221 = vmatpush1.msra.mxu0 %v1952_v37  ;;  %2292 = vmatpush1.msra.mxu1 %v2080_v26  ;;  %v2153_v37 = vld [vmem:[#allocation2 + $0x16a8] sm:$0xff]  ;;  %v2024_v26 = vld [vmem:[#allocation2 + $0x12a0] sm:$0xff] }
 0x2b8   :  { %2222 = vmatprep.subr.mxu0 %v1949_v27  ;;  %2293 = vmatprep.subr.mxu1 %v2077_v28  ;;  %v2152_v27 = vld [vmem:[#allocation2 + $0x16a0] sm:$0xff]  ;;  %v2021_v28 = vld [vmem:[#allocation2 + $0x1288] sm:$0xff] }
 0x2b9   :  { %2223 = vmatpush1.msra.mxu0 %v1948_v29  ;;  %2294 = vmatpush1.msra.mxu1 %v2076_v30  ;;  %v2149_v29 = vld [vmem:[#allocation2 + $0x1688] sm:$0xff]  ;;  %v2020_v30 = vld [vmem:[#allocation2 + $0x1280] sm:$0xff] }
 0x2ba   :  { %2224 = vmatprep.subr.mxu0 %v1945_v31  ;;  %2295 = vmatprep.subr.mxu1 %v2073_v17  ;;  %v2148_v31 = vld [vmem:[#allocation2 + $0x1680] sm:$0xff]  ;;  %v2017_v17 = vld [vmem:[#allocation2 + $0x1268] sm:$0xff] }
 0x2bb   :  { %2225 = vmatpush1.msra.mxu0 %v1944_v36  ;;  %2296 = vmatpush1.msra.mxu1 %v2072_v32  ;;  %v2145_v36 = vld [vmem:[#allocation2 + $0x1668] sm:$0xff]  ;;  %v2016_v32 = vld [vmem:[#allocation2 + $0x1260] sm:$0xff] }
 0x2bc   :  { %2226 = vmatprep.subr.mxu0 %v1941_v33  ;;  %2297 = vmatprep.subr.mxu1 %v2069_v34  ;;  %v2144_v33 = vld [vmem:[#allocation2 + $0x1660] sm:$0xff]  ;;  %v2013_v34 = vld [vmem:[#allocation2 + $0x1248] sm:$0xff] }
 0x2bd   :  { %2227 = vmatpush1.msra.mxu0 %v1940_v35  ;;  %2298 = vmatpush1.msra.mxu1 %v2068_v59  ;;  %v2141_v35 = vld [vmem:[#allocation2 + $0x1648] sm:$0xff]  ;;  %v2012_v59 = vld [vmem:[#allocation2 + $0x1240] sm:$0xff] }
 0x2be   :  { %2228 = vmatprep.subr.mxu0 %v2065_v41  ;;  %2299 = vmatprep.subr.mxu1 %v2193_v61  ;;  %v2140_v41 = vld [vmem:[#allocation2 + $0x1640] sm:$0xff]  ;;  %v2009_v61 = vld [vmem:[#allocation2 + $0x1228] sm:$0xff] }
 0x2bf   :  { %2229 = vmatpush2.msra.mxu0 %v2064_v5  ;;  %2300 = vmatpush2.msra.mxu1 %v2192_v38  ;;  %v2137_v5 = vld [vmem:[#allocation2 + $0x1628] sm:$0xff]  ;;  %v2008_v38 = vld [vmem:[#allocation2 + $0x1220] sm:$0xff] }
 0x2c0   :  { %2230 = vmatprep.subr.mxu0 %v2061_v39  ;;  %2301 = vmatprep.subr.mxu1 %v2189_v44  ;;  %v2136_v39 = vld [vmem:[#allocation2 + $0x1620] sm:$0xff]  ;;  %v2005_v44 = vld [vmem:[#allocation2 + $0x1208] sm:$0xff] }
 0x2c1   :  { %2231 = vmatpush2.msra.mxu0 %v2060_v45  ;;  %2302 = vmatpush2.msra.mxu1 %v2188_v46  ;;  %v2133_v45 = vld [vmem:[#allocation2 + $0x1608] sm:$0xff]  ;;  %v2004_v46 = vld [vmem:[#allocation2 + $0x1200] sm:$0xff] }
 0x2c2   :  { %2232 = vmatprep.subr.mxu0 %v2057_v43  ;;  %2303 = vmatprep.subr.mxu1 %v2185_v42  ;;  %v2132_v43 = vld [vmem:[#allocation2 + $0x1600] sm:$0xff]  ;;  %v2003_v42 = vld [vmem:[#allocation2 + $0x11f8] sm:$0xff] }
 0x2c3   :  { %2233 = vmatpush2.msra.mxu0 %v2056_v49  ;;  %2304 = vmatpush2.msra.mxu1 %v2184_v50  ;;  %v2131_v49 = vld [vmem:[#allocation2 + $0x15f8] sm:$0xff] }
 0x2c4   :  { %2234 = vmatprep.subr.mxu0 %v2053_v51  ;;  %2305 = vmatprep.subr.mxu1 %v2181_v52 }
 0x2c5   :  { %2235 = vmatpush2.msra.mxu0 %v2052_v53  ;;  %2306 = vmatpush2.msra.mxu1 %v2180_v54 }
 0x2c6   :  { %2236 = vmatprep.subr.mxu0 %v2049_v55  ;;  %2307 = vmatprep.subr.mxu1 %v2177_v56 }
 0x2c7   :  { %2237 = vmatpush2.msra.mxu0 %v2048_v57  ;;  %2308 = vmatpush2.msra.mxu1 %v2176_v58 }
 0x2c8   :  { %2238 = vmatprep.subr.mxu0 %v2045_v40  ;;  %2309 = vmatprep.subr.mxu1 %v2173_v16 }
 0x2c9   :  { %2239 = vmatpush2.msra.mxu0 %v2044_v62  ;;  %2310 = vmatpush2.msra.mxu1 %v2172_v63 }
 0x2ca   :  { %2240 = vmatprep.subr.mxu0 %v2041_v0  ;;  %2311 = vmatprep.subr.mxu1 %v2169_v1 }
 0x2cb   :  { %2241 = vmatpush2.msra.mxu0 %v2040_v2  ;;  %2312 = vmatpush2.msra.mxu1 %v2168_v3 }
 0x2cc   :  { %2242 = vmatprep.subr.mxu0 %v2037_v4  ;;  %2313 = vmatprep.subr.mxu1 %v2165_v6 }
 0x2cd   :  { %2243 = vmatpush2.msra.mxu0 %v2036_v8  ;;  %2314 = vmatpush2.msra.mxu1 %v2164_v12 }
 0x2ce   :  { %2244 = vmatprep.subr.mxu0 %v2033_v13  ;;  %2315 = vmatprep.subr.mxu1 %v2161_v14 }
 0x2cf   :  { %2245 = vmatpush2.msra.mxu0 %v2032_v15  ;;  %2316 = vmatpush2.msra.mxu1 %v2160_v19 }
 0x2d0   :  { %2246 = vmatprep.subr.mxu0 %v2029_v20  ;;  %2317 = vmatprep.subr.mxu1 %v2157_v24 }
 0x2d1   :  { %2247 = vmatpush2.msra.mxu0 %v2028_v25  ;;  %2318 = vmatpush2.msra.mxu1 %v2156_v47 }
 0x2d2   :  { %2248 = vmatprep.subr.mxu0 %v2025_v48  ;;  %2319 = vmatprep.subr.mxu1 %v2153_v37 }
 0x2d3   :  { %2249 = vmatpush2.msra.mxu0 %v2024_v26  ;;  %2320 = vmatpush2.msra.mxu1 %v2152_v27 }
 0x2d4   :  { %2250 = vmatprep.subr.mxu0 %v2021_v28  ;;  %2321 = vmatprep.subr.mxu1 %v2149_v29 }
 0x2d5   :  { %2251 = vmatpush2.msra.mxu0 %v2020_v30  ;;  %2322 = vmatpush2.msra.mxu1 %v2148_v31 }
 0x2d6   :  { %2252 = vmatprep.subr.mxu0 %v2017_v17  ;;  %2323 = vmatprep.subr.mxu1 %v2145_v36 }
 0x2d7   :  { %2253 = vmatpush2.msra.mxu0 %v2016_v32  ;;  %2324 = vmatpush2.msra.mxu1 %v2144_v33 }
 0x2d8   :  { %2254 = vmatprep.subr.mxu0 %v2013_v34  ;;  %2325 = vmatprep.subr.mxu1 %v2141_v35 }
 0x2d9   :  { %2255 = vmatpush2.msra.mxu0 %v2012_v59  ;;  %2326 = vmatpush2.msra.mxu1 %v2140_v41 }
 0x2da   :  { %2256 = vmatprep.subr.mxu0 %v2009_v61  ;;  %2327 = vmatprep.subr.mxu1 %v2137_v5 }
 0x2db   :  { %2257 = vmatpush2.msra.mxu0 %v2008_v38  ;;  %2328 = vmatpush2.msra.mxu1 %v2136_v39 }
 0x2dc   :  { %2258 = vmatprep.subr.mxu0 %v2005_v44  ;;  %2329 = vmatprep.subr.mxu1 %v2133_v45 }
 0x2dd   :  { %2259 = vmatpush2.msra.mxu0 %v2004_v46  ;;  %2330 = vmatpush2.msra.mxu1 %v2132_v43 }
 0x2de   :  { %2338 = vmatprep.subr.mxu0 %v2003_v42  ;;  %2409 = vmatprep.subr.mxu1 %v2131_v49 }
 0x31c   :  { %v1507_v50 = vpop.f32.mrf.mxu0  ;;  %v1578_v51 = vpop.f32.mrf.mxu1 }
 0x31d   :  { %v5787_v55 = vadd.f32 %v1578_v51, %v1507_v50 }
 0x31e   :  { %v1509_v52 = vpop.f32.mrf.mxu0  ;;  %v1580_v53 = vpop.f32.mrf.mxu1 }
 0x31f   :  { %v5785_v54 = vadd.f32 %v1580_v53, %v1509_v52  ;;  %v1727_v58 = vrot.slane %v5787_v55, 4  ;;  %v1755_v40 = vmul.f32 %v5787_v55, %v5787_v55 }
 0x321   :  { %v1733_v56 = vrot.slane %v5785_v54, 4  ;;  %v1756_v57 = vmul.f32 %v5785_v54, %v5785_v54  ;;  %v1728_v63 = vadd.f32 %v1727_v58, %v5787_v55  ;;  %v1759_v0 = vrot.slane %v1755_v40, 4 }
 0x323   :  { %v1734_v16 = vadd.f32 %v1733_v56, %v5785_v54  ;;  %v1765_v62 = vrot.slane %v1756_v57, 4  ;;  %v1729_v3 = vrot.slane %v1728_v63, 2  ;;  %v1760_v4 = vadd.f32 %v1759_v0, %v1755_v40 }
 0x325   :  { %v1735_v1 = vrot.slane %v1734_v16, 2  ;;  %v1766_v2 = vadd.f32 %v1765_v62, %v1756_v57  ;;  %v1730_v12 = vadd.f32 %v1729_v3, %v1728_v63  ;;  %v1761_v13 = vrot.slane %v1760_v4, 2 }
 0x327   :  { %v1736_v6 = vadd.f32 %v1735_v1, %v1734_v16  ;;  %v1767_v8 = vrot.slane %v1766_v2, 2  ;;  %v1731_v19 = vrot.slane %v1730_v12, 1  ;;  %v1762_v20 = vadd.f32 %v1761_v13, %v1760_v4 }
 0x329   :  { %v1737_v14 = vrot.slane %v1736_v6, 1  ;;  %v1768_v15 = vadd.f32 %v1767_v8, %v1766_v2  ;;  %v1732_v26 = vadd.f32 %v1731_v19, %v1730_v12  ;;  %v1763_v27 = vrot.slane %v1762_v20, 1 }
 0x32b   :  { %v1738_v24 = vadd.f32 %v1737_v14, %v1736_v6  ;;  %v1769_v25 = vrot.slane %v1768_v15, 1  ;;  %v1751_v41 = vmul.f32 0.125, %v1732_v26  ;;  %v1764_v61 = vadd.f32 %v1763_v27, %v1762_v20 }
 0x32d   :  { %v5804_v36 = vmul.f32 0.125, %v1738_v24  ;;  %v1770_v32 = vadd.f32 %v1769_v25, %v1768_v15  ;;  %v1783_v51 = vmul.f32 0.125, %v1764_v61  ;;  %v1787_v52 = vmul.f32 %v1751_v41, %v1751_v41 }
 0x32f   :  { %v1784_v45 = vmul.f32 0.125, %v1770_v32  ;;  %v1788_v46 = vmul.f32 %v5804_v36, %v5804_v36  ;;  %v1791_v1 = vsub.f32 %v1783_v51, %v1787_v52 }
 0x331   :  { %v1792_v40 = vsub.f32 %v1784_v45, %v1788_v46  ;;  %v1795_v19 = vadd.f32 1e-05, %v1791_v1 }
 0x333   :  { %v1796_v8 = vadd.f32 1e-05, %v1792_v40 }
 0x335   :  { %5408 = vrsqrt.f32 %v1796_v8 }
 0x336   :  { %5410 = vrsqrt.f32 %v1795_v19  ;;  %v2130_v19 = vld [vmem:[#allocation2 + $0x15f0] sm:$0xff] }
 0x342   :  { %v5409_v27 = vpop.eup %5408 }
 0x35d   :  { %v1649_v47 = vpop.f32.mrf.mxu0  ;;  %v1720_v48 = vpop.f32.mrf.mxu1 }
 0x35e   :  { %v5797_v37 = vadd.f32 %v1720_v48, %v1649_v47 }
 0x35f   :  { %v1651_v28 = vpop.f32.mrf.mxu0  ;;  %v1722_v29 = vpop.f32.mrf.mxu1 }
 0x360   :  { %v1739_v30 = vrot.slane %v5797_v37, 4  ;;  %v1757_v31 = vmul.f32 %v5797_v37, %v5797_v37  ;;  %v5802_v17 = vadd.f32 %v1722_v29, %v1651_v28  ;;  %v5411_v28 = vpop.eup %5410 }
 0x362   :  { %v1740_v33 = vadd.f32 %v1739_v30, %v5797_v37  ;;  %v1771_v34 = vrot.slane %v1757_v31, 4  ;;  %v1745_v35 = vrot.slane %v5802_v17, 4  ;;  %v1758_v59 = vmul.f32 %v5802_v17, %v5802_v17 }
 0x364   :  { %v1741_v5 = vrot.slane %v1740_v33, 2  ;;  %v1772_v38 = vadd.f32 %v1771_v34, %v1757_v31  ;;  %v1746_v39 = vadd.f32 %v1745_v35, %v5802_v17  ;;  %v1777_v44 = vrot.slane %v1758_v59, 4 }
 0x365   :  { %v1807_v31 = vcombine.low %v5411_v28, %v5409_v27  ;;  %v1994_v27 = vld [vmem:[#allocation2 + $0x11b0] sm:$0xff] }
 0x366   :  { %v1742_v43 = vadd.f32 %v1741_v5, %v1740_v33  ;;  %v1773_v42 = vrot.slane %v1772_v38, 2  ;;  %v1747_v49 = vrot.slane %v1746_v39, 2  ;;  %v1778_v50 = vadd.f32 %v1777_v44, %v1758_v59  ;;  %v5313_v5 = vld [vmem:[%s7463_s4 + $0x10] sm:$0xff] }
 0x367   :  { %v1830_v33 = vcombine.low %v1751_v41, %v5804_v36  ;;  %v1815_v59 = vrot.slane %v1807_v31, %v5656_v60  ;;  %v2122_v28 = vld [vmem:[#allocation2 + $0x15b0] sm:$0xff] }
 0x368   :  { %v1743_v53 = vrot.slane %v1742_v43, 1  ;;  %v1774_v56 = vadd.f32 %v1773_v42, %v1772_v38  ;;  %v1748_v57 = vadd.f32 %v1747_v49, %v1746_v39  ;;  %v1779_v58 = vrot.slane %v1778_v50, 2  ;;  %v1990_v31 = vld [vmem:[#allocation2 + $0x1190] sm:$0xff] }
 0x369   :  { %v1838_v38 = vrot.slane %v1830_v33, %v5656_v60  ;;  %v1987_v33 = vld [vmem:[#allocation2 + $0x1178] sm:$0xff] }
 0x36a   :  { %v1744_v16 = vadd.f32 %v1743_v53, %v1742_v43  ;;  %v1775_v62 = vrot.slane %v1774_v56, 1  ;;  %v1749_v63 = vrot.slane %v1748_v57, 1  ;;  %v1780_v0 = vadd.f32 %v1779_v58, %v1778_v50 }
 0x36c   :  { %v1753_v2 = vmul.f32 0.125, %v1744_v16  ;;  %v1776_v3 = vadd.f32 %v1775_v62, %v1774_v56  ;;  %v1750_v4 = vadd.f32 %v1749_v63, %v1748_v57  ;;  %v1781_v6 = vrot.slane %v1780_v0, 1 }
 0x36e   :  { %v1785_v12 = vmul.f32 0.125, %v1776_v3  ;;  %v1789_v13 = vmul.f32 %v1753_v2, %v1753_v2  ;;  %v1754_v14 = vmul.f32 0.125, %v1750_v4  ;;  %v1782_v15 = vadd.f32 %v1781_v6, %v1780_v0 }
 0x370   :  { %v1793_v20 = vsub.f32 %v1785_v12, %v1789_v13  ;;  %v1786_v24 = vmul.f32 0.125, %v1782_v15  ;;  %v1790_v25 = vmul.f32 %v1754_v14, %v1754_v14  ;;  %v1831_v30 = vcombine.low %v1753_v2, %v1754_v14  ;;  %v2002_v15 = vld [vmem:[#allocation2 + $0x11f0] sm:$0xff] }
 0x372   :  { %v1797_v47 = vadd.f32 1e-05, %v1793_v20  ;;  %v1794_v48 = vsub.f32 %v1786_v24, %v1790_v25  ;;  %v1845_v35 = vrot.slane %v1831_v30, %v5656_v60  ;;  %v1999_v20 = vld [vmem:[#allocation2 + $0x11d8] sm:$0xff]  ;;  %v1998_v25 = vld [vmem:[#allocation2 + $0x11d0] sm:$0xff] }
 0x373   :  { %v2127_v24 = vld [vmem:[#allocation2 + $0x15d8] sm:$0xff] }
 0x374   :  { %v1798_v26 = vadd.f32 1e-05, %v1794_v48  ;;  %5412 = vrsqrt.f32 %v1797_v47  ;;  %v1846_v44 = vcombine.low %v1838_v38, %v1845_v35  ;;  %v2126_v47 = vld [vmem:[#allocation2 + $0x15d0] sm:$0xff]  ;;  %v1995_v48 = vld [vmem:[#allocation2 + $0x11b8] sm:$0xff] }
 0x375   :  { %v2119_v30 = vld [vmem:[#allocation2 + $0x1598] sm:$0xff]  ;;  %v1986_v35 = vld [vmem:[#allocation2 + $0x1170] sm:$0xff] }
 0x376   :  { %5414 = vrsqrt.f32 %v1798_v26  ;;  %v2123_v26 = vld [vmem:[#allocation2 + $0x15b8] sm:$0xff]  ;;  %v1982_v38 = vld [vmem:[#allocation2 + $0x1150] sm:$0xff] }
 0x381   :  { %v5413_v29 = vpop.eup %5412 }
 0x383   :  { %v5415_v32 = vpop.eup %5414 }
 0x384   :  { %v1808_v34 = vcombine.low %v5413_v29, %v5415_v32  ;;  %v1991_v29 = vld [vmem:[#allocation2 + $0x1198] sm:$0xff]  ;;  %v2118_v32 = vld [vmem:[#allocation2 + $0x1590] sm:$0xff] }
 0x386   :  { %v1822_v61 = vrot.slane %v1808_v34, %v5656_v60  ;;  %v2115_v34 = vld [vmem:[#allocation2 + $0x1578] sm:$0xff] }
 0x388   :  { %v1823_v39 = vcombine.low %v1815_v59, %v1822_v61  ;;  %v2114_v59 = vld [vmem:[#allocation2 + $0x1570] sm:$0xff]  ;;  %v1983_v61 = vld [vmem:[#allocation2 + $0x1158] sm:$0xff] }
 0x38a   :  { %v1825_v45 = vmul.f32 %v5313_v5, %v1823_v39  ;;  %v2110_v39 = vld [vmem:[#allocation2 + $0x1550] sm:$0xff] }
 0x38c   :  { %v1848_v46 = vmul.f32 %v1846_v44, %v1825_v45  ;;  %v1861_v43 = vrot.slane %v1825_v45, %v5669_v10  ;;  %v1869_v36 = vrot.slane %v1825_v45, %v5667_v9  ;;  %v1857_v41 = vrot.slane %v1825_v45, %v5665_v7  ;;  %v1979_v44 = vld [vmem:[#allocation2 + $0x1138] sm:$0xff] }
 0x38d   :  { %v1865_v42 = vrot.slane %v1825_v45, %v5671_v11  ;;  %v2107_v45 = vld [vmem:[#allocation2 + $0x1538] sm:$0xff] }
 0x38e   :  { %v1850_v49 = vrot.slane %v1848_v46, 7  ;;  %v1881_v50 = vrot.slane %v1861_v43, %v5665_v7  ;;  %v1889_v51 = vrot.slane %v1869_v36, %v5665_v7  ;;  %v1877_v52 = vrot.slane %v1857_v41, %v5665_v7  ;;  %v1978_v46 = vld [vmem:[#allocation2 + $0x1130] sm:$0xff]  ;;  %v1975_v36 = vld [vmem:[#allocation2 + $0x1118] sm:$0xff] }
 0x38f   :  { %v1885_v53 = vrot.slane %v1865_v42, %v5665_v7  ;;  %v2106_v43 = vld [vmem:[#allocation2 + $0x1530] sm:$0xff]  ;;  %v2103_v41 = vld [vmem:[#allocation2 + $0x1518] sm:$0xff] }
 0x390   :  { %v1852_v56 = vsub.f32 %v5313_v5, %v1850_v49  ;;  %v1891_v62 = vmul.f32 %v1881_v50, %v5785_v54  ;;  %v1893_v63 = vmul.f32 %v1889_v51, %v5802_v17  ;;  %v1890_v0 = vmul.f32 %v1877_v52, %v5787_v55  ;;  %v2111_v5 = vld [vmem:[#allocation2 + $0x1558] sm:$0xff]  ;;  %v1974_v42 = vld [vmem:[#allocation2 + $0x1110] sm:$0xff] }
 0x391   :  { %v1892_v1 = vmul.f32 %v1885_v53, %v5797_v37  ;;  %v2102_v49 = vld [vmem:[#allocation2 + $0x1510] sm:$0xff]  ;;  %v1971_v50 = vld [vmem:[#allocation2 + $0x10f8] sm:$0xff] }
 0x392   :  { %v1902_v57 = vrot.slane %v1852_v56, %v5679_v21  ;;  %v1910_v58 = vrot.slane %v1852_v56, %v5681_v22  ;;  %v1898_v40 = vrot.slane %v1852_v56, %v5676_v18  ;;  %v1906_v16 = vrot.slane %v1852_v56, %v5683_v23  ;;  %v2099_v51 = vld [vmem:[#allocation2 + $0x14f8] sm:$0xff]  ;;  %v1970_v52 = vld [vmem:[#allocation2 + $0x10f0] sm:$0xff] }
 0x393   :  { %v2098_v53 = vld [vmem:[#allocation2 + $0x14f0] sm:$0xff]  ;;  %v1967_v56 = vld [vmem:[#allocation2 + $0x10d8] sm:$0xff] }
 0x394   :  { %v1922_v2 = vrot.slane %v1902_v57, %v5676_v18  ;;  %v1930_v3 = vrot.slane %v1910_v58, %v5676_v18  ;;  %v1918_v4 = vrot.slane %v1898_v40, %v5676_v18  ;;  %v1926_v6 = vrot.slane %v1906_v16, %v5676_v18  ;;  %v2095_v57 = vld [vmem:[#allocation2 + $0x14d8] sm:$0xff]  ;;  %v1966_v58 = vld [vmem:[#allocation2 + $0x10d0] sm:$0xff] }
 0x395   :  { %v2094_v40 = vld [vmem:[#allocation2 + $0x14d0] sm:$0xff]  ;;  %v1963_v16 = vld [vmem:[#allocation2 + $0x10b8] sm:$0xff] }
 0x396   :  { %v1932_v8 = vadd.f32 %v1922_v2, %v1891_v62  ;;  %v1934_v12 = vadd.f32 %v1930_v3, %v1893_v63  ;;  %v5841_v13 = vadd.f32 %v1918_v4, %v1890_v0  ;;  %v5843_v14 = vadd.f32 %v1926_v6, %v1892_v1  ;;  %v2091_v62 = vld [vmem:[#allocation2 + $0x14b8] sm:$0xff]  ;;  %v1962_v63 = vld [vmem:[#allocation2 + $0x10b0] sm:$0xff] }
 0x397   :  { %v2090_v0 = vld [vmem:[#allocation2 + $0x14b0] sm:$0xff]  ;;  %v1959_v1 = vld [vmem:[#allocation2 + $0x1098] sm:$0xff] }
 0x398   :  { %v1936_v54 = vmax.f32 %v1932_v8, 0.0  ;;  %v1938_v17 = vmax.f32 %v1934_v12, 0.0  ;;  %v1935_v55 = vmax.f32 %v5841_v13, 0.0  ;;  %v1937_v37 = vmax.f32 %v5843_v14, 0.0  ;;  %v2087_v2 = vld [vmem:[#allocation2 + $0x1498] sm:$0xff]  ;;  %v1958_v3 = vld [vmem:[#allocation2 + $0x1090] sm:$0xff] }
 0x399   :  { %v2086_v4 = vld [vmem:[#allocation2 + $0x1490] sm:$0xff]  ;;  %v1955_v6 = vld [vmem:[#allocation2 + $0x1078] sm:$0xff]  ;;  %v2748_v13 = vld [vmem:[#allocation2 + $0x19a8] sm:$0xff] }
 0x39a   :  { %2260 = vmatprep.mubr.f32.mxu0 %v1936_v54  ;;  %2331 = vmatprep.mubr.f32.mxu1 %v1938_v17  ;;  %v2083_v8 = vld [vmem:[#allocation2 + $0x1478] sm:$0xff]  ;;  %v1954_v12 = vld [vmem:[#allocation2 + $0x1070] sm:$0xff]  ;;  %v2747_v14 = vld [vmem:[#allocation2 + $0x19a0] sm:$0xff] }
 0x39b   :  { %2261 = vmatmul.mubr.f32.vlgmr.msra.gmra.mxu0 %v1935_v55  ;;  %2332 = vmatmul.mubr.f32.vlgmr.msra.gmra.mxu1 %v1937_v37 }
 0x39c   :  { %2339 = vmatpush1.msra.mxu0 %v2002_v15  ;;  %2410 = vmatpush1.msra.mxu1 %v2130_v19  ;;  %v2079_v15 = vld [vmem:[#allocation2 + $0x1458] sm:$0xff]  ;;  %v1950_v19 = vld [vmem:[#allocation2 + $0x1050] sm:$0xff] }
 0x39d   :  { %2340 = vmatprep.subr.mxu0 %v1999_v20  ;;  %2402 = vmatprep.mubr.f32.mxu0 %v1936_v54  ;;  %v2082_v54 = vld [vmem:[#allocation2 + $0x1470] sm:$0xff] }
 0x39e   :  { %2411 = vmatprep.subr.mxu1 %v2127_v24  ;;  %2473 = vmatprep.mubr.f32.mxu1 %v1938_v17  ;;  %v1951_v17 = vld [vmem:[#allocation2 + $0x1058] sm:$0xff]  ;;  %v2078_v20 = vld [vmem:[#allocation2 + $0x1450] sm:$0xff] }
 0x39f   :  { %2341 = vmatpush1.msra.mxu0 %v1998_v25  ;;  %2412 = vmatpush1.msra.mxu1 %v2126_v47  ;;  %v1947_v24 = vld [vmem:[#allocation2 + $0x1038] sm:$0xff]  ;;  %v1946_v47 = vld [vmem:[#allocation2 + $0x1030] sm:$0xff] }
 0x3a0   :  { %2342 = vmatprep.subr.mxu0 %v1995_v48  ;;  %2413 = vmatprep.subr.mxu1 %v2123_v26  ;;  %v2075_v25 = vld [vmem:[#allocation2 + $0x1438] sm:$0xff]  ;;  %v2074_v48 = vld [vmem:[#allocation2 + $0x1430] sm:$0xff] }
 0x3a1   :  { %2343 = vmatpush1.msra.mxu0 %v1994_v27  ;;  %2414 = vmatpush1.msra.mxu1 %v2122_v28  ;;  %v1943_v26 = vld [vmem:[#allocation2 + $0x1018] sm:$0xff]  ;;  %v1942_v28 = vld [vmem:[#allocation2 + $0x1010] sm:$0xff] }
 0x3a2   :  { %2344 = vmatprep.subr.mxu0 %v1991_v29  ;;  %2415 = vmatprep.subr.mxu1 %v2119_v30  ;;  %v2071_v27 = vld [vmem:[#allocation2 + $0x1418] sm:$0xff]  ;;  %v2070_v29 = vld [vmem:[#allocation2 + $0x1410] sm:$0xff] }
 0x3a3   :  { %2345 = vmatpush1.msra.mxu0 %v1990_v31  ;;  %2416 = vmatpush1.msra.mxu1 %v2118_v32  ;;  %v2067_v30 = vld [vmem:[#allocation2 + $0x13f8] sm:$0xff]  ;;  %v2066_v32 = vld [vmem:[#allocation2 + $0x13f0] sm:$0xff] }
 0x3a4   :  { %2346 = vmatprep.subr.mxu0 %v1987_v33  ;;  %2417 = vmatprep.subr.mxu1 %v2115_v34  ;;  %v2195_v31 = vld [vmem:[#allocation2 + $0x17f8] sm:$0xff]  ;;  %v2194_v33 = vld [vmem:[#allocation2 + $0x17f0] sm:$0xff] }
 0x3a5   :  { %2347 = vmatpush1.msra.mxu0 %v1986_v35  ;;  %2418 = vmatpush1.msra.mxu1 %v2114_v59  ;;  %v2063_v34 = vld [vmem:[#allocation2 + $0x13d8] sm:$0xff]  ;;  %v2062_v59 = vld [vmem:[#allocation2 + $0x13d0] sm:$0xff] }
 0x3a6   :  { %2348 = vmatprep.subr.mxu0 %v1983_v61  ;;  %2419 = vmatprep.subr.mxu1 %v2111_v5  ;;  %v2191_v35 = vld [vmem:[#allocation2 + $0x17d8] sm:$0xff]  ;;  %v2190_v61 = vld [vmem:[#allocation2 + $0x17d0] sm:$0xff] }
 0x3a7   :  { %2349 = vmatpush1.msra.mxu0 %v1982_v38  ;;  %2420 = vmatpush1.msra.mxu1 %v2110_v39  ;;  %v2059_v5 = vld [vmem:[#allocation2 + $0x13b8] sm:$0xff]  ;;  %v2058_v39 = vld [vmem:[#allocation2 + $0x13b0] sm:$0xff] }
 0x3a8   :  { %2350 = vmatprep.subr.mxu0 %v1979_v44  ;;  %2421 = vmatprep.subr.mxu1 %v2107_v45  ;;  %v2187_v38 = vld [vmem:[#allocation2 + $0x17b8] sm:$0xff]  ;;  %v2186_v44 = vld [vmem:[#allocation2 + $0x17b0] sm:$0xff] }
 0x3a9   :  { %2351 = vmatpush1.msra.mxu0 %v1978_v46  ;;  %2422 = vmatpush1.msra.mxu1 %v2106_v43  ;;  %v2055_v45 = vld [vmem:[#allocation2 + $0x1398] sm:$0xff]  ;;  %v2054_v43 = vld [vmem:[#allocation2 + $0x1390] sm:$0xff] }
 0x3aa   :  { %2352 = vmatprep.subr.mxu0 %v1975_v36  ;;  %2423 = vmatprep.subr.mxu1 %v2103_v41  ;;  %v2183_v46 = vld [vmem:[#allocation2 + $0x1798] sm:$0xff]  ;;  %v2182_v36 = vld [vmem:[#allocation2 + $0x1790] sm:$0xff] }
 0x3ab   :  { %2353 = vmatpush1.msra.mxu0 %v1974_v42  ;;  %2424 = vmatpush1.msra.mxu1 %v2102_v49  ;;  %v2051_v41 = vld [vmem:[#allocation2 + $0x1378] sm:$0xff]  ;;  %v2050_v49 = vld [vmem:[#allocation2 + $0x1370] sm:$0xff] }
 0x3ac   :  { %2354 = vmatprep.subr.mxu0 %v1971_v50  ;;  %2425 = vmatprep.subr.mxu1 %v2099_v51  ;;  %v2179_v42 = vld [vmem:[#allocation2 + $0x1778] sm:$0xff]  ;;  %v2178_v50 = vld [vmem:[#allocation2 + $0x1770] sm:$0xff] }
 0x3ad   :  { %2355 = vmatpush1.msra.mxu0 %v1970_v52  ;;  %2426 = vmatpush1.msra.mxu1 %v2098_v53  ;;  %v2047_v51 = vld [vmem:[#allocation2 + $0x1358] sm:$0xff]  ;;  %v2046_v53 = vld [vmem:[#allocation2 + $0x1350] sm:$0xff] }
 0x3ae   :  { %2356 = vmatprep.subr.mxu0 %v1967_v56  ;;  %2427 = vmatprep.subr.mxu1 %v2095_v57  ;;  %v2175_v52 = vld [vmem:[#allocation2 + $0x1758] sm:$0xff]  ;;  %v2174_v56 = vld [vmem:[#allocation2 + $0x1750] sm:$0xff] }
 0x3af   :  { %2357 = vmatpush1.msra.mxu0 %v1966_v58  ;;  %2428 = vmatpush1.msra.mxu1 %v2094_v40  ;;  %v2043_v57 = vld [vmem:[#allocation2 + $0x1338] sm:$0xff]  ;;  %v2042_v40 = vld [vmem:[#allocation2 + $0x1330] sm:$0xff] }
 0x3b0   :  { %2358 = vmatprep.subr.mxu0 %v1963_v16  ;;  %2429 = vmatprep.subr.mxu1 %v2091_v62  ;;  %v2171_v58 = vld [vmem:[#allocation2 + $0x1738] sm:$0xff]  ;;  %v2170_v16 = vld [vmem:[#allocation2 + $0x1730] sm:$0xff] }
 0x3b1   :  { %2359 = vmatpush1.msra.mxu0 %v1962_v63  ;;  %2430 = vmatpush1.msra.mxu1 %v2090_v0  ;;  %v2039_v62 = vld [vmem:[#allocation2 + $0x1318] sm:$0xff]  ;;  %v2038_v0 = vld [vmem:[#allocation2 + $0x1310] sm:$0xff] }
 0x3b2   :  { %2360 = vmatprep.subr.mxu0 %v1959_v1  ;;  %2431 = vmatprep.subr.mxu1 %v2087_v2  ;;  %v2167_v63 = vld [vmem:[#allocation2 + $0x1718] sm:$0xff]  ;;  %v2166_v1 = vld [vmem:[#allocation2 + $0x1710] sm:$0xff] }
 0x3b3   :  { %2361 = vmatpush1.msra.mxu0 %v1958_v3  ;;  %2432 = vmatpush1.msra.mxu1 %v2086_v4  ;;  %v2035_v2 = vld [vmem:[#allocation2 + $0x12f8] sm:$0xff]  ;;  %v2034_v4 = vld [vmem:[#allocation2 + $0x12f0] sm:$0xff] }
 0x3b4   :  { %2362 = vmatprep.subr.mxu0 %v1955_v6  ;;  %2433 = vmatprep.subr.mxu1 %v2083_v8  ;;  %v2163_v3 = vld [vmem:[#allocation2 + $0x16f8] sm:$0xff]  ;;  %v2162_v6 = vld [vmem:[#allocation2 + $0x16f0] sm:$0xff] }
 0x3b5   :  { %2363 = vmatpush1.msra.mxu0 %v1954_v12  ;;  %2434 = vmatpush1.msra.mxu1 %v2082_v54  ;;  %v2031_v8 = vld [vmem:[#allocation2 + $0x12d8] sm:$0xff]  ;;  %v2030_v54 = vld [vmem:[#allocation2 + $0x12d0] sm:$0xff] }
 0x3b6   :  { %2364 = vmatprep.subr.mxu0 %v1951_v17  ;;  %2435 = vmatprep.subr.mxu1 %v2079_v15  ;;  %v2159_v12 = vld [vmem:[#allocation2 + $0x16d8] sm:$0xff]  ;;  %v2158_v17 = vld [vmem:[#allocation2 + $0x16d0] sm:$0xff] }
 0x3b7   :  { %2365 = vmatpush1.msra.mxu0 %v1950_v19  ;;  %2436 = vmatpush1.msra.mxu1 %v2078_v20  ;;  %v2027_v15 = vld [vmem:[#allocation2 + $0x12b8] sm:$0xff]  ;;  %v2026_v20 = vld [vmem:[#allocation2 + $0x12b0] sm:$0xff] }
 0x3b8   :  { %2366 = vmatprep.subr.mxu0 %v1947_v24  ;;  %2437 = vmatprep.subr.mxu1 %v2075_v25  ;;  %v2155_v19 = vld [vmem:[#allocation2 + $0x16b8] sm:$0xff]  ;;  %v2154_v24 = vld [vmem:[#allocation2 + $0x16b0] sm:$0xff] }
 0x3b9   :  { %2367 = vmatpush1.msra.mxu0 %v1946_v47  ;;  %2438 = vmatpush1.msra.mxu1 %v2074_v48  ;;  %v2023_v25 = vld [vmem:[#allocation2 + $0x1298] sm:$0xff]  ;;  %v2022_v48 = vld [vmem:[#allocation2 + $0x1290] sm:$0xff] }
 0x3ba   :  { %2368 = vmatprep.subr.mxu0 %v1943_v26  ;;  %2439 = vmatprep.subr.mxu1 %v2071_v27  ;;  %v2151_v47 = vld [vmem:[#allocation2 + $0x1698] sm:$0xff]  ;;  %v2150_v26 = vld [vmem:[#allocation2 + $0x1690] sm:$0xff] }
 0x3bb   :  { %2369 = vmatpush1.msra.mxu0 %v1942_v28  ;;  %2440 = vmatpush1.msra.mxu1 %v2070_v29  ;;  %v2019_v27 = vld [vmem:[#allocation2 + $0x1278] sm:$0xff]  ;;  %v2018_v29 = vld [vmem:[#allocation2 + $0x1270] sm:$0xff] }
 0x3bc   :  { %2370 = vmatprep.subr.mxu0 %v2067_v30  ;;  %2441 = vmatprep.subr.mxu1 %v2195_v31  ;;  %v2147_v28 = vld [vmem:[#allocation2 + $0x1678] sm:$0xff]  ;;  %v2146_v30 = vld [vmem:[#allocation2 + $0x1670] sm:$0xff] }
 0x3bd   :  { %2371 = vmatpush2.msra.mxu0 %v2066_v32  ;;  %2442 = vmatpush2.msra.mxu1 %v2194_v33  ;;  %v2015_v31 = vld [vmem:[#allocation2 + $0x1258] sm:$0xff]  ;;  %v2014_v33 = vld [vmem:[#allocation2 + $0x1250] sm:$0xff] }
 0x3be   :  { %2372 = vmatprep.subr.mxu0 %v2063_v34  ;;  %2443 = vmatprep.subr.mxu1 %v2191_v35  ;;  %v2143_v32 = vld [vmem:[#allocation2 + $0x1658] sm:$0xff]  ;;  %v2142_v34 = vld [vmem:[#allocation2 + $0x1650] sm:$0xff] }
 0x3bf   :  { %2373 = vmatpush2.msra.mxu0 %v2062_v59  ;;  %2444 = vmatpush2.msra.mxu1 %v2190_v61  ;;  %v2011_v35 = vld [vmem:[#allocation2 + $0x1238] sm:$0xff]  ;;  %v2010_v61 = vld [vmem:[#allocation2 + $0x1230] sm:$0xff] }
 0x3c0   :  { %2374 = vmatprep.subr.mxu0 %v2059_v5  ;;  %2445 = vmatprep.subr.mxu1 %v2187_v38  ;;  %v2139_v59 = vld [vmem:[#allocation2 + $0x1638] sm:$0xff]  ;;  %v2138_v5 = vld [vmem:[#allocation2 + $0x1630] sm:$0xff] }
 0x3c1   :  { %2375 = vmatpush2.msra.mxu0 %v2058_v39  ;;  %2446 = vmatpush2.msra.mxu1 %v2186_v44  ;;  %v2007_v38 = vld [vmem:[#allocation2 + $0x1218] sm:$0xff]  ;;  %v2006_v44 = vld [vmem:[#allocation2 + $0x1210] sm:$0xff] }
 0x3c2   :  { %2376 = vmatprep.subr.mxu0 %v2055_v45  ;;  %2447 = vmatprep.subr.mxu1 %v2183_v46  ;;  %v2135_v39 = vld [vmem:[#allocation2 + $0x1618] sm:$0xff]  ;;  %v2134_v45 = vld [vmem:[#allocation2 + $0x1610] sm:$0xff]  ;;  %v2756_v46 = vld [vmem:[#allocation2 + $0x19e8] sm:$0xff] }
 0x3c3   :  { %2377 = vmatpush2.msra.mxu0 %v2054_v43  ;;  %2448 = vmatpush2.msra.mxu1 %v2182_v36  ;;  %v2884_v43 = vld [vmem:[#allocation2 + $0x1de8] sm:$0xff]  ;;  %v2755_v36 = vld [vmem:[#allocation2 + $0x19e0] sm:$0xff] }
 0x3c4   :  { %2378 = vmatprep.subr.mxu0 %v2051_v41  ;;  %2449 = vmatprep.subr.mxu1 %v2179_v42  ;;  %v2883_v41 = vld [vmem:[#allocation2 + $0x1de0] sm:$0xff]  ;;  %v2752_v42 = vld [vmem:[#allocation2 + $0x19c8] sm:$0xff] }
 0x3c5   :  { %2379 = vmatpush2.msra.mxu0 %v2050_v49  ;;  %2450 = vmatpush2.msra.mxu1 %v2178_v50  ;;  %v2880_v49 = vld [vmem:[#allocation2 + $0x1dc8] sm:$0xff]  ;;  %v2751_v50 = vld [vmem:[#allocation2 + $0x19c0] sm:$0xff] }
 0x3c6   :  { %2380 = vmatprep.subr.mxu0 %v2047_v51  ;;  %2451 = vmatprep.subr.mxu1 %v2175_v52  ;;  %v2879_v51 = vld [vmem:[#allocation2 + $0x1dc0] sm:$0xff]  ;;  %v2744_v52 = vld [vmem:[#allocation2 + $0x1988] sm:$0xff] }
 0x3c7   :  { %2381 = vmatpush2.msra.mxu0 %v2046_v53  ;;  %2452 = vmatpush2.msra.mxu1 %v2174_v56  ;;  %v2872_v53 = vld [vmem:[#allocation2 + $0x1d88] sm:$0xff]  ;;  %v2743_v56 = vld [vmem:[#allocation2 + $0x1980] sm:$0xff] }
 0x3c8   :  { %2382 = vmatprep.subr.mxu0 %v2043_v57  ;;  %2453 = vmatprep.subr.mxu1 %v2171_v58  ;;  %v2871_v57 = vld [vmem:[#allocation2 + $0x1d80] sm:$0xff]  ;;  %v2740_v58 = vld [vmem:[#allocation2 + $0x1968] sm:$0xff] }
 0x3c9   :  { %2383 = vmatpush2.msra.mxu0 %v2042_v40  ;;  %2454 = vmatpush2.msra.mxu1 %v2170_v16  ;;  %v2868_v40 = vld [vmem:[#allocation2 + $0x1d68] sm:$0xff]  ;;  %v2739_v16 = vld [vmem:[#allocation2 + $0x1960] sm:$0xff] }
 0x3ca   :  { %2384 = vmatprep.subr.mxu0 %v2039_v62  ;;  %2455 = vmatprep.subr.mxu1 %v2167_v63  ;;  %v2867_v62 = vld [vmem:[#allocation2 + $0x1d60] sm:$0xff]  ;;  %v2736_v63 = vld [vmem:[#allocation2 + $0x1948] sm:$0xff] }
 0x3cb   :  { %2385 = vmatpush2.msra.mxu0 %v2038_v0  ;;  %2456 = vmatpush2.msra.mxu1 %v2166_v1  ;;  %v2864_v0 = vld [vmem:[#allocation2 + $0x1d48] sm:$0xff]  ;;  %v2735_v1 = vld [vmem:[#allocation2 + $0x1940] sm:$0xff] }
 0x3cc   :  { %2386 = vmatprep.subr.mxu0 %v2035_v2  ;;  %2457 = vmatprep.subr.mxu1 %v2163_v3  ;;  %v2863_v2 = vld [vmem:[#allocation2 + $0x1d40] sm:$0xff]  ;;  %v2732_v3 = vld [vmem:[#allocation2 + $0x1928] sm:$0xff] }
 0x3cd   :  { %2387 = vmatpush2.msra.mxu0 %v2034_v4  ;;  %2458 = vmatpush2.msra.mxu1 %v2162_v6  ;;  %v2860_v4 = vld [vmem:[#allocation2 + $0x1d28] sm:$0xff]  ;;  %v2731_v6 = vld [vmem:[#allocation2 + $0x1920] sm:$0xff] }
 0x3ce   :  { %2388 = vmatprep.subr.mxu0 %v2031_v8  ;;  %2459 = vmatprep.subr.mxu1 %v2159_v12  ;;  %v2859_v8 = vld [vmem:[#allocation2 + $0x1d20] sm:$0xff]  ;;  %v2728_v12 = vld [vmem:[#allocation2 + $0x1908] sm:$0xff] }
 0x3cf   :  { %2389 = vmatpush2.msra.mxu0 %v2030_v54  ;;  %2460 = vmatpush2.msra.mxu1 %v2158_v17  ;;  %v2856_v54 = vld [vmem:[#allocation2 + $0x1d08] sm:$0xff]  ;;  %v2727_v17 = vld [vmem:[#allocation2 + $0x1900] sm:$0xff] }
 0x3d0   :  { %2390 = vmatprep.subr.mxu0 %v2027_v15  ;;  %2461 = vmatprep.subr.mxu1 %v2155_v19  ;;  %v2855_v15 = vld [vmem:[#allocation2 + $0x1d00] sm:$0xff]  ;;  %v2724_v19 = vld [vmem:[#allocation2 + $0x18e8] sm:$0xff] }
 0x3d1   :  { %2391 = vmatpush2.msra.mxu0 %v2026_v20  ;;  %2462 = vmatpush2.msra.mxu1 %v2154_v24  ;;  %v2852_v20 = vld [vmem:[#allocation2 + $0x1ce8] sm:$0xff]  ;;  %v2723_v24 = vld [vmem:[#allocation2 + $0x18e0] sm:$0xff] }
 0x3d2   :  { %2392 = vmatprep.subr.mxu0 %v2023_v25  ;;  %2463 = vmatprep.subr.mxu1 %v2151_v47  ;;  %v2851_v25 = vld [vmem:[#allocation2 + $0x1ce0] sm:$0xff]  ;;  %v2720_v47 = vld [vmem:[#allocation2 + $0x18c8] sm:$0xff] }
 0x3d3   :  { %2393 = vmatpush2.msra.mxu0 %v2022_v48  ;;  %2464 = vmatpush2.msra.mxu1 %v2150_v26  ;;  %v2848_v48 = vld [vmem:[#allocation2 + $0x1cc8] sm:$0xff]  ;;  %v2719_v26 = vld [vmem:[#allocation2 + $0x18c0] sm:$0xff] }
 0x3d4   :  { %2394 = vmatprep.subr.mxu0 %v2019_v27  ;;  %2465 = vmatprep.subr.mxu1 %v2147_v28  ;;  %v2847_v27 = vld [vmem:[#allocation2 + $0x1cc0] sm:$0xff]  ;;  %v2716_v28 = vld [vmem:[#allocation2 + $0x18a8] sm:$0xff] }
 0x3d5   :  { %2395 = vmatpush2.msra.mxu0 %v2018_v29  ;;  %2466 = vmatpush2.msra.mxu1 %v2146_v30  ;;  %v2844_v29 = vld [vmem:[#allocation2 + $0x1ca8] sm:$0xff]  ;;  %v2715_v30 = vld [vmem:[#allocation2 + $0x18a0] sm:$0xff] }
 0x3d6   :  { %2396 = vmatprep.subr.mxu0 %v2015_v31  ;;  %2467 = vmatprep.subr.mxu1 %v2143_v32  ;;  %v2843_v31 = vld [vmem:[#allocation2 + $0x1ca0] sm:$0xff]  ;;  %v2712_v32 = vld [vmem:[#allocation2 + $0x1888] sm:$0xff] }
 0x3d7   :  { %2397 = vmatpush2.msra.mxu0 %v2014_v33  ;;  %2468 = vmatpush2.msra.mxu1 %v2142_v34  ;;  %v2840_v33 = vld [vmem:[#allocation2 + $0x1c88] sm:$0xff]  ;;  %v2711_v34 = vld [vmem:[#allocation2 + $0x1880] sm:$0xff] }
 0x3d8   :  { %2398 = vmatprep.subr.mxu0 %v2011_v35  ;;  %2469 = vmatprep.subr.mxu1 %v2139_v59  ;;  %v2839_v35 = vld [vmem:[#allocation2 + $0x1c80] sm:$0xff]  ;;  %v2708_v59 = vld [vmem:[#allocation2 + $0x1868] sm:$0xff] }
 0x3d9   :  { %2399 = vmatpush2.msra.mxu0 %v2010_v61  ;;  %2470 = vmatpush2.msra.mxu1 %v2138_v5  ;;  %v2836_v61 = vld [vmem:[#allocation2 + $0x1c68] sm:$0xff]  ;;  %v2707_v5 = vld [vmem:[#allocation2 + $0x1860] sm:$0xff] }
 0x3da   :  { %2400 = vmatprep.subr.mxu0 %v2007_v38  ;;  %2471 = vmatprep.subr.mxu1 %v2135_v39  ;;  %v2835_v38 = vld [vmem:[#allocation2 + $0x1c60] sm:$0xff]  ;;  %v2704_v39 = vld [vmem:[#allocation2 + $0x1848] sm:$0xff] }
 0x3db   :  { %2401 = vmatpush2.msra.mxu0 %v2006_v44  ;;  %2472 = vmatpush2.msra.mxu1 %v2134_v45  ;;  %v2832_v44 = vld [vmem:[#allocation2 + $0x1c48] sm:$0xff]  ;;  %v2703_v45 = vld [vmem:[#allocation2 + $0x1840] sm:$0xff] }
 0x3dc   :  { %2403 = vmatmul.mubr.f32.vlgmr.msra.gmra.mxu0 %v1935_v55  ;;  %2474 = vmatmul.mubr.f32.vlgmr.msra.gmra.mxu1 %v1937_v37  ;;  %v2876_v55 = vld [vmem:[#allocation2 + $0x1da8] sm:$0xff]  ;;  %v2875_v37 = vld [vmem:[#allocation2 + $0x1da0] sm:$0xff] }
 0x3dd   :  { %2951 = vmatprep.subr.mxu0 %v2756_v46  ;;  %3022 = vmatprep.subr.mxu1 %v2884_v43  ;;  %v2831_v46 = vld [vmem:[#allocation2 + $0x1c40] sm:$0xff]  ;;  %v2700_v43 = vld [vmem:[#allocation2 + $0x1828] sm:$0xff] }
 0x3de   :  { %2952 = vmatpush1.msra.mxu0 %v2755_v36  ;;  %3023 = vmatpush1.msra.mxu1 %v2883_v41  ;;  %v2828_v36 = vld [vmem:[#allocation2 + $0x1c28] sm:$0xff]  ;;  %v2699_v41 = vld [vmem:[#allocation2 + $0x1820] sm:$0xff] }
 0x3df   :  { %2953 = vmatprep.subr.mxu0 %v2752_v42  ;;  %3024 = vmatprep.subr.mxu1 %v2880_v49  ;;  %v2827_v42 = vld [vmem:[#allocation2 + $0x1c20] sm:$0xff]  ;;  %v2696_v49 = vld [vmem:[#allocation2 + $0x1808] sm:$0xff] }
 0x3e0   :  { %2954 = vmatpush1.msra.mxu0 %v2751_v50  ;;  %3025 = vmatpush1.msra.mxu1 %v2879_v51  ;;  %v2824_v50 = vld [vmem:[#allocation2 + $0x1c08] sm:$0xff]  ;;  %v2695_v51 = vld [vmem:[#allocation2 + $0x1800] sm:$0xff] }
 0x3e1   :  { %2955 = vmatprep.subr.mxu0 %v2748_v13  ;;  %3026 = vmatprep.subr.mxu1 %v2876_v55  ;;  %v2823_v13 = vld [vmem:[#allocation2 + $0x1c00] sm:$0xff]  ;;  %v2820_v55 = vld [vmem:[#allocation2 + $0x1be8] sm:$0xff] }
 0x3e2   :  { %2956 = vmatpush1.msra.mxu0 %v2747_v14  ;;  %3027 = vmatpush1.msra.mxu1 %v2875_v37  ;;  %v2948_v14 = vld [vmem:[#allocation2 + $0x1fe8] sm:$0xff]  ;;  %v2819_v37 = vld [vmem:[#allocation2 + $0x1be0] sm:$0xff] }
 0x3e3   :  { %2957 = vmatprep.subr.mxu0 %v2744_v52  ;;  %3028 = vmatprep.subr.mxu1 %v2872_v53  ;;  %v2947_v52 = vld [vmem:[#allocation2 + $0x1fe0] sm:$0xff]  ;;  %v2816_v53 = vld [vmem:[#allocation2 + $0x1bc8] sm:$0xff] }
 0x3e4   :  { %2958 = vmatpush1.msra.mxu0 %v2743_v56  ;;  %3029 = vmatpush1.msra.mxu1 %v2871_v57  ;;  %v2944_v56 = vld [vmem:[#allocation2 + $0x1fc8] sm:$0xff]  ;;  %v2815_v57 = vld [vmem:[#allocation2 + $0x1bc0] sm:$0xff] }
 0x3e5   :  { %2959 = vmatprep.subr.mxu0 %v2740_v58  ;;  %3030 = vmatprep.subr.mxu1 %v2868_v40  ;;  %v2943_v58 = vld [vmem:[#allocation2 + $0x1fc0] sm:$0xff]  ;;  %v2812_v40 = vld [vmem:[#allocation2 + $0x1ba8] sm:$0xff] }
 0x3e6   :  { %2960 = vmatpush1.msra.mxu0 %v2739_v16  ;;  %3031 = vmatpush1.msra.mxu1 %v2867_v62  ;;  %v2940_v16 = vld [vmem:[#allocation2 + $0x1fa8] sm:$0xff]  ;;  %v2811_v62 = vld [vmem:[#allocation2 + $0x1ba0] sm:$0xff] }
 0x3e7   :  { %2961 = vmatprep.subr.mxu0 %v2736_v63  ;;  %3032 = vmatprep.subr.mxu1 %v2864_v0  ;;  %v2939_v63 = vld [vmem:[#allocation2 + $0x1fa0] sm:$0xff]  ;;  %v2808_v0 = vld [vmem:[#allocation2 + $0x1b88] sm:$0xff] }
 0x3e8   :  { %2962 = vmatpush1.msra.mxu0 %v2735_v1  ;;  %3033 = vmatpush1.msra.mxu1 %v2863_v2  ;;  %v2936_v1 = vld [vmem:[#allocation2 + $0x1f88] sm:$0xff]  ;;  %v2807_v2 = vld [vmem:[#allocation2 + $0x1b80] sm:$0xff] }
 0x3e9   :  { %2963 = vmatprep.subr.mxu0 %v2732_v3  ;;  %3034 = vmatprep.subr.mxu1 %v2860_v4  ;;  %v2935_v3 = vld [vmem:[#allocation2 + $0x1f80] sm:$0xff]  ;;  %v2804_v4 = vld [vmem:[#allocation2 + $0x1b68] sm:$0xff] }
 0x3ea   :  { %2964 = vmatpush1.msra.mxu0 %v2731_v6  ;;  %3035 = vmatpush1.msra.mxu1 %v2859_v8  ;;  %v2932_v6 = vld [vmem:[#allocation2 + $0x1f68] sm:$0xff]  ;;  %v2803_v8 = vld [vmem:[#allocation2 + $0x1b60] sm:$0xff] }
 0x3eb   :  { %2965 = vmatprep.subr.mxu0 %v2728_v12  ;;  %3036 = vmatprep.subr.mxu1 %v2856_v54  ;;  %v2931_v12 = vld [vmem:[#allocation2 + $0x1f60] sm:$0xff]  ;;  %v2800_v54 = vld [vmem:[#allocation2 + $0x1b48] sm:$0xff] }
 0x3ec   :  { %2966 = vmatpush1.msra.mxu0 %v2727_v17  ;;  %3037 = vmatpush1.msra.mxu1 %v2855_v15  ;;  %v2928_v17 = vld [vmem:[#allocation2 + $0x1f48] sm:$0xff]  ;;  %v2799_v15 = vld [vmem:[#allocation2 + $0x1b40] sm:$0xff] }
 0x3ed   :  { %2967 = vmatprep.subr.mxu0 %v2724_v19  ;;  %3038 = vmatprep.subr.mxu1 %v2852_v20  ;;  %v2927_v19 = vld [vmem:[#allocation2 + $0x1f40] sm:$0xff]  ;;  %v2796_v20 = vld [vmem:[#allocation2 + $0x1b28] sm:$0xff] }
 0x3ee   :  { %2968 = vmatpush1.msra.mxu0 %v2723_v24  ;;  %3039 = vmatpush1.msra.mxu1 %v2851_v25  ;;  %v2924_v24 = vld [vmem:[#allocation2 + $0x1f28] sm:$0xff]  ;;  %v2795_v25 = vld [vmem:[#allocation2 + $0x1b20] sm:$0xff] }
 0x3ef   :  { %2969 = vmatprep.subr.mxu0 %v2720_v47  ;;  %3040 = vmatprep.subr.mxu1 %v2848_v48  ;;  %v2923_v47 = vld [vmem:[#allocation2 + $0x1f20] sm:$0xff]  ;;  %v2792_v48 = vld [vmem:[#allocation2 + $0x1b08] sm:$0xff] }
 0x3f0   :  { %2970 = vmatpush1.msra.mxu0 %v2719_v26  ;;  %3041 = vmatpush1.msra.mxu1 %v2847_v27  ;;  %v2920_v26 = vld [vmem:[#allocation2 + $0x1f08] sm:$0xff]  ;;  %v2791_v27 = vld [vmem:[#allocation2 + $0x1b00] sm:$0xff] }
 0x3f1   :  { %2971 = vmatprep.subr.mxu0 %v2716_v28  ;;  %3042 = vmatprep.subr.mxu1 %v2844_v29  ;;  %v2919_v28 = vld [vmem:[#allocation2 + $0x1f00] sm:$0xff]  ;;  %v2788_v29 = vld [vmem:[#allocation2 + $0x1ae8] sm:$0xff] }
 0x3f2   :  { %2972 = vmatpush1.msra.mxu0 %v2715_v30  ;;  %3043 = vmatpush1.msra.mxu1 %v2843_v31  ;;  %v2916_v30 = vld [vmem:[#allocation2 + $0x1ee8] sm:$0xff]  ;;  %v2787_v31 = vld [vmem:[#allocation2 + $0x1ae0] sm:$0xff] }
 0x3f3   :  { %2973 = vmatprep.subr.mxu0 %v2712_v32  ;;  %3044 = vmatprep.subr.mxu1 %v2840_v33  ;;  %v2915_v32 = vld [vmem:[#allocation2 + $0x1ee0] sm:$0xff]  ;;  %v2784_v33 = vld [vmem:[#allocation2 + $0x1ac8] sm:$0xff] }
 0x3f4   :  { %2974 = vmatpush1.msra.mxu0 %v2711_v34  ;;  %3045 = vmatpush1.msra.mxu1 %v2839_v35  ;;  %v2912_v34 = vld [vmem:[#allocation2 + $0x1ec8] sm:$0xff]  ;;  %v2783_v35 = vld [vmem:[#allocation2 + $0x1ac0] sm:$0xff] }
 0x3f5   :  { %2975 = vmatprep.subr.mxu0 %v2708_v59  ;;  %3046 = vmatprep.subr.mxu1 %v2836_v61  ;;  %v2911_v59 = vld [vmem:[#allocation2 + $0x1ec0] sm:$0xff]  ;;  %v2780_v61 = vld [vmem:[#allocation2 + $0x1aa8] sm:$0xff] }
 0x3f6   :  { %2976 = vmatpush1.msra.mxu0 %v2707_v5  ;;  %3047 = vmatpush1.msra.mxu1 %v2835_v38  ;;  %v2908_v5 = vld [vmem:[#allocation2 + $0x1ea8] sm:$0xff]  ;;  %v2779_v38 = vld [vmem:[#allocation2 + $0x1aa0] sm:$0xff] }
 0x3f7   :  { %2977 = vmatprep.subr.mxu0 %v2704_v39  ;;  %3048 = vmatprep.subr.mxu1 %v2832_v44  ;;  %v2907_v39 = vld [vmem:[#allocation2 + $0x1ea0] sm:$0xff]  ;;  %v2776_v44 = vld [vmem:[#allocation2 + $0x1a88] sm:$0xff] }
 0x3f8   :  { %2978 = vmatpush1.msra.mxu0 %v2703_v45  ;;  %3049 = vmatpush1.msra.mxu1 %v2831_v46  ;;  %v2904_v45 = vld [vmem:[#allocation2 + $0x1e88] sm:$0xff]  ;;  %v2775_v46 = vld [vmem:[#allocation2 + $0x1a80] sm:$0xff] }
 0x3f9   :  { %2979 = vmatprep.subr.mxu0 %v2700_v43  ;;  %3050 = vmatprep.subr.mxu1 %v2828_v36  ;;  %v2903_v43 = vld [vmem:[#allocation2 + $0x1e80] sm:$0xff]  ;;  %v2772_v36 = vld [vmem:[#allocation2 + $0x1a68] sm:$0xff] }
 0x3fa   :  { %2980 = vmatpush1.msra.mxu0 %v2699_v41  ;;  %3051 = vmatpush1.msra.mxu1 %v2827_v42  ;;  %v2900_v41 = vld [vmem:[#allocation2 + $0x1e68] sm:$0xff]  ;;  %v2771_v42 = vld [vmem:[#allocation2 + $0x1a60] sm:$0xff] }
 0x3fb   :  { %2981 = vmatprep.subr.mxu0 %v2696_v49  ;;  %3052 = vmatprep.subr.mxu1 %v2824_v50  ;;  %v2899_v49 = vld [vmem:[#allocation2 + $0x1e60] sm:$0xff]  ;;  %v2768_v50 = vld [vmem:[#allocation2 + $0x1a48] sm:$0xff] }
 0x3fc   :  { %2982 = vmatpush1.msra.mxu0 %v2695_v51  ;;  %3053 = vmatpush1.msra.mxu1 %v2823_v13  ;;  %v2896_v51 = vld [vmem:[#allocation2 + $0x1e48] sm:$0xff]  ;;  %v2767_v13 = vld [vmem:[#allocation2 + $0x1a40] sm:$0xff] }
 0x3fd   :  { %2983 = vmatprep.subr.mxu0 %v2820_v55  ;;  %3054 = vmatprep.subr.mxu1 %v2948_v14  ;;  %v2895_v55 = vld [vmem:[#allocation2 + $0x1e40] sm:$0xff]  ;;  %v2764_v14 = vld [vmem:[#allocation2 + $0x1a28] sm:$0xff] }
 0x3fe   :  { %2984 = vmatpush2.msra.mxu0 %v2819_v37  ;;  %3055 = vmatpush2.msra.mxu1 %v2947_v52  ;;  %v2892_v37 = vld [vmem:[#allocation2 + $0x1e28] sm:$0xff]  ;;  %v2763_v52 = vld [vmem:[#allocation2 + $0x1a20] sm:$0xff] }
 0x3ff   :  { %2985 = vmatprep.subr.mxu0 %v2816_v53  ;;  %3056 = vmatprep.subr.mxu1 %v2944_v56  ;;  %v2891_v53 = vld [vmem:[#allocation2 + $0x1e20] sm:$0xff]  ;;  %v2760_v56 = vld [vmem:[#allocation2 + $0x1a08] sm:$0xff] }
 0x400   :  { %2986 = vmatpush2.msra.mxu0 %v2815_v57  ;;  %3057 = vmatpush2.msra.mxu1 %v2943_v58  ;;  %v2888_v57 = vld [vmem:[#allocation2 + $0x1e08] sm:$0xff]  ;;  %v2759_v58 = vld [vmem:[#allocation2 + $0x1a00] sm:$0xff] }
 0x401   :  { %2987 = vmatprep.subr.mxu0 %v2812_v40  ;;  %3058 = vmatprep.subr.mxu1 %v2940_v16  ;;  %v2887_v40 = vld [vmem:[#allocation2 + $0x1e00] sm:$0xff]  ;;  %v2758_v16 = vld [vmem:[#allocation2 + $0x19f8] sm:$0xff] }
 0x402   :  { %2988 = vmatpush2.msra.mxu0 %v2811_v62  ;;  %3059 = vmatpush2.msra.mxu1 %v2939_v63  ;;  %v2886_v62 = vld [vmem:[#allocation2 + $0x1df8] sm:$0xff] }
 0x403   :  { %2989 = vmatprep.subr.mxu0 %v2808_v0  ;;  %3060 = vmatprep.subr.mxu1 %v2936_v1 }
 0x404   :  { %2990 = vmatpush2.msra.mxu0 %v2807_v2  ;;  %3061 = vmatpush2.msra.mxu1 %v2935_v3 }
 0x405   :  { %2991 = vmatprep.subr.mxu0 %v2804_v4  ;;  %3062 = vmatprep.subr.mxu1 %v2932_v6 }
 0x406   :  { %2992 = vmatpush2.msra.mxu0 %v2803_v8  ;;  %3063 = vmatpush2.msra.mxu1 %v2931_v12 }
 0x407   :  { %2993 = vmatprep.subr.mxu0 %v2800_v54  ;;  %3064 = vmatprep.subr.mxu1 %v2928_v17 }
 0x408   :  { %2994 = vmatpush2.msra.mxu0 %v2799_v15  ;;  %3065 = vmatpush2.msra.mxu1 %v2927_v19 }
 0x409   :  { %2995 = vmatprep.subr.mxu0 %v2796_v20  ;;  %3066 = vmatprep.subr.mxu1 %v2924_v24 }
 0x40a   :  { %2996 = vmatpush2.msra.mxu0 %v2795_v25  ;;  %3067 = vmatpush2.msra.mxu1 %v2923_v47 }
 0x40b   :  { %2997 = vmatprep.subr.mxu0 %v2792_v48  ;;  %3068 = vmatprep.subr.mxu1 %v2920_v26 }
 0x40c   :  { %2998 = vmatpush2.msra.mxu0 %v2791_v27  ;;  %3069 = vmatpush2.msra.mxu1 %v2919_v28 }
 0x40d   :  { %2999 = vmatprep.subr.mxu0 %v2788_v29  ;;  %3070 = vmatprep.subr.mxu1 %v2916_v30 }
 0x40e   :  { %3000 = vmatpush2.msra.mxu0 %v2787_v31  ;;  %3071 = vmatpush2.msra.mxu1 %v2915_v32 }
 0x40f   :  { %3001 = vmatprep.subr.mxu0 %v2784_v33  ;;  %3072 = vmatprep.subr.mxu1 %v2912_v34 }
 0x410   :  { %3002 = vmatpush2.msra.mxu0 %v2783_v35  ;;  %3073 = vmatpush2.msra.mxu1 %v2911_v59 }
 0x411   :  { %3003 = vmatprep.subr.mxu0 %v2780_v61  ;;  %3074 = vmatprep.subr.mxu1 %v2908_v5 }
 0x412   :  { %3004 = vmatpush2.msra.mxu0 %v2779_v38  ;;  %3075 = vmatpush2.msra.mxu1 %v2907_v39 }
 0x413   :  { %3005 = vmatprep.subr.mxu0 %v2776_v44  ;;  %3076 = vmatprep.subr.mxu1 %v2904_v45 }
 0x414   :  { %3006 = vmatpush2.msra.mxu0 %v2775_v46  ;;  %3077 = vmatpush2.msra.mxu1 %v2903_v43 }
 0x415   :  { %3007 = vmatprep.subr.mxu0 %v2772_v36  ;;  %3078 = vmatprep.subr.mxu1 %v2900_v41 }
 0x416   :  { %3008 = vmatpush2.msra.mxu0 %v2771_v42  ;;  %3079 = vmatpush2.msra.mxu1 %v2899_v49 }
 0x417   :  { %3009 = vmatprep.subr.mxu0 %v2768_v50  ;;  %3080 = vmatprep.subr.mxu1 %v2896_v51 }
 0x418   :  { %3010 = vmatpush2.msra.mxu0 %v2767_v13  ;;  %3081 = vmatpush2.msra.mxu1 %v2895_v55 }
 0x419   :  { %3011 = vmatprep.subr.mxu0 %v2764_v14  ;;  %3082 = vmatprep.subr.mxu1 %v2892_v37 }
 0x41a   :  { %3012 = vmatpush2.msra.mxu0 %v2763_v52  ;;  %3083 = vmatpush2.msra.mxu1 %v2891_v53 }
 0x41b   :  { %3013 = vmatprep.subr.mxu0 %v2760_v56  ;;  %3084 = vmatprep.subr.mxu1 %v2888_v57 }
 0x41c   :  { %3014 = vmatpush2.msra.mxu0 %v2759_v58  ;;  %3085 = vmatpush2.msra.mxu1 %v2887_v40 }
 0x41d   :  { %3093 = vmatprep.subr.mxu0 %v2758_v16  ;;  %3164 = vmatprep.subr.mxu1 %v2886_v62 }
 0x45b   :  { %v2262_v63 = vpop.f32.mrf.mxu0  ;;  %v2333_v0 = vpop.f32.mrf.mxu1 }
 0x45c   :  { %v5857_v4 = vadd.f32 %v2333_v0, %v2262_v63 }
 0x45d   :  { %v2264_v1 = vpop.f32.mrf.mxu0  ;;  %v2335_v2 = vpop.f32.mrf.mxu1 }
 0x45e   :  { %v5855_v3 = vadd.f32 %v2335_v2, %v2264_v1  ;;  %v2482_v12 = vrot.slane %v5857_v4, 4  ;;  %v2510_v54 = vmul.f32 %v5857_v4, %v5857_v4 }
 0x460   :  { %v2488_v6 = vrot.slane %v5855_v3, 4  ;;  %v2511_v8 = vmul.f32 %v5855_v3, %v5855_v3  ;;  %v2483_v19 = vadd.f32 %v2482_v12, %v5857_v4  ;;  %v2514_v20 = vrot.slane %v2510_v54, 4 }
 0x462   :  { %v2489_v17 = vadd.f32 %v2488_v6, %v5855_v3  ;;  %v2520_v15 = vrot.slane %v2511_v8, 4  ;;  %v2484_v47 = vrot.slane %v2483_v19, 2  ;;  %v2515_v48 = vadd.f32 %v2514_v20, %v2510_v54 }
 0x464   :  { %v2490_v24 = vrot.slane %v2489_v17, 2  ;;  %v2521_v25 = vadd.f32 %v2520_v15, %v2511_v8  ;;  %v2485_v28 = vadd.f32 %v2484_v47, %v2483_v19  ;;  %v2516_v29 = vrot.slane %v2515_v48, 2 }
 0x466   :  { %v2491_v26 = vadd.f32 %v2490_v24, %v2489_v17  ;;  %v2522_v27 = vrot.slane %v2521_v25, 2  ;;  %v2486_v32 = vrot.slane %v2485_v28, 1  ;;  %v2517_v33 = vadd.f32 %v2516_v29, %v2515_v48 }
 0x468   :  { %v2492_v30 = vrot.slane %v2491_v26, 1  ;;  %v2523_v31 = vadd.f32 %v2522_v27, %v2521_v25  ;;  %v2487_v38 = vadd.f32 %v2486_v32, %v2485_v28  ;;  %v2518_v39 = vrot.slane %v2517_v33, 1 }
 0x46a   :  { %v2493_v34 = vadd.f32 %v2492_v30, %v2491_v26  ;;  %v2524_v35 = vrot.slane %v2523_v31, 1  ;;  %v2506_v55 = vmul.f32 0.125, %v2487_v38  ;;  %v2519_v14 = vadd.f32 %v2518_v39, %v2517_v33 }
 0x46c   :  { %v5874_v41 = vmul.f32 0.125, %v2493_v34  ;;  %v2525_v42 = vadd.f32 %v2524_v35, %v2523_v31  ;;  %v2538_v0 = vmul.f32 0.125, %v2519_v14  ;;  %v2542_v1 = vmul.f32 %v2506_v55, %v2506_v55 }
 0x46e   :  { %v2539_v57 = vmul.f32 0.125, %v2525_v42  ;;  %v2543_v58 = vmul.f32 %v5874_v41, %v5874_v41  ;;  %v2546_v24 = vsub.f32 %v2538_v0, %v2542_v1 }
 0x470   :  { %v2547_v54 = vsub.f32 %v2539_v57, %v2543_v58  ;;  %v2550_v32 = vadd.f32 1e-05, %v2546_v24 }
 0x472   :  { %v2551_v27 = vadd.f32 1e-05, %v2547_v54 }
 0x474   :  { %5416 = vrsqrt.f32 %v2551_v27 }
 0x475   :  { %5418 = vrsqrt.f32 %v2550_v32  ;;  %v2885_v32 = vld [vmem:[#allocation2 + $0x1df0] sm:$0xff] }
 0x481   :  { %v5417_v39 = vpop.eup %5416 }
 0x49c   :  { %v2404_v59 = vpop.f32.mrf.mxu0  ;;  %v2475_v61 = vpop.f32.mrf.mxu1 }
 0x49d   :  { %v5867_v5 = vadd.f32 %v2475_v61, %v2404_v59 }
 0x49e   :  { %v2406_v44 = vpop.f32.mrf.mxu0  ;;  %v2477_v45 = vpop.f32.mrf.mxu1 }
 0x49f   :  { %v2494_v46 = vrot.slane %v5867_v5, 4  ;;  %v2512_v43 = vmul.f32 %v5867_v5, %v5867_v5  ;;  %v5872_v36 = vadd.f32 %v2477_v45, %v2406_v44  ;;  %v5419_v44 = vpop.eup %5418 }
 0x4a1   :  { %v2495_v49 = vadd.f32 %v2494_v46, %v5867_v5  ;;  %v2526_v50 = vrot.slane %v2512_v43, 4  ;;  %v2500_v51 = vrot.slane %v5872_v36, 4  ;;  %v2513_v13 = vmul.f32 %v5872_v36, %v5872_v36 }
 0x4a3   :  { %v2496_v37 = vrot.slane %v2495_v49, 2  ;;  %v2527_v52 = vadd.f32 %v2526_v50, %v2512_v43  ;;  %v2501_v53 = vadd.f32 %v2500_v51, %v5872_v36  ;;  %v2532_v56 = vrot.slane %v2513_v13, 4 }
 0x4a4   :  { %v2562_v43 = vcombine.low %v5419_v44, %v5417_v39  ;;  %v2749_v39 = vld [vmem:[#allocation2 + $0x19b0] sm:$0xff] }
 0x4a5   :  { %v2497_v40 = vadd.f32 %v2496_v37, %v2495_v49  ;;  %v2528_v16 = vrot.slane %v2527_v52, 2  ;;  %v2502_v62 = vrot.slane %v2501_v53, 2  ;;  %v2533_v63 = vadd.f32 %v2532_v56, %v2513_v13  ;;  %v5314_v37 = vld [vmem:[%s7463_s4 + $0x18] sm:$0xff]  ;;  %v2877_v44 = vld [vmem:[#allocation2 + $0x1db0] sm:$0xff] }
 0x4a6   :  { %v2585_v49 = vcombine.low %v2506_v55, %v5874_v41  ;;  %v2570_v13 = vrot.slane %v2562_v43, %v5656_v60  ;;  %v2745_v43 = vld [vmem:[#allocation2 + $0x1990] sm:$0xff] }
 0x4a7   :  { %v2498_v2 = vrot.slane %v2497_v40, 1  ;;  %v2529_v6 = vadd.f32 %v2528_v16, %v2527_v52  ;;  %v2503_v8 = vadd.f32 %v2502_v62, %v2501_v53  ;;  %v2534_v12 = vrot.slane %v2533_v63, 2 }
 0x4a8   :  { %v2593_v52 = vrot.slane %v2585_v49, %v5656_v60  ;;  %v2742_v49 = vld [vmem:[#allocation2 + $0x1978] sm:$0xff] }
 0x4a9   :  { %v2499_v17 = vadd.f32 %v2498_v2, %v2497_v40  ;;  %v2530_v15 = vrot.slane %v2529_v6, 1  ;;  %v2504_v19 = vrot.slane %v2503_v8, 1  ;;  %v2535_v20 = vadd.f32 %v2534_v12, %v2533_v63 }
 0x4ab   :  { %v2508_v25 = vmul.f32 0.125, %v2499_v17  ;;  %v2531_v47 = vadd.f32 %v2530_v15, %v2529_v6  ;;  %v2505_v48 = vadd.f32 %v2504_v19, %v2503_v8  ;;  %v2536_v26 = vrot.slane %v2535_v20, 1 }
 0x4ad   :  { %v2540_v28 = vmul.f32 0.125, %v2531_v47  ;;  %v2544_v29 = vmul.f32 %v2508_v25, %v2508_v25  ;;  %v2509_v30 = vmul.f32 0.125, %v2505_v48  ;;  %v2537_v31 = vadd.f32 %v2536_v26, %v2535_v20 }
 0x4af   :  { %v2548_v33 = vsub.f32 %v2540_v28, %v2544_v29  ;;  %v2541_v34 = vmul.f32 0.125, %v2537_v31  ;;  %v2545_v35 = vmul.f32 %v2509_v30, %v2509_v30  ;;  %v2586_v46 = vcombine.low %v2508_v25, %v2509_v30  ;;  %v2757_v31 = vld [vmem:[#allocation2 + $0x19f0] sm:$0xff] }
 0x4b1   :  { %v2552_v59 = vadd.f32 1e-05, %v2548_v33  ;;  %v2549_v61 = vsub.f32 %v2541_v34, %v2545_v35  ;;  %v2600_v51 = vrot.slane %v2586_v46, %v5656_v60  ;;  %v2754_v33 = vld [vmem:[#allocation2 + $0x19d8] sm:$0xff]  ;;  %v2753_v35 = vld [vmem:[#allocation2 + $0x19d0] sm:$0xff] }
 0x4b2   :  { %v2882_v34 = vld [vmem:[#allocation2 + $0x1dd8] sm:$0xff] }
 0x4b3   :  { %v2553_v38 = vadd.f32 1e-05, %v2549_v61  ;;  %5420 = vrsqrt.f32 %v2552_v59  ;;  %v2601_v56 = vcombine.low %v2593_v52, %v2600_v51  ;;  %v2881_v59 = vld [vmem:[#allocation2 + $0x1dd0] sm:$0xff]  ;;  %v2750_v61 = vld [vmem:[#allocation2 + $0x19b8] sm:$0xff] }
 0x4b4   :  { %v2874_v46 = vld [vmem:[#allocation2 + $0x1d98] sm:$0xff]  ;;  %v2741_v51 = vld [vmem:[#allocation2 + $0x1970] sm:$0xff] }
 0x4b5   :  { %5422 = vrsqrt.f32 %v2553_v38  ;;  %v2878_v38 = vld [vmem:[#allocation2 + $0x1db8] sm:$0xff]  ;;  %v2737_v52 = vld [vmem:[#allocation2 + $0x1950] sm:$0xff] }
 0x4c0   :  { %v5421_v45 = vpop.eup %5420 }
 0x4c2   :  { %v5423_v42 = vpop.eup %5422 }
 0x4c3   :  { %v2563_v50 = vcombine.low %v5421_v45, %v5423_v42  ;;  %v2746_v45 = vld [vmem:[#allocation2 + $0x1998] sm:$0xff]  ;;  %v2873_v42 = vld [vmem:[#allocation2 + $0x1d90] sm:$0xff] }
 0x4c5   :  { %v2577_v14 = vrot.slane %v2563_v50, %v5656_v60  ;;  %v2870_v50 = vld [vmem:[#allocation2 + $0x1d78] sm:$0xff] }
 0x4c7   :  { %v2578_v53 = vcombine.low %v2570_v13, %v2577_v14  ;;  %v2869_v13 = vld [vmem:[#allocation2 + $0x1d70] sm:$0xff]  ;;  %v2738_v14 = vld [vmem:[#allocation2 + $0x1958] sm:$0xff] }
 0x4c9   :  { %v2580_v57 = vmul.f32 %v5314_v37, %v2578_v53  ;;  %v2865_v53 = vld [vmem:[#allocation2 + $0x1d50] sm:$0xff] }
 0x4cb   :  { %v2603_v58 = vmul.f32 %v2601_v56, %v2580_v57  ;;  %v2616_v40 = vrot.slane %v2580_v57, %v5669_v10  ;;  %v2624_v41 = vrot.slane %v2580_v57, %v5667_v9  ;;  %v2612_v55 = vrot.slane %v2580_v57, %v5665_v7  ;;  %v2734_v56 = vld [vmem:[#allocation2 + $0x1938] sm:$0xff] }
 0x4cc   :  { %v2620_v16 = vrot.slane %v2580_v57, %v5671_v11  ;;  %v2862_v57 = vld [vmem:[#allocation2 + $0x1d38] sm:$0xff] }
 0x4cd   :  { %v2605_v62 = vrot.slane %v2603_v58, 7  ;;  %v2636_v63 = vrot.slane %v2616_v40, %v5665_v7  ;;  %v2644_v0 = vrot.slane %v2624_v41, %v5665_v7  ;;  %v2632_v1 = vrot.slane %v2612_v55, %v5665_v7  ;;  %v2733_v58 = vld [vmem:[#allocation2 + $0x1930] sm:$0xff]  ;;  %v2730_v41 = vld [vmem:[#allocation2 + $0x1918] sm:$0xff] }
 0x4ce   :  { %v2640_v2 = vrot.slane %v2620_v16, %v5665_v7  ;;  %v2861_v40 = vld [vmem:[#allocation2 + $0x1d30] sm:$0xff]  ;;  %v2858_v55 = vld [vmem:[#allocation2 + $0x1d18] sm:$0xff] }
 0x4cf   :  { %v2607_v6 = vsub.f32 %v5314_v37, %v2605_v62  ;;  %v2646_v15 = vmul.f32 %v2636_v63, %v5855_v3  ;;  %v2648_v19 = vmul.f32 %v2644_v0, %v5872_v36  ;;  %v2645_v20 = vmul.f32 %v2632_v1, %v5857_v4  ;;  %v2866_v37 = vld [vmem:[#allocation2 + $0x1d58] sm:$0xff]  ;;  %v2729_v16 = vld [vmem:[#allocation2 + $0x1910] sm:$0xff] }
 0x4d0   :  { %v2647_v24 = vmul.f32 %v2640_v2, %v5867_v5  ;;  %v2857_v62 = vld [vmem:[#allocation2 + $0x1d10] sm:$0xff]  ;;  %v2726_v63 = vld [vmem:[#allocation2 + $0x18f8] sm:$0xff] }
 0x4d1   :  { %v2657_v8 = vrot.slane %v2607_v6, %v5679_v21  ;;  %v2665_v12 = vrot.slane %v2607_v6, %v5681_v22  ;;  %v2653_v54 = vrot.slane %v2607_v6, %v5676_v18  ;;  %v2661_v17 = vrot.slane %v2607_v6, %v5683_v23  ;;  %v2854_v0 = vld [vmem:[#allocation2 + $0x1cf8] sm:$0xff]  ;;  %v2725_v1 = vld [vmem:[#allocation2 + $0x18f0] sm:$0xff] }
 0x4d2   :  { %v2853_v2 = vld [vmem:[#allocation2 + $0x1cf0] sm:$0xff]  ;;  %v2722_v6 = vld [vmem:[#allocation2 + $0x18d8] sm:$0xff] }
 0x4d3   :  { %v2677_v25 = vrot.slane %v2657_v8, %v5676_v18  ;;  %v2685_v47 = vrot.slane %v2665_v12, %v5676_v18  ;;  %v2673_v48 = vrot.slane %v2653_v54, %v5676_v18  ;;  %v2681_v26 = vrot.slane %v2661_v17, %v5676_v18  ;;  %v2850_v8 = vld [vmem:[#allocation2 + $0x1cd8] sm:$0xff]  ;;  %v2721_v12 = vld [vmem:[#allocation2 + $0x18d0] sm:$0xff] }
 0x4d4   :  { %v2849_v54 = vld [vmem:[#allocation2 + $0x1cd0] sm:$0xff]  ;;  %v2718_v17 = vld [vmem:[#allocation2 + $0x18b8] sm:$0xff] }
 0x4d5   :  { %v2687_v27 = vadd.f32 %v2677_v25, %v2646_v15  ;;  %v2689_v28 = vadd.f32 %v2685_v47, %v2648_v19  ;;  %v5911_v29 = vadd.f32 %v2673_v48, %v2645_v20  ;;  %v5913_v30 = vadd.f32 %v2681_v26, %v2647_v24  ;;  %v2846_v15 = vld [vmem:[#allocation2 + $0x1cb8] sm:$0xff]  ;;  %v2717_v19 = vld [vmem:[#allocation2 + $0x18b0] sm:$0xff] }
 0x4d6   :  { %v2845_v20 = vld [vmem:[#allocation2 + $0x1cb0] sm:$0xff]  ;;  %v2714_v24 = vld [vmem:[#allocation2 + $0x1898] sm:$0xff] }
 0x4d7   :  { %v2691_v3 = vmax.f32 %v2687_v27, 0.0  ;;  %v2693_v36 = vmax.f32 %v2689_v28, 0.0  ;;  %v2690_v4 = vmax.f32 %v5911_v29, 0.0  ;;  %v2692_v5 = vmax.f32 %v5913_v30, 0.0  ;;  %v2842_v25 = vld [vmem:[#allocation2 + $0x1c98] sm:$0xff]  ;;  %v2713_v47 = vld [vmem:[#allocation2 + $0x1890] sm:$0xff] }
 0x4d8   :  { %v2841_v48 = vld [vmem:[#allocation2 + $0x1c90] sm:$0xff]  ;;  %v2710_v26 = vld [vmem:[#allocation2 + $0x1878] sm:$0xff]  ;;  %v3503_v29 = vld [vmem:[#allocation2 + $0x21a8] sm:$0xff] }
 0x4d9   :  { %3015 = vmatprep.mubr.f32.mxu0 %v2691_v3  ;;  %3086 = vmatprep.mubr.f32.mxu1 %v2693_v36  ;;  %v2838_v27 = vld [vmem:[#allocation2 + $0x1c78] sm:$0xff]  ;;  %v2709_v28 = vld [vmem:[#allocation2 + $0x1870] sm:$0xff]  ;;  %v3502_v30 = vld [vmem:[#allocation2 + $0x21a0] sm:$0xff] }
 0x4da   :  { %3016 = vmatmul.mubr.f32.vlgmr.msra.gmra.mxu0 %v2690_v4  ;;  %3087 = vmatmul.mubr.f32.vlgmr.msra.gmra.mxu1 %v2692_v5 }
 0x4db   :  { %3094 = vmatpush1.msra.mxu0 %v2757_v31  ;;  %3165 = vmatpush1.msra.mxu1 %v2885_v32  ;;  %v2834_v31 = vld [vmem:[#allocation2 + $0x1c58] sm:$0xff]  ;;  %v2705_v32 = vld [vmem:[#allocation2 + $0x1850] sm:$0xff] }
 0x4dc   :  { %3095 = vmatprep.subr.mxu0 %v2754_v33  ;;  %3157 = vmatprep.mubr.f32.mxu0 %v2691_v3  ;;  %v2837_v3 = vld [vmem:[#allocation2 + $0x1c70] sm:$0xff] }
 0x4dd   :  { %3166 = vmatprep.subr.mxu1 %v2882_v34  ;;  %3228 = vmatprep.mubr.f32.mxu1 %v2693_v36  ;;  %v2706_v36 = vld [vmem:[#allocation2 + $0x1858] sm:$0xff]  ;;  %v2833_v33 = vld [vmem:[#allocation2 + $0x1c50] sm:$0xff] }
 0x4de   :  { %3096 = vmatpush1.msra.mxu0 %v2753_v35  ;;  %3167 = vmatpush1.msra.mxu1 %v2881_v59  ;;  %v2702_v34 = vld [vmem:[#allocation2 + $0x1838] sm:$0xff]  ;;  %v2701_v59 = vld [vmem:[#allocation2 + $0x1830] sm:$0xff] }
 0x4df   :  { %3097 = vmatprep.subr.mxu0 %v2750_v61  ;;  %3168 = vmatprep.subr.mxu1 %v2878_v38  ;;  %v2830_v35 = vld [vmem:[#allocation2 + $0x1c38] sm:$0xff]  ;;  %v2829_v61 = vld [vmem:[#allocation2 + $0x1c30] sm:$0xff] }
 0x4e0   :  { %3098 = vmatpush1.msra.mxu0 %v2749_v39  ;;  %3169 = vmatpush1.msra.mxu1 %v2877_v44  ;;  %v2698_v38 = vld [vmem:[#allocation2 + $0x1818] sm:$0xff]  ;;  %v2697_v44 = vld [vmem:[#allocation2 + $0x1810] sm:$0xff] }
 0x4e1   :  { %3099 = vmatprep.subr.mxu0 %v2746_v45  ;;  %3170 = vmatprep.subr.mxu1 %v2874_v46  ;;  %v2826_v39 = vld [vmem:[#allocation2 + $0x1c18] sm:$0xff]  ;;  %v2825_v45 = vld [vmem:[#allocation2 + $0x1c10] sm:$0xff] }
 0x4e2   :  { %3100 = vmatpush1.msra.mxu0 %v2745_v43  ;;  %3171 = vmatpush1.msra.mxu1 %v2873_v42  ;;  %v2822_v46 = vld [vmem:[#allocation2 + $0x1bf8] sm:$0xff]  ;;  %v2821_v42 = vld [vmem:[#allocation2 + $0x1bf0] sm:$0xff] }
 0x4e3   :  { %3101 = vmatprep.subr.mxu0 %v2742_v49  ;;  %3172 = vmatprep.subr.mxu1 %v2870_v50  ;;  %v2950_v43 = vld [vmem:[#allocation2 + $0x1ff8] sm:$0xff]  ;;  %v2949_v49 = vld [vmem:[#allocation2 + $0x1ff0] sm:$0xff] }
 0x4e4   :  { %3102 = vmatpush1.msra.mxu0 %v2741_v51  ;;  %3173 = vmatpush1.msra.mxu1 %v2869_v13  ;;  %v2818_v50 = vld [vmem:[#allocation2 + $0x1bd8] sm:$0xff]  ;;  %v2817_v13 = vld [vmem:[#allocation2 + $0x1bd0] sm:$0xff] }
 0x4e5   :  { %3103 = vmatprep.subr.mxu0 %v2738_v14  ;;  %3174 = vmatprep.subr.mxu1 %v2866_v37  ;;  %v2946_v51 = vld [vmem:[#allocation2 + $0x1fd8] sm:$0xff]  ;;  %v2945_v14 = vld [vmem:[#allocation2 + $0x1fd0] sm:$0xff] }
 0x4e6   :  { %3104 = vmatpush1.msra.mxu0 %v2737_v52  ;;  %3175 = vmatpush1.msra.mxu1 %v2865_v53  ;;  %v2814_v37 = vld [vmem:[#allocation2 + $0x1bb8] sm:$0xff]  ;;  %v2813_v53 = vld [vmem:[#allocation2 + $0x1bb0] sm:$0xff] }
 0x4e7   :  { %3105 = vmatprep.subr.mxu0 %v2734_v56  ;;  %3176 = vmatprep.subr.mxu1 %v2862_v57  ;;  %v2942_v52 = vld [vmem:[#allocation2 + $0x1fb8] sm:$0xff]  ;;  %v2941_v56 = vld [vmem:[#allocation2 + $0x1fb0] sm:$0xff] }
 0x4e8   :  { %3106 = vmatpush1.msra.mxu0 %v2733_v58  ;;  %3177 = vmatpush1.msra.mxu1 %v2861_v40  ;;  %v2810_v57 = vld [vmem:[#allocation2 + $0x1b98] sm:$0xff]  ;;  %v2809_v40 = vld [vmem:[#allocation2 + $0x1b90] sm:$0xff] }
 0x4e9   :  { %3107 = vmatprep.subr.mxu0 %v2730_v41  ;;  %3178 = vmatprep.subr.mxu1 %v2858_v55  ;;  %v2938_v58 = vld [vmem:[#allocation2 + $0x1f98] sm:$0xff]  ;;  %v2937_v41 = vld [vmem:[#allocation2 + $0x1f90] sm:$0xff] }
 0x4ea   :  { %3108 = vmatpush1.msra.mxu0 %v2729_v16  ;;  %3179 = vmatpush1.msra.mxu1 %v2857_v62  ;;  %v2806_v55 = vld [vmem:[#allocation2 + $0x1b78] sm:$0xff]  ;;  %v2805_v62 = vld [vmem:[#allocation2 + $0x1b70] sm:$0xff] }
 0x4eb   :  { %3109 = vmatprep.subr.mxu0 %v2726_v63  ;;  %3180 = vmatprep.subr.mxu1 %v2854_v0  ;;  %v2934_v16 = vld [vmem:[#allocation2 + $0x1f78] sm:$0xff]  ;;  %v2933_v63 = vld [vmem:[#allocation2 + $0x1f70] sm:$0xff] }
 0x4ec   :  { %3110 = vmatpush1.msra.mxu0 %v2725_v1  ;;  %3181 = vmatpush1.msra.mxu1 %v2853_v2  ;;  %v2802_v0 = vld [vmem:[#allocation2 + $0x1b58] sm:$0xff]  ;;  %v2801_v2 = vld [vmem:[#allocation2 + $0x1b50] sm:$0xff] }
 0x4ed   :  { %3111 = vmatprep.subr.mxu0 %v2722_v6  ;;  %3182 = vmatprep.subr.mxu1 %v2850_v8  ;;  %v2930_v1 = vld [vmem:[#allocation2 + $0x1f58] sm:$0xff]  ;;  %v2929_v6 = vld [vmem:[#allocation2 + $0x1f50] sm:$0xff] }
 0x4ee   :  { %3112 = vmatpush1.msra.mxu0 %v2721_v12  ;;  %3183 = vmatpush1.msra.mxu1 %v2849_v54  ;;  %v2798_v8 = vld [vmem:[#allocation2 + $0x1b38] sm:$0xff]  ;;  %v2797_v54 = vld [vmem:[#allocation2 + $0x1b30] sm:$0xff] }
 0x4ef   :  { %3113 = vmatprep.subr.mxu0 %v2718_v17  ;;  %3184 = vmatprep.subr.mxu1 %v2846_v15  ;;  %v2926_v12 = vld [vmem:[#allocation2 + $0x1f38] sm:$0xff]  ;;  %v2925_v17 = vld [vmem:[#allocation2 + $0x1f30] sm:$0xff] }
 0x4f0   :  { %3114 = vmatpush1.msra.mxu0 %v2717_v19  ;;  %3185 = vmatpush1.msra.mxu1 %v2845_v20  ;;  %v2794_v15 = vld [vmem:[#allocation2 + $0x1b18] sm:$0xff]  ;;  %v2793_v20 = vld [vmem:[#allocation2 + $0x1b10] sm:$0xff] }
 0x4f1   :  { %3115 = vmatprep.subr.mxu0 %v2714_v24  ;;  %3186 = vmatprep.subr.mxu1 %v2842_v25  ;;  %v2922_v19 = vld [vmem:[#allocation2 + $0x1f18] sm:$0xff]  ;;  %v2921_v24 = vld [vmem:[#allocation2 + $0x1f10] sm:$0xff] }
 0x4f2   :  { %3116 = vmatpush1.msra.mxu0 %v2713_v47  ;;  %3187 = vmatpush1.msra.mxu1 %v2841_v48  ;;  %v2790_v25 = vld [vmem:[#allocation2 + $0x1af8] sm:$0xff]  ;;  %v2789_v48 = vld [vmem:[#allocation2 + $0x1af0] sm:$0xff] }
 0x4f3   :  { %3117 = vmatprep.subr.mxu0 %v2710_v26  ;;  %3188 = vmatprep.subr.mxu1 %v2838_v27  ;;  %v2918_v47 = vld [vmem:[#allocation2 + $0x1ef8] sm:$0xff]  ;;  %v2917_v26 = vld [vmem:[#allocation2 + $0x1ef0] sm:$0xff] }
 0x4f4   :  { %3118 = vmatpush1.msra.mxu0 %v2709_v28  ;;  %3189 = vmatpush1.msra.mxu1 %v2837_v3  ;;  %v2786_v27 = vld [vmem:[#allocation2 + $0x1ad8] sm:$0xff]  ;;  %v2785_v3 = vld [vmem:[#allocation2 + $0x1ad0] sm:$0xff] }
 0x4f5   :  { %3119 = vmatprep.subr.mxu0 %v2706_v36  ;;  %3190 = vmatprep.subr.mxu1 %v2834_v31  ;;  %v2914_v28 = vld [vmem:[#allocation2 + $0x1ed8] sm:$0xff]  ;;  %v2913_v36 = vld [vmem:[#allocation2 + $0x1ed0] sm:$0xff] }
 0x4f6   :  { %3120 = vmatpush1.msra.mxu0 %v2705_v32  ;;  %3191 = vmatpush1.msra.mxu1 %v2833_v33  ;;  %v2782_v31 = vld [vmem:[#allocation2 + $0x1ab8] sm:$0xff]  ;;  %v2781_v33 = vld [vmem:[#allocation2 + $0x1ab0] sm:$0xff] }
 0x4f7   :  { %3121 = vmatprep.subr.mxu0 %v2702_v34  ;;  %3192 = vmatprep.subr.mxu1 %v2830_v35  ;;  %v2910_v32 = vld [vmem:[#allocation2 + $0x1eb8] sm:$0xff]  ;;  %v2909_v34 = vld [vmem:[#allocation2 + $0x1eb0] sm:$0xff] }
 0x4f8   :  { %3122 = vmatpush1.msra.mxu0 %v2701_v59  ;;  %3193 = vmatpush1.msra.mxu1 %v2829_v61  ;;  %v2778_v35 = vld [vmem:[#allocation2 + $0x1a98] sm:$0xff]  ;;  %v2777_v61 = vld [vmem:[#allocation2 + $0x1a90] sm:$0xff] }
 0x4f9   :  { %3123 = vmatprep.subr.mxu0 %v2698_v38  ;;  %3194 = vmatprep.subr.mxu1 %v2826_v39  ;;  %v2906_v59 = vld [vmem:[#allocation2 + $0x1e98] sm:$0xff]  ;;  %v2905_v38 = vld [vmem:[#allocation2 + $0x1e90] sm:$0xff] }
 0x4fa   :  { %3124 = vmatpush1.msra.mxu0 %v2697_v44  ;;  %3195 = vmatpush1.msra.mxu1 %v2825_v45  ;;  %v2774_v39 = vld [vmem:[#allocation2 + $0x1a78] sm:$0xff]  ;;  %v2773_v45 = vld [vmem:[#allocation2 + $0x1a70] sm:$0xff] }
 0x4fb   :  { %3125 = vmatprep.subr.mxu0 %v2822_v46  ;;  %3196 = vmatprep.subr.mxu1 %v2950_v43  ;;  %v2902_v44 = vld [vmem:[#allocation2 + $0x1e78] sm:$0xff]  ;;  %v2901_v46 = vld [vmem:[#allocation2 + $0x1e70] sm:$0xff] }
 0x4fc   :  { %3126 = vmatpush2.msra.mxu0 %v2821_v42  ;;  %3197 = vmatpush2.msra.mxu1 %v2949_v49  ;;  %v2770_v43 = vld [vmem:[#allocation2 + $0x1a58] sm:$0xff]  ;;  %v2769_v49 = vld [vmem:[#allocation2 + $0x1a50] sm:$0xff] }
 0x4fd   :  { %3127 = vmatprep.subr.mxu0 %v2818_v50  ;;  %3198 = vmatprep.subr.mxu1 %v2946_v51  ;;  %v2898_v42 = vld [vmem:[#allocation2 + $0x1e58] sm:$0xff]  ;;  %v2897_v50 = vld [vmem:[#allocation2 + $0x1e50] sm:$0xff] }
 0x4fe   :  { %3128 = vmatpush2.msra.mxu0 %v2817_v13  ;;  %3199 = vmatpush2.msra.mxu1 %v2945_v14  ;;  %v2766_v51 = vld [vmem:[#allocation2 + $0x1a38] sm:$0xff]  ;;  %v2765_v14 = vld [vmem:[#allocation2 + $0x1a30] sm:$0xff] }
 0x4ff   :  { %3129 = vmatprep.subr.mxu0 %v2814_v37  ;;  %3200 = vmatprep.subr.mxu1 %v2942_v52  ;;  %v2894_v13 = vld [vmem:[#allocation2 + $0x1e38] sm:$0xff]  ;;  %v2893_v37 = vld [vmem:[#allocation2 + $0x1e30] sm:$0xff] }
 0x500   :  { %3130 = vmatpush2.msra.mxu0 %v2813_v53  ;;  %3201 = vmatpush2.msra.mxu1 %v2941_v56  ;;  %v2762_v52 = vld [vmem:[#allocation2 + $0x1a18] sm:$0xff]  ;;  %v2761_v56 = vld [vmem:[#allocation2 + $0x1a10] sm:$0xff] }
 0x501   :  { %3131 = vmatprep.subr.mxu0 %v2810_v57  ;;  %3202 = vmatprep.subr.mxu1 %v2938_v58  ;;  %v2890_v53 = vld [vmem:[#allocation2 + $0x1e18] sm:$0xff]  ;;  %v2889_v57 = vld [vmem:[#allocation2 + $0x1e10] sm:$0xff]  ;;  %v3511_v58 = vld [vmem:[#allocation2 + $0x21e8] sm:$0xff] }
 0x502   :  { %3132 = vmatpush2.msra.mxu0 %v2809_v40  ;;  %3203 = vmatpush2.msra.mxu1 %v2937_v41  ;;  %v3639_v40 = vld [vmem:[#allocation2 + $0x25e8] sm:$0xff]  ;;  %v3510_v41 = vld [vmem:[#allocation2 + $0x21e0] sm:$0xff] }
 0x503   :  { %3133 = vmatprep.subr.mxu0 %v2806_v55  ;;  %3204 = vmatprep.subr.mxu1 %v2934_v16  ;;  %v3638_v55 = vld [vmem:[#allocation2 + $0x25e0] sm:$0xff]  ;;  %v3507_v16 = vld [vmem:[#allocation2 + $0x21c8] sm:$0xff] }
 0x504   :  { %3134 = vmatpush2.msra.mxu0 %v2805_v62  ;;  %3205 = vmatpush2.msra.mxu1 %v2933_v63  ;;  %v3635_v62 = vld [vmem:[#allocation2 + $0x25c8] sm:$0xff]  ;;  %v3506_v63 = vld [vmem:[#allocation2 + $0x21c0] sm:$0xff] }
 0x505   :  { %3135 = vmatprep.subr.mxu0 %v2802_v0  ;;  %3206 = vmatprep.subr.mxu1 %v2930_v1  ;;  %v3634_v0 = vld [vmem:[#allocation2 + $0x25c0] sm:$0xff]  ;;  %v3499_v1 = vld [vmem:[#allocation2 + $0x2188] sm:$0xff] }
 0x506   :  { %3136 = vmatpush2.msra.mxu0 %v2801_v2  ;;  %3207 = vmatpush2.msra.mxu1 %v2929_v6  ;;  %v3627_v2 = vld [vmem:[#allocation2 + $0x2588] sm:$0xff]  ;;  %v3498_v6 = vld [vmem:[#allocation2 + $0x2180] sm:$0xff] }
 0x507   :  { %3137 = vmatprep.subr.mxu0 %v2798_v8  ;;  %3208 = vmatprep.subr.mxu1 %v2926_v12  ;;  %v3626_v8 = vld [vmem:[#allocation2 + $0x2580] sm:$0xff]  ;;  %v3495_v12 = vld [vmem:[#allocation2 + $0x2168] sm:$0xff] }
 0x508   :  { %3138 = vmatpush2.msra.mxu0 %v2797_v54  ;;  %3209 = vmatpush2.msra.mxu1 %v2925_v17  ;;  %v3623_v54 = vld [vmem:[#allocation2 + $0x2568] sm:$0xff]  ;;  %v3494_v17 = vld [vmem:[#allocation2 + $0x2160] sm:$0xff] }
 0x509   :  { %3139 = vmatprep.subr.mxu0 %v2794_v15  ;;  %3210 = vmatprep.subr.mxu1 %v2922_v19  ;;  %v3622_v15 = vld [vmem:[#allocation2 + $0x2560] sm:$0xff]  ;;  %v3491_v19 = vld [vmem:[#allocation2 + $0x2148] sm:$0xff] }
 0x50a   :  { %3140 = vmatpush2.msra.mxu0 %v2793_v20  ;;  %3211 = vmatpush2.msra.mxu1 %v2921_v24  ;;  %v3619_v20 = vld [vmem:[#allocation2 + $0x2548] sm:$0xff]  ;;  %v3490_v24 = vld [vmem:[#allocation2 + $0x2140] sm:$0xff] }
 0x50b   :  { %3141 = vmatprep.subr.mxu0 %v2790_v25  ;;  %3212 = vmatprep.subr.mxu1 %v2918_v47  ;;  %v3618_v25 = vld [vmem:[#allocation2 + $0x2540] sm:$0xff]  ;;  %v3487_v47 = vld [vmem:[#allocation2 + $0x2128] sm:$0xff] }
 0x50c   :  { %3142 = vmatpush2.msra.mxu0 %v2789_v48  ;;  %3213 = vmatpush2.msra.mxu1 %v2917_v26  ;;  %v3615_v48 = vld [vmem:[#allocation2 + $0x2528] sm:$0xff]  ;;  %v3486_v26 = vld [vmem:[#allocation2 + $0x2120] sm:$0xff] }
 0x50d   :  { %3143 = vmatprep.subr.mxu0 %v2786_v27  ;;  %3214 = vmatprep.subr.mxu1 %v2914_v28  ;;  %v3614_v27 = vld [vmem:[#allocation2 + $0x2520] sm:$0xff]  ;;  %v3483_v28 = vld [vmem:[#allocation2 + $0x2108] sm:$0xff] }
 0x50e   :  { %3144 = vmatpush2.msra.mxu0 %v2785_v3  ;;  %3215 = vmatpush2.msra.mxu1 %v2913_v36  ;;  %v3611_v3 = vld [vmem:[#allocation2 + $0x2508] sm:$0xff]  ;;  %v3482_v36 = vld [vmem:[#allocation2 + $0x2100] sm:$0xff] }
 0x50f   :  { %3145 = vmatprep.subr.mxu0 %v2782_v31  ;;  %3216 = vmatprep.subr.mxu1 %v2910_v32  ;;  %v3610_v31 = vld [vmem:[#allocation2 + $0x2500] sm:$0xff]  ;;  %v3479_v32 = vld [vmem:[#allocation2 + $0x20e8] sm:$0xff] }
 0x510   :  { %3146 = vmatpush2.msra.mxu0 %v2781_v33  ;;  %3217 = vmatpush2.msra.mxu1 %v2909_v34  ;;  %v3607_v33 = vld [vmem:[#allocation2 + $0x24e8] sm:$0xff]  ;;  %v3478_v34 = vld [vmem:[#allocation2 + $0x20e0] sm:$0xff] }
 0x511   :  { %3147 = vmatprep.subr.mxu0 %v2778_v35  ;;  %3218 = vmatprep.subr.mxu1 %v2906_v59  ;;  %v3606_v35 = vld [vmem:[#allocation2 + $0x24e0] sm:$0xff]  ;;  %v3475_v59 = vld [vmem:[#allocation2 + $0x20c8] sm:$0xff] }
 0x512   :  { %3148 = vmatpush2.msra.mxu0 %v2777_v61  ;;  %3219 = vmatpush2.msra.mxu1 %v2905_v38  ;;  %v3603_v61 = vld [vmem:[#allocation2 + $0x24c8] sm:$0xff]  ;;  %v3474_v38 = vld [vmem:[#allocation2 + $0x20c0] sm:$0xff] }
 0x513   :  { %3149 = vmatprep.subr.mxu0 %v2774_v39  ;;  %3220 = vmatprep.subr.mxu1 %v2902_v44  ;;  %v3602_v39 = vld [vmem:[#allocation2 + $0x24c0] sm:$0xff]  ;;  %v3471_v44 = vld [vmem:[#allocation2 + $0x20a8] sm:$0xff] }
 0x514   :  { %3150 = vmatpush2.msra.mxu0 %v2773_v45  ;;  %3221 = vmatpush2.msra.mxu1 %v2901_v46  ;;  %v3599_v45 = vld [vmem:[#allocation2 + $0x24a8] sm:$0xff]  ;;  %v3470_v46 = vld [vmem:[#allocation2 + $0x20a0] sm:$0xff] }
 0x515   :  { %3151 = vmatprep.subr.mxu0 %v2770_v43  ;;  %3222 = vmatprep.subr.mxu1 %v2898_v42  ;;  %v3598_v43 = vld [vmem:[#allocation2 + $0x24a0] sm:$0xff]  ;;  %v3467_v42 = vld [vmem:[#allocation2 + $0x2088] sm:$0xff] }
 0x516   :  { %3152 = vmatpush2.msra.mxu0 %v2769_v49  ;;  %3223 = vmatpush2.msra.mxu1 %v2897_v50  ;;  %v3595_v49 = vld [vmem:[#allocation2 + $0x2488] sm:$0xff]  ;;  %v3466_v50 = vld [vmem:[#allocation2 + $0x2080] sm:$0xff] }
 0x517   :  { %3153 = vmatprep.subr.mxu0 %v2766_v51  ;;  %3224 = vmatprep.subr.mxu1 %v2894_v13  ;;  %v3594_v51 = vld [vmem:[#allocation2 + $0x2480] sm:$0xff]  ;;  %v3463_v13 = vld [vmem:[#allocation2 + $0x2068] sm:$0xff] }
 0x518   :  { %3154 = vmatpush2.msra.mxu0 %v2765_v14  ;;  %3225 = vmatpush2.msra.mxu1 %v2893_v37  ;;  %v3591_v14 = vld [vmem:[#allocation2 + $0x2468] sm:$0xff]  ;;  %v3462_v37 = vld [vmem:[#allocation2 + $0x2060] sm:$0xff] }
 0x519   :  { %3155 = vmatprep.subr.mxu0 %v2762_v52  ;;  %3226 = vmatprep.subr.mxu1 %v2890_v53  ;;  %v3590_v52 = vld [vmem:[#allocation2 + $0x2460] sm:$0xff]  ;;  %v3459_v53 = vld [vmem:[#allocation2 + $0x2048] sm:$0xff] }
 0x51a   :  { %3156 = vmatpush2.msra.mxu0 %v2761_v56  ;;  %3227 = vmatpush2.msra.mxu1 %v2889_v57  ;;  %v3587_v56 = vld [vmem:[#allocation2 + $0x2448] sm:$0xff]  ;;  %v3458_v57 = vld [vmem:[#allocation2 + $0x2040] sm:$0xff] }
 0x51b   :  { %3158 = vmatmul.mubr.f32.vlgmr.msra.gmra.mxu0 %v2690_v4  ;;  %3229 = vmatmul.mubr.f32.vlgmr.msra.gmra.mxu1 %v2692_v5  ;;  %v3631_v4 = vld [vmem:[#allocation2 + $0x25a8] sm:$0xff]  ;;  %v3630_v5 = vld [vmem:[#allocation2 + $0x25a0] sm:$0xff] }
 0x51c   :  { %3706 = vmatprep.subr.mxu0 %v3511_v58  ;;  %3777 = vmatprep.subr.mxu1 %v3639_v40  ;;  %v3586_v58 = vld [vmem:[#allocation2 + $0x2440] sm:$0xff]  ;;  %v3455_v40 = vld [vmem:[#allocation2 + $0x2028] sm:$0xff] }
 0x51d   :  { %3707 = vmatpush1.msra.mxu0 %v3510_v41  ;;  %3778 = vmatpush1.msra.mxu1 %v3638_v55  ;;  %v3583_v41 = vld [vmem:[#allocation2 + $0x2428] sm:$0xff]  ;;  %v3454_v55 = vld [vmem:[#allocation2 + $0x2020] sm:$0xff] }
 0x51e   :  { %3708 = vmatprep.subr.mxu0 %v3507_v16  ;;  %3779 = vmatprep.subr.mxu1 %v3635_v62  ;;  %v3582_v16 = vld [vmem:[#allocation2 + $0x2420] sm:$0xff]  ;;  %v3451_v62 = vld [vmem:[#allocation2 + $0x2008] sm:$0xff] }
 0x51f   :  { %3709 = vmatpush1.msra.mxu0 %v3506_v63  ;;  %3780 = vmatpush1.msra.mxu1 %v3634_v0  ;;  %v3579_v63 = vld [vmem:[#allocation2 + $0x2408] sm:$0xff]  ;;  %v3450_v0 = vld [vmem:[#allocation2 + $0x2000] sm:$0xff] }
 0x520   :  { %3710 = vmatprep.subr.mxu0 %v3503_v29  ;;  %3781 = vmatprep.subr.mxu1 %v3631_v4  ;;  %v3578_v29 = vld [vmem:[#allocation2 + $0x2400] sm:$0xff]  ;;  %v3575_v4 = vld [vmem:[#allocation2 + $0x23e8] sm:$0xff] }
 0x521   :  { %3711 = vmatpush1.msra.mxu0 %v3502_v30  ;;  %3782 = vmatpush1.msra.mxu1 %v3630_v5  ;;  %v3703_v30 = vld [vmem:[#allocation2 + $0x27e8] sm:$0xff]  ;;  %v3574_v5 = vld [vmem:[#allocation2 + $0x23e0] sm:$0xff] }
 0x522   :  { %3712 = vmatprep.subr.mxu0 %v3499_v1  ;;  %3783 = vmatprep.subr.mxu1 %v3627_v2  ;;  %v3702_v1 = vld [vmem:[#allocation2 + $0x27e0] sm:$0xff]  ;;  %v3571_v2 = vld [vmem:[#allocation2 + $0x23c8] sm:$0xff] }
 0x523   :  { %3713 = vmatpush1.msra.mxu0 %v3498_v6  ;;  %3784 = vmatpush1.msra.mxu1 %v3626_v8  ;;  %v3699_v6 = vld [vmem:[#allocation2 + $0x27c8] sm:$0xff]  ;;  %v3570_v8 = vld [vmem:[#allocation2 + $0x23c0] sm:$0xff] }
 0x524   :  { %3714 = vmatprep.subr.mxu0 %v3495_v12  ;;  %3785 = vmatprep.subr.mxu1 %v3623_v54  ;;  %v3698_v12 = vld [vmem:[#allocation2 + $0x27c0] sm:$0xff]  ;;  %v3567_v54 = vld [vmem:[#allocation2 + $0x23a8] sm:$0xff] }
 0x525   :  { %3715 = vmatpush1.msra.mxu0 %v3494_v17  ;;  %3786 = vmatpush1.msra.mxu1 %v3622_v15  ;;  %v3695_v17 = vld [vmem:[#allocation2 + $0x27a8] sm:$0xff]  ;;  %v3566_v15 = vld [vmem:[#allocation2 + $0x23a0] sm:$0xff] }
 0x526   :  { %3716 = vmatprep.subr.mxu0 %v3491_v19  ;;  %3787 = vmatprep.subr.mxu1 %v3619_v20  ;;  %v3694_v19 = vld [vmem:[#allocation2 + $0x27a0] sm:$0xff]  ;;  %v3563_v20 = vld [vmem:[#allocation2 + $0x2388] sm:$0xff] }
 0x527   :  { %3717 = vmatpush1.msra.mxu0 %v3490_v24  ;;  %3788 = vmatpush1.msra.mxu1 %v3618_v25  ;;  %v3691_v24 = vld [vmem:[#allocation2 + $0x2788] sm:$0xff]  ;;  %v3562_v25 = vld [vmem:[#allocation2 + $0x2380] sm:$0xff] }
 0x528   :  { %3718 = vmatprep.subr.mxu0 %v3487_v47  ;;  %3789 = vmatprep.subr.mxu1 %v3615_v48  ;;  %v3690_v47 = vld [vmem:[#allocation2 + $0x2780] sm:$0xff]  ;;  %v3559_v48 = vld [vmem:[#allocation2 + $0x2368] sm:$0xff] }
 0x529   :  { %3719 = vmatpush1.msra.mxu0 %v3486_v26  ;;  %3790 = vmatpush1.msra.mxu1 %v3614_v27  ;;  %v3687_v26 = vld [vmem:[#allocation2 + $0x2768] sm:$0xff]  ;;  %v3558_v27 = vld [vmem:[#allocation2 + $0x2360] sm:$0xff] }
 0x52a   :  { %3720 = vmatprep.subr.mxu0 %v3483_v28  ;;  %3791 = vmatprep.subr.mxu1 %v3611_v3  ;;  %v3686_v28 = vld [vmem:[#allocation2 + $0x2760] sm:$0xff]  ;;  %v3555_v3 = vld [vmem:[#allocation2 + $0x2348] sm:$0xff] }
 0x52b   :  { %3721 = vmatpush1.msra.mxu0 %v3482_v36  ;;  %3792 = vmatpush1.msra.mxu1 %v3610_v31  ;;  %v3683_v36 = vld [vmem:[#allocation2 + $0x2748] sm:$0xff]  ;;  %v3554_v31 = vld [vmem:[#allocation2 + $0x2340] sm:$0xff] }
 0x52c   :  { %3722 = vmatprep.subr.mxu0 %v3479_v32  ;;  %3793 = vmatprep.subr.mxu1 %v3607_v33  ;;  %v3682_v32 = vld [vmem:[#allocation2 + $0x2740] sm:$0xff]  ;;  %v3551_v33 = vld [vmem:[#allocation2 + $0x2328] sm:$0xff] }
 0x52d   :  { %3723 = vmatpush1.msra.mxu0 %v3478_v34  ;;  %3794 = vmatpush1.msra.mxu1 %v3606_v35  ;;  %v3679_v34 = vld [vmem:[#allocation2 + $0x2728] sm:$0xff]  ;;  %v3550_v35 = vld [vmem:[#allocation2 + $0x2320] sm:$0xff] }
 0x52e   :  { %3724 = vmatprep.subr.mxu0 %v3475_v59  ;;  %3795 = vmatprep.subr.mxu1 %v3603_v61  ;;  %v3678_v59 = vld [vmem:[#allocation2 + $0x2720] sm:$0xff]  ;;  %v3547_v61 = vld [vmem:[#allocation2 + $0x2308] sm:$0xff] }
 0x52f   :  { %3725 = vmatpush1.msra.mxu0 %v3474_v38  ;;  %3796 = vmatpush1.msra.mxu1 %v3602_v39  ;;  %v3675_v38 = vld [vmem:[#allocation2 + $0x2708] sm:$0xff]  ;;  %v3546_v39 = vld [vmem:[#allocation2 + $0x2300] sm:$0xff] }
 0x530   :  { %3726 = vmatprep.subr.mxu0 %v3471_v44  ;;  %3797 = vmatprep.subr.mxu1 %v3599_v45  ;;  %v3674_v44 = vld [vmem:[#allocation2 + $0x2700] sm:$0xff]  ;;  %v3543_v45 = vld [vmem:[#allocation2 + $0x22e8] sm:$0xff] }
 0x531   :  { %3727 = vmatpush1.msra.mxu0 %v3470_v46  ;;  %3798 = vmatpush1.msra.mxu1 %v3598_v43  ;;  %v3671_v46 = vld [vmem:[#allocation2 + $0x26e8] sm:$0xff]  ;;  %v3542_v43 = vld [vmem:[#allocation2 + $0x22e0] sm:$0xff] }
 0x532   :  { %3728 = vmatprep.subr.mxu0 %v3467_v42  ;;  %3799 = vmatprep.subr.mxu1 %v3595_v49  ;;  %v3670_v42 = vld [vmem:[#allocation2 + $0x26e0] sm:$0xff]  ;;  %v3539_v49 = vld [vmem:[#allocation2 + $0x22c8] sm:$0xff] }
 0x533   :  { %3729 = vmatpush1.msra.mxu0 %v3466_v50  ;;  %3800 = vmatpush1.msra.mxu1 %v3594_v51  ;;  %v3667_v50 = vld [vmem:[#allocation2 + $0x26c8] sm:$0xff]  ;;  %v3538_v51 = vld [vmem:[#allocation2 + $0x22c0] sm:$0xff] }
 0x534   :  { %3730 = vmatprep.subr.mxu0 %v3463_v13  ;;  %3801 = vmatprep.subr.mxu1 %v3591_v14  ;;  %v3666_v13 = vld [vmem:[#allocation2 + $0x26c0] sm:$0xff]  ;;  %v3535_v14 = vld [vmem:[#allocation2 + $0x22a8] sm:$0xff] }
 0x535   :  { %3731 = vmatpush1.msra.mxu0 %v3462_v37  ;;  %3802 = vmatpush1.msra.mxu1 %v3590_v52  ;;  %v3663_v37 = vld [vmem:[#allocation2 + $0x26a8] sm:$0xff]  ;;  %v3534_v52 = vld [vmem:[#allocation2 + $0x22a0] sm:$0xff] }
 0x536   :  { %3732 = vmatprep.subr.mxu0 %v3459_v53  ;;  %3803 = vmatprep.subr.mxu1 %v3587_v56  ;;  %v3662_v53 = vld [vmem:[#allocation2 + $0x26a0] sm:$0xff]  ;;  %v3531_v56 = vld [vmem:[#allocation2 + $0x2288] sm:$0xff] }
 0x537   :  { %3733 = vmatpush1.msra.mxu0 %v3458_v57  ;;  %3804 = vmatpush1.msra.mxu1 %v3586_v58  ;;  %v3659_v57 = vld [vmem:[#allocation2 + $0x2688] sm:$0xff]  ;;  %v3530_v58 = vld [vmem:[#allocation2 + $0x2280] sm:$0xff] }
 0x538   :  { %3734 = vmatprep.subr.mxu0 %v3455_v40  ;;  %3805 = vmatprep.subr.mxu1 %v3583_v41  ;;  %v3658_v40 = vld [vmem:[#allocation2 + $0x2680] sm:$0xff]  ;;  %v3527_v41 = vld [vmem:[#allocation2 + $0x2268] sm:$0xff] }
 0x539   :  { %3735 = vmatpush1.msra.mxu0 %v3454_v55  ;;  %3806 = vmatpush1.msra.mxu1 %v3582_v16  ;;  %v3655_v55 = vld [vmem:[#allocation2 + $0x2668] sm:$0xff]  ;;  %v3526_v16 = vld [vmem:[#allocation2 + $0x2260] sm:$0xff] }
 0x53a   :  { %3736 = vmatprep.subr.mxu0 %v3451_v62  ;;  %3807 = vmatprep.subr.mxu1 %v3579_v63  ;;  %v3654_v62 = vld [vmem:[#allocation2 + $0x2660] sm:$0xff]  ;;  %v3523_v63 = vld [vmem:[#allocation2 + $0x2248] sm:$0xff] }
 0x53b   :  { %3737 = vmatpush1.msra.mxu0 %v3450_v0  ;;  %3808 = vmatpush1.msra.mxu1 %v3578_v29  ;;  %v3651_v0 = vld [vmem:[#allocation2 + $0x2648] sm:$0xff]  ;;  %v3522_v29 = vld [vmem:[#allocation2 + $0x2240] sm:$0xff] }
 0x53c   :  { %3738 = vmatprep.subr.mxu0 %v3575_v4  ;;  %3809 = vmatprep.subr.mxu1 %v3703_v30  ;;  %v3650_v4 = vld [vmem:[#allocation2 + $0x2640] sm:$0xff]  ;;  %v3519_v30 = vld [vmem:[#allocation2 + $0x2228] sm:$0xff] }
 0x53d   :  { %3739 = vmatpush2.msra.mxu0 %v3574_v5  ;;  %3810 = vmatpush2.msra.mxu1 %v3702_v1  ;;  %v3647_v5 = vld [vmem:[#allocation2 + $0x2628] sm:$0xff]  ;;  %v3518_v1 = vld [vmem:[#allocation2 + $0x2220] sm:$0xff] }
 0x53e   :  { %3740 = vmatprep.subr.mxu0 %v3571_v2  ;;  %3811 = vmatprep.subr.mxu1 %v3699_v6  ;;  %v3646_v2 = vld [vmem:[#allocation2 + $0x2620] sm:$0xff]  ;;  %v3515_v6 = vld [vmem:[#allocation2 + $0x2208] sm:$0xff] }
 0x53f   :  { %3741 = vmatpush2.msra.mxu0 %v3570_v8  ;;  %3812 = vmatpush2.msra.mxu1 %v3698_v12  ;;  %v3643_v8 = vld [vmem:[#allocation2 + $0x2608] sm:$0xff]  ;;  %v3514_v12 = vld [vmem:[#allocation2 + $0x2200] sm:$0xff] }
 0x540   :  { %3742 = vmatprep.subr.mxu0 %v3567_v54  ;;  %3813 = vmatprep.subr.mxu1 %v3695_v17  ;;  %v3642_v54 = vld [vmem:[#allocation2 + $0x2600] sm:$0xff]  ;;  %v3513_v17 = vld [vmem:[#allocation2 + $0x21f8] sm:$0xff] }
 0x541   :  { %3743 = vmatpush2.msra.mxu0 %v3566_v15  ;;  %3814 = vmatpush2.msra.mxu1 %v3694_v19  ;;  %v3641_v15 = vld [vmem:[#allocation2 + $0x25f8] sm:$0xff] }
 0x542   :  { %3744 = vmatprep.subr.mxu0 %v3563_v20  ;;  %3815 = vmatprep.subr.mxu1 %v3691_v24 }
 0x543   :  { %3745 = vmatpush2.msra.mxu0 %v3562_v25  ;;  %3816 = vmatpush2.msra.mxu1 %v3690_v47 }
 0x544   :  { %3746 = vmatprep.subr.mxu0 %v3559_v48  ;;  %3817 = vmatprep.subr.mxu1 %v3687_v26 }
 0x545   :  { %3747 = vmatpush2.msra.mxu0 %v3558_v27  ;;  %3818 = vmatpush2.msra.mxu1 %v3686_v28 }
 0x546   :  { %3748 = vmatprep.subr.mxu0 %v3555_v3  ;;  %3819 = vmatprep.subr.mxu1 %v3683_v36 }
 0x547   :  { %3749 = vmatpush2.msra.mxu0 %v3554_v31  ;;  %3820 = vmatpush2.msra.mxu1 %v3682_v32 }
 0x548   :  { %3750 = vmatprep.subr.mxu0 %v3551_v33  ;;  %3821 = vmatprep.subr.mxu1 %v3679_v34 }
 0x549   :  { %3751 = vmatpush2.msra.mxu0 %v3550_v35  ;;  %3822 = vmatpush2.msra.mxu1 %v3678_v59 }
 0x54a   :  { %3752 = vmatprep.subr.mxu0 %v3547_v61  ;;  %3823 = vmatprep.subr.mxu1 %v3675_v38 }
 0x54b   :  { %3753 = vmatpush2.msra.mxu0 %v3546_v39  ;;  %3824 = vmatpush2.msra.mxu1 %v3674_v44 }
 0x54c   :  { %3754 = vmatprep.subr.mxu0 %v3543_v45  ;;  %3825 = vmatprep.subr.mxu1 %v3671_v46 }
 0x54d   :  { %3755 = vmatpush2.msra.mxu0 %v3542_v43  ;;  %3826 = vmatpush2.msra.mxu1 %v3670_v42 }
 0x54e   :  { %3756 = vmatprep.subr.mxu0 %v3539_v49  ;;  %3827 = vmatprep.subr.mxu1 %v3667_v50 }
 0x54f   :  { %3757 = vmatpush2.msra.mxu0 %v3538_v51  ;;  %3828 = vmatpush2.msra.mxu1 %v3666_v13 }
 0x550   :  { %3758 = vmatprep.subr.mxu0 %v3535_v14  ;;  %3829 = vmatprep.subr.mxu1 %v3663_v37 }
 0x551   :  { %3759 = vmatpush2.msra.mxu0 %v3534_v52  ;;  %3830 = vmatpush2.msra.mxu1 %v3662_v53 }
 0x552   :  { %3760 = vmatprep.subr.mxu0 %v3531_v56  ;;  %3831 = vmatprep.subr.mxu1 %v3659_v57 }
 0x553   :  { %3761 = vmatpush2.msra.mxu0 %v3530_v58  ;;  %3832 = vmatpush2.msra.mxu1 %v3658_v40 }
 0x554   :  { %3762 = vmatprep.subr.mxu0 %v3527_v41  ;;  %3833 = vmatprep.subr.mxu1 %v3655_v55 }
 0x555   :  { %3763 = vmatpush2.msra.mxu0 %v3526_v16  ;;  %3834 = vmatpush2.msra.mxu1 %v3654_v62 }
 0x556   :  { %3764 = vmatprep.subr.mxu0 %v3523_v63  ;;  %3835 = vmatprep.subr.mxu1 %v3651_v0 }
 0x557   :  { %3765 = vmatpush2.msra.mxu0 %v3522_v29  ;;  %3836 = vmatpush2.msra.mxu1 %v3650_v4 }
 0x558   :  { %3766 = vmatprep.subr.mxu0 %v3519_v30  ;;  %3837 = vmatprep.subr.mxu1 %v3647_v5 }
 0x559   :  { %3767 = vmatpush2.msra.mxu0 %v3518_v1  ;;  %3838 = vmatpush2.msra.mxu1 %v3646_v2 }
 0x55a   :  { %3768 = vmatprep.subr.mxu0 %v3515_v6  ;;  %3839 = vmatprep.subr.mxu1 %v3643_v8 }
 0x55b   :  { %3769 = vmatpush2.msra.mxu0 %v3514_v12  ;;  %3840 = vmatpush2.msra.mxu1 %v3642_v54 }
 0x55c   :  { %3848 = vmatprep.subr.mxu0 %v3513_v17  ;;  %3919 = vmatprep.subr.mxu1 %v3641_v15 }
 0x59a   :  { %v3017_v19 = vpop.f32.mrf.mxu0  ;;  %v3088_v20 = vpop.f32.mrf.mxu1 }
 0x59b   :  { %v5927_v48 = vadd.f32 %v3088_v20, %v3017_v19 }
 0x59c   :  { %v3019_v24 = vpop.f32.mrf.mxu0  ;;  %v3090_v25 = vpop.f32.mrf.mxu1 }
 0x59d   :  { %v5925_v47 = vadd.f32 %v3090_v25, %v3019_v24  ;;  %v3237_v28 = vrot.slane %v5927_v48, 4  ;;  %v3265_v3 = vmul.f32 %v5927_v48, %v5927_v48 }
 0x59f   :  { %v3243_v26 = vrot.slane %v5925_v47, 4  ;;  %v3266_v27 = vmul.f32 %v5925_v47, %v5925_v47  ;;  %v3238_v32 = vadd.f32 %v3237_v28, %v5927_v48  ;;  %v3269_v33 = vrot.slane %v3265_v3, 4 }
 0x5a1   :  { %v3244_v36 = vadd.f32 %v3243_v26, %v5925_v47  ;;  %v3275_v31 = vrot.slane %v3266_v27, 4  ;;  %v3239_v59 = vrot.slane %v3238_v32, 2  ;;  %v3270_v61 = vadd.f32 %v3269_v33, %v3265_v3 }
 0x5a3   :  { %v3245_v34 = vrot.slane %v3244_v36, 2  ;;  %v3276_v35 = vadd.f32 %v3275_v31, %v3266_v27  ;;  %v3240_v44 = vadd.f32 %v3239_v59, %v3238_v32  ;;  %v3271_v45 = vrot.slane %v3270_v61, 2 }
 0x5a5   :  { %v3246_v38 = vadd.f32 %v3245_v34, %v3244_v36  ;;  %v3277_v39 = vrot.slane %v3276_v35, 2  ;;  %v3241_v42 = vrot.slane %v3240_v44, 1  ;;  %v3272_v49 = vadd.f32 %v3271_v45, %v3270_v61 }
 0x5a7   :  { %v3247_v46 = vrot.slane %v3246_v38, 1  ;;  %v3278_v43 = vadd.f32 %v3277_v39, %v3276_v35  ;;  %v3242_v52 = vadd.f32 %v3241_v42, %v3240_v44  ;;  %v3273_v53 = vrot.slane %v3272_v49, 1 }
 0x5a9   :  { %v3248_v50 = vadd.f32 %v3247_v46, %v3246_v38  ;;  %v3279_v51 = vrot.slane %v3278_v43, 1  ;;  %v3261_v4 = vmul.f32 0.125, %v3242_v52  ;;  %v3274_v30 = vadd.f32 %v3273_v53, %v3272_v49 }
 0x5ab   :  { %v5944_v55 = vmul.f32 0.125, %v3248_v50  ;;  %v3280_v16 = vadd.f32 %v3279_v51, %v3278_v43  ;;  %v3293_v20 = vmul.f32 0.125, %v3274_v30  ;;  %v3297_v24 = vmul.f32 %v3261_v4, %v3261_v4 }
 0x5ad   :  { %v3294_v8 = vmul.f32 0.125, %v3280_v16  ;;  %v3298_v12 = vmul.f32 %v5944_v55, %v5944_v55  ;;  %v3301_v34 = vsub.f32 %v3293_v20, %v3297_v24 }
 0x5af   :  { %v3302_v3 = vsub.f32 %v3294_v8, %v3298_v12  ;;  %v3305_v42 = vadd.f32 1e-05, %v3301_v34 }
 0x5b1   :  { %v3306_v39 = vadd.f32 1e-05, %v3302_v3 }
 0x5b3   :  { %5424 = vrsqrt.f32 %v3306_v39 }
 0x5b4   :  { %5426 = vrsqrt.f32 %v3305_v42  ;;  %v3640_v42 = vld [vmem:[#allocation2 + $0x25f0] sm:$0xff] }
 0x5c0   :  { %v5425_v53 = vpop.eup %5424 }
 0x5db   :  { %v3159_v13 = vpop.f32.mrf.mxu0  ;;  %v3230_v14 = vpop.f32.mrf.mxu1 }
 0x5dc   :  { %v5937_v37 = vadd.f32 %v3230_v14, %v3159_v13 }
 0x5dd   :  { %v3161_v56 = vpop.f32.mrf.mxu0  ;;  %v3232_v57 = vpop.f32.mrf.mxu1 }
 0x5de   :  { %v3249_v58 = vrot.slane %v5937_v37, 4  ;;  %v3267_v40 = vmul.f32 %v5937_v37, %v5937_v37  ;;  %v5942_v41 = vadd.f32 %v3232_v57, %v3161_v56  ;;  %v5427_v56 = vpop.eup %5426 }
 0x5e0   :  { %v3250_v62 = vadd.f32 %v3249_v58, %v5937_v37  ;;  %v3281_v63 = vrot.slane %v3267_v40, 4  ;;  %v3255_v0 = vrot.slane %v5942_v41, 4  ;;  %v3268_v29 = vmul.f32 %v5942_v41, %v5942_v41 }
 0x5e2   :  { %v3251_v5 = vrot.slane %v3250_v62, 2  ;;  %v3282_v1 = vadd.f32 %v3281_v63, %v3267_v40  ;;  %v3256_v2 = vadd.f32 %v3255_v0, %v5942_v41  ;;  %v3287_v6 = vrot.slane %v3268_v29, 4 }
 0x5e3   :  { %v3317_v40 = vcombine.low %v5427_v56, %v5425_v53  ;;  %v3504_v53 = vld [vmem:[#allocation2 + $0x21b0] sm:$0xff] }
 0x5e4   :  { %v3252_v54 = vadd.f32 %v3251_v5, %v3250_v62  ;;  %v3283_v17 = vrot.slane %v3282_v1, 2  ;;  %v3257_v15 = vrot.slane %v3256_v2, 2  ;;  %v3288_v19 = vadd.f32 %v3287_v6, %v3268_v29  ;;  %v5315_v5 = vld [vmem:[%s7463_s4 + $0x20] sm:$0xff]  ;;  %v3632_v56 = vld [vmem:[#allocation2 + $0x25b0] sm:$0xff] }
 0x5e5   :  { %v3340_v62 = vcombine.low %v3261_v4, %v5944_v55  ;;  %v3325_v29 = vrot.slane %v3317_v40, %v5656_v60  ;;  %v3500_v40 = vld [vmem:[#allocation2 + $0x2190] sm:$0xff] }
 0x5e6   :  { %v3253_v25 = vrot.slane %v3252_v54, 1  ;;  %v3284_v26 = vadd.f32 %v3283_v17, %v3282_v1  ;;  %v3258_v27 = vadd.f32 %v3257_v15, %v3256_v2  ;;  %v3289_v28 = vrot.slane %v3288_v19, 2 }
 0x5e7   :  { %v3348_v1 = vrot.slane %v3340_v62, %v5656_v60  ;;  %v3497_v62 = vld [vmem:[#allocation2 + $0x2178] sm:$0xff] }
 0x5e8   :  { %v3254_v36 = vadd.f32 %v3253_v25, %v3252_v54  ;;  %v3285_v31 = vrot.slane %v3284_v26, 1  ;;  %v3259_v32 = vrot.slane %v3258_v27, 1  ;;  %v3290_v33 = vadd.f32 %v3289_v28, %v3288_v19 }
 0x5ea   :  { %v3263_v35 = vmul.f32 0.125, %v3254_v36  ;;  %v3286_v59 = vadd.f32 %v3285_v31, %v3284_v26  ;;  %v3260_v61 = vadd.f32 %v3259_v32, %v3258_v27  ;;  %v3291_v38 = vrot.slane %v3290_v33, 1 }
 0x5ec   :  { %v3295_v44 = vmul.f32 0.125, %v3286_v59  ;;  %v3299_v45 = vmul.f32 %v3263_v35, %v3263_v35  ;;  %v3264_v46 = vmul.f32 0.125, %v3260_v61  ;;  %v3292_v43 = vadd.f32 %v3291_v38, %v3290_v33 }
 0x5ee   :  { %v3303_v49 = vsub.f32 %v3295_v44, %v3299_v45  ;;  %v3296_v50 = vmul.f32 0.125, %v3292_v43  ;;  %v3300_v51 = vmul.f32 %v3264_v46, %v3264_v46  ;;  %v3341_v58 = vcombine.low %v3263_v35, %v3264_v46  ;;  %v3512_v43 = vld [vmem:[#allocation2 + $0x21f0] sm:$0xff] }
 0x5f0   :  { %v3307_v13 = vadd.f32 1e-05, %v3303_v49  ;;  %v3304_v14 = vsub.f32 %v3296_v50, %v3300_v51  ;;  %v3355_v0 = vrot.slane %v3341_v58, %v5656_v60  ;;  %v3509_v49 = vld [vmem:[#allocation2 + $0x21d8] sm:$0xff]  ;;  %v3508_v51 = vld [vmem:[#allocation2 + $0x21d0] sm:$0xff] }
 0x5f1   :  { %v3637_v50 = vld [vmem:[#allocation2 + $0x25d8] sm:$0xff] }
 0x5f2   :  { %v3308_v52 = vadd.f32 1e-05, %v3304_v14  ;;  %5428 = vrsqrt.f32 %v3307_v13  ;;  %v3356_v6 = vcombine.low %v3348_v1, %v3355_v0  ;;  %v3636_v13 = vld [vmem:[#allocation2 + $0x25d0] sm:$0xff]  ;;  %v3505_v14 = vld [vmem:[#allocation2 + $0x21b8] sm:$0xff] }
 0x5f3   :  { %v3629_v58 = vld [vmem:[#allocation2 + $0x2598] sm:$0xff]  ;;  %v3496_v0 = vld [vmem:[#allocation2 + $0x2170] sm:$0xff] }
 0x5f4   :  { %5430 = vrsqrt.f32 %v3308_v52  ;;  %v3633_v52 = vld [vmem:[#allocation2 + $0x25b8] sm:$0xff]  ;;  %v3492_v1 = vld [vmem:[#allocation2 + $0x2150] sm:$0xff] }
 0x5ff   :  { %v5429_v57 = vpop.eup %5428 }
 0x601   :  { %v5431_v16 = vpop.eup %5430 }
 0x602   :  { %v3318_v63 = vcombine.low %v5429_v57, %v5431_v16  ;;  %v3501_v57 = vld [vmem:[#allocation2 + $0x2198] sm:$0xff]  ;;  %v3628_v16 = vld [vmem:[#allocation2 + $0x2590] sm:$0xff] }
 0x604   :  { %v3332_v30 = vrot.slane %v3318_v63, %v5656_v60  ;;  %v3625_v63 = vld [vmem:[#allocation2 + $0x2578] sm:$0xff] }
 0x606   :  { %v3333_v2 = vcombine.low %v3325_v29, %v3332_v30  ;;  %v3624_v29 = vld [vmem:[#allocation2 + $0x2570] sm:$0xff]  ;;  %v3493_v30 = vld [vmem:[#allocation2 + $0x2158] sm:$0xff] }
 0x608   :  { %v3335_v8 = vmul.f32 %v5315_v5, %v3333_v2  ;;  %v3620_v2 = vld [vmem:[#allocation2 + $0x2550] sm:$0xff] }
 0x60a   :  { %v3358_v12 = vmul.f32 %v3356_v6, %v3335_v8  ;;  %v3371_v54 = vrot.slane %v3335_v8, %v5669_v10  ;;  %v3379_v55 = vrot.slane %v3335_v8, %v5667_v9  ;;  %v3367_v4 = vrot.slane %v3335_v8, %v5665_v7  ;;  %v3489_v6 = vld [vmem:[#allocation2 + $0x2138] sm:$0xff] }
 0x60b   :  { %v3375_v17 = vrot.slane %v3335_v8, %v5671_v11  ;;  %v3617_v8 = vld [vmem:[#allocation2 + $0x2538] sm:$0xff] }
 0x60c   :  { %v3360_v15 = vrot.slane %v3358_v12, 7  ;;  %v3391_v19 = vrot.slane %v3371_v54, %v5665_v7  ;;  %v3399_v20 = vrot.slane %v3379_v55, %v5665_v7  ;;  %v3387_v24 = vrot.slane %v3367_v4, %v5665_v7  ;;  %v3488_v12 = vld [vmem:[#allocation2 + $0x2130] sm:$0xff]  ;;  %v3485_v55 = vld [vmem:[#allocation2 + $0x2118] sm:$0xff] }
 0x60d   :  { %v3395_v25 = vrot.slane %v3375_v17, %v5665_v7  ;;  %v3616_v54 = vld [vmem:[#allocation2 + $0x2530] sm:$0xff]  ;;  %v3613_v4 = vld [vmem:[#allocation2 + $0x2518] sm:$0xff] }
 0x60e   :  { %v3362_v26 = vsub.f32 %v5315_v5, %v3360_v15  ;;  %v3401_v31 = vmul.f32 %v3391_v19, %v5925_v47  ;;  %v3403_v32 = vmul.f32 %v3399_v20, %v5942_v41  ;;  %v3400_v33 = vmul.f32 %v3387_v24, %v5927_v48  ;;  %v3621_v5 = vld [vmem:[#allocation2 + $0x2558] sm:$0xff]  ;;  %v3484_v17 = vld [vmem:[#allocation2 + $0x2110] sm:$0xff] }
 0x60f   :  { %v3402_v34 = vmul.f32 %v3395_v25, %v5937_v37  ;;  %v3612_v15 = vld [vmem:[#allocation2 + $0x2510] sm:$0xff]  ;;  %v3481_v19 = vld [vmem:[#allocation2 + $0x20f8] sm:$0xff] }
 0x610   :  { %v3412_v27 = vrot.slane %v3362_v26, %v5679_v21  ;;  %v3420_v28 = vrot.slane %v3362_v26, %v5681_v22  ;;  %v3408_v3 = vrot.slane %v3362_v26, %v5676_v18  ;;  %v3416_v36 = vrot.slane %v3362_v26, %v5683_v23  ;;  %v3609_v20 = vld [vmem:[#allocation2 + $0x24f8] sm:$0xff]  ;;  %v3480_v24 = vld [vmem:[#allocation2 + $0x20f0] sm:$0xff] }
 0x611   :  { %v3608_v25 = vld [vmem:[#allocation2 + $0x24f0] sm:$0xff]  ;;  %v3477_v26 = vld [vmem:[#allocation2 + $0x20d8] sm:$0xff] }
 0x612   :  { %v3432_v35 = vrot.slane %v3412_v27, %v5676_v18  ;;  %v3440_v59 = vrot.slane %v3420_v28, %v5676_v18  ;;  %v3428_v61 = vrot.slane %v3408_v3, %v5676_v18  ;;  %v3436_v38 = vrot.slane %v3416_v36, %v5676_v18  ;;  %v3605_v27 = vld [vmem:[#allocation2 + $0x24d8] sm:$0xff]  ;;  %v3476_v28 = vld [vmem:[#allocation2 + $0x20d0] sm:$0xff] }
 0x613   :  { %v3604_v3 = vld [vmem:[#allocation2 + $0x24d0] sm:$0xff]  ;;  %v3473_v36 = vld [vmem:[#allocation2 + $0x20b8] sm:$0xff] }
 0x614   :  { %v3442_v39 = vadd.f32 %v3432_v35, %v3401_v31  ;;  %v3444_v44 = vadd.f32 %v3440_v59, %v3403_v32  ;;  %v5981_v45 = vadd.f32 %v3428_v61, %v3400_v33  ;;  %v5983_v46 = vadd.f32 %v3436_v38, %v3402_v34  ;;  %v3601_v31 = vld [vmem:[#allocation2 + $0x24b8] sm:$0xff]  ;;  %v3472_v32 = vld [vmem:[#allocation2 + $0x20b0] sm:$0xff] }
 0x615   :  { %v3600_v33 = vld [vmem:[#allocation2 + $0x24b0] sm:$0xff]  ;;  %v3469_v34 = vld [vmem:[#allocation2 + $0x2098] sm:$0xff] }
 0x616   :  { %v3446_v47 = vmax.f32 %v3442_v39, 0.0  ;;  %v3448_v41 = vmax.f32 %v3444_v44, 0.0  ;;  %v3445_v48 = vmax.f32 %v5981_v45, 0.0  ;;  %v3447_v37 = vmax.f32 %v5983_v46, 0.0  ;;  %v3597_v35 = vld [vmem:[#allocation2 + $0x2498] sm:$0xff]  ;;  %v3468_v59 = vld [vmem:[#allocation2 + $0x2090] sm:$0xff] }
 0x617   :  { %v3596_v61 = vld [vmem:[#allocation2 + $0x2490] sm:$0xff]  ;;  %v3465_v38 = vld [vmem:[#allocation2 + $0x2078] sm:$0xff]  ;;  %v4533_v45 = vld [vmem:[%s7462_s3 + $0xa48] sm:$0xff] }
 0x618   :  { %3770 = vmatprep.mubr.f32.mxu0 %v3446_v47  ;;  %3841 = vmatprep.mubr.f32.mxu1 %v3448_v41  ;;  %v3593_v39 = vld [vmem:[#allocation2 + $0x2478] sm:$0xff]  ;;  %v3464_v44 = vld [vmem:[#allocation2 + $0x2070] sm:$0xff] }
 0x619   :  { %3771 = vmatmul.mubr.f32.vlgmr.msra.gmra.mxu0 %v3445_v48  ;;  %3842 = vmatmul.mubr.f32.vlgmr.msra.gmra.mxu1 %v3447_v37  ;;  %v4303_v46 = vld [vmem:[%s7462_s3 + $0x318] sm:$0xff] }
 0x61a   :  { %3849 = vmatpush1.msra.mxu0 %v3512_v43  ;;  %3920 = vmatpush1.msra.mxu1 %v3640_v42  ;;  %v3589_v43 = vld [vmem:[#allocation2 + $0x2458] sm:$0xff]  ;;  %v3460_v42 = vld [vmem:[#allocation2 + $0x2050] sm:$0xff] }
 0x61b   :  { %3850 = vmatprep.subr.mxu0 %v3509_v49  ;;  %3912 = vmatprep.mubr.f32.mxu0 %v3446_v47  ;;  %v3592_v47 = vld [vmem:[#allocation2 + $0x2470] sm:$0xff] }
 0x61c   :  { %3921 = vmatprep.subr.mxu1 %v3637_v50  ;;  %3983 = vmatprep.mubr.f32.mxu1 %v3448_v41  ;;  %v3461_v41 = vld [vmem:[#allocation2 + $0x2058] sm:$0xff]  ;;  %v3588_v49 = vld [vmem:[#allocation2 + $0x2450] sm:$0xff] }
 0x61d   :  { %3851 = vmatpush1.msra.mxu0 %v3508_v51  ;;  %3922 = vmatpush1.msra.mxu1 %v3636_v13  ;;  %v3457_v50 = vld [vmem:[#allocation2 + $0x2038] sm:$0xff]  ;;  %v3456_v13 = vld [vmem:[#allocation2 + $0x2030] sm:$0xff] }
 0x61e   :  { %3852 = vmatprep.subr.mxu0 %v3505_v14  ;;  %3923 = vmatprep.subr.mxu1 %v3633_v52  ;;  %v3585_v51 = vld [vmem:[#allocation2 + $0x2438] sm:$0xff]  ;;  %v3584_v14 = vld [vmem:[#allocation2 + $0x2430] sm:$0xff] }
 0x61f   :  { %3853 = vmatpush1.msra.mxu0 %v3504_v53  ;;  %3924 = vmatpush1.msra.mxu1 %v3632_v56  ;;  %v3453_v52 = vld [vmem:[#allocation2 + $0x2018] sm:$0xff]  ;;  %v3452_v56 = vld [vmem:[#allocation2 + $0x2010] sm:$0xff] }
 0x620   :  { %3854 = vmatprep.subr.mxu0 %v3501_v57  ;;  %3925 = vmatprep.subr.mxu1 %v3629_v58  ;;  %v3581_v53 = vld [vmem:[#allocation2 + $0x2418] sm:$0xff]  ;;  %v3580_v57 = vld [vmem:[#allocation2 + $0x2410] sm:$0xff] }
 0x621   :  { %3855 = vmatpush1.msra.mxu0 %v3500_v40  ;;  %3926 = vmatpush1.msra.mxu1 %v3628_v16  ;;  %v3577_v58 = vld [vmem:[#allocation2 + $0x23f8] sm:$0xff]  ;;  %v3576_v16 = vld [vmem:[#allocation2 + $0x23f0] sm:$0xff] }
 0x622   :  { %3856 = vmatprep.subr.mxu0 %v3497_v62  ;;  %3927 = vmatprep.subr.mxu1 %v3625_v63  ;;  %v3705_v40 = vld [vmem:[#allocation2 + $0x27f8] sm:$0xff]  ;;  %v3704_v62 = vld [vmem:[#allocation2 + $0x27f0] sm:$0xff] }
 0x623   :  { %3857 = vmatpush1.msra.mxu0 %v3496_v0  ;;  %3928 = vmatpush1.msra.mxu1 %v3624_v29  ;;  %v3573_v63 = vld [vmem:[#allocation2 + $0x23d8] sm:$0xff]  ;;  %v3572_v29 = vld [vmem:[#allocation2 + $0x23d0] sm:$0xff] }
 0x624   :  { %3858 = vmatprep.subr.mxu0 %v3493_v30  ;;  %3929 = vmatprep.subr.mxu1 %v3621_v5  ;;  %v3701_v0 = vld [vmem:[#allocation2 + $0x27d8] sm:$0xff]  ;;  %v3700_v30 = vld [vmem:[#allocation2 + $0x27d0] sm:$0xff] }
 0x625   :  { %3859 = vmatpush1.msra.mxu0 %v3492_v1  ;;  %3930 = vmatpush1.msra.mxu1 %v3620_v2  ;;  %v3569_v5 = vld [vmem:[#allocation2 + $0x23b8] sm:$0xff]  ;;  %v3568_v2 = vld [vmem:[#allocation2 + $0x23b0] sm:$0xff] }
 0x626   :  { %3860 = vmatprep.subr.mxu0 %v3489_v6  ;;  %3931 = vmatprep.subr.mxu1 %v3617_v8  ;;  %v3697_v1 = vld [vmem:[#allocation2 + $0x27b8] sm:$0xff]  ;;  %v3696_v6 = vld [vmem:[#allocation2 + $0x27b0] sm:$0xff] }
 0x627   :  { %3861 = vmatpush1.msra.mxu0 %v3488_v12  ;;  %3932 = vmatpush1.msra.mxu1 %v3616_v54  ;;  %v3565_v8 = vld [vmem:[#allocation2 + $0x2398] sm:$0xff]  ;;  %v3564_v54 = vld [vmem:[#allocation2 + $0x2390] sm:$0xff] }
 0x628   :  { %3862 = vmatprep.subr.mxu0 %v3485_v55  ;;  %3933 = vmatprep.subr.mxu1 %v3613_v4  ;;  %v3693_v12 = vld [vmem:[#allocation2 + $0x2798] sm:$0xff]  ;;  %v3692_v55 = vld [vmem:[#allocation2 + $0x2790] sm:$0xff] }
 0x629   :  { %3863 = vmatpush1.msra.mxu0 %v3484_v17  ;;  %3934 = vmatpush1.msra.mxu1 %v3612_v15  ;;  %v3561_v4 = vld [vmem:[#allocation2 + $0x2378] sm:$0xff]  ;;  %v3560_v15 = vld [vmem:[#allocation2 + $0x2370] sm:$0xff] }
 0x62a   :  { %3864 = vmatprep.subr.mxu0 %v3481_v19  ;;  %3935 = vmatprep.subr.mxu1 %v3609_v20  ;;  %v3689_v17 = vld [vmem:[#allocation2 + $0x2778] sm:$0xff]  ;;  %v3688_v19 = vld [vmem:[#allocation2 + $0x2770] sm:$0xff] }
 0x62b   :  { %3865 = vmatpush1.msra.mxu0 %v3480_v24  ;;  %3936 = vmatpush1.msra.mxu1 %v3608_v25  ;;  %v3557_v20 = vld [vmem:[#allocation2 + $0x2358] sm:$0xff]  ;;  %v3556_v25 = vld [vmem:[#allocation2 + $0x2350] sm:$0xff] }
 0x62c   :  { %3866 = vmatprep.subr.mxu0 %v3477_v26  ;;  %3937 = vmatprep.subr.mxu1 %v3605_v27  ;;  %v3685_v24 = vld [vmem:[#allocation2 + $0x2758] sm:$0xff]  ;;  %v3684_v26 = vld [vmem:[#allocation2 + $0x2750] sm:$0xff] }
 0x62d   :  { %3867 = vmatpush1.msra.mxu0 %v3476_v28  ;;  %3938 = vmatpush1.msra.mxu1 %v3604_v3  ;;  %v3553_v27 = vld [vmem:[#allocation2 + $0x2338] sm:$0xff]  ;;  %v3552_v3 = vld [vmem:[#allocation2 + $0x2330] sm:$0xff] }
 0x62e   :  { %3868 = vmatprep.subr.mxu0 %v3473_v36  ;;  %3939 = vmatprep.subr.mxu1 %v3601_v31  ;;  %v3681_v28 = vld [vmem:[#allocation2 + $0x2738] sm:$0xff]  ;;  %v3680_v36 = vld [vmem:[#allocation2 + $0x2730] sm:$0xff] }
 0x62f   :  { %3869 = vmatpush1.msra.mxu0 %v3472_v32  ;;  %3940 = vmatpush1.msra.mxu1 %v3600_v33  ;;  %v3549_v31 = vld [vmem:[#allocation2 + $0x2318] sm:$0xff]  ;;  %v3548_v33 = vld [vmem:[#allocation2 + $0x2310] sm:$0xff] }
 0x630   :  { %3870 = vmatprep.subr.mxu0 %v3469_v34  ;;  %3941 = vmatprep.subr.mxu1 %v3597_v35  ;;  %v3677_v32 = vld [vmem:[#allocation2 + $0x2718] sm:$0xff]  ;;  %v3676_v34 = vld [vmem:[#allocation2 + $0x2710] sm:$0xff] }
 0x631   :  { %3871 = vmatpush1.msra.mxu0 %v3468_v59  ;;  %3942 = vmatpush1.msra.mxu1 %v3596_v61  ;;  %v3545_v35 = vld [vmem:[#allocation2 + $0x22f8] sm:$0xff]  ;;  %v3544_v61 = vld [vmem:[#allocation2 + $0x22f0] sm:$0xff] }
 0x632   :  { %3872 = vmatprep.subr.mxu0 %v3465_v38  ;;  %3943 = vmatprep.subr.mxu1 %v3593_v39  ;;  %v3673_v59 = vld [vmem:[#allocation2 + $0x26f8] sm:$0xff]  ;;  %v3672_v38 = vld [vmem:[#allocation2 + $0x26f0] sm:$0xff] }
 0x633   :  { %3873 = vmatpush1.msra.mxu0 %v3464_v44  ;;  %3944 = vmatpush1.msra.mxu1 %v3592_v47  ;;  %v3541_v39 = vld [vmem:[#allocation2 + $0x22d8] sm:$0xff]  ;;  %v3540_v47 = vld [vmem:[#allocation2 + $0x22d0] sm:$0xff] }
 0x634   :  { %3874 = vmatprep.subr.mxu0 %v3461_v41  ;;  %3945 = vmatprep.subr.mxu1 %v3589_v43  ;;  %v3669_v44 = vld [vmem:[#allocation2 + $0x26d8] sm:$0xff]  ;;  %v3668_v41 = vld [vmem:[#allocation2 + $0x26d0] sm:$0xff] }
 0x635   :  { %3875 = vmatpush1.msra.mxu0 %v3460_v42  ;;  %3946 = vmatpush1.msra.mxu1 %v3588_v49  ;;  %v3537_v43 = vld [vmem:[#allocation2 + $0x22b8] sm:$0xff]  ;;  %v3536_v49 = vld [vmem:[#allocation2 + $0x22b0] sm:$0xff] }
 0x636   :  { %3876 = vmatprep.subr.mxu0 %v3457_v50  ;;  %3947 = vmatprep.subr.mxu1 %v3585_v51  ;;  %v3665_v42 = vld [vmem:[#allocation2 + $0x26b8] sm:$0xff]  ;;  %v3664_v50 = vld [vmem:[#allocation2 + $0x26b0] sm:$0xff] }
 0x637   :  { %3877 = vmatpush1.msra.mxu0 %v3456_v13  ;;  %3948 = vmatpush1.msra.mxu1 %v3584_v14  ;;  %v3533_v51 = vld [vmem:[#allocation2 + $0x2298] sm:$0xff]  ;;  %v3532_v14 = vld [vmem:[#allocation2 + $0x2290] sm:$0xff] }
 0x638   :  { %3878 = vmatprep.subr.mxu0 %v3453_v52  ;;  %3949 = vmatprep.subr.mxu1 %v3581_v53  ;;  %v3661_v13 = vld [vmem:[#allocation2 + $0x2698] sm:$0xff]  ;;  %v3660_v52 = vld [vmem:[#allocation2 + $0x2690] sm:$0xff] }
 0x639   :  { %3879 = vmatpush1.msra.mxu0 %v3452_v56  ;;  %3950 = vmatpush1.msra.mxu1 %v3580_v57  ;;  %v3529_v53 = vld [vmem:[#allocation2 + $0x2278] sm:$0xff]  ;;  %v3528_v57 = vld [vmem:[#allocation2 + $0x2270] sm:$0xff] }
 0x63a   :  { %3880 = vmatprep.subr.mxu0 %v3577_v58  ;;  %3951 = vmatprep.subr.mxu1 %v3705_v40  ;;  %v3657_v56 = vld [vmem:[#allocation2 + $0x2678] sm:$0xff]  ;;  %v3656_v58 = vld [vmem:[#allocation2 + $0x2670] sm:$0xff] }
 0x63b   :  { %3881 = vmatpush2.msra.mxu0 %v3576_v16  ;;  %3952 = vmatpush2.msra.mxu1 %v3704_v62  ;;  %v3525_v40 = vld [vmem:[#allocation2 + $0x2258] sm:$0xff]  ;;  %v3524_v62 = vld [vmem:[#allocation2 + $0x2250] sm:$0xff] }
 0x63c   :  { %3882 = vmatprep.subr.mxu0 %v3573_v63  ;;  %3953 = vmatprep.subr.mxu1 %v3701_v0  ;;  %v3653_v16 = vld [vmem:[#allocation2 + $0x2658] sm:$0xff]  ;;  %v3652_v63 = vld [vmem:[#allocation2 + $0x2650] sm:$0xff] }
 0x63d   :  { %3883 = vmatpush2.msra.mxu0 %v3572_v29  ;;  %3954 = vmatpush2.msra.mxu1 %v3700_v30  ;;  %v3521_v0 = vld [vmem:[#allocation2 + $0x2238] sm:$0xff]  ;;  %v3520_v30 = vld [vmem:[#allocation2 + $0x2230] sm:$0xff] }
 0x63e   :  { %3884 = vmatprep.subr.mxu0 %v3569_v5  ;;  %3955 = vmatprep.subr.mxu1 %v3697_v1  ;;  %v3649_v29 = vld [vmem:[#allocation2 + $0x2638] sm:$0xff]  ;;  %v3648_v5 = vld [vmem:[#allocation2 + $0x2630] sm:$0xff] }
 0x63f   :  { %3885 = vmatpush2.msra.mxu0 %v3568_v2  ;;  %3956 = vmatpush2.msra.mxu1 %v3696_v6  ;;  %v3517_v1 = vld [vmem:[#allocation2 + $0x2218] sm:$0xff]  ;;  %v3516_v6 = vld [vmem:[#allocation2 + $0x2210] sm:$0xff] }
 0x640   :  { %3886 = vmatprep.subr.mxu0 %v3565_v8  ;;  %3957 = vmatprep.subr.mxu1 %v3693_v12  ;;  %v3645_v2 = vld [vmem:[#allocation2 + $0x2618] sm:$0xff]  ;;  %v3644_v8 = vld [vmem:[#allocation2 + $0x2610] sm:$0xff] }
 0x641   :  { %3887 = vmatpush2.msra.mxu0 %v3564_v54  ;;  %3958 = vmatpush2.msra.mxu1 %v3692_v55  ;;  %v4310_v12 = vld [vmem:[%s7462_s3 + $0x350] sm:$0xff]  ;;  %v4309_v55 = vld [vmem:[%s7462_s3 + $0x348] sm:$0xff] }
 0x642   :  { %3888 = vmatprep.subr.mxu0 %v3561_v4  ;;  %3959 = vmatprep.subr.mxu1 %v3689_v17  ;;  %v4534_v54 = vld [vmem:[%s7462_s3 + $0xa50] sm:$0xff]  ;;  %v4296_v17 = vld [vmem:[%s7462_s3 + $0x2e0] sm:$0xff] }
 0x643   :  { %3889 = vmatpush2.msra.mxu0 %v3560_v15  ;;  %3960 = vmatpush2.msra.mxu1 %v3688_v19  ;;  %v4526_v4 = vld [vmem:[%s7462_s3 + $0xa10] sm:$0xff]  ;;  %v4520_v15 = vld [vmem:[%s7462_s3 + $0x9e0] sm:$0xff]  ;;  %v4295_v19 = vld [vmem:[%s7462_s3 + $0x2d8] sm:$0xff] }
 0x644   :  { %3890 = vmatprep.subr.mxu0 %v3557_v20  ;;  %3961 = vmatprep.subr.mxu1 %v3685_v24  ;;  %v4519_v20 = vld [vmem:[%s7462_s3 + $0x9d8] sm:$0xff]  ;;  %v4289_v24 = vld [vmem:[%s7462_s3 + $0x2a8] sm:$0xff] }
 0x645   :  { %3891 = vmatpush2.msra.mxu0 %v3556_v25  ;;  %3962 = vmatpush2.msra.mxu1 %v3684_v26  ;;  %v4513_v25 = vld [vmem:[%s7462_s3 + $0x9a8] sm:$0xff]  ;;  %v4288_v26 = vld [vmem:[%s7462_s3 + $0x2a0] sm:$0xff] }
 0x646   :  { %3892 = vmatprep.subr.mxu0 %v3553_v27  ;;  %3963 = vmatprep.subr.mxu1 %v3681_v28  ;;  %v4512_v27 = vld [vmem:[%s7462_s3 + $0x9a0] sm:$0xff]  ;;  %v4282_v28 = vld [vmem:[%s7462_s3 + $0x270] sm:$0xff] }
 0x647   :  { %3893 = vmatpush2.msra.mxu0 %v3552_v3  ;;  %3964 = vmatpush2.msra.mxu1 %v3680_v36  ;;  %v4506_v3 = vld [vmem:[%s7462_s3 + $0x970] sm:$0xff]  ;;  %v4281_v36 = vld [vmem:[%s7462_s3 + $0x268] sm:$0xff] }
 0x648   :  { %3894 = vmatprep.subr.mxu0 %v3549_v31  ;;  %3965 = vmatprep.subr.mxu1 %v3677_v32  ;;  %v4505_v31 = vld [vmem:[%s7462_s3 + $0x968] sm:$0xff]  ;;  %v4275_v32 = vld [vmem:[%s7462_s3 + $0x238] sm:$0xff] }
 0x649   :  { %3895 = vmatpush2.msra.mxu0 %v3548_v33  ;;  %3966 = vmatpush2.msra.mxu1 %v3676_v34  ;;  %v4499_v33 = vld [vmem:[%s7462_s3 + $0x938] sm:$0xff]  ;;  %v4274_v34 = vld [vmem:[%s7462_s3 + $0x230] sm:$0xff] }
 0x64a   :  { %3896 = vmatprep.subr.mxu0 %v3545_v35  ;;  %3967 = vmatprep.subr.mxu1 %v3673_v59  ;;  %v4498_v35 = vld [vmem:[%s7462_s3 + $0x930] sm:$0xff]  ;;  %v4268_v59 = vld [vmem:[%s7462_s3 + $0x200] sm:$0xff] }
 0x64b   :  { %3897 = vmatpush2.msra.mxu0 %v3544_v61  ;;  %3968 = vmatpush2.msra.mxu1 %v3672_v38  ;;  %v4492_v61 = vld [vmem:[%s7462_s3 + $0x900] sm:$0xff]  ;;  %v4267_v38 = vld [vmem:[%s7462_s3 + $0x1f8] sm:$0xff] }
 0x64c   :  { %3898 = vmatprep.subr.mxu0 %v3541_v39  ;;  %3969 = vmatprep.subr.mxu1 %v3669_v44  ;;  %v4491_v39 = vld [vmem:[%s7462_s3 + $0x8f8] sm:$0xff]  ;;  %v4261_v44 = vld [vmem:[%s7462_s3 + $0x1c8] sm:$0xff] }
 0x64d   :  { %3899 = vmatpush2.msra.mxu0 %v3540_v47  ;;  %3970 = vmatpush2.msra.mxu1 %v3668_v41  ;;  %v4485_v47 = vld [vmem:[%s7462_s3 + $0x8c8] sm:$0xff]  ;;  %v4260_v41 = vld [vmem:[%s7462_s3 + $0x1c0] sm:$0xff] }
 0x64e   :  { %3900 = vmatprep.subr.mxu0 %v3537_v43  ;;  %3971 = vmatprep.subr.mxu1 %v3665_v42  ;;  %v4484_v43 = vld [vmem:[%s7462_s3 + $0x8c0] sm:$0xff]  ;;  %v4254_v42 = vld [vmem:[%s7462_s3 + $0x190] sm:$0xff] }
 0x64f   :  { %3901 = vmatpush2.msra.mxu0 %v3536_v49  ;;  %3972 = vmatpush2.msra.mxu1 %v3664_v50  ;;  %v4478_v49 = vld [vmem:[%s7462_s3 + $0x890] sm:$0xff]  ;;  %v4253_v50 = vld [vmem:[%s7462_s3 + $0x188] sm:$0xff] }
 0x650   :  { %3902 = vmatprep.subr.mxu0 %v3533_v51  ;;  %3973 = vmatprep.subr.mxu1 %v3661_v13  ;;  %v4477_v51 = vld [vmem:[%s7462_s3 + $0x888] sm:$0xff]  ;;  %v4247_v13 = vld [vmem:[%s7462_s3 + $0x158] sm:$0xff] }
 0x651   :  { %3903 = vmatpush2.msra.mxu0 %v3532_v14  ;;  %3974 = vmatpush2.msra.mxu1 %v3660_v52  ;;  %v4471_v14 = vld [vmem:[%s7462_s3 + $0x858] sm:$0xff]  ;;  %v4246_v52 = vld [vmem:[%s7462_s3 + $0x150] sm:$0xff] }
 0x652   :  { %3904 = vmatprep.subr.mxu0 %v3529_v53  ;;  %3975 = vmatprep.subr.mxu1 %v3657_v56  ;;  %v4470_v53 = vld [vmem:[%s7462_s3 + $0x850] sm:$0xff]  ;;  %v4240_v56 = vld [vmem:[%s7462_s3 + $0x120] sm:$0xff] }
 0x653   :  { %3905 = vmatpush2.msra.mxu0 %v3528_v57  ;;  %3976 = vmatpush2.msra.mxu1 %v3656_v58  ;;  %v4464_v57 = vld [vmem:[%s7462_s3 + $0x820] sm:$0xff]  ;;  %v4239_v58 = vld [vmem:[%s7462_s3 + $0x118] sm:$0xff] }
 0x654   :  { %3906 = vmatprep.subr.mxu0 %v3525_v40  ;;  %3977 = vmatprep.subr.mxu1 %v3653_v16  ;;  %v4463_v40 = vld [vmem:[%s7462_s3 + $0x818] sm:$0xff]  ;;  %v4233_v16 = vld [vmem:[%s7462_s3 + $0xe8] sm:$0xff] }
 0x655   :  { %3907 = vmatpush2.msra.mxu0 %v3524_v62  ;;  %3978 = vmatpush2.msra.mxu1 %v3652_v63  ;;  %v4457_v62 = vld [vmem:[%s7462_s3 + $0x7e8] sm:$0xff]  ;;  %v4232_v63 = vld [vmem:[%s7462_s3 + $0xe0] sm:$0xff] }
 0x656   :  { %3908 = vmatprep.subr.mxu0 %v3521_v0  ;;  %3979 = vmatprep.subr.mxu1 %v3649_v29  ;;  %v4456_v0 = vld [vmem:[%s7462_s3 + $0x7e0] sm:$0xff]  ;;  %v4226_v29 = vld [vmem:[%s7462_s3 + $0xb0] sm:$0xff] }
 0x657   :  { %3909 = vmatpush2.msra.mxu0 %v3520_v30  ;;  %3980 = vmatpush2.msra.mxu1 %v3648_v5  ;;  %v4450_v30 = vld [vmem:[%s7462_s3 + $0x7b0] sm:$0xff]  ;;  %v4225_v5 = vld [vmem:[%s7462_s3 + $0xa8] sm:$0xff] }
 0x658   :  { %3910 = vmatprep.subr.mxu0 %v3517_v1  ;;  %3981 = vmatprep.subr.mxu1 %v3645_v2  ;;  %v4449_v1 = vld [vmem:[%s7462_s3 + $0x7a8] sm:$0xff]  ;;  %v4219_v2 = vld [vmem:[%s7462_s3 + $0x78] sm:$0xff] }
 0x659   :  { %3911 = vmatpush2.msra.mxu0 %v3516_v6  ;;  %3982 = vmatpush2.msra.mxu1 %v3644_v8  ;;  %v4443_v6 = vld [vmem:[%s7462_s3 + $0x778] sm:$0xff]  ;;  %v4218_v8 = vld [vmem:[%s7462_s3 + $0x70] sm:$0xff] }
 0x65a   :  { %3913 = vmatmul.mubr.f32.vlgmr.msra.gmra.mxu0 %v3445_v48  ;;  %3984 = vmatmul.mubr.f32.vlgmr.msra.gmra.mxu1 %v3447_v37  ;;  %v4527_v48 = vld [vmem:[%s7462_s3 + $0xa18] sm:$0xff]  ;;  %v4302_v37 = vld [vmem:[%s7462_s3 + $0x310] sm:$0xff] }
 0x65b   :  { %4689 = vmatprep.subr.mxu0 %v4310_v12  ;;  %4760 = vmatprep.subr.mxu1 %v4534_v54  ;;  %v4442_v12 = vld [vmem:[%s7462_s3 + $0x770] sm:$0xff]  ;;  %v4212_v54 = vld [vmem:[%s7462_s3 + $0x40] sm:$0xff] }
 0x65c   :  { %4690 = vmatpush1.msra.mxu0 %v4309_v55  ;;  %4761 = vmatpush1.msra.mxu1 %v4533_v45  ;;  %v4436_v55 = vld [vmem:[%s7462_s3 + $0x740] sm:$0xff]  ;;  %v4211_v45 = vld [vmem:[%s7462_s3 + $0x38] sm:$0xff] }
 0x65d   :  { %4691 = vmatprep.subr.mxu0 %v4303_v46  ;;  %4762 = vmatprep.subr.mxu1 %v4527_v48  ;;  %v4435_v46 = vld [vmem:[%s7462_s3 + $0x738] sm:$0xff]  ;;  %v4205_v48 = vld [vmem:[%s7462_s3 + $0x8] sm:$0xff] }
 0x65e   :  { %4692 = vmatpush1.msra.mxu0 %v4302_v37  ;;  %4763 = vmatpush1.msra.mxu1 %v4526_v4  ;;  %v4429_v37 = vld [vmem:[%s7462_s3 + $0x708] sm:$0xff]  ;;  %v4204_v4 = vld [vmem:[%s7462_s3] sm:$0xff] }
 0x65f   :  { %4693 = vmatprep.subr.mxu0 %v4296_v17  ;;  %4764 = vmatprep.subr.mxu1 %v4520_v15  ;;  %v4428_v17 = vld [vmem:[%s7462_s3 + $0x700] sm:$0xff]  ;;  %v4422_v15 = vld [vmem:[%s7462_s3 + $0x6d0] sm:$0xff] }
 0x660   :  { %4694 = vmatpush1.msra.mxu0 %v4295_v19  ;;  %4765 = vmatpush1.msra.mxu1 %v4519_v20  ;;  %v4646_v19 = vld [vmem:[%s7462_s3 + $0xdd0] sm:$0xff]  ;;  %v4421_v20 = vld [vmem:[%s7462_s3 + $0x6c8] sm:$0xff] }
 0x661   :  { %4695 = vmatprep.subr.mxu0 %v4289_v24  ;;  %4766 = vmatprep.subr.mxu1 %v4513_v25  ;;  %v4645_v24 = vld [vmem:[%s7462_s3 + $0xdc8] sm:$0xff]  ;;  %v4415_v25 = vld [vmem:[%s7462_s3 + $0x698] sm:$0xff] }
 0x662   :  { %4696 = vmatpush1.msra.mxu0 %v4288_v26  ;;  %4767 = vmatpush1.msra.mxu1 %v4512_v27  ;;  %v4639_v26 = vld [vmem:[%s7462_s3 + $0xd98] sm:$0xff]  ;;  %v4414_v27 = vld [vmem:[%s7462_s3 + $0x690] sm:$0xff] }
 0x663   :  { %4697 = vmatprep.subr.mxu0 %v4282_v28  ;;  %4768 = vmatprep.subr.mxu1 %v4506_v3  ;;  %v4638_v28 = vld [vmem:[%s7462_s3 + $0xd90] sm:$0xff]  ;;  %v4408_v3 = vld [vmem:[%s7462_s3 + $0x660] sm:$0xff] }
 0x664   :  { %4698 = vmatpush1.msra.mxu0 %v4281_v36  ;;  %4769 = vmatpush1.msra.mxu1 %v4505_v31  ;;  %v4632_v36 = vld [vmem:[%s7462_s3 + $0xd60] sm:$0xff]  ;;  %v4407_v31 = vld [vmem:[%s7462_s3 + $0x658] sm:$0xff] }
 0x665   :  { %4699 = vmatprep.subr.mxu0 %v4275_v32  ;;  %4770 = vmatprep.subr.mxu1 %v4499_v33  ;;  %v4631_v32 = vld [vmem:[%s7462_s3 + $0xd58] sm:$0xff]  ;;  %v4401_v33 = vld [vmem:[%s7462_s3 + $0x628] sm:$0xff] }
 0x666   :  { %4700 = vmatpush1.msra.mxu0 %v4274_v34  ;;  %4771 = vmatpush1.msra.mxu1 %v4498_v35  ;;  %v4625_v34 = vld [vmem:[%s7462_s3 + $0xd28] sm:$0xff]  ;;  %v4400_v35 = vld [vmem:[%s7462_s3 + $0x620] sm:$0xff] }
 0x667   :  { %4701 = vmatprep.subr.mxu0 %v4268_v59  ;;  %4772 = vmatprep.subr.mxu1 %v4492_v61  ;;  %v4624_v59 = vld [vmem:[%s7462_s3 + $0xd20] sm:$0xff]  ;;  %v4394_v61 = vld [vmem:[%s7462_s3 + $0x5f0] sm:$0xff] }
 0x668   :  { %4702 = vmatpush1.msra.mxu0 %v4267_v38  ;;  %4773 = vmatpush1.msra.mxu1 %v4491_v39  ;;  %v4618_v38 = vld [vmem:[%s7462_s3 + $0xcf0] sm:$0xff]  ;;  %v4393_v39 = vld [vmem:[%s7462_s3 + $0x5e8] sm:$0xff] }
 0x669   :  { %4703 = vmatprep.subr.mxu0 %v4261_v44  ;;  %4774 = vmatprep.subr.mxu1 %v4485_v47  ;;  %v4617_v44 = vld [vmem:[%s7462_s3 + $0xce8] sm:$0xff]  ;;  %v4387_v47 = vld [vmem:[%s7462_s3 + $0x5b8] sm:$0xff] }
 0x66a   :  { %4704 = vmatpush1.msra.mxu0 %v4260_v41  ;;  %4775 = vmatpush1.msra.mxu1 %v4484_v43  ;;  %v4611_v41 = vld [vmem:[%s7462_s3 + $0xcb8] sm:$0xff]  ;;  %v4386_v43 = vld [vmem:[%s7462_s3 + $0x5b0] sm:$0xff] }
 0x66b   :  { %4705 = vmatprep.subr.mxu0 %v4254_v42  ;;  %4776 = vmatprep.subr.mxu1 %v4478_v49  ;;  %v4610_v42 = vld [vmem:[%s7462_s3 + $0xcb0] sm:$0xff]  ;;  %v4380_v49 = vld [vmem:[%s7462_s3 + $0x580] sm:$0xff] }
 0x66c   :  { %4706 = vmatpush1.msra.mxu0 %v4253_v50  ;;  %4777 = vmatpush1.msra.mxu1 %v4477_v51  ;;  %v4604_v50 = vld [vmem:[%s7462_s3 + $0xc80] sm:$0xff]  ;;  %v4379_v51 = vld [vmem:[%s7462_s3 + $0x578] sm:$0xff] }
 0x66d   :  { %4707 = vmatprep.subr.mxu0 %v4247_v13  ;;  %4778 = vmatprep.subr.mxu1 %v4471_v14  ;;  %v4603_v13 = vld [vmem:[%s7462_s3 + $0xc78] sm:$0xff]  ;;  %v4373_v14 = vld [vmem:[%s7462_s3 + $0x548] sm:$0xff] }
 0x66e   :  { %4708 = vmatpush1.msra.mxu0 %v4246_v52  ;;  %4779 = vmatpush1.msra.mxu1 %v4470_v53  ;;  %v4597_v52 = vld [vmem:[%s7462_s3 + $0xc48] sm:$0xff]  ;;  %v4372_v53 = vld [vmem:[%s7462_s3 + $0x540] sm:$0xff] }
 0x66f   :  { %4709 = vmatprep.subr.mxu0 %v4240_v56  ;;  %4780 = vmatprep.subr.mxu1 %v4464_v57  ;;  %v4596_v56 = vld [vmem:[%s7462_s3 + $0xc40] sm:$0xff]  ;;  %v4366_v57 = vld [vmem:[%s7462_s3 + $0x510] sm:$0xff] }
 0x670   :  { %4710 = vmatpush1.msra.mxu0 %v4239_v58  ;;  %4781 = vmatpush1.msra.mxu1 %v4463_v40  ;;  %v4590_v58 = vld [vmem:[%s7462_s3 + $0xc10] sm:$0xff]  ;;  %v4365_v40 = vld [vmem:[%s7462_s3 + $0x508] sm:$0xff] }
 0x671   :  { %4711 = vmatprep.subr.mxu0 %v4233_v16  ;;  %4782 = vmatprep.subr.mxu1 %v4457_v62  ;;  %v4589_v16 = vld [vmem:[%s7462_s3 + $0xc08] sm:$0xff]  ;;  %v4359_v62 = vld [vmem:[%s7462_s3 + $0x4d8] sm:$0xff] }
 0x672   :  { %4712 = vmatpush1.msra.mxu0 %v4232_v63  ;;  %4783 = vmatpush1.msra.mxu1 %v4456_v0  ;;  %v4583_v63 = vld [vmem:[%s7462_s3 + $0xbd8] sm:$0xff]  ;;  %v4358_v0 = vld [vmem:[%s7462_s3 + $0x4d0] sm:$0xff] }
 0x673   :  { %4713 = vmatprep.subr.mxu0 %v4226_v29  ;;  %4784 = vmatprep.subr.mxu1 %v4450_v30  ;;  %v4582_v29 = vld [vmem:[%s7462_s3 + $0xbd0] sm:$0xff]  ;;  %v4352_v30 = vld [vmem:[%s7462_s3 + $0x4a0] sm:$0xff] }
 0x674   :  { %4714 = vmatpush1.msra.mxu0 %v4225_v5  ;;  %4785 = vmatpush1.msra.mxu1 %v4449_v1  ;;  %v4576_v5 = vld [vmem:[%s7462_s3 + $0xba0] sm:$0xff]  ;;  %v4351_v1 = vld [vmem:[%s7462_s3 + $0x498] sm:$0xff] }
 0x675   :  { %4715 = vmatprep.subr.mxu0 %v4219_v2  ;;  %4786 = vmatprep.subr.mxu1 %v4443_v6  ;;  %v4575_v2 = vld [vmem:[%s7462_s3 + $0xb98] sm:$0xff]  ;;  %v4345_v6 = vld [vmem:[%s7462_s3 + $0x468] sm:$0xff] }
 0x676   :  { %4716 = vmatpush1.msra.mxu0 %v4218_v8  ;;  %4787 = vmatpush1.msra.mxu1 %v4442_v12  ;;  %v4569_v8 = vld [vmem:[%s7462_s3 + $0xb68] sm:$0xff]  ;;  %v4344_v12 = vld [vmem:[%s7462_s3 + $0x460] sm:$0xff] }
 0x677   :  { %4717 = vmatprep.subr.mxu0 %v4212_v54  ;;  %4788 = vmatprep.subr.mxu1 %v4436_v55  ;;  %v4568_v54 = vld [vmem:[%s7462_s3 + $0xb60] sm:$0xff]  ;;  %v4338_v55 = vld [vmem:[%s7462_s3 + $0x430] sm:$0xff] }
 0x678   :  { %4718 = vmatpush1.msra.mxu0 %v4211_v45  ;;  %4789 = vmatpush1.msra.mxu1 %v4435_v46  ;;  %v4562_v45 = vld [vmem:[%s7462_s3 + $0xb30] sm:$0xff]  ;;  %v4337_v46 = vld [vmem:[%s7462_s3 + $0x428] sm:$0xff] }
 0x679   :  { %4719 = vmatprep.subr.mxu0 %v4205_v48  ;;  %4790 = vmatprep.subr.mxu1 %v4429_v37  ;;  %v4561_v48 = vld [vmem:[%s7462_s3 + $0xb28] sm:$0xff]  ;;  %v4331_v37 = vld [vmem:[%s7462_s3 + $0x3f8] sm:$0xff] }
 0x67a   :  { %4720 = vmatpush1.msra.mxu0 %v4204_v4  ;;  %4791 = vmatpush1.msra.mxu1 %v4428_v17  ;;  %v4555_v4 = vld [vmem:[%s7462_s3 + $0xaf8] sm:$0xff]  ;;  %v4330_v17 = vld [vmem:[%s7462_s3 + $0x3f0] sm:$0xff] }
 0x67b   :  { %4721 = vmatprep.subr.mxu0 %v4422_v15  ;;  %4792 = vmatprep.subr.mxu1 %v4646_v19  ;;  %v4554_v15 = vld [vmem:[%s7462_s3 + $0xaf0] sm:$0xff]  ;;  %v4324_v19 = vld [vmem:[%s7462_s3 + $0x3c0] sm:$0xff] }
 0x67c   :  { %4722 = vmatpush2.msra.mxu0 %v4421_v20  ;;  %4793 = vmatpush2.msra.mxu1 %v4645_v24  ;;  %v4548_v20 = vld [vmem:[%s7462_s3 + $0xac0] sm:$0xff]  ;;  %v4323_v24 = vld [vmem:[%s7462_s3 + $0x3b8] sm:$0xff] }
 0x67d   :  { %4723 = vmatprep.subr.mxu0 %v4415_v25  ;;  %4794 = vmatprep.subr.mxu1 %v4639_v26  ;;  %v4547_v25 = vld [vmem:[%s7462_s3 + $0xab8] sm:$0xff]  ;;  %v4317_v26 = vld [vmem:[%s7462_s3 + $0x388] sm:$0xff] }
 0x67e   :  { %4724 = vmatpush2.msra.mxu0 %v4414_v27  ;;  %4795 = vmatpush2.msra.mxu1 %v4638_v28  ;;  %v4541_v27 = vld [vmem:[%s7462_s3 + $0xa88] sm:$0xff]  ;;  %v4316_v28 = vld [vmem:[%s7462_s3 + $0x380] sm:$0xff] }
 0x67f   :  { %4725 = vmatprep.subr.mxu0 %v4408_v3  ;;  %4796 = vmatprep.subr.mxu1 %v4632_v36  ;;  %v4540_v3 = vld [vmem:[%s7462_s3 + $0xa80] sm:$0xff] }
 0x680   :  { %4726 = vmatpush2.msra.mxu0 %v4407_v31  ;;  %4797 = vmatpush2.msra.mxu1 %v4631_v32  ;;  %v4312_v36 = vld [vmem:[%s7462_s3 + $0x360] sm:$0xff] }
 0x681   :  { %4727 = vmatprep.subr.mxu0 %v4401_v33  ;;  %4798 = vmatprep.subr.mxu1 %v4625_v34  ;;  %v4536_v31 = vld [vmem:[%s7462_s3 + $0xa60] sm:$0xff] }
 0x682   :  { %4728 = vmatpush2.msra.mxu0 %v4400_v35  ;;  %4799 = vmatpush2.msra.mxu1 %v4624_v59 }
 0x683   :  { %4729 = vmatprep.subr.mxu0 %v4394_v61  ;;  %4800 = vmatprep.subr.mxu1 %v4618_v38 }
 0x684   :  { %4730 = vmatpush2.msra.mxu0 %v4393_v39  ;;  %4801 = vmatpush2.msra.mxu1 %v4617_v44 }
 0x685   :  { %4731 = vmatprep.subr.mxu0 %v4387_v47  ;;  %4802 = vmatprep.subr.mxu1 %v4611_v41 }
 0x686   :  { %4732 = vmatpush2.msra.mxu0 %v4386_v43  ;;  %4803 = vmatpush2.msra.mxu1 %v4610_v42 }
 0x687   :  { %4733 = vmatprep.subr.mxu0 %v4380_v49  ;;  %4804 = vmatprep.subr.mxu1 %v4604_v50 }
 0x688   :  { %4734 = vmatpush2.msra.mxu0 %v4379_v51  ;;  %4805 = vmatpush2.msra.mxu1 %v4603_v13 }
 0x689   :  { %4735 = vmatprep.subr.mxu0 %v4373_v14  ;;  %4806 = vmatprep.subr.mxu1 %v4597_v52 }
 0x68a   :  { %4736 = vmatpush2.msra.mxu0 %v4372_v53  ;;  %4807 = vmatpush2.msra.mxu1 %v4596_v56 }
 0x68b   :  { %4737 = vmatprep.subr.mxu0 %v4366_v57  ;;  %4808 = vmatprep.subr.mxu1 %v4590_v58 }
 0x68c   :  { %4738 = vmatpush2.msra.mxu0 %v4365_v40  ;;  %4809 = vmatpush2.msra.mxu1 %v4589_v16 }
 0x68d   :  { %4739 = vmatprep.subr.mxu0 %v4359_v62  ;;  %4810 = vmatprep.subr.mxu1 %v4583_v63 }
 0x68e   :  { %4740 = vmatpush2.msra.mxu0 %v4358_v0  ;;  %4811 = vmatpush2.msra.mxu1 %v4582_v29 }
 0x68f   :  { %4741 = vmatprep.subr.mxu0 %v4352_v30  ;;  %4812 = vmatprep.subr.mxu1 %v4576_v5 }
 0x690   :  { %4742 = vmatpush2.msra.mxu0 %v4351_v1  ;;  %4813 = vmatpush2.msra.mxu1 %v4575_v2 }
 0x691   :  { %4743 = vmatprep.subr.mxu0 %v4345_v6  ;;  %4814 = vmatprep.subr.mxu1 %v4569_v8 }
 0x692   :  { %4744 = vmatpush2.msra.mxu0 %v4344_v12  ;;  %4815 = vmatpush2.msra.mxu1 %v4568_v54 }
 0x693   :  { %4745 = vmatprep.subr.mxu0 %v4338_v55  ;;  %4816 = vmatprep.subr.mxu1 %v4562_v45 }
 0x694   :  { %4746 = vmatpush2.msra.mxu0 %v4337_v46  ;;  %4817 = vmatpush2.msra.mxu1 %v4561_v48 }
 0x695   :  { %4747 = vmatprep.subr.mxu0 %v4331_v37  ;;  %4818 = vmatprep.subr.mxu1 %v4555_v4 }
 0x696   :  { %4748 = vmatpush2.msra.mxu0 %v4330_v17  ;;  %4819 = vmatpush2.msra.mxu1 %v4554_v15 }
 0x697   :  { %4749 = vmatprep.subr.mxu0 %v4324_v19  ;;  %4820 = vmatprep.subr.mxu1 %v4548_v20 }
 0x698   :  { %4750 = vmatpush2.msra.mxu0 %v4323_v24  ;;  %4821 = vmatpush2.msra.mxu1 %v4547_v25 }
 0x699   :  { %4751 = vmatprep.subr.mxu0 %v4317_v26  ;;  %4822 = vmatprep.subr.mxu1 %v4541_v27 }
 0x69a   :  { %4752 = vmatpush2.msra.mxu0 %v4316_v28  ;;  %4823 = vmatpush2.msra.mxu1 %v4540_v3 }
 0x69b   :  { %4831 = vmatprep.subr.mxu0 %v4312_v36  ;;  %4902 = vmatprep.subr.mxu1 %v4536_v31 }
 0x6d9   :  { %v3772_v32 = vpop.f32.mrf.mxu0  ;;  %v3843_v33 = vpop.f32.mrf.mxu1 }
 0x6da   :  { %v6387_v61 = vadd.f32 %v3843_v33, %v3772_v32 }
 0x6db   :  { %v3774_v34 = vpop.f32.mrf.mxu0  ;;  %v3845_v35 = vpop.f32.mrf.mxu1 }
 0x6dc   :  { %v6385_v59 = vadd.f32 %v3845_v35, %v3774_v34  ;;  %v3992_v44 = vrot.slane %v6387_v61, 4  ;;  %v4020_v47 = vmul.f32 %v6387_v61, %v6387_v61 }
 0x6de   :  { %v3998_v38 = vrot.slane %v6385_v59, 4  ;;  %v4021_v39 = vmul.f32 %v6385_v59, %v6385_v59  ;;  %v3993_v42 = vadd.f32 %v3992_v44, %v6387_v61  ;;  %v4024_v49 = vrot.slane %v4020_v47, 4 }
 0x6e0   :  { %v3999_v41 = vadd.f32 %v3998_v38, %v6385_v59  ;;  %v4030_v43 = vrot.slane %v4021_v39, 4  ;;  %v3994_v13 = vrot.slane %v3993_v42, 2  ;;  %v4025_v14 = vadd.f32 %v4024_v49, %v4020_v47 }
 0x6e2   :  { %v4000_v50 = vrot.slane %v3999_v41, 2  ;;  %v4031_v51 = vadd.f32 %v4030_v43, %v4021_v39  ;;  %v3995_v56 = vadd.f32 %v3994_v13, %v3993_v42  ;;  %v4026_v57 = vrot.slane %v4025_v14, 2 }
 0x6e4   :  { %v4001_v52 = vadd.f32 %v4000_v50, %v3999_v41  ;;  %v4032_v53 = vrot.slane %v4031_v51, 2  ;;  %v3996_v16 = vrot.slane %v3995_v56, 1  ;;  %v4027_v62 = vadd.f32 %v4026_v57, %v4025_v14 }
 0x6e6   :  { %v4002_v58 = vrot.slane %v4001_v52, 1  ;;  %v4033_v40 = vadd.f32 %v4032_v53, %v4031_v51  ;;  %v3997_v1 = vadd.f32 %v3996_v16, %v3995_v56  ;;  %v4028_v2 = vrot.slane %v4027_v62, 1 }
 0x6e8   :  { %v4003_v63 = vadd.f32 %v4002_v58, %v4001_v52  ;;  %v4034_v0 = vrot.slane %v4033_v40, 1  ;;  %v4016_v15 = vmul.f32 0.125, %v3997_v1  ;;  %v4029_v19 = vadd.f32 %v4028_v2, %v4027_v62 }
 0x6ea   :  { %v6404_v45 = vmul.f32 0.125, %v4003_v63  ;;  %v4035_v46 = vadd.f32 %v4034_v0, %v4033_v40  ;;  %v4048_v33 = vmul.f32 0.125, %v4029_v19  ;;  %v4052_v34 = vmul.f32 %v4016_v15, %v4016_v15 }
 0x6ec   :  { %v4049_v27 = vmul.f32 0.125, %v4035_v46  ;;  %v4053_v28 = vmul.f32 %v6404_v45, %v6404_v45  ;;  %v4056_v50 = vsub.f32 %v4048_v33, %v4052_v34 }
 0x6ee   :  { %v4057_v47 = vsub.f32 %v4049_v27, %v4053_v28  ;;  %v4060_v16 = vadd.f32 1e-05, %v4056_v50 }
 0x6f0   :  { %v4061_v53 = vadd.f32 1e-05, %v4057_v47 }
 0x6f2   :  { %5432 = vrsqrt.f32 %v4061_v53 }
 0x6f3   :  { %5434 = vrsqrt.f32 %v4060_v16  ;;  %v4529_v16 = vld [vmem:[%s7462_s3 + $0xa28] sm:$0xff] }
 0x6ff   :  { %v5433_v2 = vpop.eup %5432 }
 0x71a   :  { %v3914_v29 = vpop.f32.mrf.mxu0  ;;  %v3985_v30 = vpop.f32.mrf.mxu1 }
 0x71b   :  { %v6397_v5 = vadd.f32 %v3985_v30, %v3914_v29 }
 0x71c   :  { %v3916_v6 = vpop.f32.mrf.mxu0  ;;  %v3987_v8 = vpop.f32.mrf.mxu1 }
 0x71d   :  { %v4004_v12 = vrot.slane %v6397_v5, 4  ;;  %v4022_v54 = vmul.f32 %v6397_v5, %v6397_v5  ;;  %v6402_v55 = vadd.f32 %v3987_v8, %v3916_v6  ;;  %v5435_v6 = vpop.eup %5434 }
 0x71f   :  { %v4005_v48 = vadd.f32 %v4004_v12, %v6397_v5  ;;  %v4036_v37 = vrot.slane %v4022_v54, 4  ;;  %v4010_v4 = vrot.slane %v6402_v55, 4  ;;  %v4023_v17 = vmul.f32 %v6402_v55, %v6402_v55 }
 0x720   :  { %v4072_v12 = vcombine.low %v5435_v6, %v5433_v2  ;;  %v4291_v2 = vld [vmem:[%s7462_s3 + $0x2b8] sm:$0xff] }
 0x721   :  { %v4006_v20 = vrot.slane %v4005_v48, 2  ;;  %v4037_v24 = vadd.f32 %v4036_v37, %v4022_v54  ;;  %v4011_v25 = vadd.f32 %v4010_v4, %v6402_v55  ;;  %v4042_v26 = vrot.slane %v4023_v17, 4  ;;  %v4515_v6 = vld [vmem:[%s7462_s3 + $0x9b8] sm:$0xff] }
 0x722   :  { %v4080_v4 = vrot.slane %v4072_v12, %v5656_v60  ;;  %v4514_v12 = vld [vmem:[%s7462_s3 + $0x9b0] sm:$0xff] }
 0x723   :  { %v4007_v3 = vadd.f32 %v4006_v20, %v4005_v48  ;;  %v4038_v36 = vrot.slane %v4037_v24, 2  ;;  %v4012_v31 = vrot.slane %v4011_v25, 2  ;;  %v4043_v32 = vadd.f32 %v4042_v26, %v4023_v17  ;;  %v5316_v20 = vld [vmem:[%s7463_s4 + $0x28] sm:$0xff] }
 0x724   :  { %v4095_v48 = vcombine.low %v4016_v15, %v6404_v45 }
 0x725   :  { %v4008_v35 = vrot.slane %v4007_v3, 1  ;;  %v4039_v38 = vadd.f32 %v4038_v36, %v4037_v24  ;;  %v4013_v39 = vadd.f32 %v4012_v31, %v4011_v25  ;;  %v4044_v44 = vrot.slane %v4043_v32, 2 }
 0x726   :  { %v4103_v24 = vrot.slane %v4095_v48, %v5656_v60  ;;  %v4283_v48 = vld [vmem:[%s7462_s3 + $0x278] sm:$0xff] }
 0x727   :  { %v4009_v41 = vadd.f32 %v4008_v35, %v4007_v3  ;;  %v4040_v43 = vrot.slane %v4039_v38, 1  ;;  %v4014_v42 = vrot.slane %v4013_v39, 1  ;;  %v4045_v49 = vadd.f32 %v4044_v44, %v4043_v32 }
 0x729   :  { %v4018_v51 = vmul.f32 0.125, %v4009_v41  ;;  %v4041_v13 = vadd.f32 %v4040_v43, %v4039_v38  ;;  %v4015_v14 = vadd.f32 %v4014_v42, %v4013_v39  ;;  %v4046_v52 = vrot.slane %v4045_v49, 1 }
 0x72b   :  { %v4050_v56 = vmul.f32 0.125, %v4041_v13  ;;  %v4054_v57 = vmul.f32 %v4018_v51, %v4018_v51  ;;  %v4019_v58 = vmul.f32 0.125, %v4015_v14  ;;  %v4047_v40 = vadd.f32 %v4046_v52, %v4045_v49 }
 0x72d   :  { %v4058_v62 = vsub.f32 %v4050_v56, %v4054_v57  ;;  %v4051_v63 = vmul.f32 0.125, %v4047_v40  ;;  %v4055_v0 = vmul.f32 %v4019_v58, %v4019_v58  ;;  %v4096_v54 = vcombine.low %v4018_v51, %v4019_v58  ;;  %v4535_v58 = vld [vmem:[%s7462_s3 + $0xa58] sm:$0xff]  ;;  %v4305_v40 = vld [vmem:[%s7462_s3 + $0x328] sm:$0xff] }
 0x72f   :  { %v4062_v29 = vadd.f32 1e-05, %v4058_v62  ;;  %v4059_v30 = vsub.f32 %v4051_v63, %v4055_v0  ;;  %v4110_v19 = vrot.slane %v4096_v54, %v5656_v60  ;;  %v4304_v62 = vld [vmem:[%s7462_s3 + $0x320] sm:$0xff]  ;;  %v4298_v0 = vld [vmem:[%s7462_s3 + $0x2f0] sm:$0xff] }
 0x730   :  { %v4528_v63 = vld [vmem:[%s7462_s3 + $0xa20] sm:$0xff] }
 0x731   :  { %v4063_v1 = vadd.f32 1e-05, %v4059_v30  ;;  %5436 = vrsqrt.f32 %v4062_v29  ;;  %v4111_v27 = vcombine.low %v4103_v24, %v4110_v19  ;;  %v4522_v29 = vld [vmem:[%s7462_s3 + $0x9f0] sm:$0xff]  ;;  %v4297_v30 = vld [vmem:[%s7462_s3 + $0x2e8] sm:$0xff]  ;;  %v4284_v54 = vld [vmem:[%s7462_s3 + $0x280] sm:$0xff] }
 0x732   :  { %v4276_v19 = vld [vmem:[%s7462_s3 + $0x240] sm:$0xff]  ;;  %v4270_v24 = vld [vmem:[%s7462_s3 + $0x210] sm:$0xff] }
 0x733   :  { %5438 = vrsqrt.f32 %v4063_v1  ;;  %v4521_v1 = vld [vmem:[%s7462_s3 + $0x9e8] sm:$0xff] }
 0x73e   :  { %v5437_v8 = vpop.eup %5436 }
 0x740   :  { %v5439_v46 = vpop.eup %5438 }
 0x741   :  { %v4073_v37 = vcombine.low %v5437_v8, %v5439_v46  ;;  %v4290_v8 = vld [vmem:[%s7462_s3 + $0x2b0] sm:$0xff]  ;;  %v4508_v46 = vld [vmem:[%s7462_s3 + $0x980] sm:$0xff] }
 0x743   :  { %v4087_v17 = vrot.slane %v4073_v37, %v5656_v60  ;;  %v4507_v37 = vld [vmem:[%s7462_s3 + $0x978] sm:$0xff] }
 0x745   :  { %v4088_v25 = vcombine.low %v4080_v4, %v4087_v17  ;;  %v4277_v4 = vld [vmem:[%s7462_s3 + $0x248] sm:$0xff] }
 0x746   :  { %v4501_v17 = vld [vmem:[%s7462_s3 + $0x948] sm:$0xff] }
 0x747   :  { %v4090_v26 = vmul.f32 %v5316_v20, %v4088_v25  ;;  %v4494_v25 = vld [vmem:[%s7462_s3 + $0x910] sm:$0xff] }
 0x749   :  { %v4113_v28 = vmul.f32 %v4111_v27, %v4090_v26  ;;  %v4134_v3 = vrot.slane %v4090_v26, %v5667_v9  ;;  %v4126_v45 = vrot.slane %v4090_v26, %v5669_v10  ;;  %v4122_v15 = vrot.slane %v4090_v26, %v5665_v7  ;;  %v4493_v27 = vld [vmem:[%s7462_s3 + $0x908] sm:$0xff] }
 0x74a   :  { %v4130_v36 = vrot.slane %v4090_v26, %v5671_v11  ;;  %v4269_v26 = vld [vmem:[%s7462_s3 + $0x208] sm:$0xff] }
 0x74b   :  { %v4115_v31 = vrot.slane %v4113_v28, 7  ;;  %v4154_v32 = vrot.slane %v4134_v3, %v5665_v7  ;;  %v4146_v33 = vrot.slane %v4126_v45, %v5665_v7  ;;  %v4142_v34 = vrot.slane %v4122_v15, %v5665_v7  ;;  %v4263_v28 = vld [vmem:[%s7462_s3 + $0x1d8] sm:$0xff]  ;;  %v4262_v45 = vld [vmem:[%s7462_s3 + $0x1d0] sm:$0xff] }
 0x74c   :  { %v4150_v60 = vrot.slane %v4130_v36, %v5665_v7  ;;  %v4487_v3 = vld [vmem:[%s7462_s3 + $0x8d8] sm:$0xff]  ;;  %v4486_v15 = vld [vmem:[%s7462_s3 + $0x8d0] sm:$0xff]  ;;  %v4256_v36 = vld [vmem:[%s7462_s3 + $0x1a0] sm:$0xff] }
 0x74d   :  { %v4117_v35 = vsub.f32 %v5316_v20, %v4115_v31  ;;  %v4158_v41 = vmul.f32 %v4154_v32, %v6402_v55  ;;  %v4156_v43 = vmul.f32 %v4146_v33, %v6385_v59  ;;  %v4155_v42 = vmul.f32 %v4142_v34, %v6387_v61  ;;  %v4500_v20 = vld [vmem:[%s7462_s3 + $0x940] sm:$0xff]  ;;  %v4255_v32 = vld [vmem:[%s7462_s3 + $0x198] sm:$0xff]  ;;  %v4249_v34 = vld [vmem:[%s7462_s3 + $0x168] sm:$0xff] }
 0x74e   :  { %v4157_v49 = vmul.f32 %v4150_v60, %v6397_v5  ;;  %v4311_v5 = vld [vmem:[%s7462_s3 + $0x358] sm:$0xff]  ;;  %v4480_v31 = vld [vmem:[%s7462_s3 + $0x8a0] sm:$0xff]  ;;  %v4473_v60 = vld [vmem:[%s7462_s3 + $0x868] sm:$0xff] }
 0x74f   :  { %v4167_v38 = vrot.slane %v4117_v35, %v5679_v21  ;;  %v4175_v39 = vrot.slane %v4117_v35, %v5681_v22  ;;  %v4163_v44 = vrot.slane %v4117_v35, %v5676_v18  ;;  %v4171_v47 = vrot.slane %v4117_v35, %v5683_v23  ;;  %v4479_v33 = vld [vmem:[%s7462_s3 + $0x898] sm:$0xff]  ;;  %v4248_v35 = vld [vmem:[%s7462_s3 + $0x160] sm:$0xff] }
 0x751   :  { %v4187_v50 = vrot.slane %v4167_v38, %v5676_v18  ;;  %v4195_v51 = vrot.slane %v4175_v39, %v5676_v18  ;;  %v4183_v13 = vrot.slane %v4163_v44, %v5676_v18  ;;  %v4191_v22 = vrot.slane %v4171_v47, %v5676_v18  ;;  %v4472_v38 = vld [vmem:[%s7462_s3 + $0x860] sm:$0xff]  ;;  %v4242_v39 = vld [vmem:[%s7462_s3 + $0x130] sm:$0xff]  ;;  %v4241_v47 = vld [vmem:[%s7462_s3 + $0x128] sm:$0xff] }
 0x752   :  { %v4466_v44 = vld [vmem:[%s7462_s3 + $0x830] sm:$0xff] }
 0x753   :  { %v4197_v14 = vadd.f32 %v4187_v50, %v4156_v43  ;;  %v4199_v52 = vadd.f32 %v4195_v51, %v4158_v41  ;;  %v4196_v53 = vadd.f32 %v4183_v13, %v4155_v42  ;;  %v4198_v56 = vadd.f32 %v4191_v22, %v4157_v49  ;;  %v4465_v41 = vld [vmem:[%s7462_s3 + $0x828] sm:$0xff]  ;;  %v4235_v43 = vld [vmem:[%s7462_s3 + $0xf8] sm:$0xff]  ;;  %v4234_v49 = vld [vmem:[%s7462_s3 + $0xf0] sm:$0xff] }
 0x754   :  { %v4459_v42 = vld [vmem:[%s7462_s3 + $0x7f8] sm:$0xff]  ;;  %v4458_v50 = vld [vmem:[%s7462_s3 + $0x7f0] sm:$0xff]  ;;  %v4228_v51 = vld [vmem:[%s7462_s3 + $0xc0] sm:$0xff] }
 0x755   :  { %v6441_v57 = vmax.f32 %v4197_v14, 0.0  ;;  %v6443_v55 = vmax.f32 %v4199_v52, 0.0  ;;  %v6445_v59 = vmax.f32 %v4196_v53, 0.0  ;;  %v6447_v61 = vmax.f32 %v4198_v56, 0.0  ;;  %v4452_v13 = vld [vmem:[%s7462_s3 + $0x7c0] sm:$0xff]  ;;  %v4227_v22 = vld [vmem:[%s7462_s3 + $0xb8] sm:$0xff] }
 0x756   :  { %v4451_v14 = vld [vmem:[%s7462_s3 + $0x7b8] sm:$0xff]  ;;  %v4221_v52 = vld [vmem:[%s7462_s3 + $0x88] sm:$0xff]  ;;  %v4220_v56 = vld [vmem:[%s7462_s3 + $0x80] sm:$0xff] }
 0x757   :  { %4753 = vmatprep.mubr.f32.mxu0 %v6441_v57  ;;  %4824 = vmatprep.mubr.f32.mxu1 %v6443_v55  ;;  %v4445_v53 = vld [vmem:[%s7462_s3 + $0x788] sm:$0xff] }
 0x758   :  { %4754 = vmatmul.mubr.f32.vlgmr.msra.gmra.mxu0 %v6445_v59  ;;  %4825 = vmatmul.mubr.f32.vlgmr.msra.gmra.mxu1 %v6447_v61 }
 0x759   :  { %4832 = vmatpush1.msra.mxu0 %v4311_v5  ;;  %4903 = vmatpush1.msra.mxu1 %v4535_v58  ;;  %v4444_v5 = vld [vmem:[%s7462_s3 + $0x780] sm:$0xff]  ;;  %v4214_v58 = vld [vmem:[%s7462_s3 + $0x50] sm:$0xff] }
 0x75a   :  { %4833 = vmatprep.subr.mxu0 %v4305_v40  ;;  %4895 = vmatprep.mubr.f32.mxu0 %v6441_v57  ;;  %v4438_v40 = vld [vmem:[%s7462_s3 + $0x750] sm:$0xff] }
 0x75b   :  { %4904 = vmatprep.subr.mxu1 %v4529_v16  ;;  %4966 = vmatprep.mubr.f32.mxu1 %v6443_v55  ;;  %v4213_v16 = vld [vmem:[%s7462_s3 + $0x48] sm:$0xff] }
 0x75c   :  { %4834 = vmatpush1.msra.mxu0 %v4304_v62  ;;  %4905 = vmatpush1.msra.mxu1 %v4528_v63  ;;  %v4437_v62 = vld [vmem:[%s7462_s3 + $0x748] sm:$0xff]  ;;  %v4207_v63 = vld [vmem:[%s7462_s3 + $0x18] sm:$0xff] }
 0x75d   :  { %4835 = vmatprep.subr.mxu0 %v4298_v0  ;;  %4906 = vmatprep.subr.mxu1 %v4522_v29  ;;  %v4431_v0 = vld [vmem:[%s7462_s3 + $0x718] sm:$0xff]  ;;  %v4206_v29 = vld [vmem:[%s7462_s3 + $0x10] sm:$0xff] }
 0x75e   :  { %4836 = vmatpush1.msra.mxu0 %v4297_v30  ;;  %4907 = vmatpush1.msra.mxu1 %v4521_v1  ;;  %v4430_v30 = vld [vmem:[%s7462_s3 + $0x710] sm:$0xff]  ;;  %v4424_v1 = vld [vmem:[%s7462_s3 + $0x6e0] sm:$0xff] }
 0x75f   :  { %4837 = vmatprep.subr.mxu0 %v4291_v2  ;;  %4908 = vmatprep.subr.mxu1 %v4515_v6  ;;  %v4648_v2 = vld [vmem:[%s7462_s3 + $0xde0] sm:$0xff]  ;;  %v4423_v6 = vld [vmem:[%s7462_s3 + $0x6d8] sm:$0xff] }
 0x760   :  { %4838 = vmatpush1.msra.mxu0 %v4290_v8  ;;  %4909 = vmatpush1.msra.mxu1 %v4514_v12  ;;  %v4647_v8 = vld [vmem:[%s7462_s3 + $0xdd8] sm:$0xff]  ;;  %v4417_v12 = vld [vmem:[%s7462_s3 + $0x6a8] sm:$0xff] }
 0x761   :  { %4839 = vmatprep.subr.mxu0 %v4284_v54  ;;  %4910 = vmatprep.subr.mxu1 %v4508_v46  ;;  %v4641_v54 = vld [vmem:[%s7462_s3 + $0xda8] sm:$0xff]  ;;  %v4416_v46 = vld [vmem:[%s7462_s3 + $0x6a0] sm:$0xff] }
 0x762   :  { %4840 = vmatpush1.msra.mxu0 %v4283_v48  ;;  %4911 = vmatpush1.msra.mxu1 %v4507_v37  ;;  %v4640_v48 = vld [vmem:[%s7462_s3 + $0xda0] sm:$0xff]  ;;  %v4410_v37 = vld [vmem:[%s7462_s3 + $0x670] sm:$0xff] }
 0x763   :  { %4841 = vmatprep.subr.mxu0 %v4277_v4  ;;  %4912 = vmatprep.subr.mxu1 %v4501_v17  ;;  %v4634_v4 = vld [vmem:[%s7462_s3 + $0xd70] sm:$0xff]  ;;  %v4409_v17 = vld [vmem:[%s7462_s3 + $0x668] sm:$0xff] }
 0x764   :  { %4842 = vmatpush1.msra.mxu0 %v4276_v19  ;;  %4913 = vmatpush1.msra.mxu1 %v4500_v20  ;;  %v4633_v19 = vld [vmem:[%s7462_s3 + $0xd68] sm:$0xff]  ;;  %v4403_v20 = vld [vmem:[%s7462_s3 + $0x638] sm:$0xff] }
 0x765   :  { %4843 = vmatprep.subr.mxu0 %v4270_v24  ;;  %4914 = vmatprep.subr.mxu1 %v4494_v25  ;;  %v4627_v24 = vld [vmem:[%s7462_s3 + $0xd38] sm:$0xff]  ;;  %v4402_v25 = vld [vmem:[%s7462_s3 + $0x630] sm:$0xff] }
 0x766   :  { %4844 = vmatpush1.msra.mxu0 %v4269_v26  ;;  %4915 = vmatpush1.msra.mxu1 %v4493_v27  ;;  %v4626_v26 = vld [vmem:[%s7462_s3 + $0xd30] sm:$0xff]  ;;  %v4396_v27 = vld [vmem:[%s7462_s3 + $0x600] sm:$0xff] }
 0x767   :  { %4845 = vmatprep.subr.mxu0 %v4263_v28  ;;  %4916 = vmatprep.subr.mxu1 %v4487_v3  ;;  %v4620_v28 = vld [vmem:[%s7462_s3 + $0xd00] sm:$0xff]  ;;  %v4395_v3 = vld [vmem:[%s7462_s3 + $0x5f8] sm:$0xff] }
 0x768   :  { %4846 = vmatpush1.msra.mxu0 %v4262_v45  ;;  %4917 = vmatpush1.msra.mxu1 %v4486_v15  ;;  %v4619_v45 = vld [vmem:[%s7462_s3 + $0xcf8] sm:$0xff]  ;;  %v4389_v15 = vld [vmem:[%s7462_s3 + $0x5c8] sm:$0xff] }
 0x769   :  { %4847 = vmatprep.subr.mxu0 %v4256_v36  ;;  %4918 = vmatprep.subr.mxu1 %v4480_v31  ;;  %v4613_v36 = vld [vmem:[%s7462_s3 + $0xcc8] sm:$0xff]  ;;  %v4388_v31 = vld [vmem:[%s7462_s3 + $0x5c0] sm:$0xff] }
 0x76a   :  { %4848 = vmatpush1.msra.mxu0 %v4255_v32  ;;  %4919 = vmatpush1.msra.mxu1 %v4479_v33  ;;  %v4612_v32 = vld [vmem:[%s7462_s3 + $0xcc0] sm:$0xff]  ;;  %v4382_v33 = vld [vmem:[%s7462_s3 + $0x590] sm:$0xff] }
 0x76b   :  { %4849 = vmatprep.subr.mxu0 %v4249_v34  ;;  %4920 = vmatprep.subr.mxu1 %v4473_v60  ;;  %v4606_v34 = vld [vmem:[%s7462_s3 + $0xc90] sm:$0xff]  ;;  %v4381_v60 = vld [vmem:[%s7462_s3 + $0x588] sm:$0xff] }
 0x76c   :  { %4850 = vmatpush1.msra.mxu0 %v4248_v35  ;;  %4921 = vmatpush1.msra.mxu1 %v4472_v38  ;;  %v4605_v35 = vld [vmem:[%s7462_s3 + $0xc88] sm:$0xff]  ;;  %v4375_v38 = vld [vmem:[%s7462_s3 + $0x558] sm:$0xff] }
 0x76d   :  { %4851 = vmatprep.subr.mxu0 %v4242_v39  ;;  %4922 = vmatprep.subr.mxu1 %v4466_v44  ;;  %v4599_v39 = vld [vmem:[%s7462_s3 + $0xc58] sm:$0xff]  ;;  %v4374_v44 = vld [vmem:[%s7462_s3 + $0x550] sm:$0xff] }
 0x76e   :  { %4852 = vmatpush1.msra.mxu0 %v4241_v47  ;;  %4923 = vmatpush1.msra.mxu1 %v4465_v41  ;;  %v4598_v47 = vld [vmem:[%s7462_s3 + $0xc50] sm:$0xff]  ;;  %v4368_v41 = vld [vmem:[%s7462_s3 + $0x520] sm:$0xff] }
 0x76f   :  { %4853 = vmatprep.subr.mxu0 %v4235_v43  ;;  %4924 = vmatprep.subr.mxu1 %v4459_v42  ;;  %v4592_v43 = vld [vmem:[%s7462_s3 + $0xc20] sm:$0xff]  ;;  %v4367_v42 = vld [vmem:[%s7462_s3 + $0x518] sm:$0xff] }
 0x770   :  { %4854 = vmatpush1.msra.mxu0 %v4234_v49  ;;  %4925 = vmatpush1.msra.mxu1 %v4458_v50  ;;  %v4591_v49 = vld [vmem:[%s7462_s3 + $0xc18] sm:$0xff]  ;;  %v4361_v50 = vld [vmem:[%s7462_s3 + $0x4e8] sm:$0xff] }
 0x771   :  { %4855 = vmatprep.subr.mxu0 %v4228_v51  ;;  %4926 = vmatprep.subr.mxu1 %v4452_v13  ;;  %v4585_v51 = vld [vmem:[%s7462_s3 + $0xbe8] sm:$0xff]  ;;  %v4360_v13 = vld [vmem:[%s7462_s3 + $0x4e0] sm:$0xff] }
 0x772   :  { %4856 = vmatpush1.msra.mxu0 %v4227_v22  ;;  %4927 = vmatpush1.msra.mxu1 %v4451_v14  ;;  %v4584_v22 = vld [vmem:[%s7462_s3 + $0xbe0] sm:$0xff]  ;;  %v4354_v14 = vld [vmem:[%s7462_s3 + $0x4b0] sm:$0xff] }
 0x773   :  { %4857 = vmatprep.subr.mxu0 %v4221_v52  ;;  %4928 = vmatprep.subr.mxu1 %v4445_v53  ;;  %v4578_v52 = vld [vmem:[%s7462_s3 + $0xbb0] sm:$0xff]  ;;  %v4353_v53 = vld [vmem:[%s7462_s3 + $0x4a8] sm:$0xff] }
 0x774   :  { %4858 = vmatpush1.msra.mxu0 %v4220_v56  ;;  %4929 = vmatpush1.msra.mxu1 %v4444_v5  ;;  %v4577_v56 = vld [vmem:[%s7462_s3 + $0xba8] sm:$0xff]  ;;  %v4347_v5 = vld [vmem:[%s7462_s3 + $0x478] sm:$0xff] }
 0x775   :  { %4859 = vmatprep.subr.mxu0 %v4214_v58  ;;  %4930 = vmatprep.subr.mxu1 %v4438_v40  ;;  %v4571_v58 = vld [vmem:[%s7462_s3 + $0xb78] sm:$0xff]  ;;  %v4346_v40 = vld [vmem:[%s7462_s3 + $0x470] sm:$0xff] }
 0x776   :  { %4860 = vmatpush1.msra.mxu0 %v4213_v16  ;;  %4931 = vmatpush1.msra.mxu1 %v4437_v62  ;;  %v4570_v16 = vld [vmem:[%s7462_s3 + $0xb70] sm:$0xff]  ;;  %v4340_v62 = vld [vmem:[%s7462_s3 + $0x440] sm:$0xff] }
 0x777   :  { %4861 = vmatprep.subr.mxu0 %v4207_v63  ;;  %4932 = vmatprep.subr.mxu1 %v4431_v0  ;;  %v4564_v63 = vld [vmem:[%s7462_s3 + $0xb40] sm:$0xff]  ;;  %v4339_v0 = vld [vmem:[%s7462_s3 + $0x438] sm:$0xff] }
 0x778   :  { %4862 = vmatpush1.msra.mxu0 %v4206_v29  ;;  %4933 = vmatpush1.msra.mxu1 %v4430_v30  ;;  %v4563_v29 = vld [vmem:[%s7462_s3 + $0xb38] sm:$0xff]  ;;  %v4333_v30 = vld [vmem:[%s7462_s3 + $0x408] sm:$0xff] }
 0x779   :  { %4863 = vmatprep.subr.mxu0 %v4424_v1  ;;  %4934 = vmatprep.subr.mxu1 %v4648_v2  ;;  %v4557_v1 = vld [vmem:[%s7462_s3 + $0xb08] sm:$0xff]  ;;  %v4332_v2 = vld [vmem:[%s7462_s3 + $0x400] sm:$0xff] }
 0x77a   :  { %4864 = vmatpush2.msra.mxu0 %v4423_v6  ;;  %4935 = vmatpush2.msra.mxu1 %v4647_v8  ;;  %v4556_v6 = vld [vmem:[%s7462_s3 + $0xb00] sm:$0xff]  ;;  %v4326_v8 = vld [vmem:[%s7462_s3 + $0x3d0] sm:$0xff] }
 0x77b   :  { %4865 = vmatprep.subr.mxu0 %v4417_v12  ;;  %4936 = vmatprep.subr.mxu1 %v4641_v54  ;;  %v4550_v12 = vld [vmem:[%s7462_s3 + $0xad0] sm:$0xff]  ;;  %v4325_v54 = vld [vmem:[%s7462_s3 + $0x3c8] sm:$0xff] }
 0x77c   :  { %4866 = vmatpush2.msra.mxu0 %v4416_v46  ;;  %4937 = vmatpush2.msra.mxu1 %v4640_v48  ;;  %v4549_v46 = vld [vmem:[%s7462_s3 + $0xac8] sm:$0xff]  ;;  %v4319_v48 = vld [vmem:[%s7462_s3 + $0x398] sm:$0xff] }
 0x77d   :  { %4867 = vmatprep.subr.mxu0 %v4410_v37  ;;  %4938 = vmatprep.subr.mxu1 %v4634_v4  ;;  %v4543_v37 = vld [vmem:[%s7462_s3 + $0xa98] sm:$0xff]  ;;  %v4318_v4 = vld [vmem:[%s7462_s3 + $0x390] sm:$0xff] }
 0x77e   :  { %4868 = vmatpush2.msra.mxu0 %v4409_v17  ;;  %4939 = vmatpush2.msra.mxu1 %v4633_v19  ;;  %v4542_v17 = vld [vmem:[%s7462_s3 + $0xa90] sm:$0xff] }
 0x77f   :  { %4869 = vmatprep.subr.mxu0 %v4403_v20  ;;  %4940 = vmatprep.subr.mxu1 %v4627_v24  ;;  %v4314_v19 = vld [vmem:[%s7462_s3 + $0x370] sm:$0xff]  ;;  %v4313_v24 = vld [vmem:[%s7462_s3 + $0x368] sm:$0xff] }
 0x780   :  { %4870 = vmatpush2.msra.mxu0 %v4402_v25  ;;  %4941 = vmatpush2.msra.mxu1 %v4626_v26  ;;  %v4538_v20 = vld [vmem:[%s7462_s3 + $0xa70] sm:$0xff]  ;;  %v4537_v25 = vld [vmem:[%s7462_s3 + $0xa68] sm:$0xff]  ;;  %v4307_v26 = vld [vmem:[%s7462_s3 + $0x338] sm:$0xff] }
 0x781   :  { %4871 = vmatprep.subr.mxu0 %v4396_v27  ;;  %4942 = vmatprep.subr.mxu1 %v4620_v28  ;;  %v4531_v27 = vld [vmem:[%s7462_s3 + $0xa38] sm:$0xff]  ;;  %v4306_v28 = vld [vmem:[%s7462_s3 + $0x330] sm:$0xff] }
 0x782   :  { %4872 = vmatpush2.msra.mxu0 %v4395_v3  ;;  %4943 = vmatpush2.msra.mxu1 %v4619_v45  ;;  %v4530_v3 = vld [vmem:[%s7462_s3 + $0xa30] sm:$0xff]  ;;  %v4300_v45 = vld [vmem:[%s7462_s3 + $0x300] sm:$0xff] }
 0x783   :  { %4873 = vmatprep.subr.mxu0 %v4389_v15  ;;  %4944 = vmatprep.subr.mxu1 %v4613_v36  ;;  %v4524_v15 = vld [vmem:[%s7462_s3 + $0xa00] sm:$0xff]  ;;  %v4299_v36 = vld [vmem:[%s7462_s3 + $0x2f8] sm:$0xff] }
 0x784   :  { %4874 = vmatpush2.msra.mxu0 %v4388_v31  ;;  %4945 = vmatpush2.msra.mxu1 %v4612_v32  ;;  %v4523_v31 = vld [vmem:[%s7462_s3 + $0x9f8] sm:$0xff]  ;;  %v4293_v32 = vld [vmem:[%s7462_s3 + $0x2c8] sm:$0xff] }
 0x785   :  { %4875 = vmatprep.subr.mxu0 %v4382_v33  ;;  %4946 = vmatprep.subr.mxu1 %v4606_v34  ;;  %v4517_v33 = vld [vmem:[%s7462_s3 + $0x9c8] sm:$0xff]  ;;  %v4292_v34 = vld [vmem:[%s7462_s3 + $0x2c0] sm:$0xff] }
 0x786   :  { %4876 = vmatpush2.msra.mxu0 %v4381_v60  ;;  %4947 = vmatpush2.msra.mxu1 %v4605_v35  ;;  %v4516_v60 = vld [vmem:[%s7462_s3 + $0x9c0] sm:$0xff]  ;;  %v4286_v35 = vld [vmem:[%s7462_s3 + $0x290] sm:$0xff] }
 0x787   :  { %4877 = vmatprep.subr.mxu0 %v4375_v38  ;;  %4948 = vmatprep.subr.mxu1 %v4599_v39  ;;  %v4510_v38 = vld [vmem:[%s7462_s3 + $0x990] sm:$0xff]  ;;  %v4285_v39 = vld [vmem:[%s7462_s3 + $0x288] sm:$0xff] }
 0x788   :  { %4878 = vmatpush2.msra.mxu0 %v4374_v44  ;;  %4949 = vmatpush2.msra.mxu1 %v4598_v47  ;;  %v4509_v44 = vld [vmem:[%s7462_s3 + $0x988] sm:$0xff]  ;;  %v4279_v47 = vld [vmem:[%s7462_s3 + $0x258] sm:$0xff] }
 0x789   :  { %4879 = vmatprep.subr.mxu0 %v4368_v41  ;;  %4950 = vmatprep.subr.mxu1 %v4592_v43  ;;  %v4503_v41 = vld [vmem:[%s7462_s3 + $0x958] sm:$0xff]  ;;  %v4278_v43 = vld [vmem:[%s7462_s3 + $0x250] sm:$0xff] }
 0x78a   :  { %4880 = vmatpush2.msra.mxu0 %v4367_v42  ;;  %4951 = vmatpush2.msra.mxu1 %v4591_v49  ;;  %v4502_v42 = vld [vmem:[%s7462_s3 + $0x950] sm:$0xff]  ;;  %v4272_v49 = vld [vmem:[%s7462_s3 + $0x220] sm:$0xff] }
 0x78b   :  { %4881 = vmatprep.subr.mxu0 %v4361_v50  ;;  %4952 = vmatprep.subr.mxu1 %v4585_v51  ;;  %v4496_v50 = vld [vmem:[%s7462_s3 + $0x920] sm:$0xff]  ;;  %v4271_v51 = vld [vmem:[%s7462_s3 + $0x218] sm:$0xff] }
 0x78c   :  { %4882 = vmatpush2.msra.mxu0 %v4360_v13  ;;  %4953 = vmatpush2.msra.mxu1 %v4584_v22  ;;  %v4495_v13 = vld [vmem:[%s7462_s3 + $0x918] sm:$0xff]  ;;  %v4265_v22 = vld [vmem:[%s7462_s3 + $0x1e8] sm:$0xff] }
 0x78d   :  { %4883 = vmatprep.subr.mxu0 %v4354_v14  ;;  %4954 = vmatprep.subr.mxu1 %v4578_v52  ;;  %v4489_v14 = vld [vmem:[%s7462_s3 + $0x8e8] sm:$0xff]  ;;  %v4264_v52 = vld [vmem:[%s7462_s3 + $0x1e0] sm:$0xff] }
 0x78e   :  { %4884 = vmatpush2.msra.mxu0 %v4353_v53  ;;  %4955 = vmatpush2.msra.mxu1 %v4577_v56  ;;  %v4488_v53 = vld [vmem:[%s7462_s3 + $0x8e0] sm:$0xff]  ;;  %v4258_v56 = vld [vmem:[%s7462_s3 + $0x1b0] sm:$0xff] }
 0x78f   :  { %4885 = vmatprep.subr.mxu0 %v4347_v5  ;;  %4956 = vmatprep.subr.mxu1 %v4571_v58  ;;  %v4482_v5 = vld [vmem:[%s7462_s3 + $0x8b0] sm:$0xff]  ;;  %v4257_v58 = vld [vmem:[%s7462_s3 + $0x1a8] sm:$0xff] }
 0x790   :  { %4886 = vmatpush2.msra.mxu0 %v4346_v40  ;;  %4957 = vmatpush2.msra.mxu1 %v4570_v16  ;;  %v4481_v40 = vld [vmem:[%s7462_s3 + $0x8a8] sm:$0xff]  ;;  %v4251_v16 = vld [vmem:[%s7462_s3 + $0x178] sm:$0xff] }
 0x791   :  { %4887 = vmatprep.subr.mxu0 %v4340_v62  ;;  %4958 = vmatprep.subr.mxu1 %v4564_v63  ;;  %v4475_v62 = vld [vmem:[%s7462_s3 + $0x878] sm:$0xff]  ;;  %v4250_v63 = vld [vmem:[%s7462_s3 + $0x170] sm:$0xff] }
 0x792   :  { %4888 = vmatpush2.msra.mxu0 %v4339_v0  ;;  %4959 = vmatpush2.msra.mxu1 %v4563_v29  ;;  %v4474_v0 = vld [vmem:[%s7462_s3 + $0x870] sm:$0xff]  ;;  %v4244_v29 = vld [vmem:[%s7462_s3 + $0x140] sm:$0xff] }
 0x793   :  { %4889 = vmatprep.subr.mxu0 %v4333_v30  ;;  %4960 = vmatprep.subr.mxu1 %v4557_v1  ;;  %v4468_v30 = vld [vmem:[%s7462_s3 + $0x840] sm:$0xff]  ;;  %v4243_v1 = vld [vmem:[%s7462_s3 + $0x138] sm:$0xff] }
 0x794   :  { %4890 = vmatpush2.msra.mxu0 %v4332_v2  ;;  %4961 = vmatpush2.msra.mxu1 %v4556_v6  ;;  %v4467_v2 = vld [vmem:[%s7462_s3 + $0x838] sm:$0xff]  ;;  %v4237_v6 = vld [vmem:[%s7462_s3 + $0x108] sm:$0xff] }
 0x795   :  { %4891 = vmatprep.subr.mxu0 %v4326_v8  ;;  %4962 = vmatprep.subr.mxu1 %v4550_v12  ;;  %v4461_v8 = vld [vmem:[%s7462_s3 + $0x808] sm:$0xff]  ;;  %v4236_v12 = vld [vmem:[%s7462_s3 + $0x100] sm:$0xff] }
 0x796   :  { %4892 = vmatpush2.msra.mxu0 %v4325_v54  ;;  %4963 = vmatpush2.msra.mxu1 %v4549_v46  ;;  %v4460_v54 = vld [vmem:[%s7462_s3 + $0x800] sm:$0xff]  ;;  %v4230_v46 = vld [vmem:[%s7462_s3 + $0xd0] sm:$0xff] }
 0x797   :  { %4893 = vmatprep.subr.mxu0 %v4319_v48  ;;  %4964 = vmatprep.subr.mxu1 %v4543_v37  ;;  %v4454_v48 = vld [vmem:[%s7462_s3 + $0x7d0] sm:$0xff]  ;;  %v4229_v37 = vld [vmem:[%s7462_s3 + $0xc8] sm:$0xff] }
 0x798   :  { %4894 = vmatpush2.msra.mxu0 %v4318_v4  ;;  %4965 = vmatpush2.msra.mxu1 %v4542_v17  ;;  %v4453_v4 = vld [vmem:[%s7462_s3 + $0x7c8] sm:$0xff]  ;;  %v4223_v17 = vld [vmem:[%s7462_s3 + $0x98] sm:$0xff] }
 0x799   :  { %4896 = vmatmul.mubr.f32.vlgmr.msra.gmra.mxu0 %v6445_v59  ;;  %4967 = vmatmul.mubr.f32.vlgmr.msra.gmra.mxu1 %v6447_v61 }
 0x79a   :  { %4973 = vmatprep.subr.mxu0 %v4314_v19  ;;  %5044 = vmatprep.subr.mxu1 %v4538_v20  ;;  %v4447_v19 = vld [vmem:[%s7462_s3 + $0x798] sm:$0xff]  ;;  %v4222_v20 = vld [vmem:[%s7462_s3 + $0x90] sm:$0xff] }
 0x79b   :  { %4974 = vmatpush1.msra.mxu0 %v4313_v24  ;;  %5037 = vmatprep.mubr.f32.mxu0 %v6441_v57  ;;  %v4446_v24 = vld [vmem:[%s7462_s3 + $0x790] sm:$0xff] }
 0x79c   :  { %5045 = vmatpush1.msra.mxu1 %v4537_v25  ;;  %5108 = vmatprep.mubr.f32.mxu1 %v6443_v55  ;;  %v4216_v25 = vld [vmem:[%s7462_s3 + $0x60] sm:$0xff] }
 0x79d   :  { %4975 = vmatprep.subr.mxu0 %v4307_v26  ;;  %5046 = vmatprep.subr.mxu1 %v4531_v27  ;;  %v4440_v26 = vld [vmem:[%s7462_s3 + $0x760] sm:$0xff]  ;;  %v4215_v27 = vld [vmem:[%s7462_s3 + $0x58] sm:$0xff] }
 0x79e   :  { %4976 = vmatpush1.msra.mxu0 %v4306_v28  ;;  %5047 = vmatpush1.msra.mxu1 %v4530_v3  ;;  %v4439_v28 = vld [vmem:[%s7462_s3 + $0x758] sm:$0xff]  ;;  %v4209_v3 = vld [vmem:[%s7462_s3 + $0x28] sm:$0xff] }
 0x79f   :  { %4977 = vmatprep.subr.mxu0 %v4300_v45  ;;  %5048 = vmatprep.subr.mxu1 %v4524_v15  ;;  %v4433_v45 = vld [vmem:[%s7462_s3 + $0x728] sm:$0xff]  ;;  %v4208_v15 = vld [vmem:[%s7462_s3 + $0x20] sm:$0xff] }
 0x7a0   :  { %4978 = vmatpush1.msra.mxu0 %v4299_v36  ;;  %5049 = vmatpush1.msra.mxu1 %v4523_v31  ;;  %v4432_v36 = vld [vmem:[%s7462_s3 + $0x720] sm:$0xff]  ;;  %v4426_v31 = vld [vmem:[%s7462_s3 + $0x6f0] sm:$0xff] }
 0x7a1   :  { %4979 = vmatprep.subr.mxu0 %v4293_v32  ;;  %5050 = vmatprep.subr.mxu1 %v4517_v33  ;;  %v4650_v32 = vld [vmem:[%s7462_s3 + $0xdf0] sm:$0xff]  ;;  %v4425_v33 = vld [vmem:[%s7462_s3 + $0x6e8] sm:$0xff] }
 0x7a2   :  { %4980 = vmatpush1.msra.mxu0 %v4292_v34  ;;  %5051 = vmatpush1.msra.mxu1 %v4516_v60  ;;  %v4649_v34 = vld [vmem:[%s7462_s3 + $0xde8] sm:$0xff]  ;;  %v4419_v60 = vld [vmem:[%s7462_s3 + $0x6b8] sm:$0xff] }
 0x7a3   :  { %4981 = vmatprep.subr.mxu0 %v4286_v35  ;;  %5052 = vmatprep.subr.mxu1 %v4510_v38  ;;  %v4643_v35 = vld [vmem:[%s7462_s3 + $0xdb8] sm:$0xff]  ;;  %v4418_v38 = vld [vmem:[%s7462_s3 + $0x6b0] sm:$0xff] }
 0x7a4   :  { %4982 = vmatpush1.msra.mxu0 %v4285_v39  ;;  %5053 = vmatpush1.msra.mxu1 %v4509_v44  ;;  %v4642_v39 = vld [vmem:[%s7462_s3 + $0xdb0] sm:$0xff]  ;;  %v4412_v44 = vld [vmem:[%s7462_s3 + $0x680] sm:$0xff] }
 0x7a5   :  { %4983 = vmatprep.subr.mxu0 %v4279_v47  ;;  %5054 = vmatprep.subr.mxu1 %v4503_v41  ;;  %v4636_v47 = vld [vmem:[%s7462_s3 + $0xd80] sm:$0xff]  ;;  %v4411_v41 = vld [vmem:[%s7462_s3 + $0x678] sm:$0xff] }
 0x7a6   :  { %4984 = vmatpush1.msra.mxu0 %v4278_v43  ;;  %5055 = vmatpush1.msra.mxu1 %v4502_v42  ;;  %v4635_v43 = vld [vmem:[%s7462_s3 + $0xd78] sm:$0xff]  ;;  %v4405_v42 = vld [vmem:[%s7462_s3 + $0x648] sm:$0xff] }
 0x7a7   :  { %4985 = vmatprep.subr.mxu0 %v4272_v49  ;;  %5056 = vmatprep.subr.mxu1 %v4496_v50  ;;  %v4629_v49 = vld [vmem:[%s7462_s3 + $0xd48] sm:$0xff]  ;;  %v4404_v50 = vld [vmem:[%s7462_s3 + $0x640] sm:$0xff] }
 0x7a8   :  { %4986 = vmatpush1.msra.mxu0 %v4271_v51  ;;  %5057 = vmatpush1.msra.mxu1 %v4495_v13  ;;  %v4628_v51 = vld [vmem:[%s7462_s3 + $0xd40] sm:$0xff]  ;;  %v4398_v13 = vld [vmem:[%s7462_s3 + $0x610] sm:$0xff] }
 0x7a9   :  { %4987 = vmatprep.subr.mxu0 %v4265_v22  ;;  %5058 = vmatprep.subr.mxu1 %v4489_v14  ;;  %v4622_v22 = vld [vmem:[%s7462_s3 + $0xd10] sm:$0xff]  ;;  %v4397_v14 = vld [vmem:[%s7462_s3 + $0x608] sm:$0xff] }
 0x7aa   :  { %4988 = vmatpush1.msra.mxu0 %v4264_v52  ;;  %5059 = vmatpush1.msra.mxu1 %v4488_v53  ;;  %v4621_v52 = vld [vmem:[%s7462_s3 + $0xd08] sm:$0xff]  ;;  %v4391_v53 = vld [vmem:[%s7462_s3 + $0x5d8] sm:$0xff] }
 0x7ab   :  { %4989 = vmatprep.subr.mxu0 %v4258_v56  ;;  %5060 = vmatprep.subr.mxu1 %v4482_v5  ;;  %v4615_v56 = vld [vmem:[%s7462_s3 + $0xcd8] sm:$0xff]  ;;  %v4390_v5 = vld [vmem:[%s7462_s3 + $0x5d0] sm:$0xff] }
 0x7ac   :  { %4990 = vmatpush1.msra.mxu0 %v4257_v58  ;;  %5061 = vmatpush1.msra.mxu1 %v4481_v40  ;;  %v4614_v58 = vld [vmem:[%s7462_s3 + $0xcd0] sm:$0xff]  ;;  %v4384_v40 = vld [vmem:[%s7462_s3 + $0x5a0] sm:$0xff] }
 0x7ad   :  { %4991 = vmatprep.subr.mxu0 %v4251_v16  ;;  %5062 = vmatprep.subr.mxu1 %v4475_v62  ;;  %v4608_v16 = vld [vmem:[%s7462_s3 + $0xca0] sm:$0xff]  ;;  %v4383_v62 = vld [vmem:[%s7462_s3 + $0x598] sm:$0xff] }
 0x7ae   :  { %4992 = vmatpush1.msra.mxu0 %v4250_v63  ;;  %5063 = vmatpush1.msra.mxu1 %v4474_v0  ;;  %v4607_v63 = vld [vmem:[%s7462_s3 + $0xc98] sm:$0xff]  ;;  %v4377_v0 = vld [vmem:[%s7462_s3 + $0x568] sm:$0xff] }
 0x7af   :  { %4993 = vmatprep.subr.mxu0 %v4244_v29  ;;  %5064 = vmatprep.subr.mxu1 %v4468_v30  ;;  %v4601_v29 = vld [vmem:[%s7462_s3 + $0xc68] sm:$0xff]  ;;  %v4376_v30 = vld [vmem:[%s7462_s3 + $0x560] sm:$0xff] }
 0x7b0   :  { %4994 = vmatpush1.msra.mxu0 %v4243_v1  ;;  %5065 = vmatpush1.msra.mxu1 %v4467_v2  ;;  %v4600_v1 = vld [vmem:[%s7462_s3 + $0xc60] sm:$0xff]  ;;  %v4370_v2 = vld [vmem:[%s7462_s3 + $0x530] sm:$0xff] }
 0x7b1   :  { %4995 = vmatprep.subr.mxu0 %v4237_v6  ;;  %5066 = vmatprep.subr.mxu1 %v4461_v8  ;;  %v4594_v6 = vld [vmem:[%s7462_s3 + $0xc30] sm:$0xff]  ;;  %v4369_v8 = vld [vmem:[%s7462_s3 + $0x528] sm:$0xff] }
 0x7b2   :  { %4996 = vmatpush1.msra.mxu0 %v4236_v12  ;;  %5067 = vmatpush1.msra.mxu1 %v4460_v54  ;;  %v4593_v12 = vld [vmem:[%s7462_s3 + $0xc28] sm:$0xff]  ;;  %v4363_v54 = vld [vmem:[%s7462_s3 + $0x4f8] sm:$0xff] }
 0x7b3   :  { %4997 = vmatprep.subr.mxu0 %v4230_v46  ;;  %5068 = vmatprep.subr.mxu1 %v4454_v48  ;;  %v4587_v46 = vld [vmem:[%s7462_s3 + $0xbf8] sm:$0xff]  ;;  %v4362_v48 = vld [vmem:[%s7462_s3 + $0x4f0] sm:$0xff] }
 0x7b4   :  { %4998 = vmatpush1.msra.mxu0 %v4229_v37  ;;  %5069 = vmatpush1.msra.mxu1 %v4453_v4  ;;  %v4586_v37 = vld [vmem:[%s7462_s3 + $0xbf0] sm:$0xff]  ;;  %v4356_v4 = vld [vmem:[%s7462_s3 + $0x4c0] sm:$0xff] }
 0x7b5   :  { %4999 = vmatprep.subr.mxu0 %v4223_v17  ;;  %5070 = vmatprep.subr.mxu1 %v4447_v19  ;;  %v4580_v17 = vld [vmem:[%s7462_s3 + $0xbc0] sm:$0xff]  ;;  %v4355_v19 = vld [vmem:[%s7462_s3 + $0x4b8] sm:$0xff] }
 0x7b6   :  { %5000 = vmatpush1.msra.mxu0 %v4222_v20  ;;  %5071 = vmatpush1.msra.mxu1 %v4446_v24  ;;  %v4579_v20 = vld [vmem:[%s7462_s3 + $0xbb8] sm:$0xff]  ;;  %v4349_v24 = vld [vmem:[%s7462_s3 + $0x488] sm:$0xff] }
 0x7b7   :  { %5001 = vmatprep.subr.mxu0 %v4216_v25  ;;  %5072 = vmatprep.subr.mxu1 %v4440_v26  ;;  %v4573_v25 = vld [vmem:[%s7462_s3 + $0xb88] sm:$0xff]  ;;  %v4348_v26 = vld [vmem:[%s7462_s3 + $0x480] sm:$0xff] }
 0x7b8   :  { %5002 = vmatpush1.msra.mxu0 %v4215_v27  ;;  %5073 = vmatpush1.msra.mxu1 %v4439_v28  ;;  %v4572_v27 = vld [vmem:[%s7462_s3 + $0xb80] sm:$0xff]  ;;  %v4342_v28 = vld [vmem:[%s7462_s3 + $0x450] sm:$0xff] }
 0x7b9   :  { %5003 = vmatprep.subr.mxu0 %v4209_v3  ;;  %5074 = vmatprep.subr.mxu1 %v4433_v45  ;;  %v4566_v3 = vld [vmem:[%s7462_s3 + $0xb50] sm:$0xff]  ;;  %v4341_v45 = vld [vmem:[%s7462_s3 + $0x448] sm:$0xff] }
 0x7ba   :  { %5004 = vmatpush1.msra.mxu0 %v4208_v15  ;;  %5075 = vmatpush1.msra.mxu1 %v4432_v36  ;;  %v4565_v15 = vld [vmem:[%s7462_s3 + $0xb48] sm:$0xff]  ;;  %v4335_v36 = vld [vmem:[%s7462_s3 + $0x418] sm:$0xff] }
 0x7bb   :  { %5005 = vmatprep.subr.mxu0 %v4426_v31  ;;  %5076 = vmatprep.subr.mxu1 %v4650_v32  ;;  %v4559_v31 = vld [vmem:[%s7462_s3 + $0xb18] sm:$0xff]  ;;  %v4334_v32 = vld [vmem:[%s7462_s3 + $0x410] sm:$0xff] }
 0x7bc   :  { %5006 = vmatpush2.msra.mxu0 %v4425_v33  ;;  %5077 = vmatpush2.msra.mxu1 %v4649_v34  ;;  %v4558_v33 = vld [vmem:[%s7462_s3 + $0xb10] sm:$0xff]  ;;  %v4328_v34 = vld [vmem:[%s7462_s3 + $0x3e0] sm:$0xff] }
 0x7bd   :  { %5007 = vmatprep.subr.mxu0 %v4419_v60  ;;  %5078 = vmatprep.subr.mxu1 %v4643_v35  ;;  %v4552_v60 = vld [vmem:[%s7462_s3 + $0xae0] sm:$0xff]  ;;  %v4327_v35 = vld [vmem:[%s7462_s3 + $0x3d8] sm:$0xff] }
 0x7be   :  { %5008 = vmatpush2.msra.mxu0 %v4418_v38  ;;  %5079 = vmatpush2.msra.mxu1 %v4642_v39  ;;  %v4551_v38 = vld [vmem:[%s7462_s3 + $0xad8] sm:$0xff]  ;;  %v4321_v39 = vld [vmem:[%s7462_s3 + $0x3a8] sm:$0xff] }
 0x7bf   :  { %5009 = vmatprep.subr.mxu0 %v4412_v44  ;;  %5080 = vmatprep.subr.mxu1 %v4636_v47  ;;  %v4545_v44 = vld [vmem:[%s7462_s3 + $0xaa8] sm:$0xff]  ;;  %v4320_v47 = vld [vmem:[%s7462_s3 + $0x3a0] sm:$0xff] }
 0x7c0   :  { %5010 = vmatpush2.msra.mxu0 %v4411_v41  ;;  %5081 = vmatpush2.msra.mxu1 %v4635_v43  ;;  %v4544_v41 = vld [vmem:[%s7462_s3 + $0xaa0] sm:$0xff]  ;;  %v4427_v43 = vld [vmem:[%s7462_s3 + $0x6f8] sm:$0xff] }
 0x7c1   :  { %5011 = vmatprep.subr.mxu0 %v4405_v42  ;;  %5082 = vmatprep.subr.mxu1 %v4629_v49  ;;  %v4651_v42 = vld [vmem:[%s7462_s3 + $0xdf8] sm:$0xff] }
 0x7c2   :  { %5012 = vmatpush2.msra.mxu0 %v4404_v50  ;;  %5083 = vmatpush2.msra.mxu1 %v4628_v51  ;;  %v4315_v49 = vld [vmem:[%s7462_s3 + $0x378] sm:$0xff]  ;;  %v4420_v51 = vld [vmem:[%s7462_s3 + $0x6c0] sm:$0xff] }
 0x7c3   :  { %5013 = vmatprep.subr.mxu0 %v4398_v13  ;;  %5084 = vmatprep.subr.mxu1 %v4622_v22  ;;  %v4539_v50 = vld [vmem:[%s7462_s3 + $0xa78] sm:$0xff]  ;;  %v4644_v13 = vld [vmem:[%s7462_s3 + $0xdc0] sm:$0xff] }
 0x7c4   :  { %5014 = vmatpush2.msra.mxu0 %v4397_v14  ;;  %5085 = vmatpush2.msra.mxu1 %v4621_v52  ;;  %v4308_v22 = vld [vmem:[%s7462_s3 + $0x340] sm:$0xff]  ;;  %v4413_v52 = vld [vmem:[%s7462_s3 + $0x688] sm:$0xff] }
 0x7c5   :  { %5015 = vmatprep.subr.mxu0 %v4391_v53  ;;  %5086 = vmatprep.subr.mxu1 %v4615_v56  ;;  %v4532_v14 = vld [vmem:[%s7462_s3 + $0xa40] sm:$0xff]  ;;  %v4637_v53 = vld [vmem:[%s7462_s3 + $0xd88] sm:$0xff] }
 0x7c6   :  { %5016 = vmatpush2.msra.mxu0 %v4390_v5  ;;  %5087 = vmatpush2.msra.mxu1 %v4614_v58  ;;  %v4525_v56 = vld [vmem:[%s7462_s3 + $0xa08] sm:$0xff]  ;;  %v4630_v5 = vld [vmem:[%s7462_s3 + $0xd50] sm:$0xff] }
 0x7c7   :  { %5017 = vmatprep.subr.mxu0 %v4384_v40  ;;  %5088 = vmatprep.subr.mxu1 %v4608_v16  ;;  %v4294_v58 = vld [vmem:[%s7462_s3 + $0x2d0] sm:$0xff]  ;;  %v4399_v16 = vld [vmem:[%s7462_s3 + $0x618] sm:$0xff] }
 0x7c8   :  { %5018 = vmatpush2.msra.mxu0 %v4383_v62  ;;  %5089 = vmatpush2.msra.mxu1 %v4607_v63  ;;  %v4518_v40 = vld [vmem:[%s7462_s3 + $0x9d0] sm:$0xff]  ;;  %v4623_v62 = vld [vmem:[%s7462_s3 + $0xd18] sm:$0xff] }
 0x7c9   :  { %5019 = vmatprep.subr.mxu0 %v4377_v0  ;;  %5090 = vmatprep.subr.mxu1 %v4601_v29  ;;  %v4287_v63 = vld [vmem:[%s7462_s3 + $0x298] sm:$0xff]  ;;  %v4392_v29 = vld [vmem:[%s7462_s3 + $0x5e0] sm:$0xff] }
 0x7ca   :  { %5020 = vmatpush2.msra.mxu0 %v4376_v30  ;;  %5091 = vmatpush2.msra.mxu1 %v4600_v1  ;;  %v4511_v0 = vld [vmem:[%s7462_s3 + $0x998] sm:$0xff]  ;;  %v4616_v30 = vld [vmem:[%s7462_s3 + $0xce0] sm:$0xff] }
 0x7cb   :  { %5021 = vmatprep.subr.mxu0 %v4370_v2  ;;  %5092 = vmatprep.subr.mxu1 %v4594_v6  ;;  %v4280_v1 = vld [vmem:[%s7462_s3 + $0x260] sm:$0xff]  ;;  %v4385_v6 = vld [vmem:[%s7462_s3 + $0x5a8] sm:$0xff] }
 0x7cc   :  { %5022 = vmatpush2.msra.mxu0 %v4369_v8  ;;  %5093 = vmatpush2.msra.mxu1 %v4593_v12  ;;  %v4504_v2 = vld [vmem:[%s7462_s3 + $0x960] sm:$0xff]  ;;  %v4609_v8 = vld [vmem:[%s7462_s3 + $0xca8] sm:$0xff] }
 0x7cd   :  { %5023 = vmatprep.subr.mxu0 %v4363_v54  ;;  %5094 = vmatprep.subr.mxu1 %v4587_v46  ;;  %v4273_v12 = vld [vmem:[%s7462_s3 + $0x228] sm:$0xff]  ;;  %v4378_v46 = vld [vmem:[%s7462_s3 + $0x570] sm:$0xff] }
 0x7ce   :  { %5024 = vmatpush2.msra.mxu0 %v4362_v48  ;;  %5095 = vmatpush2.msra.mxu1 %v4586_v37  ;;  %v4497_v54 = vld [vmem:[%s7462_s3 + $0x928] sm:$0xff]  ;;  %v4602_v48 = vld [vmem:[%s7462_s3 + $0xc70] sm:$0xff] }
 0x7cf   :  { %5025 = vmatprep.subr.mxu0 %v4356_v4  ;;  %5096 = vmatprep.subr.mxu1 %v4580_v17  ;;  %v4266_v37 = vld [vmem:[%s7462_s3 + $0x1f0] sm:$0xff]  ;;  %v4371_v17 = vld [vmem:[%s7462_s3 + $0x538] sm:$0xff] }
 0x7d0   :  { %5026 = vmatpush2.msra.mxu0 %v4355_v19  ;;  %5097 = vmatpush2.msra.mxu1 %v4579_v20  ;;  %v4490_v4 = vld [vmem:[%s7462_s3 + $0x8f0] sm:$0xff]  ;;  %v4595_v19 = vld [vmem:[%s7462_s3 + $0xc38] sm:$0xff] }
 0x7d1   :  { %5027 = vmatprep.subr.mxu0 %v4349_v24  ;;  %5098 = vmatprep.subr.mxu1 %v4573_v25  ;;  %v4259_v20 = vld [vmem:[%s7462_s3 + $0x1b8] sm:$0xff]  ;;  %v4364_v25 = vld [vmem:[%s7462_s3 + $0x500] sm:$0xff] }
 0x7d2   :  { %5028 = vmatpush2.msra.mxu0 %v4348_v26  ;;  %5099 = vmatpush2.msra.mxu1 %v4572_v27  ;;  %v4483_v24 = vld [vmem:[%s7462_s3 + $0x8b8] sm:$0xff]  ;;  %v4588_v26 = vld [vmem:[%s7462_s3 + $0xc00] sm:$0xff] }
 0x7d3   :  { %5029 = vmatprep.subr.mxu0 %v4342_v28  ;;  %5100 = vmatprep.subr.mxu1 %v4566_v3  ;;  %v4252_v27 = vld [vmem:[%s7462_s3 + $0x180] sm:$0xff]  ;;  %v4357_v3 = vld [vmem:[%s7462_s3 + $0x4c8] sm:$0xff] }
 0x7d4   :  { %5030 = vmatpush2.msra.mxu0 %v4341_v45  ;;  %5101 = vmatpush2.msra.mxu1 %v4565_v15  ;;  %v4476_v28 = vld [vmem:[%s7462_s3 + $0x880] sm:$0xff]  ;;  %v4581_v45 = vld [vmem:[%s7462_s3 + $0xbc8] sm:$0xff] }
 0x7d5   :  { %5031 = vmatprep.subr.mxu0 %v4335_v36  ;;  %5102 = vmatprep.subr.mxu1 %v4559_v31  ;;  %v4245_v15 = vld [vmem:[%s7462_s3 + $0x148] sm:$0xff]  ;;  %v4350_v31 = vld [vmem:[%s7462_s3 + $0x490] sm:$0xff] }
 0x7d6   :  { %5032 = vmatpush2.msra.mxu0 %v4334_v32  ;;  %5103 = vmatpush2.msra.mxu1 %v4558_v33  ;;  %v4469_v36 = vld [vmem:[%s7462_s3 + $0x848] sm:$0xff]  ;;  %v4574_v32 = vld [vmem:[%s7462_s3 + $0xb90] sm:$0xff] }
 0x7d7   :  { %5033 = vmatprep.subr.mxu0 %v4328_v34  ;;  %5104 = vmatprep.subr.mxu1 %v4552_v60  ;;  %v4238_v33 = vld [vmem:[%s7462_s3 + $0x110] sm:$0xff]  ;;  %v4343_v60 = vld [vmem:[%s7462_s3 + $0x458] sm:$0xff] }
 0x7d8   :  { %5034 = vmatpush2.msra.mxu0 %v4327_v35  ;;  %5105 = vmatpush2.msra.mxu1 %v4551_v38  ;;  %v4462_v34 = vld [vmem:[%s7462_s3 + $0x810] sm:$0xff]  ;;  %v4567_v35 = vld [vmem:[%s7462_s3 + $0xb58] sm:$0xff] }
 0x7d9   :  { %5035 = vmatprep.subr.mxu0 %v4321_v39  ;;  %5106 = vmatprep.subr.mxu1 %v4545_v44  ;;  %v4231_v38 = vld [vmem:[%s7462_s3 + $0xd8] sm:$0xff]  ;;  %v4336_v44 = vld [vmem:[%s7462_s3 + $0x420] sm:$0xff] }
 0x7da   :  { %5036 = vmatpush2.msra.mxu0 %v4320_v47  ;;  %5107 = vmatpush2.msra.mxu1 %v4544_v41  ;;  %v4455_v39 = vld [vmem:[%s7462_s3 + $0x7d8] sm:$0xff]  ;;  %v4560_v47 = vld [vmem:[%s7462_s3 + $0xb20] sm:$0xff] }
 0x7db   :  { %5038 = vmatmul.mubr.f32.vlgmr.msra.gmra.mxu0 %v6445_v59  ;;  %5109 = vmatmul.mubr.f32.vlgmr.msra.gmra.mxu1 %v6447_v61  ;;  %v4224_v41 = vld [vmem:[%s7462_s3 + $0xa0] sm:$0xff] }
 0x7dc   :  { %5317 = vmatprep.subr.mxu0 %v4427_v43  ;;  %5352 = vmatprep.subr.mxu1 %v4651_v42  ;;  %v4448_v43 = vld [vmem:[%s7462_s3 + $0x7a0] sm:$0xff]  ;;  %v4329_v42 = vld [vmem:[%s7462_s3 + $0x3e8] sm:$0xff] }
 0x7dd   :  { %5318 = vmatpush3.msra.mxu0 %v4315_v49  ;;  %5179 = vmatprep.mubr.f32.mxu0 %v6441_v57  ;;  %v4301_v57 = vld [vmem:[%s7462_s3 + $0x308] sm:$0xff] }
 0x7de   :  { %5353 = vmatpush3.msra.mxu1 %v4539_v50  ;;  %5249 = vmatprep.mubr.f32.mxu1 %v6443_v55  ;;  %v4406_v55 = vld [vmem:[%s7462_s3 + $0x650] sm:$0xff]  ;;  %v4553_v49 = vld [vmem:[%s7462_s3 + $0xae8] sm:$0xff] }
 0x7df   :  { %5319 = vmatprep.subr.mxu0 %v4420_v51  ;;  %5354 = vmatprep.subr.mxu1 %v4644_v13  ;;  %v4217_v50 = vld [vmem:[%s7462_s3 + $0x68] sm:$0xff]  ;;  %v4322_v13 = vld [vmem:[%s7462_s3 + $0x3b0] sm:$0xff] }
 0x7e0   :  { %5320 = vmatpush3.msra.mxu0 %v4308_v22  ;;  %5355 = vmatpush3.msra.mxu1 %v4532_v14  ;;  %v4441_v51 = vld [vmem:[%s7462_s3 + $0x768] sm:$0xff]  ;;  %v4546_v22 = vld [vmem:[%s7462_s3 + $0xab0] sm:$0xff] }
 0x7e1   :  { %5321 = vmatprep.subr.mxu0 %v4413_v52  ;;  %5356 = vmatprep.subr.mxu1 %v4637_v53  ;;  %v4210_v14 = vld [vmem:[%s7462_s3 + $0x30] sm:$0xff]  ;;  %v7422_v53 = vld [vmem:[%s7464_s5] sm:$0x7f] }
 0x7e2   :  { %5322 = vmatpush3.msra.mxu0 %v4301_v57  ;;  %5357 = vmatpush3.msra.mxu1 %v4525_v56  ;;  %v4434_v52 = vld [vmem:[%s7462_s3 + $0x730] sm:$0xff]  ;;  %v4657_v57 = vrot.slane %v7422_v53, %v5665_v7  ;;  %v4661_v56 = vrot.slane %v7422_v53, %v5676_v18 }
 0x7e3   :  { %5323 = vmatprep.subr.mxu0 %v4406_v55  ;;  %5358 = vmatprep.subr.mxu1 %v4630_v5 }
 0x7e4   :  { %5324 = vmatpush3.msra.mxu0 %v4294_v58  ;;  %5359 = vmatpush3.msra.mxu1 %v4518_v40 }
 0x7e5   :  { %5325 = vmatprep.subr.mxu0 %v4399_v16  ;;  %5360 = vmatprep.subr.mxu1 %v4623_v62 }
 0x7e6   :  { %5326 = vmatpush3.msra.mxu0 %v4287_v63  ;;  %5361 = vmatpush3.msra.mxu1 %v4511_v0 }
 0x7e7   :  { %5327 = vmatprep.subr.mxu0 %v4392_v29  ;;  %5362 = vmatprep.subr.mxu1 %v4616_v30 }
 0x7e8   :  { %5328 = vmatpush3.msra.mxu0 %v4280_v1  ;;  %5363 = vmatpush3.msra.mxu1 %v4504_v2 }
 0x7e9   :  { %5329 = vmatprep.subr.mxu0 %v4385_v6  ;;  %5364 = vmatprep.subr.mxu1 %v4609_v8 }
 0x7ea   :  { %5330 = vmatpush3.msra.mxu0 %v4273_v12  ;;  %5365 = vmatpush3.msra.mxu1 %v4497_v54  ;;  %v4665_v12 = vrot.slane %v7422_v53, %v5669_v10  ;;  %v4669_v54 = vrot.slane %v7422_v53, %v5679_v21 }
 0x7eb   :  { %5331 = vmatprep.subr.mxu0 %v4378_v46  ;;  %5366 = vmatprep.subr.mxu1 %v4602_v48 }
 0x7ec   :  { %5332 = vmatpush3.msra.mxu0 %v4266_v37  ;;  %5367 = vmatpush3.msra.mxu1 %v4490_v4 }
 0x7ed   :  { %5333 = vmatprep.subr.mxu0 %v4371_v17  ;;  %5368 = vmatprep.subr.mxu1 %v4595_v19 }
 0x7ee   :  { %5334 = vmatpush3.msra.mxu0 %v4259_v20  ;;  %5369 = vmatpush3.msra.mxu1 %v4483_v24 }
 0x7ef   :  { %5335 = vmatprep.subr.mxu0 %v4364_v25  ;;  %5370 = vmatprep.subr.mxu1 %v4588_v26 }
 0x7f0   :  { %5336 = vmatpush3.msra.mxu0 %v4252_v27  ;;  %5371 = vmatpush3.msra.mxu1 %v4476_v28 }
 0x7f1   :  { %5337 = vmatprep.subr.mxu0 %v4357_v3  ;;  %5372 = vmatprep.subr.mxu1 %v4581_v45 }
 0x7f2   :  { %5338 = vmatpush3.msra.mxu0 %v4245_v15  ;;  %5373 = vmatpush3.msra.mxu1 %v4469_v36 }
 0x7f3   :  { %5339 = vmatprep.subr.mxu0 %v4350_v31  ;;  %5374 = vmatprep.subr.mxu1 %v4574_v32  ;;  %v4673_v31 = vrot.slane %v7422_v53, %v5671_v11  ;;  %v4677_v32 = vrot.slane %v7422_v53, %v5683_v23 }
 0x7f4   :  { %5340 = vmatpush3.msra.mxu0 %v4238_v33  ;;  %5375 = vmatpush3.msra.mxu1 %v4462_v34 }
 0x7f5   :  { %5341 = vmatprep.subr.mxu0 %v4343_v60  ;;  %5376 = vmatprep.subr.mxu1 %v4567_v35 }
 0x7f6   :  { %5342 = vmatpush3.msra.mxu0 %v4231_v38  ;;  %5377 = vmatpush3.msra.mxu1 %v4455_v39 }
 0x7f7   :  { %5343 = vmatprep.subr.mxu0 %v4336_v44  ;;  %5378 = vmatprep.subr.mxu1 %v4560_v47 }
 0x7f8   :  { %5344 = vmatpush3.msra.mxu0 %v4224_v41  ;;  %5379 = vmatpush3.msra.mxu1 %v4448_v43 }
 0x7f9   :  { %5345 = vmatprep.subr.mxu0 %v4329_v42  ;;  %5380 = vmatprep.subr.mxu1 %v4553_v49 }
 0x7fa   :  { %5346 = vmatpush3.msra.mxu0 %v4217_v50  ;;  %5381 = vmatpush3.msra.mxu1 %v4441_v51 }
 0x7fb   :  { %5347 = vmatprep.subr.mxu0 %v4322_v13  ;;  %5382 = vmatprep.subr.mxu1 %v4546_v22 }
 0x7fc   :  { %5348 = vmatpush3.msra.mxu0 %v4210_v14  ;;  %5383 = vmatpush3.msra.mxu1 %v4434_v52  ;;  %v4681_v14 = vrot.slane %v7422_v53, %v5667_v9 }
 0x7fd   :  { %5180 = vmatmul.mubr.f32.vlgmr.msra.gmra.mxu0 %v6445_v59  ;;  %5250 = vmatmul.mubr.f32.vlgmr.msra.gmra.mxu1 %v6447_v61 }
 0x818   :  { %v4755_v55 = vpop.f32.mrf.mxu0  ;;  %v4826_v5 = vpop.f32.mrf.mxu1 }
 0x819   :  { %v4756_v58 = vadd.f32 %v4755_v55, %v4657_v57 }
 0x81a   :  { %v4757_v40 = vpop.f32.mrf.mxu0  ;;  %v4828_v59 = vpop.f32.mrf.mxu1 }
 0x81b   :  { %v4827_v16 = vadd.f32 %v4826_v5, %v4756_v58  ;;  %v4758_v62 = vadd.f32 %v4757_v40, %v4661_v56 }
 0x81d   :  { %v5255_v63 = vsub.f32 0.0, %v4827_v16  ;;  %v4829_v61 = vadd.f32 %v4828_v59, %v4758_v62 }
 0x81f   :  { %v5262_v0 = vmul.f32 1.442695, %v5255_v63  ;;  %v5256_v29 = vsub.f32 0.0, %v4829_v61 }
 0x821   :  { %5440 = vpow2.f32 %v5262_v0  ;;  %v5264_v30 = vmul.f32 1.442695, %v5256_v29 }
 0x823   :  { %5442 = vpow2.f32 %v5264_v30 }
 0x82e   :  { %v5441_v1 = vpop.eup %5440 }
 0x82f   :  { %v5276_v2 = vadd.f32 1.0, %v5441_v1 }
 0x830   :  { %v5443_v7 = vpop.eup %5442 }
 0x831   :  { %5444 = vrcp.f32 %v5276_v2  ;;  %v5277_v6 = vadd.f32 1.0, %v5443_v7 }
 0x833   :  { %5446 = vrcp.f32 %v5277_v6 }
 0x83e   :  { %v5445_v18 = vpop.eup %5444 }
 0x83f   :  { %5297 = vst [vmem:[%s7465_s6] sm:$0xff] %v5445_v18 }
 0x840   :  { %v5447_v8 = vpop.eup %5446 }
 0x841   :  { %5298 = vst [vmem:[%s7465_s6 + $0x8] sm:$0xff] %v5447_v8 }
 0x859   :  { %v4897_v46 = vpop.f32.mrf.mxu0  ;;  %v4968_v48 = vpop.f32.mrf.mxu1 }
 0x85a   :  { %v4898_v37 = vadd.f32 %v4897_v46, %v4665_v12 }
 0x85b   :  { %v4899_v4 = vpop.f32.mrf.mxu0  ;;  %v4970_v20 = vpop.f32.mrf.mxu1 }
 0x85c   :  { %v4969_v17 = vadd.f32 %v4968_v48, %v4898_v37  ;;  %v4900_v19 = vadd.f32 %v4899_v4, %v4669_v54 }
 0x85e   :  { %v5257_v24 = vsub.f32 0.0, %v4969_v17  ;;  %v4971_v25 = vadd.f32 %v4970_v20, %v4900_v19 }
 0x860   :  { %v5266_v26 = vmul.f32 1.442695, %v5257_v24  ;;  %v5258_v27 = vsub.f32 0.0, %v4971_v25 }
 0x862   :  { %5448 = vpow2.f32 %v5266_v26  ;;  %v5268_v28 = vmul.f32 1.442695, %v5258_v27 }
 0x864   :  { %5450 = vpow2.f32 %v5268_v28 }
 0x86f   :  { %v5449_v3 = vpop.eup %5448 }
 0x870   :  { %v5278_v45 = vadd.f32 1.0, %v5449_v3 }
 0x871   :  { %v5451_v10 = vpop.eup %5450 }
 0x872   :  { %5452 = vrcp.f32 %v5278_v45  ;;  %v5279_v15 = vadd.f32 1.0, %v5451_v10 }
 0x874   :  { %5454 = vrcp.f32 %v5279_v15 }
 0x87f   :  { %v5453_v21 = vpop.eup %5452 }
 0x880   :  { %5299 = vst [vmem:[%s7465_s6 + $0x10] sm:$0xff] %v5453_v21 }
 0x881   :  { %v5455_v36 = vpop.eup %5454 }
 0x882   :  { %5300 = vst [vmem:[%s7465_s6 + $0x18] sm:$0xff] %v5455_v36 }
 0x89b   :  { %v5039_v33 = vpop.f32.mrf.mxu0  ;;  %v5110_v34 = vpop.f32.mrf.mxu1 }
 0x89c   :  { %v5040_v60 = vadd.f32 %v5039_v33, %v4673_v31 }
 0x89d   :  { %v5041_v35 = vpop.f32.mrf.mxu0  ;;  %v5112_v44 = vpop.f32.mrf.mxu1 }
 0x89e   :  { %v5111_v38 = vadd.f32 %v5110_v34, %v5040_v60  ;;  %v5042_v39 = vadd.f32 %v5041_v35, %v4677_v32 }
 0x8a0   :  { %v5259_v47 = vsub.f32 0.0, %v5111_v38  ;;  %v5113_v41 = vadd.f32 %v5112_v44, %v5042_v39 }
 0x8a2   :  { %v5270_v43 = vmul.f32 1.442695, %v5259_v47  ;;  %v5260_v42 = vsub.f32 0.0, %v5113_v41 }
 0x8a4   :  { %5456 = vpow2.f32 %v5270_v43  ;;  %v5272_v49 = vmul.f32 1.442695, %v5260_v42 }
 0x8a6   :  { %5458 = vpow2.f32 %v5272_v49 }
 0x8b1   :  { %v5457_v50 = vpop.eup %5456 }
 0x8b2   :  { %v5280_v51 = vadd.f32 1.0, %v5457_v50 }
 0x8b3   :  { %v5459_v11 = vpop.eup %5458 }
 0x8b4   :  { %5460 = vrcp.f32 %v5280_v51  ;;  %v5281_v13 = vadd.f32 1.0, %v5459_v11 }
 0x8b6   :  { %5462 = vrcp.f32 %v5281_v13 }
 0x8bd   :  { %v5349_v23 = vpop.f32.mrf.mxu0  ;;  %v5384_v22 = vpop.f32.mrf.mxu1 }
 0x8bf   :  { %v5350_v52 = vpop.f32.mrf.mxu0  ;;  %v5385_v57 = vpop.f32.mrf.mxu1 }
 0x8c0   :  { %v5351_v56 = vadd.f32 %v5350_v52, %v5349_v23  ;;  %v5386_v58 = vadd.f32 %v5385_v57, %v5384_v22 }
 0x8c1   :  { %v5461_v55 = vpop.eup %5460 }
 0x8c2   :  { %5301 = vst [vmem:[%s7465_s6 + $0x20] sm:$0xff] %v5461_v55  ;;  %v5182_v5 = vadd.f32 %v5351_v56, %v4681_v14 }
 0x8c3   :  { %v5463_v40 = vpop.eup %5462 }
 0x8c4   :  { %5302 = vst [vmem:[%s7465_s6 + $0x28] sm:$0xff] %v5463_v40  ;;  %v5252_v16 = vadd.f32 %v5386_v58, %v5182_v5 }
 0x8c6   :  { %v5261_v62 = vsub.f32 0.0, %v5252_v16 }
 0x8c8   :  { %v5274_v59 = vmul.f32 1.442695, %v5261_v62 }
 0x8ca   :  { %5464 = vpow2.f32 %v5274_v59 }
 0x8d7   :  { %v5465_v9 = vpop.eup %5464 }
 0x8d8   :  { %v5282_v53 = vadd.f32 1.0, %v5465_v9 }
 0x8da   :  { %5466 = vrcp.f32 %v5282_v53 }
 0x8e7   :  { %v5467_v63 = vpop.eup %5466 }
 0x8e8   :  { %5304 = vst.msk [vmem:[%s7465_s6 + $0x30] sm:$0xff] %vm5303_vm1, %v5467_v63 }
 0x8e9   :  { %5309 = vsyncpa [#allocation3], 1 }

</bundles_post_ra>
